<compile_context>
chip_gen: v6e
topology: v6e:2x2x1
jax: 0.10.0
libtpu: 0.0.40
codegen_flags: <defaults>
</compile_context>

<pallas_src>
import functools

import numpy as np
import jax
import jax.numpy as jnp
from jax.experimental import pallas as pl
from jax.experimental.pallas import tpu as pltpu

IMG = 32 * 32  # per-image stride on the flat (n, h, w) axis


def _round_up(v, m):
    return (v + m - 1) // m * m


def _flat_widths(n):
    """Widths of the flat-axis buffers.

    Every consumer reads shifted slices of its producer, so each producer needs a
    right margin covering the largest shift its consumer applies:
      gather reads p2[:, img*1024 : img*1024+640]     -> w2p >= (n-1)*1024 + 640
      pool2  reads o2 shifted by {0, 2, 64, 66}       -> w2o >= w2p + 66
      conv2  reads p1 shifted by 64*i + 2*j (<= 264)  -> w1p >= w2o + 264
      pool1  reads o1 shifted by {0, 1, 32, 33}       -> w1o >= w1p + 33
      conv1  reads a1 shifted by 32*i + j   (<= 132)  -> wa  >= w1o + 132
    Margin / cross-image columns hold garbage but are never consumed by any valid
    output position (asserted in convnet_forward).
    """
    w2p = _round_up((n - 1) * IMG + 640, 128)
    w2o = _round_up(w2p + 66, 128)
    w1p = _round_up(w2o + 264, 128)
    w1o = _round_up(w1p + 33, 128)
    wa = _round_up(max(w1o + 132, n * IMG), 128)
    return wa, w1o, w1p, w2o, w2p


# ------------------------------ fused kernel -------------------------------

def _convnet_kernel(a1_ref, w1k_ref, b1_ref, w2k_ref, b2_ref,
                    g25_ref, tid_ref, bd_ref,
                    fw1_ref, fb1_ref, fw2_ref, fb2_ref, fw3_ref, fb3_ref,
                    out_ref,
                    stk_ref, o1_ref, p1_ref, o2_ref, p2_ref, x_ref,
                    *, n_img, w1o, w1p, w2o, w2p):
    f32 = jnp.float32
    bf16 = jnp.bfloat16

    # ---- conv1: stack the 25 taps along K, ONE MXU dot, bias + ReLU --------
    # stk[(i*5+j)*8 + c, col] = a1[c, col + 32*i + j]
    for i in range(5):
        for j in range(5):
            t = i * 5 + j
            stk_ref[8 * t:8 * t + 8, :] = a1_ref[:, 32 * i + j:32 * i + j + w1o]
    o1 = jnp.dot(w1k_ref[...], stk_ref[...], preferred_element_type=f32)
    o1_ref[...] = jnp.maximum(o1 + b1_ref[...], 0.0)

    # ---- maxpool 2x2 / stride 2: elementwise max of 4 shifted views (VPU) --
    p1_ref[...] = jnp.maximum(
        jnp.maximum(o1_ref[:, 0:w1p], o1_ref[:, 1:w1p + 1]),
        jnp.maximum(o1_ref[:, 32:w1p + 32], o1_ref[:, 33:w1p + 33]))

    # ---- conv2: taps on the stride-2 pooled sub-grid, same K-stacking ------
    for i in range(5):
        for j in range(5):
            t = i * 5 + j
            d = 64 * i + 2 * j
            stk_ref[8 * t:8 * t + 8, 0:w2o] = p1_ref[:, d:d + w2o]
    o2 = jnp.dot(w2k_ref[...], stk_ref[:, 0:w2o], preferred_element_type=f32)
    o2_ref[...] = jnp.maximum(o2 + b2_ref[...], 0.0)

    # ---- maxpool 2x2 / stride 2 on the stride-2 sub-grid -------------------
    p2_ref[...] = jnp.maximum(
        jnp.maximum(o2_ref[:, 0:w2p], o2_ref[:, 2:w2p + 2]),
        jnp.maximum(o2_ref[:, 64:w2p + 64], o2_ref[:, 66:w2p + 66]))

    # ---- pool2 -> (n, 400) flatten in PyTorch (oc*25 + y*5 + x) order ------
    # gi[oc, s]          = p2[oc, img*1024 + 128*(s//5) + 4*(s%5)]   (one-hot dot)
    # gt[oc, oc'*25 + s] = gi[oc, s]                                  (tile dot)
    # X[img, oc*25 + s]  = sum_oc' gt * block_diag = gi[oc, s]        (mask+reduce)
    g25 = g25_ref[...]
    tid = tid_ref[...]
    bd = bd_ref[...]
    for img in range(n_img):
        win = p2_ref[:, img * IMG:img * IMG + 640].astype(bf16)        # (16, 640)
        gi = jnp.dot(win, g25, preferred_element_type=f32)             # (16, 25)
        gt = jnp.dot(gi.astype(bf16), tid, preferred_element_type=f32)  # (16, 400)
        x_ref[img:img + 1, :] = jnp.sum(gt * bd, axis=0, keepdims=True)

    # ---- batched FC tail: 3 matmuls, bf16 operands, f32 accumulation -------
    h1 = jnp.maximum(
        jnp.dot(x_ref[...].astype(bf16), fw1_ref[...],
                preferred_element_type=f32) + fb1_ref[...], 0.0)
    h2 = jnp.maximum(
        jnp.dot(h1.astype(bf16), fw2_ref[...],
                preferred_element_type=f32) + fb2_ref[...], 0.0)
    out_ref[...] = (jnp.dot(h2.astype(bf16), fw3_ref[...],
                            preferred_element_type=f32)
                    + fb3_ref[...]).astype(out_ref.dtype)


# ------------------------------ wrappers ------------------------------------

def prepare_params(p):
    """One-time re-layout of PyTorch-style parameters for the fused kernel."""
    f32, bf16 = jnp.float32, jnp.bfloat16

    # Conv weights packed as (OC, 200): column (i*5+j)*8 + c holds W[oc, c, i, j],
    # with the input-channel dim zero-padded to a full 8-sublane group.
    w1 = jnp.transpose(p["conv1_w"], (0, 2, 3, 1))            # (6, 5, 5, 3)
    w1 = jnp.pad(w1, ((0, 2), (0, 0), (0, 0), (0, 5)))        # (8, 5, 5, 8)
    w2 = jnp.transpose(p["conv2_w"], (0, 2, 3, 1))            # (16, 5, 5, 6)
    w2 = jnp.pad(w2, ((0, 0), (0, 0), (0, 0), (0, 2)))        # (16, 5, 5, 8)

    # Batch-independent gather / flatten constants (tiny; bf16 where they feed MXU).
    offs = (128 * np.arange(5)[:, None] + 4 * np.arange(5)[None, :]).reshape(-1)
    g25 = np.zeros((640, 25), np.float32)
    g25[offs, np.arange(25)] = 1.0                            # picks the 25 valid pixels
    tid = np.tile(np.eye(25, dtype=np.float32), (1, 16))      # (25, 400) lane tiler
    bd = np.kron(np.eye(16, dtype=np.float32),
                 np.ones((1, 25), np.float32))                # (16, 400) block-diag mask

    return dict(
        w1k=w1.reshape(8, 200).astype(f32),
        b1=jnp.pad(p["conv1_b"], (0, 2)).reshape(8, 1),
        w2k=w2.reshape(16, 200).astype(f32),
        b2=p["conv2_b"].reshape(16, 1),
        g25=jnp.asarray(g25, dtype=bf16),
        tid=jnp.asarray(tid, dtype=bf16),
        bd=jnp.asarray(bd, dtype=f32),
        fc1_wT=p["fc1_w"].T.astype(bf16),                     # (400, 120)
        fc1_b=p["fc1_b"].reshape(1, 120),
        fc2_wT=p["fc2_w"].T.astype(bf16),                     # (120, 84)
        fc2_b=p["fc2_b"].reshape(1, 84),
        fc3_wT=p["fc3_w"].T.astype(bf16),                     # (84, 10)
        fc3_b=p["fc3_b"].reshape(1, 10),
    )


def convnet_forward(prepped, x):
    """Forward pass matching ConvNet.forward; x is NCHW (N, 3, 32, 32) float32."""
    n, c, h, w = x.shape
    assert (c, h, w) == (3, 32, 32)
    wa, w1o, w1p, w2o, w2p = _flat_widths(n)
    # Margin invariants (see _flat_widths): all shifted reads stay in-bounds and
    # every consumed position maps to a valid same-image pixel.
    assert wa >= w1o + 132 and w1o >= w1p + 33 and w1p >= w2o + 264
    assert w2o >= w2p + 66 and w2p >= (n - 1) * IMG + 640 and wa >= n * IMG

    # NCHW -> channel-major flat (C, n*h*w); channels padded 3->8, flat axis padded
    # for the tap shifts.  Runs inside the same jit as the kernel (no extra HBM hop).
    a1 = jnp.transpose(x, (1, 0, 2, 3)).reshape(3, n * IMG)
    a1 = jnp.pad(a1, ((0, 5), (0, wa - n * IMG)))

    kernel = functools.partial(_convnet_kernel, n_img=n,
                               w1o=w1o, w1p=w1p, w2o=w2o, w2p=w2p)
    vmem = pltpu.MemorySpace.VMEM
    return pl.pallas_call(
        kernel,
        out_shape=jax.ShapeDtypeStruct((n, 10), jnp.float32),
        in_specs=[pl.BlockSpec(memory_space=vmem)] * 14,
        out_specs=pl.BlockSpec(memory_space=vmem),
        scratch_shapes=[
            pltpu.VMEM((200, w1o), jnp.float32),   # K-stacked conv taps (shared conv1/conv2)
            pltpu.VMEM((8, w1o), jnp.float32),     # conv1 output (post-ReLU)
            pltpu.VMEM((8, w1p), jnp.float32),     # pool1 output
            pltpu.VMEM((16, w2o), jnp.float32),    # conv2 output (post-ReLU)
            pltpu.VMEM((16, w2p), jnp.float32),    # pool2 output
            pltpu.VMEM((n, 400), jnp.float32),     # flattened fc1 input (n, 16*5*5)
        ],
    )(a1, prepped["w1k"], prepped["b1"], prepped["w2k"], prepped["b2"],
      prepped["g25"], prepped["tid"], prepped["bd"],
      prepped["fc1_wT"], prepped["fc1_b"], prepped["fc2_wT"], prepped["fc2_b"],
      prepped["fc3_wT"], prepped["fc3_b"])


# --------------------------- params & reference -----------------------------

def init_params(key):
    """Deterministic params with PyTorch-style uniform(-1/sqrt(fan_in), ...)."""
    def uniform(k, shape, fan_in):
        bound = 1.0 / jnp.sqrt(float(fan_in))
        return jax.random.uniform(k, shape, jnp.float32, -bound, bound)

    ks = jax.random.split(key, 10)
    return dict(
        conv1_w=uniform(ks[0], (6, 3, 5, 5), 3 * 5 * 5),
        conv1_b=uniform(ks[1], (6,), 3 * 5 * 5),
        conv2_w=uniform(ks[2], (16, 6, 5, 5), 6 * 5 * 5),
        conv2_b=uniform(ks[3], (16,), 6 * 5 * 5),
        fc1_w=uniform(ks[4], (120, 16 * 5 * 5), 16 * 5 * 5),
        fc1_b=uniform(ks[5], (120,), 16 * 5 * 5),
        fc2_w=uniform(ks[6], (84, 120), 120),
        fc2_b=uniform(ks[7], (84,), 120),
        fc3_w=uniform(ks[8], (10, 84), 84),
        fc3_b=uniform(ks[9], (10,), 84),
    )


def reference_forward(params, x):
    """Plain-JAX reference identical to the PyTorch module."""
    dn = ("NCHW", "OIHW", "NCHW")
    y = jax.lax.conv_general_dilated(x, params["conv1_w"], (1, 1), "VALID",
                                     dimension_numbers=dn)
    y = jnp.maximum(y + params["conv1_b"][None, :, None, None], 0.0)
    n, c, h, w = y.shape
    y = y.reshape(n, c, h // 2, 2, w // 2, 2).max(axis=(3, 5))
    y = jax.lax.conv_general_dilated(y, params["conv2_w"], (1, 1), "VALID",
                                     dimension_numbers=dn)
    y = jnp.maximum(y + params["conv2_b"][None, :, None, None], 0.0)
    n, c, h, w = y.shape
    y = y.reshape(n, c, h // 2, 2, w // 2, 2).max(axis=(3, 5))
    y = y.reshape(n, 16 * 5 * 5)
    y = jnp.maximum(y @ params["fc1_w"].T + params["fc1_b"], 0.0)
    y = jnp.maximum(y @ params["fc2_w"].T + params["fc2_b"], 0.0)
    return y @ params["fc3_w"].T + params["fc3_b"]


if __name__ == "__main__":
    key = jax.random.PRNGKey(0)
    pkey, xkey = jax.random.split(key)
    params = init_params(pkey)
    # 32x32 spatial input is required by fc1 = Linear(16*5*5, 120); batch = 2.
    x = jax.random.normal(xkey, (2, 3, 32, 32), dtype=jnp.float32)

    prepped = prepare_params(params)
    fwd = jax.jit(convnet_forward)
    out = jax.block_until_ready(fwd(prepped, x))

    assert out.shape == (2, 10), out.shape
    assert out.dtype == jnp.float32

    with jax.default_matmul_precision("highest"):
        ref = jax.block_until_ready(jax.jit(reference_forward)(params, x))
    # bf16 MXU operands in the gather / FC tail (per perf review) => slightly looser
    # tolerance than the pure-f32 pipeline.
    max_err = float(jnp.max(jnp.abs(out - ref)))
    assert max_err < 2e-2, f"mismatch vs reference: max|diff|={max_err}"

    print("KERNEL_OK")
</pallas_src>

<mosaic_0001>
module attributes {stable_mosaic.version = 11 : i64} {
  func.func @_convnet_kernel(%arg0: memref<8x2560xf32, #tpu.memory_space<vmem>>, %arg1: memref<8x200xf32, #tpu.memory_space<vmem>>, %arg2: memref<8x1xf32, #tpu.memory_space<vmem>>, %arg3: memref<16x200xf32, #tpu.memory_space<vmem>>, %arg4: memref<16x1xf32, #tpu.memory_space<vmem>>, %arg5: memref<640x25xbf16, #tpu.memory_space<vmem>>, %arg6: memref<25x400xbf16, #tpu.memory_space<vmem>>, %arg7: memref<16x400xf32, #tpu.memory_space<vmem>>, %arg8: memref<400x120xbf16, #tpu.memory_space<vmem>>, %arg9: memref<1x120xf32, #tpu.memory_space<vmem>>, %arg10: memref<120x84xbf16, #tpu.memory_space<vmem>>, %arg11: memref<1x84xf32, #tpu.memory_space<vmem>>, %arg12: memref<84x10xbf16, #tpu.memory_space<vmem>>, %arg13: memref<1x10xf32, #tpu.memory_space<vmem>>, %arg14: memref<2x10xf32, #tpu.memory_space<vmem>>, %arg15: memref<200x2304xf32, #tpu.memory_space<vmem>>, %arg16: memref<8x2304xf32, #tpu.memory_space<vmem>>, %arg17: memref<8x2176xf32, #tpu.memory_space<vmem>>, %arg18: memref<16x1792xf32, #tpu.memory_space<vmem>>, %arg19: memref<16x1664xf32, #tpu.memory_space<vmem>>, %arg20: memref<2x400xf32, #tpu.memory_space<vmem>>) attributes {dimension_semantics = [], scalar_prefetch = 0 : i64, scratch_operands = 6 : i64, tpu.core_type = #tpu.core_type<tc>} {
    %c0 = arith.constant 0 : index
    %c0_0 = arith.constant 0 : index
    %0 = vector.load %arg0[%c0, %c0_0] : memref<8x2560xf32, #tpu.memory_space<vmem>>, vector<8x2304xf32>
    %c0_1 = arith.constant 0 : index
    %c0_2 = arith.constant 0 : index
    %1 = vector.load %arg15[%c0_1, %c0_2] : memref<200x2304xf32, #tpu.memory_space<vmem>>, vector<8x2304xf32>
    tpu.vector_store %arg15[%c0_1, %c0_2], %0 {strides = array<i32>} : memref<200x2304xf32, #tpu.memory_space<vmem>>, vector<8x2304xf32>,
    %c0_3 = arith.constant 0 : index
    %c1 = arith.constant 1 : index
    %2 = vector.load %arg0[%c0_3, %c1] : memref<8x2560xf32, #tpu.memory_space<vmem>>, vector<8x2304xf32>
    %c8 = arith.constant 8 : index
    %c0_4 = arith.constant 0 : index
    %3 = vector.load %arg15[%c8, %c0_4] : memref<200x2304xf32, #tpu.memory_space<vmem>>, vector<8x2304xf32>
    tpu.vector_store %arg15[%c8, %c0_4], %2 {strides = array<i32>} : memref<200x2304xf32, #tpu.memory_space<vmem>>, vector<8x2304xf32>,
    %c0_5 = arith.constant 0 : index
    %c2 = arith.constant 2 : index
    %4 = vector.load %arg0[%c0_5, %c2] : memref<8x2560xf32, #tpu.memory_space<vmem>>, vector<8x2304xf32>
    %c16 = arith.constant 16 : index
    %c0_6 = arith.constant 0 : index
    %5 = vector.load %arg15[%c16, %c0_6] : memref<200x2304xf32, #tpu.memory_space<vmem>>, vector<8x2304xf32>
    tpu.vector_store %arg15[%c16, %c0_6], %4 {strides = array<i32>} : memref<200x2304xf32, #tpu.memory_space<vmem>>, vector<8x2304xf32>,
    %c0_7 = arith.constant 0 : index
    %c3 = arith.constant 3 : index
    %6 = vector.load %arg0[%c0_7, %c3] : memref<8x2560xf32, #tpu.memory_space<vmem>>, vector<8x2304xf32>
    %c24 = arith.constant 24 : index
    %c0_8 = arith.constant 0 : index
    %7 = vector.load %arg15[%c24, %c0_8] : memref<200x2304xf32, #tpu.memory_space<vmem>>, vector<8x2304xf32>
    tpu.vector_store %arg15[%c24, %c0_8], %6 {strides = array<i32>} : memref<200x2304xf32, #tpu.memory_space<vmem>>, vector<8x2304xf32>,
    %c0_9 = arith.constant 0 : index
    %c4 = arith.constant 4 : index
    %8 = vector.load %arg0[%c0_9, %c4] : memref<8x2560xf32, #tpu.memory_space<vmem>>, vector<8x2304xf32>
    %c32 = arith.constant 32 : index
    %c0_10 = arith.constant 0 : index
    %9 = vector.load %arg15[%c32, %c0_10] : memref<200x2304xf32, #tpu.memory_space<vmem>>, vector<8x2304xf32>
    tpu.vector_store %arg15[%c32, %c0_10], %8 {strides = array<i32>} : memref<200x2304xf32, #tpu.memory_space<vmem>>, vector<8x2304xf32>,
    %c0_11 = arith.constant 0 : index
    %c32_12 = arith.constant 32 : index
    %10 = vector.load %arg0[%c0_11, %c32_12] : memref<8x2560xf32, #tpu.memory_space<vmem>>, vector<8x2304xf32>
    %c40 = arith.constant 40 : index
    %c0_13 = arith.constant 0 : index
    %11 = vector.load %arg15[%c40, %c0_13] : memref<200x2304xf32, #tpu.memory_space<vmem>>, vector<8x2304xf32>
    tpu.vector_store %arg15[%c40, %c0_13], %10 {strides = array<i32>} : memref<200x2304xf32, #tpu.memory_space<vmem>>, vector<8x2304xf32>,
    %c0_14 = arith.constant 0 : index
    %c33 = arith.constant 33 : index
    %12 = vector.load %arg0[%c0_14, %c33] : memref<8x2560xf32, #tpu.memory_space<vmem>>, vector<8x2304xf32>
    %c48 = arith.constant 48 : index
    %c0_15 = arith.constant 0 : index
    %13 = vector.load %arg15[%c48, %c0_15] : memref<200x2304xf32, #tpu.memory_space<vmem>>, vector<8x2304xf32>
    tpu.vector_store %arg15[%c48, %c0_15], %12 {strides = array<i32>} : memref<200x2304xf32, #tpu.memory_space<vmem>>, vector<8x2304xf32>,
    %c0_16 = arith.constant 0 : index
    %c34 = arith.constant 34 : index
    %14 = vector.load %arg0[%c0_16, %c34] : memref<8x2560xf32, #tpu.memory_space<vmem>>, vector<8x2304xf32>
    %c56 = arith.constant 56 : index
    %c0_17 = arith.constant 0 : index
    %15 = vector.load %arg15[%c56, %c0_17] : memref<200x2304xf32, #tpu.memory_space<vmem>>, vector<8x2304xf32>
    tpu.vector_store %arg15[%c56, %c0_17], %14 {strides = array<i32>} : memref<200x2304xf32, #tpu.memory_space<vmem>>, vector<8x2304xf32>,
    %c0_18 = arith.constant 0 : index
    %c35 = arith.constant 35 : index
    %16 = vector.load %arg0[%c0_18, %c35] : memref<8x2560xf32, #tpu.memory_space<vmem>>, vector<8x2304xf32>
    %c64 = arith.constant 64 : index
    %c0_19 = arith.constant 0 : index
    %17 = vector.load %arg15[%c64, %c0_19] : memref<200x2304xf32, #tpu.memory_space<vmem>>, vector<8x2304xf32>
    tpu.vector_store %arg15[%c64, %c0_19], %16 {strides = array<i32>} : memref<200x2304xf32, #tpu.memory_space<vmem>>, vector<8x2304xf32>,
    %c0_20 = arith.constant 0 : index
    %c36 = arith.constant 36 : index
    %18 = vector.load %arg0[%c0_20, %c36] : memref<8x2560xf32, #tpu.memory_space<vmem>>, vector<8x2304xf32>
    %c72 = arith.constant 72 : index
    %c0_21 = arith.constant 0 : index
    %19 = vector.load %arg15[%c72, %c0_21] : memref<200x2304xf32, #tpu.memory_space<vmem>>, vector<8x2304xf32>
    tpu.vector_store %arg15[%c72, %c0_21], %18 {strides = array<i32>} : memref<200x2304xf32, #tpu.memory_space<vmem>>, vector<8x2304xf32>,
    %c0_22 = arith.constant 0 : index
    %c64_23 = arith.constant 64 : index
    %20 = vector.load %arg0[%c0_22, %c64_23] : memref<8x2560xf32, #tpu.memory_space<vmem>>, vector<8x2304xf32>
    %c80 = arith.constant 80 : index
    %c0_24 = arith.constant 0 : index
    %21 = vector.load %arg15[%c80, %c0_24] : memref<200x2304xf32, #tpu.memory_space<vmem>>, vector<8x2304xf32>
    tpu.vector_store %arg15[%c80, %c0_24], %20 {strides = array<i32>} : memref<200x2304xf32, #tpu.memory_space<vmem>>, vector<8x2304xf32>,
    %c0_25 = arith.constant 0 : index
    %c65 = arith.constant 65 : index
    %22 = vector.load %arg0[%c0_25, %c65] : memref<8x2560xf32, #tpu.memory_space<vmem>>, vector<8x2304xf32>
    %c88 = arith.constant 88 : index
    %c0_26 = arith.constant 0 : index
    %23 = vector.load %arg15[%c88, %c0_26] : memref<200x2304xf32, #tpu.memory_space<vmem>>, vector<8x2304xf32>
    tpu.vector_store %arg15[%c88, %c0_26], %22 {strides = array<i32>} : memref<200x2304xf32, #tpu.memory_space<vmem>>, vector<8x2304xf32>,
    %c0_27 = arith.constant 0 : index
    %c66 = arith.constant 66 : index
    %24 = vector.load %arg0[%c0_27, %c66] : memref<8x2560xf32, #tpu.memory_space<vmem>>, vector<8x2304xf32>
    %c96 = arith.constant 96 : index
    %c0_28 = arith.constant 0 : index
    %25 = vector.load %arg15[%c96, %c0_28] : memref<200x2304xf32, #tpu.memory_space<vmem>>, vector<8x2304xf32>
    tpu.vector_store %arg15[%c96, %c0_28], %24 {strides = array<i32>} : memref<200x2304xf32, #tpu.memory_space<vmem>>, vector<8x2304xf32>,
    %c0_29 = arith.constant 0 : index
    %c67 = arith.constant 67 : index
    %26 = vector.load %arg0[%c0_29, %c67] : memref<8x2560xf32, #tpu.memory_space<vmem>>, vector<8x2304xf32>
    %c104 = arith.constant 104 : index
    %c0_30 = arith.constant 0 : index
    %27 = vector.load %arg15[%c104, %c0_30] : memref<200x2304xf32, #tpu.memory_space<vmem>>, vector<8x2304xf32>
    tpu.vector_store %arg15[%c104, %c0_30], %26 {strides = array<i32>} : memref<200x2304xf32, #tpu.memory_space<vmem>>, vector<8x2304xf32>,
    %c0_31 = arith.constant 0 : index
    %c68 = arith.constant 68 : index
    %28 = vector.load %arg0[%c0_31, %c68] : memref<8x2560xf32, #tpu.memory_space<vmem>>, vector<8x2304xf32>
    %c112 = arith.constant 112 : index
    %c0_32 = arith.constant 0 : index
    %29 = vector.load %arg15[%c112, %c0_32] : memref<200x2304xf32, #tpu.memory_space<vmem>>, vector<8x2304xf32>
    tpu.vector_store %arg15[%c112, %c0_32], %28 {strides = array<i32>} : memref<200x2304xf32, #tpu.memory_space<vmem>>, vector<8x2304xf32>,
    %c0_33 = arith.constant 0 : index
    %c96_34 = arith.constant 96 : index
    %30 = vector.load %arg0[%c0_33, %c96_34] : memref<8x2560xf32, #tpu.memory_space<vmem>>, vector<8x2304xf32>
    %c120 = arith.constant 120 : index
    %c0_35 = arith.constant 0 : index
    %31 = vector.load %arg15[%c120, %c0_35] : memref<200x2304xf32, #tpu.memory_space<vmem>>, vector<8x2304xf32>
    tpu.vector_store %arg15[%c120, %c0_35], %30 {strides = array<i32>} : memref<200x2304xf32, #tpu.memory_space<vmem>>, vector<8x2304xf32>,
    %c0_36 = arith.constant 0 : index
    %c97 = arith.constant 97 : index
    %32 = vector.load %arg0[%c0_36, %c97] : memref<8x2560xf32, #tpu.memory_space<vmem>>, vector<8x2304xf32>
    %c128 = arith.constant 128 : index
    %c0_37 = arith.constant 0 : index
    %33 = vector.load %arg15[%c128, %c0_37] : memref<200x2304xf32, #tpu.memory_space<vmem>>, vector<8x2304xf32>
    tpu.vector_store %arg15[%c128, %c0_37], %32 {strides = array<i32>} : memref<200x2304xf32, #tpu.memory_space<vmem>>, vector<8x2304xf32>,
    %c0_38 = arith.constant 0 : index
    %c98 = arith.constant 98 : index
    %34 = vector.load %arg0[%c0_38, %c98] : memref<8x2560xf32, #tpu.memory_space<vmem>>, vector<8x2304xf32>
    %c136 = arith.constant 136 : index
    %c0_39 = arith.constant 0 : index
    %35 = vector.load %arg15[%c136, %c0_39] : memref<200x2304xf32, #tpu.memory_space<vmem>>, vector<8x2304xf32>
    tpu.vector_store %arg15[%c136, %c0_39], %34 {strides = array<i32>} : memref<200x2304xf32, #tpu.memory_space<vmem>>, vector<8x2304xf32>,
    %c0_40 = arith.constant 0 : index
    %c99 = arith.constant 99 : index
    %36 = vector.load %arg0[%c0_40, %c99] : memref<8x2560xf32, #tpu.memory_space<vmem>>, vector<8x2304xf32>
    %c144 = arith.constant 144 : index
    %c0_41 = arith.constant 0 : index
    %37 = vector.load %arg15[%c144, %c0_41] : memref<200x2304xf32, #tpu.memory_space<vmem>>, vector<8x2304xf32>
    tpu.vector_store %arg15[%c144, %c0_41], %36 {strides = array<i32>} : memref<200x2304xf32, #tpu.memory_space<vmem>>, vector<8x2304xf32>,
    %c0_42 = arith.constant 0 : index
    %c100 = arith.constant 100 : index
    %38 = vector.load %arg0[%c0_42, %c100] : memref<8x2560xf32, #tpu.memory_space<vmem>>, vector<8x2304xf32>
    %c152 = arith.constant 152 : index
    %c0_43 = arith.constant 0 : index
    %39 = vector.load %arg15[%c152, %c0_43] : memref<200x2304xf32, #tpu.memory_space<vmem>>, vector<8x2304xf32>
    tpu.vector_store %arg15[%c152, %c0_43], %38 {strides = array<i32>} : memref<200x2304xf32, #tpu.memory_space<vmem>>, vector<8x2304xf32>,
    %c0_44 = arith.constant 0 : index
    %c128_45 = arith.constant 128 : index
    %40 = vector.load %arg0[%c0_44, %c128_45] : memref<8x2560xf32, #tpu.memory_space<vmem>>, vector<8x2304xf32>
    %c160 = arith.constant 160 : index
    %c0_46 = arith.constant 0 : index
    %41 = vector.load %arg15[%c160, %c0_46] : memref<200x2304xf32, #tpu.memory_space<vmem>>, vector<8x2304xf32>
    tpu.vector_store %arg15[%c160, %c0_46], %40 {strides = array<i32>} : memref<200x2304xf32, #tpu.memory_space<vmem>>, vector<8x2304xf32>,
    %c0_47 = arith.constant 0 : index
    %c129 = arith.constant 129 : index
    %42 = vector.load %arg0[%c0_47, %c129] : memref<8x2560xf32, #tpu.memory_space<vmem>>, vector<8x2304xf32>
    %c168 = arith.constant 168 : index
    %c0_48 = arith.constant 0 : index
    %43 = vector.load %arg15[%c168, %c0_48] : memref<200x2304xf32, #tpu.memory_space<vmem>>, vector<8x2304xf32>
    tpu.vector_store %arg15[%c168, %c0_48], %42 {strides = array<i32>} : memref<200x2304xf32, #tpu.memory_space<vmem>>, vector<8x2304xf32>,
    %c0_49 = arith.constant 0 : index
    %c130 = arith.constant 130 : index
    %44 = vector.load %arg0[%c0_49, %c130] : memref<8x2560xf32, #tpu.memory_space<vmem>>, vector<8x2304xf32>
    %c176 = arith.constant 176 : index
    %c0_50 = arith.constant 0 : index
    %45 = vector.load %arg15[%c176, %c0_50] : memref<200x2304xf32, #tpu.memory_space<vmem>>, vector<8x2304xf32>
    tpu.vector_store %arg15[%c176, %c0_50], %44 {strides = array<i32>} : memref<200x2304xf32, #tpu.memory_space<vmem>>, vector<8x2304xf32>,
    %c0_51 = arith.constant 0 : index
    %c131 = arith.constant 131 : index
    %46 = vector.load %arg0[%c0_51, %c131] : memref<8x2560xf32, #tpu.memory_space<vmem>>, vector<8x2304xf32>
    %c184 = arith.constant 184 : index
    %c0_52 = arith.constant 0 : index
    %47 = vector.load %arg15[%c184, %c0_52] : memref<200x2304xf32, #tpu.memory_space<vmem>>, vector<8x2304xf32>
    tpu.vector_store %arg15[%c184, %c0_52], %46 {strides = array<i32>} : memref<200x2304xf32, #tpu.memory_space<vmem>>, vector<8x2304xf32>,
    %c0_53 = arith.constant 0 : index
    %c132 = arith.constant 132 : index
    %48 = vector.load %arg0[%c0_53, %c132] : memref<8x2560xf32, #tpu.memory_space<vmem>>, vector<8x2304xf32>
    %c192 = arith.constant 192 : index
    %c0_54 = arith.constant 0 : index
    %49 = vector.load %arg15[%c192, %c0_54] : memref<200x2304xf32, #tpu.memory_space<vmem>>, vector<8x2304xf32>
    tpu.vector_store %arg15[%c192, %c0_54], %48 {strides = array<i32>} : memref<200x2304xf32, #tpu.memory_space<vmem>>, vector<8x2304xf32>,
    %c0_55 = arith.constant 0 : index
    %c0_56 = arith.constant 0 : index
    %50 = vector.load %arg1[%c0_55, %c0_56] : memref<8x200xf32, #tpu.memory_space<vmem>>, vector<8x200xf32>
    %c0_57 = arith.constant 0 : index
    %c0_58 = arith.constant 0 : index
    %51 = vector.load %arg15[%c0_57, %c0_58] : memref<200x2304xf32, #tpu.memory_space<vmem>>, vector<200x2304xf32>
    %cst = arith.constant dense<0.000000e+00> : vector<8x2304xf32>
    %52 = tpu.matmul %50, %51, %cst {dimension_numbers = #tpu.dot_dimension_numbers<[1], [0], [0], [1], [0, 0, 1, 1], [], []>} : vector<8x200xf32>, vector<200x2304xf32>, vector<8x2304xf32> -> vector<8x2304xf32>
    %c0_59 = arith.constant 0 : index
    %c0_60 = arith.constant 0 : index
    %53 = vector.load %arg2[%c0_59, %c0_60] : memref<8x1xf32, #tpu.memory_space<vmem>>, vector<8x1xf32>
    %54 = vector.broadcast %53 : vector<8x1xf32> to vector<8x2304xf32>
    %55 = arith.addf %52, %54 : vector<8x2304xf32>
    %cst_61 = arith.constant 0.000000e+00 : f32
    %56 = vector.broadcast %cst_61 : f32 to vector<8x2304xf32>
    %57 = arith.maximumf %55, %56 : vector<8x2304xf32>
    %c0_62 = arith.constant 0 : index
    %c0_63 = arith.constant 0 : index
    %58 = vector.load %arg16[%c0_62, %c0_63] : memref<8x2304xf32, #tpu.memory_space<vmem>>, vector<8x2304xf32>
    tpu.vector_store %arg16[%c0_62, %c0_63], %57 {strides = array<i32>} : memref<8x2304xf32, #tpu.memory_space<vmem>>, vector<8x2304xf32>,
    %c0_64 = arith.constant 0 : index
    %c0_65 = arith.constant 0 : index
    %59 = vector.load %arg16[%c0_64, %c0_65] : memref<8x2304xf32, #tpu.memory_space<vmem>>, vector<8x2176xf32>
    %c0_66 = arith.constant 0 : index
    %c1_67 = arith.constant 1 : index
    %60 = vector.load %arg16[%c0_66, %c1_67] : memref<8x2304xf32, #tpu.memory_space<vmem>>, vector<8x2176xf32>
    %61 = arith.maximumf %59, %60 : vector<8x2176xf32>
    %c0_68 = arith.constant 0 : index
    %c32_69 = arith.constant 32 : index
    %62 = vector.load %arg16[%c0_68, %c32_69] : memref<8x2304xf32, #tpu.memory_space<vmem>>, vector<8x2176xf32>
    %c0_70 = arith.constant 0 : index
    %c33_71 = arith.constant 33 : index
    %63 = vector.load %arg16[%c0_70, %c33_71] : memref<8x2304xf32, #tpu.memory_space<vmem>>, vector<8x2176xf32>
    %64 = arith.maximumf %62, %63 : vector<8x2176xf32>
    %65 = arith.maximumf %61, %64 : vector<8x2176xf32>
    %c0_72 = arith.constant 0 : index
    %c0_73 = arith.constant 0 : index
    %66 = vector.load %arg17[%c0_72, %c0_73] : memref<8x2176xf32, #tpu.memory_space<vmem>>, vector<8x2176xf32>
    tpu.vector_store %arg17[%c0_72, %c0_73], %65 {strides = array<i32>} : memref<8x2176xf32, #tpu.memory_space<vmem>>, vector<8x2176xf32>,
    %c0_74 = arith.constant 0 : index
    %c0_75 = arith.constant 0 : index
    %67 = vector.load %arg17[%c0_74, %c0_75] : memref<8x2176xf32, #tpu.memory_space<vmem>>, vector<8x1792xf32>
    %c0_76 = arith.constant 0 : index
    %c0_77 = arith.constant 0 : index
    %68 = vector.load %arg15[%c0_76, %c0_77] : memref<200x2304xf32, #tpu.memory_space<vmem>>, vector<8x1792xf32>
    tpu.vector_store %arg15[%c0_76, %c0_77], %67 {strides = array<i32>} : memref<200x2304xf32, #tpu.memory_space<vmem>>, vector<8x1792xf32>,
    %c0_78 = arith.constant 0 : index
    %c2_79 = arith.constant 2 : index
    %69 = vector.load %arg17[%c0_78, %c2_79] : memref<8x2176xf32, #tpu.memory_space<vmem>>, vector<8x1792xf32>
    %c8_80 = arith.constant 8 : index
    %c0_81 = arith.constant 0 : index
    %70 = vector.load %arg15[%c8_80, %c0_81] : memref<200x2304xf32, #tpu.memory_space<vmem>>, vector<8x1792xf32>
    tpu.vector_store %arg15[%c8_80, %c0_81], %69 {strides = array<i32>} : memref<200x2304xf32, #tpu.memory_space<vmem>>, vector<8x1792xf32>,
    %c0_82 = arith.constant 0 : index
    %c4_83 = arith.constant 4 : index
    %71 = vector.load %arg17[%c0_82, %c4_83] : memref<8x2176xf32, #tpu.memory_space<vmem>>, vector<8x1792xf32>
    %c16_84 = arith.constant 16 : index
    %c0_85 = arith.constant 0 : index
    %72 = vector.load %arg15[%c16_84, %c0_85] : memref<200x2304xf32, #tpu.memory_space<vmem>>, vector<8x1792xf32>
    tpu.vector_store %arg15[%c16_84, %c0_85], %71 {strides = array<i32>} : memref<200x2304xf32, #tpu.memory_space<vmem>>, vector<8x1792xf32>,
    %c0_86 = arith.constant 0 : index
    %c6 = arith.constant 6 : index
    %73 = vector.load %arg17[%c0_86, %c6] : memref<8x2176xf32, #tpu.memory_space<vmem>>, vector<8x1792xf32>
    %c24_87 = arith.constant 24 : index
    %c0_88 = arith.constant 0 : index
    %74 = vector.load %arg15[%c24_87, %c0_88] : memref<200x2304xf32, #tpu.memory_space<vmem>>, vector<8x1792xf32>
    tpu.vector_store %arg15[%c24_87, %c0_88], %73 {strides = array<i32>} : memref<200x2304xf32, #tpu.memory_space<vmem>>, vector<8x1792xf32>,
    %c0_89 = arith.constant 0 : index
    %c8_90 = arith.constant 8 : index
    %75 = vector.load %arg17[%c0_89, %c8_90] : memref<8x2176xf32, #tpu.memory_space<vmem>>, vector<8x1792xf32>
    %c32_91 = arith.constant 32 : index
    %c0_92 = arith.constant 0 : index
    %76 = vector.load %arg15[%c32_91, %c0_92] : memref<200x2304xf32, #tpu.memory_space<vmem>>, vector<8x1792xf32>
    tpu.vector_store %arg15[%c32_91, %c0_92], %75 {strides = array<i32>} : memref<200x2304xf32, #tpu.memory_space<vmem>>, vector<8x1792xf32>,
    %c0_93 = arith.constant 0 : index
    %c64_94 = arith.constant 64 : index
    %77 = vector.load %arg17[%c0_93, %c64_94] : memref<8x2176xf32, #tpu.memory_space<vmem>>, vector<8x1792xf32>
    %c40_95 = arith.constant 40 : index
    %c0_96 = arith.constant 0 : index
    %78 = vector.load %arg15[%c40_95, %c0_96] : memref<200x2304xf32, #tpu.memory_space<vmem>>, vector<8x1792xf32>
    tpu.vector_store %arg15[%c40_95, %c0_96], %77 {strides = array<i32>} : memref<200x2304xf32, #tpu.memory_space<vmem>>, vector<8x1792xf32>,
    %c0_97 = arith.constant 0 : index
    %c66_98 = arith.constant 66 : index
    %79 = vector.load %arg17[%c0_97, %c66_98] : memref<8x2176xf32, #tpu.memory_space<vmem>>, vector<8x1792xf32>
    %c48_99 = arith.constant 48 : index
    %c0_100 = arith.constant 0 : index
    %80 = vector.load %arg15[%c48_99, %c0_100] : memref<200x2304xf32, #tpu.memory_space<vmem>>, vector<8x1792xf32>
    tpu.vector_store %arg15[%c48_99, %c0_100], %79 {strides = array<i32>} : memref<200x2304xf32, #tpu.memory_space<vmem>>, vector<8x1792xf32>,
    %c0_101 = arith.constant 0 : index
    %c68_102 = arith.constant 68 : index
    %81 = vector.load %arg17[%c0_101, %c68_102] : memref<8x2176xf32, #tpu.memory_space<vmem>>, vector<8x1792xf32>
    %c56_103 = arith.constant 56 : index
    %c0_104 = arith.constant 0 : index
    %82 = vector.load %arg15[%c56_103, %c0_104] : memref<200x2304xf32, #tpu.memory_space<vmem>>, vector<8x1792xf32>
    tpu.vector_store %arg15[%c56_103, %c0_104], %81 {strides = array<i32>} : memref<200x2304xf32, #tpu.memory_space<vmem>>, vector<8x1792xf32>,
    %c0_105 = arith.constant 0 : index
    %c70 = arith.constant 70 : index
    %83 = vector.load %arg17[%c0_105, %c70] : memref<8x2176xf32, #tpu.memory_space<vmem>>, vector<8x1792xf32>
    %c64_106 = arith.constant 64 : index
    %c0_107 = arith.constant 0 : index
    %84 = vector.load %arg15[%c64_106, %c0_107] : memref<200x2304xf32, #tpu.memory_space<vmem>>, vector<8x1792xf32>
    tpu.vector_store %arg15[%c64_106, %c0_107], %83 {strides = array<i32>} : memref<200x2304xf32, #tpu.memory_space<vmem>>, vector<8x1792xf32>,
    %c0_108 = arith.constant 0 : index
    %c72_109 = arith.constant 72 : index
    %85 = vector.load %arg17[%c0_108, %c72_109] : memref<8x2176xf32, #tpu.memory_space<vmem>>, vector<8x1792xf32>
    %c72_110 = arith.constant 72 : index
    %c0_111 = arith.constant 0 : index
    %86 = vector.load %arg15[%c72_110, %c0_111] : memref<200x2304xf32, #tpu.memory_space<vmem>>, vector<8x1792xf32>
    tpu.vector_store %arg15[%c72_110, %c0_111], %85 {strides = array<i32>} : memref<200x2304xf32, #tpu.memory_space<vmem>>, vector<8x1792xf32>,
    %c0_112 = arith.constant 0 : index
    %c128_113 = arith.constant 128 : index
    %87 = vector.load %arg17[%c0_112, %c128_113] : memref<8x2176xf32, #tpu.memory_space<vmem>>, vector<8x1792xf32>
    %c80_114 = arith.constant 80 : index
    %c0_115 = arith.constant 0 : index
    %88 = vector.load %arg15[%c80_114, %c0_115] : memref<200x2304xf32, #tpu.memory_space<vmem>>, vector<8x1792xf32>
    tpu.vector_store %arg15[%c80_114, %c0_115], %87 {strides = array<i32>} : memref<200x2304xf32, #tpu.memory_space<vmem>>, vector<8x1792xf32>,
    %c0_116 = arith.constant 0 : index
    %c130_117 = arith.constant 130 : index
    %89 = vector.load %arg17[%c0_116, %c130_117] : memref<8x2176xf32, #tpu.memory_space<vmem>>, vector<8x1792xf32>
    %c88_118 = arith.constant 88 : index
    %c0_119 = arith.constant 0 : index
    %90 = vector.load %arg15[%c88_118, %c0_119] : memref<200x2304xf32, #tpu.memory_space<vmem>>, vector<8x1792xf32>
    tpu.vector_store %arg15[%c88_118, %c0_119], %89 {strides = array<i32>} : memref<200x2304xf32, #tpu.memory_space<vmem>>, vector<8x1792xf32>,
    %c0_120 = arith.constant 0 : index
    %c132_121 = arith.constant 132 : index
    %91 = vector.load %arg17[%c0_120, %c132_121] : memref<8x2176xf32, #tpu.memory_space<vmem>>, vector<8x1792xf32>
    %c96_122 = arith.constant 96 : index
    %c0_123 = arith.constant 0 : index
    %92 = vector.load %arg15[%c96_122, %c0_123] : memref<200x2304xf32, #tpu.memory_space<vmem>>, vector<8x1792xf32>
    tpu.vector_store %arg15[%c96_122, %c0_123], %91 {strides = array<i32>} : memref<200x2304xf32, #tpu.memory_space<vmem>>, vector<8x1792xf32>,
    %c0_124 = arith.constant 0 : index
    %c134 = arith.constant 134 : index
    %93 = vector.load %arg17[%c0_124, %c134] : memref<8x2176xf32, #tpu.memory_space<vmem>>, vector<8x1792xf32>
    %c104_125 = arith.constant 104 : index
    %c0_126 = arith.constant 0 : index
    %94 = vector.load %arg15[%c104_125, %c0_126] : memref<200x2304xf32, #tpu.memory_space<vmem>>, vector<8x1792xf32>
    tpu.vector_store %arg15[%c104_125, %c0_126], %93 {strides = array<i32>} : memref<200x2304xf32, #tpu.memory_space<vmem>>, vector<8x1792xf32>,
    %c0_127 = arith.constant 0 : index
    %c136_128 = arith.constant 136 : index
    %95 = vector.load %arg17[%c0_127, %c136_128] : memref<8x2176xf32, #tpu.memory_space<vmem>>, vector<8x1792xf32>
    %c112_129 = arith.constant 112 : index
    %c0_130 = arith.constant 0 : index
    %96 = vector.load %arg15[%c112_129, %c0_130] : memref<200x2304xf32, #tpu.memory_space<vmem>>, vector<8x1792xf32>
    tpu.vector_store %arg15[%c112_129, %c0_130], %95 {strides = array<i32>} : memref<200x2304xf32, #tpu.memory_space<vmem>>, vector<8x1792xf32>,
    %c0_131 = arith.constant 0 : index
    %c192_132 = arith.constant 192 : index
    %97 = vector.load %arg17[%c0_131, %c192_132] : memref<8x2176xf32, #tpu.memory_space<vmem>>, vector<8x1792xf32>
    %c120_133 = arith.constant 120 : index
    %c0_134 = arith.constant 0 : index
    %98 = vector.load %arg15[%c120_133, %c0_134] : memref<200x2304xf32, #tpu.memory_space<vmem>>, vector<8x1792xf32>
    tpu.vector_store %arg15[%c120_133, %c0_134], %97 {strides = array<i32>} : memref<200x2304xf32, #tpu.memory_space<vmem>>, vector<8x1792xf32>,
    %c0_135 = arith.constant 0 : index
    %c194 = arith.constant 194 : index
    %99 = vector.load %arg17[%c0_135, %c194] : memref<8x2176xf32, #tpu.memory_space<vmem>>, vector<8x1792xf32>
    %c128_136 = arith.constant 128 : index
    %c0_137 = arith.constant 0 : index
    %100 = vector.load %arg15[%c128_136, %c0_137] : memref<200x2304xf32, #tpu.memory_space<vmem>>, vector<8x1792xf32>
    tpu.vector_store %arg15[%c128_136, %c0_137], %99 {strides = array<i32>} : memref<200x2304xf32, #tpu.memory_space<vmem>>, vector<8x1792xf32>,
    %c0_138 = arith.constant 0 : index
    %c196 = arith.constant 196 : index
    %101 = vector.load %arg17[%c0_138, %c196] : memref<8x2176xf32, #tpu.memory_space<vmem>>, vector<8x1792xf32>
    %c136_139 = arith.constant 136 : index
    %c0_140 = arith.constant 0 : index
    %102 = vector.load %arg15[%c136_139, %c0_140] : memref<200x2304xf32, #tpu.memory_space<vmem>>, vector<8x1792xf32>
    tpu.vector_store %arg15[%c136_139, %c0_140], %101 {strides = array<i32>} : memref<200x2304xf32, #tpu.memory_space<vmem>>, vector<8x1792xf32>,
    %c0_141 = arith.constant 0 : index
    %c198 = arith.constant 198 : index
    %103 = vector.load %arg17[%c0_141, %c198] : memref<8x2176xf32, #tpu.memory_space<vmem>>, vector<8x1792xf32>
    %c144_142 = arith.constant 144 : index
    %c0_143 = arith.constant 0 : index
    %104 = vector.load %arg15[%c144_142, %c0_143] : memref<200x2304xf32, #tpu.memory_space<vmem>>, vector<8x1792xf32>
    tpu.vector_store %arg15[%c144_142, %c0_143], %103 {strides = array<i32>} : memref<200x2304xf32, #tpu.memory_space<vmem>>, vector<8x1792xf32>,
    %c0_144 = arith.constant 0 : index
    %c200 = arith.constant 200 : index
    %105 = vector.load %arg17[%c0_144, %c200] : memref<8x2176xf32, #tpu.memory_space<vmem>>, vector<8x1792xf32>
    %c152_145 = arith.constant 152 : index
    %c0_146 = arith.constant 0 : index
    %106 = vector.load %arg15[%c152_145, %c0_146] : memref<200x2304xf32, #tpu.memory_space<vmem>>, vector<8x1792xf32>
    tpu.vector_store %arg15[%c152_145, %c0_146], %105 {strides = array<i32>} : memref<200x2304xf32, #tpu.memory_space<vmem>>, vector<8x1792xf32>,
    %c0_147 = arith.constant 0 : index
    %c256 = arith.constant 256 : index
    %107 = vector.load %arg17[%c0_147, %c256] : memref<8x2176xf32, #tpu.memory_space<vmem>>, vector<8x1792xf32>
    %c160_148 = arith.constant 160 : index
    %c0_149 = arith.constant 0 : index
    %108 = vector.load %arg15[%c160_148, %c0_149] : memref<200x2304xf32, #tpu.memory_space<vmem>>, vector<8x1792xf32>
    tpu.vector_store %arg15[%c160_148, %c0_149], %107 {strides = array<i32>} : memref<200x2304xf32, #tpu.memory_space<vmem>>, vector<8x1792xf32>,
    %c0_150 = arith.constant 0 : index
    %c258 = arith.constant 258 : index
    %109 = vector.load %arg17[%c0_150, %c258] : memref<8x2176xf32, #tpu.memory_space<vmem>>, vector<8x1792xf32>
    %c168_151 = arith.constant 168 : index
    %c0_152 = arith.constant 0 : index
    %110 = vector.load %arg15[%c168_151, %c0_152] : memref<200x2304xf32, #tpu.memory_space<vmem>>, vector<8x1792xf32>
    tpu.vector_store %arg15[%c168_151, %c0_152], %109 {strides = array<i32>} : memref<200x2304xf32, #tpu.memory_space<vmem>>, vector<8x1792xf32>,
    %c0_153 = arith.constant 0 : index
    %c260 = arith.constant 260 : index
    %111 = vector.load %arg17[%c0_153, %c260] : memref<8x2176xf32, #tpu.memory_space<vmem>>, vector<8x1792xf32>
    %c176_154 = arith.constant 176 : index
    %c0_155 = arith.constant 0 : index
    %112 = vector.load %arg15[%c176_154, %c0_155] : memref<200x2304xf32, #tpu.memory_space<vmem>>, vector<8x1792xf32>
    tpu.vector_store %arg15[%c176_154, %c0_155], %111 {strides = array<i32>} : memref<200x2304xf32, #tpu.memory_space<vmem>>, vector<8x1792xf32>,
    %c0_156 = arith.constant 0 : index
    %c262 = arith.constant 262 : index
    %113 = vector.load %arg17[%c0_156, %c262] : memref<8x2176xf32, #tpu.memory_space<vmem>>, vector<8x1792xf32>
    %c184_157 = arith.constant 184 : index
    %c0_158 = arith.constant 0 : index
    %114 = vector.load %arg15[%c184_157, %c0_158] : memref<200x2304xf32, #tpu.memory_space<vmem>>, vector<8x1792xf32>
    tpu.vector_store %arg15[%c184_157, %c0_158], %113 {strides = array<i32>} : memref<200x2304xf32, #tpu.memory_space<vmem>>, vector<8x1792xf32>,
    %c0_159 = arith.constant 0 : index
    %c264 = arith.constant 264 : index
    %115 = vector.load %arg17[%c0_159, %c264] : memref<8x2176xf32, #tpu.memory_space<vmem>>, vector<8x1792xf32>
    %c192_160 = arith.constant 192 : index
    %c0_161 = arith.constant 0 : index
    %116 = vector.load %arg15[%c192_160, %c0_161] : memref<200x2304xf32, #tpu.memory_space<vmem>>, vector<8x1792xf32>
    tpu.vector_store %arg15[%c192_160, %c0_161], %115 {strides = array<i32>} : memref<200x2304xf32, #tpu.memory_space<vmem>>, vector<8x1792xf32>,
    %c0_162 = arith.constant 0 : index
    %c0_163 = arith.constant 0 : index
    %117 = vector.load %arg3[%c0_162, %c0_163] : memref<16x200xf32, #tpu.memory_space<vmem>>, vector<16x200xf32>
    %c0_164 = arith.constant 0 : index
    %c0_165 = arith.constant 0 : index
    %118 = vector.load %arg15[%c0_164, %c0_165] : memref<200x2304xf32, #tpu.memory_space<vmem>>, vector<200x1792xf32>
    %cst_166 = arith.constant dense<0.000000e+00> : vector<16x1792xf32>
    %119 = tpu.matmul %117, %118, %cst_166 {dimension_numbers = #tpu.dot_dimension_numbers<[1], [0], [0], [1], [0, 0, 1, 1], [], []>} : vector<16x200xf32>, vector<200x1792xf32>, vector<16x1792xf32> -> vector<16x1792xf32>
    %c0_167 = arith.constant 0 : index
    %c0_168 = arith.constant 0 : index
    %120 = vector.load %arg4[%c0_167, %c0_168] : memref<16x1xf32, #tpu.memory_space<vmem>>, vector<16x1xf32>
    %121 = vector.broadcast %120 : vector<16x1xf32> to vector<16x1792xf32>
    %122 = arith.addf %119, %121 : vector<16x1792xf32>
    %cst_169 = arith.constant 0.000000e+00 : f32
    %123 = vector.broadcast %cst_169 : f32 to vector<16x1792xf32>
    %124 = arith.maximumf %122, %123 : vector<16x1792xf32>
    %c0_170 = arith.constant 0 : index
    %c0_171 = arith.constant 0 : index
    %125 = vector.load %arg18[%c0_170, %c0_171] : memref<16x1792xf32, #tpu.memory_space<vmem>>, vector<16x1792xf32>
    tpu.vector_store %arg18[%c0_170, %c0_171], %124 {strides = array<i32>} : memref<16x1792xf32, #tpu.memory_space<vmem>>, vector<16x1792xf32>,
    %c0_172 = arith.constant 0 : index
    %c0_173 = arith.constant 0 : index
    %126 = vector.load %arg18[%c0_172, %c0_173] : memref<16x1792xf32, #tpu.memory_space<vmem>>, vector<16x1664xf32>
    %c0_174 = arith.constant 0 : index
    %c2_175 = arith.constant 2 : index
    %127 = vector.load %arg18[%c0_174, %c2_175] : memref<16x1792xf32, #tpu.memory_space<vmem>>, vector<16x1664xf32>
    %128 = arith.maximumf %126, %127 : vector<16x1664xf32>
    %c0_176 = arith.constant 0 : index
    %c64_177 = arith.constant 64 : index
    %129 = vector.load %arg18[%c0_176, %c64_177] : memref<16x1792xf32, #tpu.memory_space<vmem>>, vector<16x1664xf32>
    %c0_178 = arith.constant 0 : index
    %c66_179 = arith.constant 66 : index
    %130 = vector.load %arg18[%c0_178, %c66_179] : memref<16x1792xf32, #tpu.memory_space<vmem>>, vector<16x1664xf32>
    %131 = arith.maximumf %129, %130 : vector<16x1664xf32>
    %132 = arith.maximumf %128, %131 : vector<16x1664xf32>
    %c0_180 = arith.constant 0 : index
    %c0_181 = arith.constant 0 : index
    %133 = vector.load %arg19[%c0_180, %c0_181] : memref<16x1664xf32, #tpu.memory_space<vmem>>, vector<16x1664xf32>
    tpu.vector_store %arg19[%c0_180, %c0_181], %132 {strides = array<i32>} : memref<16x1664xf32, #tpu.memory_space<vmem>>, vector<16x1664xf32>,
    %c0_182 = arith.constant 0 : index
    %c0_183 = arith.constant 0 : index
    %134 = vector.load %arg5[%c0_182, %c0_183] : memref<640x25xbf16, #tpu.memory_space<vmem>>, vector<640x25xbf16>
    %c0_184 = arith.constant 0 : index
    %c0_185 = arith.constant 0 : index
    %135 = vector.load %arg6[%c0_184, %c0_185] : memref<25x400xbf16, #tpu.memory_space<vmem>>, vector<25x400xbf16>
    %c0_186 = arith.constant 0 : index
    %c0_187 = arith.constant 0 : index
    %136 = vector.load %arg7[%c0_186, %c0_187] : memref<16x400xf32, #tpu.memory_space<vmem>>, vector<16x400xf32>
    %c0_188 = arith.constant 0 : index
    %c0_189 = arith.constant 0 : index
    %137 = vector.load %arg19[%c0_188, %c0_189] : memref<16x1664xf32, #tpu.memory_space<vmem>>, vector<16x640xf32>
    %138 = arith.truncf %137 : vector<16x640xf32> to vector<16x640xbf16>
    %cst_190 = arith.constant dense<0.000000e+00> : vector<16x25xf32>
    %139 = tpu.matmul %138, %134, %cst_190 {dimension_numbers = #tpu.dot_dimension_numbers<[1], [0], [0], [1], [0, 0, 1, 1], [], []>} : vector<16x640xbf16>, vector<640x25xbf16>, vector<16x25xf32> -> vector<16x25xf32>
    %140 = arith.truncf %139 : vector<16x25xf32> to vector<16x25xbf16>
    %cst_191 = arith.constant dense<0.000000e+00> : vector<16x400xf32>
    %141 = tpu.matmul %140, %135, %cst_191 {dimension_numbers = #tpu.dot_dimension_numbers<[1], [0], [0], [1], [0, 0, 1, 1], [], []>} : vector<16x25xbf16>, vector<25x400xbf16>, vector<16x400xf32> -> vector<16x400xf32>
    %142 = arith.mulf %141, %136 : vector<16x400xf32>
    %cst_192 = arith.constant dense<0.000000e+00> : vector<400xf32>
    %143 = vector.multi_reduction <add>, %142, %cst_192 [0] : vector<16x400xf32> to vector<400xf32>
    %144 = vector.shape_cast %143 : vector<400xf32> to vector<1x400xf32>
    %c0_193 = arith.constant 0 : index
    %c0_194 = arith.constant 0 : index
    %145 = vector.load %arg20[%c0_193, %c0_194] : memref<2x400xf32, #tpu.memory_space<vmem>>, vector<1x400xf32>
    tpu.vector_store %arg20[%c0_193, %c0_194], %144 {strides = array<i32>} : memref<2x400xf32, #tpu.memory_space<vmem>>, vector<1x400xf32>,
    %c0_195 = arith.constant 0 : index
    %c1024 = arith.constant 1024 : index
    %146 = vector.load %arg19[%c0_195, %c1024] : memref<16x1664xf32, #tpu.memory_space<vmem>>, vector<16x640xf32>
    %147 = arith.truncf %146 : vector<16x640xf32> to vector<16x640xbf16>
    %cst_196 = arith.constant dense<0.000000e+00> : vector<16x25xf32>
    %148 = tpu.matmul %147, %134, %cst_196 {dimension_numbers = #tpu.dot_dimension_numbers<[1], [0], [0], [1], [0, 0, 1, 1], [], []>} : vector<16x640xbf16>, vector<640x25xbf16>, vector<16x25xf32> -> vector<16x25xf32>
    %149 = arith.truncf %148 : vector<16x25xf32> to vector<16x25xbf16>
    %cst_197 = arith.constant dense<0.000000e+00> : vector<16x400xf32>
    %150 = tpu.matmul %149, %135, %cst_197 {dimension_numbers = #tpu.dot_dimension_numbers<[1], [0], [0], [1], [0, 0, 1, 1], [], []>} : vector<16x25xbf16>, vector<25x400xbf16>, vector<16x400xf32> -> vector<16x400xf32>
    %151 = arith.mulf %150, %136 : vector<16x400xf32>
    %cst_198 = arith.constant dense<0.000000e+00> : vector<400xf32>
    %152 = vector.multi_reduction <add>, %151, %cst_198 [0] : vector<16x400xf32> to vector<400xf32>
    %153 = vector.shape_cast %152 : vector<400xf32> to vector<1x400xf32>
    %c1_199 = arith.constant 1 : index
    %c0_200 = arith.constant 0 : index
    %154 = vector.load %arg20[%c1_199, %c0_200] : memref<2x400xf32, #tpu.memory_space<vmem>>, vector<1x400xf32>
    tpu.vector_store %arg20[%c1_199, %c0_200], %153 {strides = array<i32>} : memref<2x400xf32, #tpu.memory_space<vmem>>, vector<1x400xf32>,
    %c0_201 = arith.constant 0 : index
    %c0_202 = arith.constant 0 : index
    %155 = vector.load %arg20[%c0_201, %c0_202] : memref<2x400xf32, #tpu.memory_space<vmem>>, vector<2x400xf32>
    %156 = arith.truncf %155 : vector<2x400xf32> to vector<2x400xbf16>
    %c0_203 = arith.constant 0 : index
    %c0_204 = arith.constant 0 : index
    %157 = vector.load %arg8[%c0_203, %c0_204] : memref<400x120xbf16, #tpu.memory_space<vmem>>, vector<400x120xbf16>
    %cst_205 = arith.constant dense<0.000000e+00> : vector<2x120xf32>
    %158 = tpu.matmul %156, %157, %cst_205 {dimension_numbers = #tpu.dot_dimension_numbers<[1], [0], [0], [1], [0, 0, 1, 1], [], []>} : vector<2x400xbf16>, vector<400x120xbf16>, vector<2x120xf32> -> vector<2x120xf32>
    %c0_206 = arith.constant 0 : index
    %c0_207 = arith.constant 0 : index
    %159 = vector.load %arg9[%c0_206, %c0_207] : memref<1x120xf32, #tpu.memory_space<vmem>>, vector<1x120xf32>
    %160 = vector.broadcast %159 : vector<1x120xf32> to vector<2x120xf32>
    %161 = arith.addf %158, %160 : vector<2x120xf32>
    %cst_208 = arith.constant 0.000000e+00 : f32
    %162 = vector.broadcast %cst_208 : f32 to vector<2x120xf32>
    %163 = arith.maximumf %161, %162 : vector<2x120xf32>
    %164 = arith.truncf %163 : vector<2x120xf32> to vector<2x120xbf16>
    %c0_209 = arith.constant 0 : index
    %c0_210 = arith.constant 0 : index
    %165 = vector.load %arg10[%c0_209, %c0_210] : memref<120x84xbf16, #tpu.memory_space<vmem>>, vector<120x84xbf16>
    %cst_211 = arith.constant dense<0.000000e+00> : vector<2x84xf32>
    %166 = tpu.matmul %164, %165, %cst_211 {dimension_numbers = #tpu.dot_dimension_numbers<[1], [0], [0], [1], [0, 0, 1, 1], [], []>} : vector<2x120xbf16>, vector<120x84xbf16>, vector<2x84xf32> -> vector<2x84xf32>
    %c0_212 = arith.constant 0 : index
    %c0_213 = arith.constant 0 : index
    %167 = vector.load %arg11[%c0_212, %c0_213] : memref<1x84xf32, #tpu.memory_space<vmem>>, vector<1x84xf32>
    %168 = vector.broadcast %167 : vector<1x84xf32> to vector<2x84xf32>
    %169 = arith.addf %166, %168 : vector<2x84xf32>
    %cst_214 = arith.constant 0.000000e+00 : f32
    %170 = vector.broadcast %cst_214 : f32 to vector<2x84xf32>
    %171 = arith.maximumf %169, %170 : vector<2x84xf32>
    %172 = arith.truncf %171 : vector<2x84xf32> to vector<2x84xbf16>
    %c0_215 = arith.constant 0 : index
    %c0_216 = arith.constant 0 : index
    %173 = vector.load %arg12[%c0_215, %c0_216] : memref<84x10xbf16, #tpu.memory_space<vmem>>, vector<84x10xbf16>
    %cst_217 = arith.constant dense<0.000000e+00> : vector<2x10xf32>
    %174 = tpu.matmul %172, %173, %cst_217 {dimension_numbers = #tpu.dot_dimension_numbers<[1], [0], [0], [1], [0, 0, 1, 1], [], []>} : vector<2x84xbf16>, vector<84x10xbf16>, vector<2x10xf32> -> vector<2x10xf32>
    %c0_218 = arith.constant 0 : index
    %c0_219 = arith.constant 0 : index
    %175 = vector.load %arg13[%c0_218, %c0_219] : memref<1x10xf32, #tpu.memory_space<vmem>>, vector<1x10xf32>
    %176 = vector.broadcast %175 : vector<1x10xf32> to vector<2x10xf32>
    %177 = arith.addf %174, %176 : vector<2x10xf32>
    %c0_220 = arith.constant 0 : index
    %c0_221 = arith.constant 0 : index
    %178 = vector.load %arg14[%c0_220, %c0_221] : memref<2x10xf32, #tpu.memory_space<vmem>>, vector<2x10xf32>
    tpu.vector_store %arg14[%c0_220, %c0_221], %177 {strides = array<i32>} : memref<2x10xf32, #tpu.memory_space<vmem>>, vector<2x10xf32>,
    return
  }
}

</mosaic_0001>

<bundles_post_ra>
// kernel: convnet_forward.1
= control target key start
LH: loop header
LB: loop body
LE: loop exit
PB: predicated region body
PF: predicated region fallthrough
CT: control target
= control target key end

     0   :  { %s15850_s0 = inlined_call_operand.vmem [shape: f32[8,2560], index: 0, kind: input, shape index: {}]   ;;  %s15851_s1 = inlined_call_operand.vmem [shape: f32[8,200], index: 1, kind: input, shape index: {}]   ;;  %s15852_s2 = inlined_call_operand.vmem [shape: f32[8,1], index: 2, kind: input, shape index: {}]   ;;  %s15853_s3 = inlined_call_operand.vmem [shape: f32[16,200], index: 3, kind: input, shape index: {}]   ;;  %s15854_s4 = inlined_call_operand.vmem [shape: f32[16,1], index: 4, kind: input, shape index: {}]   ;;  %s15855_s5 = inlined_call_operand.vmem [shape: bf16[640,25], index: 5, kind: input, shape index: {}]   ;;  %s15856_s6 = inlined_call_operand.vmem [shape: bf16[25,400], index: 6, kind: input, shape index: {}]   ;;  %s15857_s7 = inlined_call_operand.vmem [shape: f32[16,400], index: 7, kind: input, shape index: {}]   ;;  %s15858_s8 = inlined_call_operand.vmem [shape: bf16[400,120], index: 8, kind: input, shape index: {}]   ;;  %s15859_s9 = inlined_call_operand.vmem [shape: f32[1,120], index: 9, kind: input, shape index: {}]   ;;  %s15860_s10 = inlined_call_operand.vmem [shape: bf16[120,84], index: 10, kind: input, shape index: {}]   ;;  %s15861_s11 = inlined_call_operand.vmem [shape: f32[1,84], index: 11, kind: input, shape index: {}]   ;;  %s15862_s12 = inlined_call_operand.vmem [shape: bf16[84,10], index: 12, kind: input, shape index: {}]   ;;  %s15863_s13 = inlined_call_operand.vmem [shape: f32[1,10], index: 13, kind: input, shape index: {}]   ;;  %s15864_s14 = inlined_call_operand.hbm [shape: f32[2,10], index: 14, kind: output, shape index: {}]  }
   0x1   :  { %15946 = sst [smem:[#allocation14_spill]] %s15858_s8 }
   0x2   :  { %15947 = sst [smem:[#allocation15_spill]] %s15859_s9 }
   0x3   :  { %15948 = sst [smem:[#allocation16_spill]] %s15860_s10 }
   0x4   :  { %15949 = sst [smem:[#allocation17_spill]] %s15861_s11 }
   0x5   :  { %15950 = sst [smem:[#allocation18_spill]] %s15862_s12 }
   0x6   :  { %15951 = sst [smem:[#allocation19_spill]] %s15863_s13 }
   0x7   :  { %15952 = sst [smem:[#allocation20_spill]] %s15864_s14 }
   0x8   :  { %v10544_v0 = vld [vmem:[%s15850_s0 + $0x8] sm:$0xff]  ;;  %v10549_v1 = vld [vmem:[%s15850_s0] sm:$0xff]  ;;  %s15885_s17 = smov 32   ;;  %v10558_v2 = vld [vmem:[%s15850_s0 + $0x10] sm:$0xff]  ;;  %s15903_s20 = smov 60  }
   0x9   :  { %1959 = vrot.lane.b32.xlu0 %v10544_v0, %s15885_s17  ;;  %1957 = vrot.lane.b32.xlu1 %v10549_v1, %s15885_s17  ;;  %s15901_s21 = smov 61   ;;  %s15899_s22 = smov 62   ;;  %v10607_v3 = vld [vmem:[%s15850_s0 + $0x20] sm:$0xff]  ;;  %v10612_v4 = vld [vmem:[%s15850_s0 + $0x18] sm:$0xff] }
   0xa   :  { %s15895_s23 = smov 63   ;;  %s15887_s24 = smov 64  }
   0xb   :  { %s15873_s25 = smov 92   ;;  %s15871_s26 = smov 93  }
   0xc   :  { %s15869_s15 = smov 94   ;;  %s15867_s16 = smov 95  }
   0xd   :  { %1961 = vrot.lane.b32.xlu0 %v10558_v2, %s15885_s17  ;;  %1828 = vrot.lane.b32.xlu1 %v10544_v0, %s15903_s20 }
  0x11   :  { %1830 = vrot.lane.b32.xlu0 %v10558_v2, %s15903_s20  ;;  %1826 = vrot.lane.b32.xlu1 %v10549_v1, %s15903_s20 }
  0x15   :  { %1699 = vrot.lane.b32.xlu1 %v10558_v2, %s15901_s21  ;;  %1697 = vrot.lane.b32.xlu0 %v10544_v0, %s15901_s21 }
  0x19   :  { %1695 = vrot.lane.b32.xlu0 %v10549_v1, %s15901_s21  ;;  %1566 = vrot.lane.b32.xlu1 %v10544_v0, %s15899_s22 }
  0x1d   :  { %1568 = vrot.lane.b32.xlu0 %v10558_v2, %s15899_s22  ;;  %1564 = vrot.lane.b32.xlu1 %v10549_v1, %s15899_s22 }
  0x21   :  { %1437 = vrot.lane.b32.xlu1 %v10558_v2, %s15895_s23  ;;  %1435 = vrot.lane.b32.xlu0 %v10544_v0, %s15895_s23 }
  0x25   :  { %1433 = vrot.lane.b32.xlu0 %v10549_v1, %s15895_s23  ;;  %1304 = vrot.lane.b32.xlu1 %v10544_v0, %s15887_s24 }
  0x29   :  { %1306 = vrot.lane.b32.xlu0 %v10558_v2, %s15887_s24  ;;  %1302 = vrot.lane.b32.xlu1 %v10549_v1, %s15887_s24 }
  0x2d   :  { %1175 = vrot.lane.b32.xlu1 %v10558_v2, %s15873_s25  ;;  %1173 = vrot.lane.b32.xlu0 %v10544_v0, %s15873_s25 }
  0x31   :  { %1171 = vrot.lane.b32.xlu0 %v10549_v1, %s15873_s25  ;;  %1042 = vrot.lane.b32.xlu1 %v10544_v0, %s15871_s26 }
  0x35   :  { %1044 = vrot.lane.b32.xlu0 %v10558_v2, %s15871_s26  ;;  %1040 = vrot.lane.b32.xlu1 %v10549_v1, %s15871_s26 }
  0x39   :  { %913 = vrot.lane.b32.xlu1 %v10558_v2, %s15869_s15  ;;  %911 = vrot.lane.b32.xlu0 %v10544_v0, %s15869_s15 }
  0x3d   :  { %1965 = vrot.lane.b32.xlu1 %v10607_v3, %s15885_s17  ;;  %1963 = vrot.lane.b32.xlu0 %v10612_v4, %s15885_s17 }
  0x41   :  { %909 = vrot.lane.b32.xlu0 %v10549_v1, %s15869_s15  ;;  %780 = vrot.lane.b32.xlu1 %v10544_v0, %s15867_s16 }
  0x45   :  { %782 = vrot.lane.b32.xlu0 %v10558_v2, %s15867_s16  ;;  %1832 = vrot.lane.b32.xlu1 %v10612_v4, %s15903_s20 }
  0x46   :  { %19 = vsyncpa [#allocation9], 0  ;;  %s15865_s18 = smov 96   ;;  %s15907_s19 = smov 124   ;;  %vm1995_vm0 = vcmask 261120   ;;  %vm1864_vm1 = vcmask 490496  }
  0x47   :  { %s15905_s27 = smov 125   ;;  %s15889_s28 = smov 126   ;;  %vm1733_vm2 = vcmask 498688   ;;  %vm1602_vm3 = vcmask 506880   ;;  %vm1471_vm4 = vcmask 515072   ;;  %vm15913_vm5 = vcmask 523264  }
  0x48   :  { %s15881_s29 = smov 127   ;;  %vm15909_vm6 = vcmask 752640   ;;  %vm15894_vm7 = vcmask 760832   ;;  %vm15893_vm8 = vcmask 769024   ;;  %s15879_s30 = smov 28   ;;  %vm15892_vm9 = vcmask 777216  }
  0x49   :  { %1834 = vrot.lane.b32.xlu0 %v10607_v3, %s15903_s20  ;;  %778 = vrot.lane.b32.xlu1 %v10549_v1, %s15867_s16  ;;  %vm15891_vm10 = vcmask 785408   ;;  %vm3588_vm11 = vcmask 588800   ;;  %vm554_vm12 = vcmask 1014784   ;;  %vm423_vm13 = vcmask 1022976   ;;  %s15971_s14 = smov 125   ;;  %s15978_s13 = smov 63  }
  0x4a   :  { %vm292_vm14 = vcmask 1031168   ;;  %vm161_vm15 = vcmask 1039360   ;;  %s15987_s9 = smov 124  }
  0x4d   :  { %651 = vrot.lane.b32.xlu1 %v10558_v2, %s15865_s18  ;;  %649 = vrot.lane.b32.xlu0 %v10544_v0, %s15865_s18 }
  0x51   :  { %1703 = vrot.lane.b32.xlu1 %v10607_v3, %s15901_s21  ;;  %1701 = vrot.lane.b32.xlu0 %v10612_v4, %s15901_s21 }
  0x55   :  { %647 = vrot.lane.b32.xlu0 %v10549_v1, %s15865_s18  ;;  %518 = vrot.lane.b32.xlu1 %v10544_v0, %s15907_s19 }
  0x59   :  { %520 = vrot.lane.b32.xlu0 %v10558_v2, %s15907_s19  ;;  %1570 = vrot.lane.b32.xlu1 %v10612_v4, %s15899_s22 }
  0x5d   :  { %1572 = vrot.lane.b32.xlu0 %v10607_v3, %s15899_s22  ;;  %516 = vrot.lane.b32.xlu1 %v10549_v1, %s15907_s19 }
  0x61   :  { %389 = vrot.lane.b32.xlu1 %v10558_v2, %s15905_s27  ;;  %387 = vrot.lane.b32.xlu0 %v10544_v0, %s15905_s27 }
  0x65   :  { %1441 = vrot.lane.b32.xlu1 %v10607_v3, %s15895_s23  ;;  %1439 = vrot.lane.b32.xlu0 %v10612_v4, %s15895_s23 }
  0x69   :  { %385 = vrot.lane.b32.xlu0 %v10549_v1, %s15905_s27  ;;  %256 = vrot.lane.b32.xlu1 %v10544_v0, %s15889_s28 }
  0x6d   :  { %258 = vrot.lane.b32.xlu0 %v10558_v2, %s15889_s28  ;;  %1308 = vrot.lane.b32.xlu1 %v10612_v4, %s15887_s24 }
  0x71   :  { %1310 = vrot.lane.b32.xlu0 %v10607_v3, %s15887_s24  ;;  %254 = vrot.lane.b32.xlu1 %v10549_v1, %s15889_s28 }
  0x75   :  { %127 = vrot.lane.b32.xlu1 %v10558_v2, %s15881_s29  ;;  %125 = vrot.lane.b32.xlu0 %v10544_v0, %s15881_s29 }
  0x79   :  { %1179 = vrot.lane.b32.xlu1 %v10607_v3, %s15873_s25  ;;  %1177 = vrot.lane.b32.xlu0 %v10612_v4, %s15873_s25  ;;  %s15883_s25 = smov 31  }
  0x7b   :  { %v1960_v5 = vpop.permute.xlu0 %1959  ;;  %v1958_v6 = vpop.permute.xlu1 %1957 }
  0x7c   :  { %v1996_v10 = vsel %vm1995_vm0, %v1958_v6, %v1960_v5 }
  0x7d   :  { %1046 = vrot.lane.b32.xlu1 %v10612_v4, %s15871_s26  ;;  %123 = vrot.lane.b32.xlu0 %v10549_v1, %s15881_s29 }
  0x7f   :  { %v10686_v7 = vpop.permute.xlu0 %1961  ;;  %v1829_v8 = vpop.permute.xlu1 %1828 }
  0x80   :  { %v1997_v9 = vsel %vm1995_vm0, %v1960_v5, %v10686_v7 }
  0x81   :  { %3592 = vmatprep.subr.mxu0 %v1997_v9  ;;  %915 = vrot.lane.b32.xlu1 %v10612_v4, %s15869_s15 }
  0x82   :  { %1048 = vrot.lane.b32.xlu0 %v10607_v3, %s15871_s26  ;;  %3593 = vmatpush1.msra.mxu0 %v1996_v10  ;;  %s15953_s26 = smov 92  }
  0x83   :  { %v10695_v11 = vpop.permute.xlu0 %1830  ;;  %v1827_v12 = vpop.permute.xlu1 %1826 }
  0x84   :  { %v1866_v13 = vsel %vm1864_vm1, %v1829_v8, %v10695_v11  ;;  %v1865_v14 = vsel %vm1864_vm1, %v1827_v12, %v1829_v8 }
  0x85   :  { %3594 = vmatprep.subr.mxu0 %v1866_v13  ;;  %3040 = vrot.lane.b32.xlu1 %v10558_v2, %s15907_s19 }
  0x86   :  { %917 = vrot.lane.b32.xlu0 %v10607_v3, %s15869_s15  ;;  %3595 = vmatpush1.msra.mxu0 %v1865_v14  ;;  %v10834_v14 = vld [vmem:[%s15851_s1 + $0x8] sm:$0xff]  ;;  %s15954_s15 = smov 30  }
  0x87   :  { %v10704_v15 = vpop.permute.xlu1 %1699  ;;  %v1698_v16 = vpop.permute.xlu0 %1697  ;;  %9817 = vmatprep.mubr.msk.f32.mxu0 %vm3588_vm11, %v10834_v14  ;;  %9818 = vmatprep.mubr.msk.f32.mxu1 %vm3588_vm11, %v10834_v14 }
  0x88   :  { %v1735_v17 = vsel %vm1733_vm2, %v1698_v16, %v10704_v15 }
  0x89   :  { %3596 = vmatprep.subr.mxu0 %v1735_v17  ;;  %3038 = vrot.lane.b32.xlu1 %v10544_v0, %s15907_s19  ;;  %v10847_v17 = vld [vmem:[%s15850_s0 + $0x28] sm:$0xff] }
  0x8a   :  { %3042 = vrot.lane.b32.xlu0 %v10612_v4, %s15907_s19 }
  0x8b   :  { %v1696_v18 = vpop.permute.xlu0 %1695  ;;  %v1567_v19 = vpop.permute.xlu1 %1566 }
  0x8c   :  { %v1734_v20 = vsel %vm1733_vm2, %v1696_v18, %v1698_v16 }
  0x8d   :  { %786 = vrot.lane.b32.xlu1 %v10607_v3, %s15867_s16  ;;  %3597 = vmatpush1.msra.mxu0 %v1734_v20 }
  0x8e   :  { %784 = vrot.lane.b32.xlu0 %v10612_v4, %s15867_s16  ;;  %s15875_s16 = smov 30  }
  0x8f   :  { %v10717_v21 = vpop.permute.xlu0 %1568  ;;  %v1565_v22 = vpop.permute.xlu1 %1564 }
  0x90   :  { %v1604_v23 = vsel %vm1602_vm3, %v1567_v19, %v10717_v21  ;;  %v1603_v24 = vsel %vm1602_vm3, %v1565_v22, %v1567_v19 }
  0x91   :  { %3598 = vmatprep.subr.mxu0 %v1604_v23  ;;  %2912 = vrot.lane.b32.xlu1 %v10612_v4, %s15905_s27 }
  0x92   :  { %2910 = vrot.lane.b32.xlu0 %v10558_v2, %s15905_s27  ;;  %3599 = vmatpush1.msra.mxu0 %v1603_v24 }
  0x93   :  { %v10726_v25 = vpop.permute.xlu1 %1437  ;;  %v1436_v26 = vpop.permute.xlu0 %1435 }
  0x94   :  { %v1473_v27 = vsel %vm1471_vm4, %v1436_v26, %v10726_v25 }
  0x95   :  { %3600 = vmatprep.subr.mxu0 %v1473_v27  ;;  %653 = vrot.lane.b32.xlu1 %v10612_v4, %s15865_s18  ;;  %v10873_v27 = vld [vmem:[%s15850_s0 + $0x30] sm:$0xff] }
  0x96   :  { %2908 = vrot.lane.b32.xlu0 %v10544_v0, %s15905_s27 }
  0x97   :  { %v1434_v28 = vpop.permute.xlu0 %1433  ;;  %v1305_v29 = vpop.permute.xlu1 %1304 }
  0x98   :  { %v1472_v30 = vsel %vm1471_vm4, %v1434_v28, %v1436_v26 }
  0x99   :  { %2780 = vrot.lane.b32.xlu1 %v10558_v2, %s15889_s28  ;;  %3601 = vmatpush1.msra.mxu0 %v1472_v30 }
  0x9a   :  { %655 = vrot.lane.b32.xlu0 %v10607_v3, %s15865_s18  ;;  %s15877_s18 = smov 29  }
  0x9b   :  { %v10739_v31 = vpop.permute.xlu0 %1306  ;;  %v1303_v32 = vpop.permute.xlu1 %1302 }
  0x9c   :  { %v1342_v33 = vsel %vm15913_vm5, %v1305_v29, %v10739_v31  ;;  %v1341_v34 = vsel %vm15913_vm5, %v1303_v32, %v1305_v29 }
  0x9d   :  { %3602 = vmatprep.subr.mxu0 %v1342_v33  ;;  %2778 = vrot.lane.b32.xlu1 %v10544_v0, %s15889_s28 }
  0x9e   :  { %2782 = vrot.lane.b32.xlu0 %v10612_v4, %s15889_s28  ;;  %3603 = vmatpush1.msra.mxu0 %v1341_v34 }
  0x9f   :  { %v10748_v35 = vpop.permute.xlu1 %1175  ;;  %v1174_v36 = vpop.permute.xlu0 %1173 }
  0xa0   :  { %v1211_v37 = vsel %vm15909_vm6, %v1174_v36, %v10748_v35 }
  0xa1   :  { %3604 = vmatprep.subr.mxu0 %v1211_v37  ;;  %524 = vrot.lane.b32.xlu1 %v10607_v3, %s15907_s19 }
  0xa2   :  { %522 = vrot.lane.b32.xlu0 %v10612_v4, %s15907_s19 }
  0xa3   :  { %v1172_v38 = vpop.permute.xlu0 %1171  ;;  %v1043_v39 = vpop.permute.xlu1 %1042 }
  0xa4   :  { %v1210_v40 = vsel %vm15909_vm6, %v1172_v38, %v1174_v36 }
  0xa5   :  { %2652 = vrot.lane.b32.xlu1 %v10612_v4, %s15881_s29  ;;  %3605 = vmatpush1.msra.mxu0 %v1210_v40 }
  0xa6   :  { %2650 = vrot.lane.b32.xlu0 %v10558_v2, %s15881_s29 }
  0xa7   :  { %v10761_v41 = vpop.permute.xlu0 %1044  ;;  %v1041_v42 = vpop.permute.xlu1 %1040 }
  0xa8   :  { %v1080_v43 = vsel %vm15894_vm7, %v1043_v39, %v10761_v41  ;;  %v1079_v44 = vsel %vm15894_vm7, %v1041_v42, %v1043_v39 }
  0xa9   :  { %3606 = vmatprep.subr.mxu0 %v1080_v43  ;;  %391 = vrot.lane.b32.xlu1 %v10612_v4, %s15905_s27 }
  0xaa   :  { %2648 = vrot.lane.b32.xlu0 %v10544_v0, %s15881_s29  ;;  %3607 = vmatpush1.msra.mxu0 %v1079_v44 }
  0xab   :  { %v10770_v45 = vpop.permute.xlu1 %913  ;;  %v912_v46 = vpop.permute.xlu0 %911 }
  0xac   :  { %v949_v47 = vsel %vm15893_vm8, %v912_v46, %v10770_v45 }
  0xad   :  { %3608 = vmatprep.subr.mxu0 %v949_v47  ;;  %260 = vrot.lane.b32.xlu1 %v10612_v4, %s15889_s28 }
  0xae   :  { %393 = vrot.lane.b32.xlu0 %v10607_v3, %s15905_s27 }
  0xaf   :  { %v10778_v48 = vpop.permute.xlu1 %1965  ;;  %v1964_v49 = vpop.permute.xlu0 %1963 }
  0xb0   :  { %v1999_v50 = vsel %vm1995_vm0, %v1964_v49, %v10778_v48  ;;  %v1998_v51 = vsel %vm1995_vm0, %v10686_v7, %v1964_v49 }
  0xb1   :  { %3663 = vmatprep.subr.mxu1 %v1999_v50  ;;  %2483 = vrot.lane.b32.xlu1 %v10544_v0, %s15879_s30 }
  0xb2   :  { %262 = vrot.lane.b32.xlu0 %v10607_v3, %s15889_s28  ;;  %3664 = vmatpush1.msra.mxu1 %v1998_v51 }
  0xb3   :  { %v910_v52 = vpop.permute.xlu0 %909  ;;  %v781_v53 = vpop.permute.xlu1 %780 }
  0xb4   :  { %v948_v54 = vsel %vm15893_vm8, %v910_v52, %v912_v46 }
  0xb5   :  { %2481 = vrot.lane.b32.xlu1 %v10549_v1, %s15879_s30  ;;  %3609 = vmatpush1.msra.mxu0 %v948_v54 }
  0xb6   :  { %2485 = vrot.lane.b32.xlu0 %v10558_v2, %s15879_s30 }
  0xb7   :  { %v10793_v55 = vpop.permute.xlu0 %782  ;;  %v1833_v56 = vpop.permute.xlu1 %1832 }
  0xb8   :  { %v818_v57 = vsel %vm15892_vm9, %v781_v53, %v10793_v55  ;;  %v1867_v62 = vsel %vm1864_vm1, %v10695_v11, %v1833_v56 }
  0xb9   :  { %3610 = vmatprep.subr.mxu0 %v818_v57  ;;  %131 = vrot.lane.b32.xlu1 %v10607_v3, %s15881_s29 }
  0xba   :  { %129 = vrot.lane.b32.xlu0 %v10612_v4, %s15881_s29 }
  0xbb   :  { %v10801_v58 = vpop.permute.xlu0 %1834  ;;  %v779_v59 = vpop.permute.xlu1 %778 }
  0xbc   :  { %v817_v60 = vsel %vm15892_vm9, %v779_v59, %v781_v53  ;;  %v1868_v61 = vsel %vm1864_vm1, %v1833_v56, %v10801_v58 }
  0xbd   :  { %3611 = vmatpush1.msra.mxu0 %v817_v60  ;;  %3665 = vmatprep.subr.mxu1 %v1868_v61 }
  0xbe   :  { %2354 = vrot.lane.b32.xlu1 %v10558_v2, %s15877_s18  ;;  %2352 = vrot.lane.b32.xlu0 %v10544_v0, %s15877_s18 }
  0xbf   :  { %3666 = vmatpush1.msra.mxu1 %v1867_v62  ;;  %v10812_v63 = vpop.permute.xlu1 %651  ;;  %v650_v5 = vpop.permute.xlu0 %649 }
  0xc0   :  { %v687_v6 = vsel %vm15891_vm10, %v650_v5, %v10812_v63 }
  0xc1   :  { %3612 = vmatprep.subr.mxu0 %v687_v6 }
  0xc2   :  { %2221 = vrot.lane.b32.xlu1 %v10544_v0, %s15875_s16  ;;  %2350 = vrot.lane.b32.xlu0 %v10549_v1, %s15877_s18 }
  0xc3   :  { %v10820_v7 = vpop.permute.xlu1 %1703  ;;  %v1702_v8 = vpop.permute.xlu0 %1701 }
  0xc4   :  { %v1737_v9 = vsel %vm1733_vm2, %v1702_v8, %v10820_v7  ;;  %v1736_v10 = vsel %vm1733_vm2, %v10704_v15, %v1702_v8 }
  0xc5   :  { %3667 = vmatprep.subr.mxu1 %v1737_v9 }
  0xc6   :  { %2219 = vrot.lane.b32.xlu1 %v10549_v1, %s15875_s16  ;;  %2223 = vrot.lane.b32.xlu0 %v10558_v2, %s15875_s16  ;;  %s15955_s16 = smov 93  }
  0xc7   :  { %3668 = vmatpush1.msra.mxu1 %v1736_v10  ;;  %v648_v11 = vpop.permute.xlu0 %647  ;;  %v519_v12 = vpop.permute.xlu1 %518 }
  0xc8   :  { %v686_v13 = vsel %vm15891_vm10, %v648_v11, %v650_v5 }
  0xc9   :  { %3613 = vmatpush1.msra.mxu0 %v686_v13 }
  0xca   :  { %2092 = vrot.lane.b32.xlu1 %v10558_v2, %s15883_s25  ;;  %2090 = vrot.lane.b32.xlu0 %v10544_v0, %s15883_s25 }
  0xcb   :  { %v10842_v15 = vpop.permute.xlu0 %520  ;;  %v1571_v16 = vpop.permute.xlu1 %1570 }
  0xcc   :  { %v556_v18 = vsel %vm554_vm12, %v519_v12, %v10842_v15  ;;  %v1605_v23 = vsel %vm1602_vm3, %v10717_v21, %v1571_v16 }
  0xcd   :  { %3614 = vmatprep.subr.mxu0 %v556_v18 }
  0xce   :  { %3046 = vrot.lane.b32.xlu1 %v10847_v17, %s15907_s19  ;;  %3044 = vrot.lane.b32.xlu0 %v10607_v3, %s15907_s19 }
  0xcf   :  { %v10857_v2 = vpop.permute.xlu0 %1572  ;;  %v517_v19 = vpop.permute.xlu1 %516 }
  0xd0   :  { %v555_v20 = vsel %vm554_vm12, %v517_v19, %v519_v12  ;;  %v1606_v22 = vsel %vm1602_vm3, %v1571_v16, %v10857_v2 }
  0xd1   :  { %3615 = vmatpush1.msra.mxu0 %v555_v20  ;;  %3669 = vmatprep.subr.mxu1 %v1606_v22 }
  0xd2   :  { %1967 = vrot.lane.b32.xlu1 %v10847_v17, %s15885_s17  ;;  %2088 = vrot.lane.b32.xlu0 %v10549_v1, %s15883_s25 }
  0xd3   :  { %3670 = vmatpush1.msra.mxu1 %v1605_v23  ;;  %v10868_v24 = vpop.permute.xlu1 %389  ;;  %v388_v26 = vpop.permute.xlu0 %387 }
  0xd4   :  { %v425_v28 = vsel %vm423_vm13, %v388_v26, %v10868_v24 }
  0xd5   :  { %3616 = vmatprep.subr.mxu0 %v425_v28  ;;  %v11005_v28 = vld [vmem:[%s15850_s0 + $0x38] sm:$0xff] }
  0xd6   :  { %2914 = vrot.lane.b32.xlu1 %v10607_v3, %s15905_s27  ;;  %1969 = vrot.lane.b32.xlu0 %v10873_v27, %s15885_s17 }
  0xd7   :  { %v10881_v21 = vpop.permute.xlu1 %1441  ;;  %v1440_v29 = vpop.permute.xlu0 %1439 }
  0xd8   :  { %v1475_v30 = vsel %vm1471_vm4, %v1440_v29, %v10881_v21  ;;  %v1474_v32 = vsel %vm1471_vm4, %v10726_v25, %v1440_v29 }
  0xd9   :  { %3671 = vmatprep.subr.mxu1 %v1475_v30 }
  0xda   :  { %1836 = vrot.lane.b32.xlu1 %v10847_v17, %s15903_s20  ;;  %2916 = vrot.lane.b32.xlu0 %v10847_v17, %s15905_s27 }
  0xdb   :  { %3672 = vmatpush1.msra.mxu1 %v1474_v32  ;;  %v386_v33 = vpop.permute.xlu0 %385  ;;  %v257_v34 = vpop.permute.xlu1 %256 }
  0xdc   :  { %v424_v36 = vsel %vm423_vm13, %v386_v33, %v388_v26 }
  0xdd   :  { %3617 = vmatpush1.msra.mxu0 %v424_v36 }
  0xde   :  { %2784 = vrot.lane.b32.xlu1 %v10607_v3, %s15889_s28  ;;  %1838 = vrot.lane.b32.xlu0 %v10873_v27, %s15903_s20 }
  0xdf   :  { %v10896_v25 = vpop.permute.xlu0 %258  ;;  %v1309_v37 = vpop.permute.xlu1 %1308 }
  0xe0   :  { %v294_v38 = vsel %vm292_vm14, %v257_v34, %v10896_v25  ;;  %v1343_v44 = vsel %vm15913_vm5, %v10739_v31, %v1309_v37 }
  0xe1   :  { %3618 = vmatprep.subr.mxu0 %v294_v38 }
  0xe2   :  { %1705 = vrot.lane.b32.xlu1 %v10847_v17, %s15901_s21  ;;  %2786 = vrot.lane.b32.xlu0 %v10847_v17, %s15889_s28  ;;  %s15963_s28 = smov 29  }
  0xe3   :  { %v10904_v39 = vpop.permute.xlu0 %1310  ;;  %v255_v40 = vpop.permute.xlu1 %254 }
  0xe4   :  { %v293_v42 = vsel %vm292_vm14, %v255_v40, %v257_v34  ;;  %v1344_v43 = vsel %vm15913_vm5, %v1309_v37, %v10904_v39 }
  0xe5   :  { %3619 = vmatpush1.msra.mxu0 %v293_v42  ;;  %3673 = vmatprep.subr.mxu1 %v1344_v43 }
  0xe6   :  { %2654 = vrot.lane.b32.xlu1 %v10607_v3, %s15881_s29  ;;  %1707 = vrot.lane.b32.xlu0 %v10873_v27, %s15901_s21 }
  0xe7   :  { %3674 = vmatpush1.msra.mxu1 %v1343_v44  ;;  %v10915_v46 = vpop.permute.xlu1 %127  ;;  %v126_v47 = vpop.permute.xlu0 %125  ;;  %v2575_v44 = vld [vmem:[%s15850_s0 + $0x10] sm:$0xff] }
  0xe8   :  { %v163_v49 = vsel %vm161_vm15, %v126_v47, %v10915_v46 }
  0xe9   :  { %3620 = vmatprep.subr.mxu0 %v163_v49 }
  0xea   :  { %1574 = vrot.lane.b32.xlu1 %v10847_v17, %s15899_s22  ;;  %2656 = vrot.lane.b32.xlu0 %v10847_v17, %s15881_s29  ;;  %s15959_s29 = smov 126  }
  0xeb   :  { %v10923_v50 = vpop.permute.xlu1 %1179  ;;  %v1178_v51 = vpop.permute.xlu0 %1177 }
  0xec   :  { %v1213_v31 = vsel %vm15909_vm6, %v1178_v51, %v10923_v50  ;;  %v1212_v52 = vsel %vm15909_vm6, %v10748_v35, %v1178_v51 }
  0xed   :  { %3675 = vmatprep.subr.mxu1 %v1213_v31 }
  0xee   :  { %1443 = vrot.lane.b32.xlu1 %v10847_v17, %s15895_s23  ;;  %1576 = vrot.lane.b32.xlu0 %v10873_v27, %s15899_s22 }
  0xef   :  { %3676 = vmatpush1.msra.mxu1 %v1212_v52  ;;  %v1047_v53 = vpop.permute.xlu1 %1046  ;;  %v124_v54 = vpop.permute.xlu0 %123 }
  0xf0   :  { %v162_v56 = vsel %vm161_vm15, %v124_v54, %v126_v47  ;;  %v1081_v60 = vsel %vm15894_vm7, %v10761_v41, %v1047_v53  ;;  %v2574_v47 = vld [vmem:[%s15850_s0 + $0x8] sm:$0xff] }
  0xf1   :  { %3621 = vmatpush1.msra.mxu0 %v162_v56 }
  0xf2   :  { %2487 = vrot.lane.b32.xlu1 %v10612_v4, %s15879_s30  ;;  %1445 = vrot.lane.b32.xlu0 %v10873_v27, %s15895_s23 }
  0xf3   :  { %v916_v35 = vpop.permute.xlu1 %915  ;;  %3622 = vmatprep.subr.mxu0 %v10544_v0 }
  0xf4   :  { %v10939_v57 = vpop.permute.xlu0 %1048  ;;  %3623 = vmatpush1.msra.mxu0 %v10549_v1  ;;  %v950_v62 = vsel %vm15893_vm8, %v10770_v45, %v916_v35 }
  0xf5   :  { %v1082_v59 = vsel %vm15894_vm7, %v1047_v53, %v10939_v57  ;;  %vm2126_vm7 = vcmask 252928  }
  0xf6   :  { %1312 = vrot.lane.b32.xlu1 %v10847_v17, %s15887_s24  ;;  %2489 = vrot.lane.b32.xlu0 %v10607_v3, %s15879_s30  ;;  %s15960_s30 = smov 64  }
  0xf7   :  { %3677 = vmatprep.subr.mxu1 %v1082_v59  ;;  %v3041_v61 = vpop.permute.xlu1 %3040 }
  0xf8   :  { %3678 = vmatpush1.msra.mxu1 %v1081_v60  ;;  %v10950_v0 = vpop.permute.xlu0 %917 }
  0xf9   :  { %v951_v1 = vsel %vm15893_vm8, %v916_v35, %v10950_v0  ;;  %vm2257_vm8 = vcmask 244736  }
  0xfa   :  { %2356 = vrot.lane.b32.xlu1 %v10612_v4, %s15877_s18  ;;  %1314 = vrot.lane.b32.xlu0 %v10873_v27, %s15887_s24  ;;  %s15961_s24 = smov 127  }
  0xfb   :  { %3679 = vmatprep.subr.mxu1 %v951_v1  ;;  %v3039_v5 = vpop.permute.xlu1 %3038 }
  0xfc   :  { %3680 = vmatpush1.msra.mxu1 %v950_v62  ;;  %v10960_v41 = vpop.permute.xlu0 %3042  ;;  %v3076_v8 = vsel %vm554_vm12, %v3039_v5, %v3041_v61 }
  0xfd   :  { %v3077_v6 = vsel %vm554_vm12, %v3041_v61, %v10960_v41 }
  0xfe   :  { %1181 = vrot.lane.b32.xlu1 %v10847_v17, %s15953_s26  ;;  %2358 = vrot.lane.b32.xlu0 %v10607_v3, %s15877_s18  ;;  %s15956_s18 = smov 94  }
  0xff   :  { %3638 = vmatprep.subr.mxu0 %v3077_v6  ;;  %v10969_v9 = vpop.permute.xlu1 %786  ;;  %v11092_v6 = vld [vmem:[%s15850_s0 + $0x18] sm:$0xff] }
 0x100   :  { %3639 = vmatpush2.msra.mxu0 %v3076_v8  ;;  %v785_v45 = vpop.permute.xlu0 %784 }
 0x101   :  { %v820_v10 = vsel %vm15892_vm9, %v785_v45, %v10969_v9  ;;  %v819_v11 = vsel %vm15892_vm9, %v10793_v55, %v785_v45  ;;  %vm15897_vm9 = vcmask 236544  }
 0x102   :  { %2225 = vrot.lane.b32.xlu1 %v10612_v4, %s15954_s15  ;;  %1183 = vrot.lane.b32.xlu0 %v10873_v27, %s15953_s26 }
 0x103   :  { %3681 = vmatprep.subr.mxu1 %v820_v10  ;;  %v10979_v12 = vpop.permute.xlu1 %2912 }
 0x104   :  { %3682 = vmatpush1.msra.mxu1 %v819_v11  ;;  %v2911_v13 = vpop.permute.xlu0 %2910 }
 0x105   :  { %v2947_v16 = vsel %vm423_vm13, %v2911_v13, %v10979_v12 }
 0x106   :  { %1050 = vrot.lane.b32.xlu1 %v10847_v17, %s15955_s16  ;;  %2227 = vrot.lane.b32.xlu0 %v10607_v3, %s15954_s15 }
 0x107   :  { %3640 = vmatprep.subr.mxu0 %v2947_v16  ;;  %v654_v55 = vpop.permute.xlu1 %653 }
 0x108   :  { %v2909_v18 = vpop.permute.xlu0 %2908 }
 0x109   :  { %v2946_v19 = vsel %vm423_vm13, %v2909_v18, %v2911_v13 }
 0x10a   :  { %2094 = vrot.lane.b32.xlu1 %v10612_v4, %s15883_s25  ;;  %1052 = vrot.lane.b32.xlu0 %v10873_v27, %s15955_s16  ;;  %v688_v4 = vsel %vm15891_vm10, %v10812_v63, %v654_v55  ;;  %v11021_v63 = vld [vmem:[%s15850_s0 + $0x40] sm:$0xff] }
 0x10b   :  { %v2781_v20 = vpop.permute.xlu1 %2780  ;;  %3641 = vmatpush2.msra.mxu0 %v2946_v19 }
 0x10c   :  { %v10992_v22 = vpop.permute.xlu0 %655 }
 0x10d   :  { %v689_v23 = vsel %vm15891_vm10, %v654_v55, %v10992_v22  ;;  %vm15898_vm10 = vcmask 228352  }
 0x10e   :  { %919 = vrot.lane.b32.xlu1 %v10847_v17, %s15956_s18  ;;  %2096 = vrot.lane.b32.xlu0 %v10607_v3, %s15883_s25  ;;  %s15957_s25 = smov 95  }
 0x10f   :  { %3683 = vmatprep.subr.mxu1 %v689_v23  ;;  %v2779_v26 = vpop.permute.xlu1 %2778 }
 0x110   :  { %3684 = vmatpush1.msra.mxu1 %v688_v4  ;;  %v11007_v29 = vpop.permute.xlu0 %2782  ;;  %v2816_v32 = vsel %vm292_vm14, %v2779_v26, %v2781_v20 }
 0x111   :  { %v2817_v30 = vsel %vm292_vm14, %v2781_v20, %v11007_v29 }
 0x112   :  { %1971 = vrot.lane.b32.xlu1 %v11005_v28, %s15885_s17  ;;  %921 = vrot.lane.b32.xlu0 %v10873_v27, %s15956_s18 }
 0x113   :  { %3642 = vmatprep.subr.mxu0 %v2817_v30  ;;  %v11016_v3 = vpop.permute.xlu1 %524 }
 0x114   :  { %3643 = vmatpush2.msra.mxu0 %v2816_v32  ;;  %v523_v33 = vpop.permute.xlu0 %522 }
 0x115   :  { %v558_v34 = vsel %vm554_vm12, %v523_v33, %v11016_v3  ;;  %v557_v36 = vsel %vm554_vm12, %v10842_v15, %v523_v33 }
 0x116   :  { %788 = vrot.lane.b32.xlu1 %v10847_v17, %s15957_s25  ;;  %1973 = vrot.lane.b32.xlu0 %v11021_v63, %s15885_s17  ;;  %s15958_s17 = smov 96  }
 0x117   :  { %3685 = vmatprep.subr.mxu1 %v558_v34  ;;  %v11031_v37 = vpop.permute.xlu1 %2652 }
 0x118   :  { %3686 = vmatpush1.msra.mxu1 %v557_v36  ;;  %v2651_v38 = vpop.permute.xlu0 %2650 }
 0x119   :  { %v2687_v40 = vsel %vm161_vm15, %v2651_v38, %v11031_v37 }
 0x11a   :  { %1840 = vrot.lane.b32.xlu1 %v11005_v28, %s15903_s20  ;;  %790 = vrot.lane.b32.xlu0 %v10873_v27, %s15957_s25 }
 0x11b   :  { %3644 = vmatprep.subr.mxu0 %v2687_v40  ;;  %v392_v15 = vpop.permute.xlu1 %391  ;;  %v11139_v40 = vld [vmem:[%s15851_s1] sm:$0xff] }
 0x11c   :  { %v2649_v42 = vpop.permute.xlu0 %2648  ;;  %v426_v52 = vsel %vm423_vm13, %v10868_v24, %v392_v15 }
 0x11d   :  { %v2686_v43 = vsel %vm161_vm15, %v2649_v42, %v2651_v38 }
 0x11e   :  { %657 = vrot.lane.b32.xlu1 %v10847_v17, %s15958_s17  ;;  %1842 = vrot.lane.b32.xlu0 %v11021_v63, %s15903_s20  ;;  %s15973_s20 = smov 60  }
 0x11f   :  { %v261_v49 = vpop.permute.xlu1 %260  ;;  %3645 = vmatpush2.msra.mxu0 %v2686_v43 }
 0x120   :  { %v11050_v51 = vpop.permute.xlu0 %393  ;;  %3646 = vmatprep.subr.mxu0 %v2575_v44  ;;  %v295_v35 = vsel %vm292_vm14, %v10896_v25, %v261_v49 }
 0x121   :  { %v427_v31 = vsel %vm423_vm13, %v392_v15, %v11050_v51  ;;  %3647 = vmatpush2.msra.mxu0 %v2574_v47 }
 0x122   :  { %1709 = vrot.lane.b32.xlu1 %v11005_v28, %s15901_s21  ;;  %659 = vrot.lane.b32.xlu0 %v10873_v27, %s15958_s17 }
 0x123   :  { %3687 = vmatprep.subr.mxu1 %v427_v31  ;;  %v2484_v53 = vpop.permute.xlu1 %2483 }
 0x124   :  { %3688 = vmatpush1.msra.mxu1 %v426_v52  ;;  %v11060_v54 = vpop.permute.xlu0 %262 }
 0x125   :  { %v296_v56 = vsel %vm292_vm14, %v261_v49, %v11060_v54 }
 0x126   :  { %526 = vrot.lane.b32.xlu1 %v10847_v17, %s15907_s19  ;;  %1711 = vrot.lane.b32.xlu0 %v11021_v63, %s15901_s21  ;;  %s15976_s21 = smov 61  }
 0x127   :  { %3689 = vmatprep.subr.mxu1 %v296_v56  ;;  %v2482_v59 = vpop.permute.xlu1 %2481 }
 0x128   :  { %3690 = vmatpush1.msra.mxu1 %v295_v35  ;;  %v11070_v24 = vpop.permute.xlu0 %2485  ;;  %v2520_v61 = vsel %vm15898_vm10, %v2482_v59, %v2484_v53 }
 0x129   :  { %v2521_v60 = vsel %vm15898_vm10, %v2484_v53, %v11070_v24 }
 0x12a   :  { %1578 = vrot.lane.b32.xlu1 %v11005_v28, %s15899_s22  ;;  %528 = vrot.lane.b32.xlu0 %v10873_v27, %s15907_s19 }
 0x12b   :  { %3648 = vmatprep.subr.mxu0 %v2521_v60  ;;  %v11079_v1 = vpop.permute.xlu1 %131 }
 0x12c   :  { %3649 = vmatpush2.msra.mxu0 %v2520_v61  ;;  %v130_v25 = vpop.permute.xlu0 %129 }
 0x12d   :  { %v165_v62 = vsel %vm161_vm15, %v130_v25, %v11079_v1  ;;  %v164_v5 = vsel %vm161_vm15, %v10915_v46, %v130_v25 }
 0x12e   :  { %395 = vrot.lane.b32.xlu1 %v10847_v17, %s15905_s27  ;;  %1580 = vrot.lane.b32.xlu0 %v11021_v63, %s15899_s22  ;;  %s15966_s22 = smov 31  }
 0x12f   :  { %3691 = vmatprep.subr.mxu1 %v165_v62 }
 0x130   :  { %3692 = vmatpush1.msra.mxu1 %v164_v5  ;;  %v11094_v8 = vpop.permute.xlu1 %2354  ;;  %v2353_v45 = vpop.permute.xlu0 %2352 }
 0x131   :  { %v2390_v46 = vsel %vm15897_vm9, %v2353_v45, %v11094_v8  ;;  %3693 = vmatprep.subr.mxu1 %v11092_v6 }
 0x132   :  { %1447 = vrot.lane.b32.xlu1 %v11005_v28, %s15895_s23  ;;  %397 = vrot.lane.b32.xlu0 %v10873_v27, %s15905_s27 }
 0x133   :  { %3650 = vmatprep.subr.mxu0 %v2390_v46  ;;  %3694 = vmatpush1.msra.mxu1 %v2575_v44  ;;  %v11209_v46 = vld [vmem:[%s15850_s0 + $0x20] sm:$0xff] }
 0x134   :  { %v2222_v10 = vpop.permute.xlu1 %2221  ;;  %v2351_v11 = vpop.permute.xlu0 %2350 }
 0x135   :  { %v2389_v13 = vsel %vm15897_vm9, %v2351_v11, %v2353_v45 }
 0x136   :  { %264 = vrot.lane.b32.xlu1 %v10847_v17, %s15959_s29  ;;  %1449 = vrot.lane.b32.xlu0 %v11021_v63, %s15895_s23  ;;  %s15962_s23 = smov 28  }
 0x137   :  { %3651 = vmatpush2.msra.mxu0 %v2389_v13 }
 0x138   :  { %v2220_v16 = vpop.permute.xlu1 %2219  ;;  %v11108_v55 = vpop.permute.xlu0 %2223 }
 0x139   :  { %v2259_v18 = vsel %vm2257_vm8, %v2222_v10, %v11108_v55  ;;  %v2258_v19 = vsel %vm2257_vm8, %v2220_v16, %v2222_v10 }
 0x13a   :  { %1316 = vrot.lane.b32.xlu1 %v11005_v28, %s15960_s30  ;;  %266 = vrot.lane.b32.xlu0 %v10873_v27, %s15959_s29 }
 0x13b   :  { %3652 = vmatprep.subr.mxu0 %v2259_v18 }
 0x13c   :  { %3653 = vmatpush2.msra.mxu0 %v2258_v19  ;;  %v11117_v20 = vpop.permute.xlu1 %2092  ;;  %v2091_v23 = vpop.permute.xlu0 %2090 }
 0x13d   :  { %v2128_v4 = vsel %vm2126_vm7, %v2091_v23, %v11117_v20 }
 0x13e   :  { %133 = vrot.lane.b32.xlu1 %v10847_v17, %s15961_s24  ;;  %1318 = vrot.lane.b32.xlu0 %v11021_v63, %s15960_s30 }
 0x13f   :  { %3654 = vmatprep.subr.mxu0 %v2128_v4 }
 0x140   :  { %v11125_v26 = vpop.permute.xlu1 %3046  ;;  %v3045_v30 = vpop.permute.xlu0 %3044 }
 0x141   :  { %v3079_v32 = vsel %vm554_vm12, %v3045_v30, %v11125_v26  ;;  %v3078_v33 = vsel %vm554_vm12, %v10960_v41, %v3045_v30 }
 0x142   :  { %1185 = vrot.lane.b32.xlu1 %v11005_v28, %s15953_s26  ;;  %135 = vrot.lane.b32.xlu0 %v10873_v27, %s15961_s24 }
 0x143   :  { %3709 = vmatprep.subr.mxu1 %v3079_v32 }
 0x144   :  { %3710 = vmatpush2.msra.mxu1 %v3078_v33  ;;  %v1968_v34 = vpop.permute.xlu1 %1967  ;;  %v2089_v36 = vpop.permute.xlu0 %2088 }
 0x145   :  { %v2127_v38 = vsel %vm2126_vm7, %v2089_v36, %v2091_v23  ;;  %v2000_v43 = vsel %vm1995_vm0, %v10778_v48, %v1968_v34 }
 0x146   :  { %1054 = vrot.lane.b32.xlu1 %v11005_v28, %s15955_s16  ;;  %1187 = vrot.lane.b32.xlu0 %v11021_v63, %s15953_s26 }
 0x147   :  { %3655 = vmatpush2.msra.mxu0 %v2127_v38 }
 0x148   :  { %v2915_v41 = vpop.permute.xlu1 %2914  ;;  %v11145_v15 = vpop.permute.xlu0 %1969  ;;  %3657 = vmatmul.mubr.f32.vlgmr.msra.gmra.mxu0 %v11139_v40 }
 0x149   :  { %v2001_v42 = vsel %vm1995_vm0, %v1968_v34, %v11145_v15  ;;  %9819 = vmatprep.mubr.msk.f32.mxu0 %vm3588_vm11, %v10834_v14  ;;  %v2948_v31 = vsel %vm423_vm13, %v10979_v12, %v2915_v41 }
 0x14a   :  { %923 = vrot.lane.b32.xlu1 %v11005_v28, %s15956_s18  ;;  %1056 = vrot.lane.b32.xlu0 %v11021_v63, %s15955_s16 }
 0x14b   :  { %3734 = vmatprep.subr.mxu0 %v2001_v42 }
 0x14c   :  { %3735 = vmatpush1.msra.mxu0 %v2000_v43  ;;  %v1837_v44 = vpop.permute.xlu1 %1836  ;;  %v11158_v47 = vpop.permute.xlu0 %2916 }
 0x14d   :  { %v2949_v49 = vsel %vm423_vm13, %v2915_v41, %v11158_v47  ;;  %v1869_v56 = vsel %vm1864_vm1, %v10801_v58, %v1837_v44 }
 0x14e   :  { %3048 = vrot.lane.b32.xlu1 %v10873_v27, %s15907_s19  ;;  %925 = vrot.lane.b32.xlu0 %v11021_v63, %s15956_s18 }
 0x14f   :  { %3711 = vmatprep.subr.mxu1 %v2949_v49 }
 0x150   :  { %3712 = vmatpush2.msra.mxu1 %v2948_v31  ;;  %v2785_v52 = vpop.permute.xlu1 %2784  ;;  %v11168_v48 = vpop.permute.xlu0 %1838 }
 0x151   :  { %v1870_v53 = vsel %vm1864_vm1, %v1837_v44, %v11168_v48  ;;  %v2818_v60 = vsel %vm292_vm14, %v11007_v29, %v2785_v52 }
 0x152   :  { %792 = vrot.lane.b32.xlu1 %v11005_v28, %s15957_s25  ;;  %3050 = vrot.lane.b32.xlu0 %v11005_v28, %s15907_s19 }
 0x153   :  { %3736 = vmatprep.subr.mxu0 %v1870_v53 }
 0x154   :  { %3737 = vmatpush1.msra.mxu0 %v1869_v56  ;;  %v1706_v35 = vpop.permute.xlu1 %1705  ;;  %v11178_v12 = vpop.permute.xlu0 %2786 }
 0x155   :  { %v2819_v59 = vsel %vm292_vm14, %v2785_v52, %v11178_v12  ;;  %v1738_v62 = vsel %vm1733_vm2, %v10820_v7, %v1706_v35 }
 0x156   :  { %2918 = vrot.lane.b32.xlu1 %v10873_v27, %s15905_s27  ;;  %794 = vrot.lane.b32.xlu0 %v11021_v63, %s15957_s25 }
 0x157   :  { %3713 = vmatprep.subr.mxu1 %v2819_v59 }
 0x158   :  { %3714 = vmatpush2.msra.mxu1 %v2818_v60  ;;  %v2655_v61 = vpop.permute.xlu1 %2654  ;;  %v11188_v58 = vpop.permute.xlu0 %1707 }
 0x159   :  { %v1739_v25 = vsel %vm1733_vm2, %v1706_v35, %v11188_v58  ;;  %v2688_v7 = vsel %vm161_vm15, %v11031_v37, %v2655_v61 }
 0x15a   :  { %661 = vrot.lane.b32.xlu1 %v11005_v28, %s15958_s17  ;;  %2920 = vrot.lane.b32.xlu0 %v11005_v28, %s15905_s27 }
 0x15b   :  { %3738 = vmatprep.subr.mxu0 %v1739_v25 }
 0x15c   :  { %3739 = vmatpush1.msra.mxu0 %v1738_v62  ;;  %v1575_v5 = vpop.permute.xlu1 %1574  ;;  %v11198_v29 = vpop.permute.xlu0 %2656 }
 0x15d   :  { %v2689_v45 = vsel %vm161_vm15, %v2655_v61, %v11198_v29  ;;  %v1607_v16 = vsel %vm1602_vm3, %v10857_v2, %v1575_v5 }
 0x15e   :  { %2788 = vrot.lane.b32.xlu1 %v10873_v27, %s15959_s29  ;;  %663 = vrot.lane.b32.xlu0 %v11021_v63, %s15958_s17 }
 0x15f   :  { %3715 = vmatprep.subr.mxu1 %v2689_v45 }
 0x160   :  { %3716 = vmatpush2.msra.mxu1 %v2688_v7  ;;  %v1444_v10 = vpop.permute.xlu1 %1443  ;;  %v11213_v11 = vpop.permute.xlu0 %1576 }
 0x161   :  { %v1608_v13 = vsel %vm1602_vm3, %v1575_v5, %v11213_v11  ;;  %3717 = vmatprep.subr.mxu1 %v11209_v46  ;;  %v1476_v23 = vsel %vm1471_vm4, %v10881_v21, %v1444_v10 }
 0x162   :  { %530 = vrot.lane.b32.xlu1 %v11005_v28, %s15907_s19  ;;  %2790 = vrot.lane.b32.xlu0 %v11005_v28, %s15959_s29 }
 0x163   :  { %3740 = vmatprep.subr.mxu0 %v1608_v13  ;;  %3718 = vmatpush2.msra.mxu1 %v11092_v6 }
 0x164   :  { %3741 = vmatpush1.msra.mxu0 %v1607_v16  ;;  %v2488_v37 = vpop.permute.xlu1 %2487  ;;  %v11225_v18 = vpop.permute.xlu0 %1445 }
 0x165   :  { %v1477_v19 = vsel %vm1471_vm4, %v1444_v10, %v11225_v18  ;;  %v2522_v30 = vsel %vm15898_vm10, %v11070_v24, %v2488_v37 }
 0x166   :  { %2658 = vrot.lane.b32.xlu1 %v10873_v27, %s15961_s24  ;;  %532 = vrot.lane.b32.xlu0 %v11021_v63, %s15907_s19 }
 0x167   :  { %3742 = vmatprep.subr.mxu0 %v1477_v19 }
 0x168   :  { %3743 = vmatpush1.msra.mxu0 %v1476_v23  ;;  %v1313_v2 = vpop.permute.xlu1 %1312  ;;  %v11235_v6 = vpop.permute.xlu0 %2489 }
 0x169   :  { %v2523_v4 = vsel %vm15898_vm10, %v2488_v37, %v11235_v6  ;;  %v1345_v34 = vsel %vm15913_vm5, %v10904_v39, %v1313_v2 }
 0x16a   :  { %399 = vrot.lane.b32.xlu1 %v11005_v28, %s15905_s27  ;;  %2660 = vrot.lane.b32.xlu0 %v11005_v28, %s15961_s24 }
 0x16b   :  { %3719 = vmatprep.subr.mxu1 %v2523_v4 }
 0x16c   :  { %3720 = vmatpush2.msra.mxu1 %v2522_v30  ;;  %v2357_v32 = vpop.permute.xlu1 %2356  ;;  %v11245_v21 = vpop.permute.xlu0 %1314 }
 0x16d   :  { %v1346_v33 = vsel %vm15913_vm5, %v1313_v2, %v11245_v21  ;;  %v2391_v41 = vsel %vm15897_vm9, %v11094_v8, %v2357_v32 }
 0x16e   :  { %268 = vrot.lane.b32.xlu1 %v11005_v28, %s15959_s29  ;;  %401 = vrot.lane.b32.xlu0 %v11021_v63, %s15905_s27  ;;  %s15969_s27 = smov 32  }
 0x16f   :  { %3744 = vmatprep.subr.mxu0 %v1346_v33 }
 0x170   :  { %3745 = vmatpush1.msra.mxu0 %v1345_v34  ;;  %v1182_v36 = vpop.permute.xlu1 %1181  ;;  %v11255_v24 = vpop.permute.xlu0 %2358 }
 0x171   :  { %v2392_v38 = vsel %vm15897_vm9, %v2357_v32, %v11255_v24  ;;  %v1214_v44 = vsel %vm15909_vm6, %v10923_v50, %v1182_v36  ;;  %vm15964_vm9 = vcmask 760832  }
 0x172   :  { %2491 = vrot.lane.b32.xlu1 %v10847_v17, %s15962_s23  ;;  %270 = vrot.lane.b32.xlu0 %v11021_v63, %s15959_s29  ;;  %vm15965_vm10 = vmmov %vm15964_vm9 }
 0x173   :  { %3721 = vmatprep.subr.mxu1 %v2392_v38 }
 0x174   :  { %3722 = vmatpush2.msra.mxu1 %v2391_v41  ;;  %v2226_v42 = vpop.permute.xlu1 %2225  ;;  %v11265_v39 = vpop.permute.xlu0 %1183 }
 0x175   :  { %v1215_v43 = vsel %vm15909_vm6, %v1182_v36, %v11265_v39  ;;  %v2260_v52 = vsel %vm2257_vm8, %v11108_v55, %v2226_v42 }
 0x176   :  { %137 = vrot.lane.b32.xlu1 %v11005_v28, %s15961_s24  ;;  %2493 = vrot.lane.b32.xlu0 %v10873_v27, %s15962_s23 }
 0x177   :  { %3746 = vmatprep.subr.mxu0 %v1215_v43 }
 0x178   :  { %3747 = vmatpush1.msra.mxu0 %v1214_v44  ;;  %v1051_v49 = vpop.permute.xlu1 %1050  ;;  %v11275_v8 = vpop.permute.xlu0 %2227 }
 0x179   :  { %v2261_v31 = vsel %vm2257_vm8, %v2226_v42, %v11275_v8  ;;  %v1083_v35 = vsel %vm15965_vm10, %v10939_v57, %v1051_v49 }
 0x17a   :  { %2360 = vrot.lane.b32.xlu1 %v10847_v17, %s15963_s28  ;;  %139 = vrot.lane.b32.xlu0 %v11021_v63, %s15961_s24 }
 0x17b   :  { %3723 = vmatprep.subr.mxu1 %v2261_v31 }
 0x17c   :  { %3724 = vmatpush2.msra.mxu1 %v2260_v52  ;;  %v2095_v53 = vpop.permute.xlu1 %2094  ;;  %v11285_v50 = vpop.permute.xlu0 %1052 }
 0x17d   :  { %v1084_v56 = vsel %vm15964_vm9, %v1051_v49, %v11285_v50  ;;  %v2129_v61 = vsel %vm2126_vm7, %v11117_v20, %v2095_v53  ;;  %vm15967_vm9 = vcmask 769024   ;;  %v11319_v20 = vld [vmem:[%s15850_s0 + $0x48] sm:$0xff] }
 0x17e   :  { %2229 = vrot.lane.b32.xlu1 %v10847_v17, %s15954_s15  ;;  %2362 = vrot.lane.b32.xlu0 %v10873_v27, %s15963_s28  ;;  %vm15968_vm10 = vmmov %vm15967_vm9 }
 0x17f   :  { %3748 = vmatprep.subr.mxu0 %v1084_v56 }
 0x180   :  { %3749 = vmatpush1.msra.mxu0 %v1083_v35  ;;  %v920_v59 = vpop.permute.xlu1 %919  ;;  %v11295_v55 = vpop.permute.xlu0 %2096 }
 0x181   :  { %v2130_v60 = vsel %vm2126_vm7, %v2095_v53, %v11295_v55 }
 0x182   :  { %2098 = vrot.lane.b32.xlu1 %v10847_v17, %s15966_s22  ;;  %2231 = vrot.lane.b32.xlu0 %v10873_v27, %s15954_s15  ;;  %v952_v17 = vsel %vm15968_vm10, %v10950_v0, %v920_v59 }
 0x183   :  { %3725 = vmatprep.subr.mxu1 %v2130_v60 }
 0x184   :  { %3726 = vmatpush2.msra.mxu1 %v2129_v61  ;;  %v1972_v25 = vpop.permute.xlu1 %1971  ;;  %v11305_v57 = vpop.permute.xlu0 %921 }
 0x185   :  { %v953_v62 = vsel %vm15967_vm9, %v920_v59, %v11305_v57  ;;  %3728 = vmatmul.mubr.f32.vlgmr.msra.gmra.mxu1 %v11139_v40  ;;  %vm15970_vm9 = vcmask 777216  }
 0x186   :  { %3052 = vrot.lane.b32.xlu1 %v11021_v63, %s15907_s19  ;;  %2100 = vrot.lane.b32.xlu0 %v10873_v27, %s15966_s22  ;;  %v2002_v27 = vsel %vm1995_vm0, %v11145_v15, %v1972_v25  ;;  %vm15972_vm10 = vmmov %vm15970_vm9 }
 0x187   :  { %3750 = vmatprep.subr.mxu0 %v953_v62  ;;  %9820 = vmatprep.mubr.msk.f32.mxu1 %vm3588_vm11, %v10834_v14  ;;  %v11336_v14 = vld [vmem:[%s15850_s0 + $0x50] sm:$0xff] }
 0x188   :  { %3751 = vmatpush1.msra.mxu0 %v952_v17  ;;  %v789_v5 = vpop.permute.xlu1 %788  ;;  %v11323_v45 = vpop.permute.xlu0 %1973 }
 0x189   :  { %v2003_v7 = vsel %vm1995_vm0, %v1972_v25, %v11323_v45  ;;  %v821_v15 = vsel %vm15972_vm10, %v10969_v9, %v789_v5 }
 0x18a   :  { %1975 = vrot.lane.b32.xlu1 %v11319_v20, %s15969_s27  ;;  %3054 = vrot.lane.b32.xlu0 %v11319_v20, %s15907_s19  ;;  %s15977_s19 = smov 62  }
 0x18b   :  { %3805 = vmatprep.subr.mxu1 %v2003_v7 }
 0x18c   :  { %3806 = vmatpush1.msra.mxu1 %v2002_v27  ;;  %v1841_v0 = vpop.permute.xlu1 %1840  ;;  %v11338_v10 = vpop.permute.xlu0 %790  ;;  %v11449_v27 = vld [vmem:[%s15850_s0 + $0x28] sm:$0xff] }
 0x18d   :  { %v822_v13 = vsel %vm15970_vm9, %v789_v5, %v11338_v10  ;;  %v1871_v23 = vsel %vm1864_vm1, %v11168_v48, %v1841_v0  ;;  %vm15974_vm9 = vcmask 785408  }
 0x18e   :  { %2922 = vrot.lane.b32.xlu1 %v11021_v63, %s15971_s14  ;;  %1977 = vrot.lane.b32.xlu0 %v11336_v14, %s15969_s27  ;;  %vm15975_vm10 = vmmov %vm15974_vm9 }
 0x18f   :  { %3752 = vmatprep.subr.mxu0 %v822_v13 }
 0x190   :  { %3753 = vmatpush1.msra.mxu0 %v821_v15  ;;  %v658_v16 = vpop.permute.xlu1 %657  ;;  %v11348_v37 = vpop.permute.xlu0 %1842 }
 0x191   :  { %v1872_v19 = vsel %vm1864_vm1, %v1841_v0, %v11348_v37  ;;  %v690_v30 = vsel %vm15975_vm10, %v10992_v22, %v658_v16 }
 0x192   :  { %1844 = vrot.lane.b32.xlu1 %v11319_v20, %s15973_s20  ;;  %2924 = vrot.lane.b32.xlu0 %v11319_v20, %s15971_s14 }
 0x193   :  { %3807 = vmatprep.subr.mxu1 %v1872_v19 }
 0x194   :  { %3808 = vmatpush1.msra.mxu1 %v1871_v23  ;;  %v1710_v2 = vpop.permute.xlu1 %1709  ;;  %v11358_v9 = vpop.permute.xlu0 %659 }
 0x195   :  { %v691_v4 = vsel %vm15974_vm9, %v658_v16, %v11358_v9  ;;  %v1740_v34 = vsel %vm1733_vm2, %v11188_v58, %v1710_v2  ;;  %vm15979_vm9 = vcmask 760832  }
 0x196   :  { %2792 = vrot.lane.b32.xlu1 %v11021_v63, %s15959_s29  ;;  %1846 = vrot.lane.b32.xlu0 %v11336_v14, %s15973_s20  ;;  %vm15980_vm10 = vmmov %vm15979_vm9 }
 0x197   :  { %3754 = vmatprep.subr.mxu0 %v691_v4 }
 0x198   :  { %3755 = vmatpush1.msra.mxu0 %v690_v30  ;;  %v527_v32 = vpop.permute.xlu1 %526  ;;  %v11368_v48 = vpop.permute.xlu0 %1711 }
 0x199   :  { %v1741_v33 = vsel %vm1733_vm2, %v1710_v2, %v11368_v48  ;;  %v559_v41 = vsel %vm554_vm12, %v11016_v3, %v527_v32 }
 0x19a   :  { %1713 = vrot.lane.b32.xlu1 %v11319_v20, %s15976_s21  ;;  %2794 = vrot.lane.b32.xlu0 %v11319_v20, %s15959_s29 }
 0x19b   :  { %3809 = vmatprep.subr.mxu1 %v1741_v33 }
 0x19c   :  { %3810 = vmatpush1.msra.mxu1 %v1740_v34  ;;  %v1579_v36 = vpop.permute.xlu1 %1578  ;;  %v11378_v22 = vpop.permute.xlu0 %528 }
 0x19d   :  { %v560_v38 = vsel %vm554_vm12, %v527_v32, %v11378_v22  ;;  %v1609_v44 = vsel %vm1602_vm3, %v11213_v11, %v1579_v36 }
 0x19e   :  { %2662 = vrot.lane.b32.xlu1 %v11021_v63, %s15961_s24  ;;  %1715 = vrot.lane.b32.xlu0 %v11336_v14, %s15976_s21 }
 0x19f   :  { %3756 = vmatprep.subr.mxu0 %v560_v38 }
 0x1a0   :  { %3757 = vmatpush1.msra.mxu0 %v559_v41  ;;  %v396_v42 = vpop.permute.xlu1 %395  ;;  %v11388_v58 = vpop.permute.xlu0 %1580 }
 0x1a1   :  { %v1610_v43 = vsel %vm1602_vm3, %v1579_v36, %v11388_v58  ;;  %v428_v52 = vsel %vm423_vm13, %v11050_v51, %v396_v42 }
 0x1a2   :  { %1582 = vrot.lane.b32.xlu1 %v11319_v20, %s15977_s19  ;;  %2664 = vrot.lane.b32.xlu0 %v11319_v20, %s15961_s24 }
 0x1a3   :  { %3811 = vmatprep.subr.mxu1 %v1610_v43 }
 0x1a4   :  { %3812 = vmatpush1.msra.mxu1 %v1609_v44  ;;  %v1448_v49 = vpop.permute.xlu1 %1447  ;;  %v11398_v3 = vpop.permute.xlu0 %397 }
 0x1a5   :  { %v429_v31 = vsel %vm423_vm13, %v396_v42, %v11398_v3  ;;  %v1478_v35 = vsel %vm1471_vm4, %v11225_v18, %v1448_v49 }
 0x1a6   :  { %1451 = vrot.lane.b32.xlu1 %v11319_v20, %s15978_s13  ;;  %1584 = vrot.lane.b32.xlu0 %v11336_v14, %s15977_s19 }
 0x1a7   :  { %3758 = vmatprep.subr.mxu0 %v429_v31 }
 0x1a8   :  { %3759 = vmatpush1.msra.mxu0 %v428_v52  ;;  %v265_v53 = vpop.permute.xlu1 %264  ;;  %v11408_v11 = vpop.permute.xlu0 %1449 }
 0x1a9   :  { %v1479_v56 = vsel %vm1471_vm4, %v1448_v49, %v11408_v11  ;;  %v297_v61 = vsel %vm292_vm14, %v11060_v54, %v265_v53 }
 0x1aa   :  { %2495 = vrot.lane.b32.xlu1 %v11005_v28, %s15962_s23  ;;  %1453 = vrot.lane.b32.xlu0 %v11336_v14, %s15978_s13 }
 0x1ab   :  { %3813 = vmatprep.subr.mxu1 %v1479_v56 }
 0x1ac   :  { %3814 = vmatpush1.msra.mxu1 %v1478_v35  ;;  %v1317_v59 = vpop.permute.xlu1 %1316  ;;  %v11418_v51 = vpop.permute.xlu0 %266 }
 0x1ad   :  { %v298_v60 = vsel %vm292_vm14, %v265_v53, %v11418_v51  ;;  %v1347_v17 = vsel %vm15913_vm5, %v11245_v21, %v1317_v59 }
 0x1ae   :  { %1320 = vrot.lane.b32.xlu1 %v11319_v20, %s15960_s30  ;;  %2497 = vrot.lane.b32.xlu0 %v11021_v63, %s15962_s23 }
 0x1af   :  { %3760 = vmatprep.subr.mxu0 %v298_v60 }
 0x1b0   :  { %3761 = vmatpush1.msra.mxu0 %v297_v61  ;;  %v134_v25 = vpop.permute.xlu1 %133  ;;  %v11428_v18 = vpop.permute.xlu0 %1318 }
 0x1b1   :  { %v1348_v62 = vsel %vm15913_vm5, %v1317_v59, %v11428_v18  ;;  %v166_v21 = vsel %vm161_vm15, %v11079_v1, %v134_v25 }
 0x1b2   :  { %2364 = vrot.lane.b32.xlu1 %v11005_v28, %s15963_s28  ;;  %1322 = vrot.lane.b32.xlu0 %v11336_v14, %s15960_s30 }
 0x1b3   :  { %3815 = vmatprep.subr.mxu1 %v1348_v62 }
 0x1b4   :  { %3816 = vmatpush1.msra.mxu1 %v1347_v17  ;;  %v1186_v5 = vpop.permute.xlu1 %1185  ;;  %v11438_v54 = vpop.permute.xlu0 %135  ;;  %v2579_v17 = vld [vmem:[%s15850_s0 + $0x30] sm:$0xff] }
 0x1b5   :  { %v167_v7 = vsel %vm161_vm15, %v134_v25, %v11438_v54  ;;  %v1216_v16 = vsel %vm15909_vm6, %v11265_v39, %v1186_v5 }
 0x1b6   :  { %1189 = vrot.lane.b32.xlu1 %v11319_v20, %s15953_s26  ;;  %2366 = vrot.lane.b32.xlu0 %v11021_v63, %s15963_s28 }
 0x1b7   :  { %3762 = vmatprep.subr.mxu0 %v167_v7 }
 0x1b8   :  { %3763 = vmatpush1.msra.mxu0 %v166_v21  ;;  %v1055_v0 = vpop.permute.xlu1 %1054  ;;  %v11453_v13 = vpop.permute.xlu0 %1187 }
 0x1b9   :  { %v1217_v15 = vsel %vm15909_vm6, %v1186_v5, %v11453_v13  ;;  %3764 = vmatprep.subr.mxu0 %v11449_v27  ;;  %v1085_v2 = vsel %vm15980_vm10, %v11285_v50, %v1055_v0  ;;  %vm15981_vm6 = vcmask 769024  }
 0x1ba   :  { %2233 = vrot.lane.b32.xlu1 %v11005_v28, %s15954_s15  ;;  %1191 = vrot.lane.b32.xlu0 %v11336_v14, %s15953_s26 }
 0x1bb   :  { %3817 = vmatprep.subr.mxu1 %v1217_v15  ;;  %3765 = vmatpush1.msra.mxu0 %v11209_v46 }
 0x1bc   :  { %3818 = vmatpush1.msra.mxu1 %v1216_v16  ;;  %v924_v1 = vpop.permute.xlu1 %923  ;;  %v11465_v19 = vpop.permute.xlu0 %1056 }
 0x1bd   :  { %v1086_v23 = vsel %vm15979_vm9, %v1055_v0, %v11465_v19  ;;  %vm15982_vm9 = vmmov %vm15981_vm6 }
 0x1be   :  { %1058 = vrot.lane.b32.xlu1 %v11319_v20, %s15955_s16  ;;  %2235 = vrot.lane.b32.xlu0 %v11021_v63, %s15954_s15  ;;  %v954_v30 = vsel %vm15982_vm9, %v11305_v57, %v924_v1  ;;  %v11498_v57 = vld [vmem:[%s15850_s0 + $0x58] sm:$0xff]  ;;  %vm15985_vm9 = vcmask 785408  }
 0x1bf   :  { %3819 = vmatprep.subr.mxu1 %v1086_v23 }
 0x1c0   :  { %3820 = vmatpush1.msra.mxu1 %v1085_v2  ;;  %v3049_v39 = vpop.permute.xlu1 %3048  ;;  %v11475_v46 = vpop.permute.xlu0 %925 }
 0x1c1   :  { %v955_v4 = vsel %vm15981_vm6, %v924_v1, %v11475_v46  ;;  %vm15983_vm6 = vcmask 777216  }
 0x1c2   :  { %2102 = vrot.lane.b32.xlu1 %v11005_v28, %s15966_s22  ;;  %1060 = vrot.lane.b32.xlu0 %v11336_v14, %s15955_s16  ;;  %v3080_v28 = vsel %vm554_vm12, %v11125_v26, %v3049_v39  ;;  %vm15984_vm10 = vmmov %vm15983_vm6  ;;  %v11513_v26 = vld [vmem:[%s15850_s0 + $0x60] sm:$0xff] }
 0x1c3   :  { %3821 = vmatprep.subr.mxu1 %v955_v4 }
 0x1c4   :  { %3822 = vmatpush1.msra.mxu1 %v954_v30  ;;  %v793_v32 = vpop.permute.xlu1 %792  ;;  %v11485_v50 = vpop.permute.xlu0 %3050  ;;  %v11610_v30 = vld [vmem:[%s15850_s0 + $0x38] sm:$0xff] }
 0x1c5   :  { %v3081_v33 = vsel %vm554_vm12, %v3049_v39, %v11485_v50 }
 0x1c6   :  { %927 = vrot.lane.b32.xlu1 %v11319_v20, %s15956_s18  ;;  %2104 = vrot.lane.b32.xlu0 %v11021_v63, %s15966_s22  ;;  %v823_v63 = vsel %vm15984_vm10, %v11338_v10, %v793_v32  ;;  %vm15988_vm10 = vcmask 228352  }
 0x1c7   :  { %3780 = vmatprep.subr.mxu0 %v3081_v33 }
 0x1c8   :  { %3781 = vmatpush2.msra.mxu0 %v3080_v28  ;;  %v2919_v34 = vpop.permute.xlu1 %2918  ;;  %v11500_v36 = vpop.permute.xlu0 %794 }
 0x1c9   :  { %v824_v38 = vsel %vm15983_vm6, %v793_v32, %v11500_v36  ;;  %v2950_v10 = vsel %vm423_vm13, %v11158_v47, %v2919_v34  ;;  %vm15986_vm6 = vmmov %vm15985_vm9 }
 0x1ca   :  { %1979 = vrot.lane.b32.xlu1 %v11498_v57, %s15969_s27  ;;  %929 = vrot.lane.b32.xlu0 %v11336_v14, %s15956_s18 }
 0x1cb   :  { %3823 = vmatprep.subr.mxu1 %v824_v38 }
 0x1cc   :  { %3824 = vmatpush1.msra.mxu1 %v823_v63  ;;  %v662_v41 = vpop.permute.xlu1 %661  ;;  %v11515_v42 = vpop.permute.xlu0 %2920 }
 0x1cd   :  { %v2951_v43 = vsel %vm423_vm13, %v2919_v34, %v11515_v42  ;;  %v692_v52 = vsel %vm15986_vm6, %v11358_v9, %v662_v41  ;;  %vm15990_vm6 = vcmask 236544  }
 0x1ce   :  { %796 = vrot.lane.b32.xlu1 %v11319_v20, %s15957_s25  ;;  %1981 = vrot.lane.b32.xlu0 %v11513_v26, %s15969_s27 }
 0x1cf   :  { %3782 = vmatprep.subr.mxu0 %v2951_v43 }
 0x1d0   :  { %3783 = vmatpush2.msra.mxu0 %v2950_v10  ;;  %v2789_v44 = vpop.permute.xlu1 %2788  ;;  %v11525_v49 = vpop.permute.xlu0 %663 }
 0x1d1   :  { %v693_v31 = vsel %vm15985_vm9, %v662_v41, %v11525_v49  ;;  %v2820_v35 = vsel %vm292_vm14, %v11178_v12, %v2789_v44  ;;  %vm15989_vm9 = vmmov %vm15988_vm10 }
 0x1d2   :  { %1848 = vrot.lane.b32.xlu1 %v11498_v57, %s15973_s20  ;;  %798 = vrot.lane.b32.xlu0 %v11336_v14, %s15957_s25 }
 0x1d3   :  { %3825 = vmatprep.subr.mxu1 %v693_v31 }
 0x1d4   :  { %3826 = vmatpush1.msra.mxu1 %v692_v52  ;;  %v531_v53 = vpop.permute.xlu1 %530  ;;  %v11535_v47 = vpop.permute.xlu0 %2790 }
 0x1d5   :  { %v2821_v56 = vsel %vm292_vm14, %v2789_v44, %v11535_v47  ;;  %v561_v61 = vsel %vm554_vm12, %v11378_v22, %v531_v53 }
 0x1d6   :  { %665 = vrot.lane.b32.xlu1 %v11319_v20, %s15958_s17  ;;  %1850 = vrot.lane.b32.xlu0 %v11513_v26, %s15973_s20 }
 0x1d7   :  { %3784 = vmatprep.subr.mxu0 %v2821_v56 }
 0x1d8   :  { %3785 = vmatpush2.msra.mxu0 %v2820_v35  ;;  %v2659_v59 = vpop.permute.xlu1 %2658  ;;  %v11545_v9 = vpop.permute.xlu0 %532 }
 0x1d9   :  { %v562_v60 = vsel %vm554_vm12, %v531_v53, %v11545_v9  ;;  %v2690_v22 = vsel %vm161_vm15, %v11198_v29, %v2659_v59 }
 0x1da   :  { %1717 = vrot.lane.b32.xlu1 %v11498_v57, %s15976_s21  ;;  %667 = vrot.lane.b32.xlu0 %v11336_v14, %s15958_s17 }
 0x1db   :  { %3827 = vmatprep.subr.mxu1 %v562_v60 }
 0x1dc   :  { %3828 = vmatpush1.msra.mxu1 %v561_v61  ;;  %v400_v25 = vpop.permute.xlu1 %399  ;;  %v11555_v12 = vpop.permute.xlu0 %2660 }
 0x1dd   :  { %v2691_v62 = vsel %vm161_vm15, %v2659_v59, %v11555_v12  ;;  %v430_v0 = vsel %vm423_vm13, %v11398_v3, %v400_v25 }
 0x1de   :  { %534 = vrot.lane.b32.xlu1 %v11319_v20, %s15987_s9  ;;  %1719 = vrot.lane.b32.xlu0 %v11513_v26, %s15976_s21 }
 0x1df   :  { %3786 = vmatprep.subr.mxu0 %v2691_v62 }
 0x1e0   :  { %3787 = vmatpush2.msra.mxu0 %v2690_v22  ;;  %v269_v5 = vpop.permute.xlu1 %268  ;;  %v11568_v7 = vpop.permute.xlu0 %401 }
 0x1e1   :  { %v431_v21 = vsel %vm423_vm13, %v400_v25, %v11568_v7  ;;  %3788 = vmatprep.subr.mxu0 %v2579_v17  ;;  %v299_v1 = vsel %vm292_vm14, %v11418_v51, %v269_v5 }
 0x1e2   :  { %1586 = vrot.lane.b32.xlu1 %v11498_v57, %s15977_s19  ;;  %536 = vrot.lane.b32.xlu0 %v11336_v14, %s15987_s9 }
 0x1e3   :  { %3829 = vmatprep.subr.mxu1 %v431_v21  ;;  %3789 = vmatpush2.msra.mxu0 %v11449_v27 }
 0x1e4   :  { %3830 = vmatpush1.msra.mxu1 %v430_v0  ;;  %v2492_v29 = vpop.permute.xlu1 %2491  ;;  %v11579_v15 = vpop.permute.xlu0 %270 }
 0x1e5   :  { %v300_v16 = vsel %vm292_vm14, %v269_v5, %v11579_v15  ;;  %v2524_v2 = vsel %vm15989_vm9, %v11235_v6, %v2492_v29 }
 0x1e6   :  { %403 = vrot.lane.b32.xlu1 %v11319_v20, %s15971_s14  ;;  %1588 = vrot.lane.b32.xlu0 %v11513_v26, %s15977_s19 }
 0x1e7   :  { %3831 = vmatprep.subr.mxu1 %v300_v16 }
 0x1e8   :  { %3832 = vmatpush1.msra.mxu1 %v299_v1  ;;  %v138_v3 = vpop.permute.xlu1 %137  ;;  %v11589_v27 = vpop.permute.xlu0 %2493 }
 0x1e9   :  { %v2525_v23 = vsel %vm15988_vm10, %v2492_v29, %v11589_v27  ;;  %v168_v6 = vsel %vm161_vm15, %v11438_v54, %v138_v3  ;;  %vm15991_vm10 = vmmov %vm15990_vm6 }
 0x1ea   :  { %1455 = vrot.lane.b32.xlu1 %v11498_v57, %s15978_s13  ;;  %405 = vrot.lane.b32.xlu0 %v11336_v14, %s15971_s14 }
 0x1eb   :  { %3790 = vmatprep.subr.mxu0 %v2525_v23 }
 0x1ec   :  { %3791 = vmatpush2.msra.mxu0 %v2524_v2  ;;  %v2361_v39 = vpop.permute.xlu1 %2360  ;;  %v11599_v51 = vpop.permute.xlu0 %139  ;;  %v11724_v2 = vld [vmem:[%s15850_s0 + $0x40] sm:$0xff] }
 0x1ed   :  { %v169_v4 = vsel %vm161_vm15, %v138_v3, %v11599_v51  ;;  %v2393_v34 = vsel %vm15991_vm10, %v11255_v24, %v2361_v39 }
 0x1ee   :  { %272 = vrot.lane.b32.xlu1 %v11319_v20, %s15959_s29  ;;  %1457 = vrot.lane.b32.xlu0 %v11513_v26, %s15978_s13 }
 0x1ef   :  { %3833 = vmatprep.subr.mxu1 %v169_v4 }
 0x1f0   :  { %3834 = vmatpush1.msra.mxu1 %v168_v6  ;;  %v2230_v32 = vpop.permute.xlu1 %2229  ;;  %v11614_v33 = vpop.permute.xlu0 %2362 }
 0x1f1   :  { %v2394_v28 = vsel %vm15990_vm6, %v2361_v39, %v11614_v33  ;;  %3835 = vmatprep.subr.mxu1 %v11610_v30  ;;  %v2262_v41 = vsel %vm2257_vm8, %v11275_v8, %v2230_v32  ;;  %vm15992_vm6 = vmmov %vm15989_vm9 }
 0x1f2   :  { %1324 = vrot.lane.b32.xlu1 %v11498_v57, %s15960_s30  ;;  %274 = vrot.lane.b32.xlu0 %v11336_v14, %s15959_s29 }
 0x1f3   :  { %3792 = vmatprep.subr.mxu0 %v2394_v28  ;;  %3836 = vmatpush1.msra.mxu1 %v2579_v17 }
 0x1f4   :  { %3793 = vmatpush2.msra.mxu0 %v2393_v34  ;;  %v2099_v54 = vpop.permute.xlu1 %2098  ;;  %v11625_v38 = vpop.permute.xlu0 %2231 }
 0x1f5   :  { %v2263_v63 = vsel %vm2257_vm8, %v2230_v32, %v11625_v38  ;;  %v2131_v44 = vsel %vm2126_vm7, %v11295_v55, %v2099_v54  ;;  %v11659_v55 = vld [vmem:[%s15851_s1 + $0x8] sm:$0xff] }
 0x1f6   :  { %141 = vrot.lane.b32.xlu1 %v11319_v20, %s15961_s24  ;;  %1326 = vrot.lane.b32.xlu0 %v11513_v26, %s15960_s30 }
 0x1f7   :  { %3794 = vmatprep.subr.mxu0 %v2263_v63 }
 0x1f8   :  { %3795 = vmatpush2.msra.mxu0 %v2262_v41  ;;  %v3053_v24 = vpop.permute.xlu1 %3052  ;;  %v11635_v43 = vpop.permute.xlu0 %2100 }
 0x1f9   :  { %v2132_v10 = vsel %vm2126_vm7, %v2099_v54, %v11635_v43  ;;  %v3082_v53 = vsel %vm554_vm12, %v11485_v50, %v3053_v24 }
 0x1fa   :  { %1193 = vrot.lane.b32.xlu1 %v11498_v57, %s15953_s26  ;;  %143 = vrot.lane.b32.xlu0 %v11336_v14, %s15961_s24 }
 0x1fb   :  { %3796 = vmatprep.subr.mxu0 %v2132_v10 }
 0x1fc   :  { %3797 = vmatpush2.msra.mxu0 %v2131_v44  ;;  %v1976_v31 = vpop.permute.xlu1 %1975  ;;  %v11645_v8 = vpop.permute.xlu0 %3054 }
 0x1fd   :  { %v3083_v52 = vsel %vm554_vm12, %v3053_v24, %v11645_v8  ;;  %3799 = vmatmul.mubr.f32.vlgmr.msra.gmra.mxu0 %v11139_v40  ;;  %v2004_v50 = vsel %vm1995_vm0, %v11323_v45, %v1976_v31 }
 0x1fe   :  { %1062 = vrot.lane.b32.xlu1 %v11498_v57, %s15955_s16  ;;  %1195 = vrot.lane.b32.xlu0 %v11513_v26, %s15953_s26 }
 0x1ff   :  { %3851 = vmatprep.subr.mxu1 %v3083_v52  ;;  %9821 = vmatprep.mubr.msk.f32.mxu0 %vm3588_vm11, %v11659_v55 }
 0x200   :  { %3852 = vmatpush2.msra.mxu1 %v3082_v53  ;;  %v2923_v40 = vpop.permute.xlu1 %2922  ;;  %v11663_v56 = vpop.permute.xlu0 %1977 }
 0x201   :  { %v2005_v35 = vsel %vm1995_vm0, %v1976_v31, %v11663_v56  ;;  %v2952_v25 = vsel %vm423_vm13, %v11515_v42, %v2923_v40 }
 0x202   :  { %931 = vrot.lane.b32.xlu1 %v11498_v57, %s15956_s18  ;;  %1064 = vrot.lane.b32.xlu0 %v11513_v26, %s15955_s16 }
 0x203   :  { %3876 = vmatprep.subr.mxu0 %v2005_v35 }
 0x204   :  { %3877 = vmatpush1.msra.mxu0 %v2004_v50  ;;  %v1845_v59 = vpop.permute.xlu1 %1844  ;;  %v11673_v60 = vpop.permute.xlu0 %2924 }
 0x205   :  { %v2953_v61 = vsel %vm423_vm13, %v2923_v40, %v11673_v60  ;;  %v1873_v22 = vsel %vm1864_vm1, %v11348_v37, %v1845_v59 }
 0x206   :  { %3056 = vrot.lane.b32.xlu1 %v11336_v14, %s15987_s9  ;;  %933 = vrot.lane.b32.xlu0 %v11513_v26, %s15956_s18 }
 0x207   :  { %3853 = vmatprep.subr.mxu1 %v2953_v61 }
 0x208   :  { %3854 = vmatpush2.msra.mxu1 %v2952_v25  ;;  %v2793_v62 = vpop.permute.xlu1 %2792  ;;  %v11683_v45 = vpop.permute.xlu0 %1846 }
 0x209   :  { %v1874_v17 = vsel %vm1864_vm1, %v1845_v59, %v11683_v45  ;;  %v2822_v0 = vsel %vm292_vm14, %v11535_v47, %v2793_v62 }
 0x20a   :  { %800 = vrot.lane.b32.xlu1 %v11498_v57, %s15957_s25  ;;  %3058 = vrot.lane.b32.xlu0 %v11498_v57, %s15987_s9 }
 0x20b   :  { %3878 = vmatprep.subr.mxu0 %v1874_v17 }
 0x20c   :  { %3879 = vmatpush1.msra.mxu0 %v1873_v22  ;;  %v1714_v5 = vpop.permute.xlu1 %1713  ;;  %v11693_v42 = vpop.permute.xlu0 %2794 }
 0x20d   :  { %v2823_v21 = vsel %vm292_vm14, %v2793_v62, %v11693_v42  ;;  %v1742_v1 = vsel %vm1733_vm2, %v11368_v48, %v1714_v5 }
 0x20e   :  { %2926 = vrot.lane.b32.xlu1 %v11336_v14, %s15971_s14  ;;  %802 = vrot.lane.b32.xlu0 %v11513_v26, %s15957_s25 }
 0x20f   :  { %3855 = vmatprep.subr.mxu1 %v2823_v21 }
 0x210   :  { %3856 = vmatpush2.msra.mxu1 %v2822_v0  ;;  %v2663_v29 = vpop.permute.xlu1 %2662  ;;  %v11703_v37 = vpop.permute.xlu0 %1715  ;;  %v15914_v0 = vmov 0  }
 0x211   :  { %v1743_v16 = vsel %vm1733_vm2, %v1714_v5, %v11703_v37  ;;  %v2692_v48 = vsel %vm161_vm15, %v11555_v12, %v2663_v29  ;;  %10187 = vset.pattern.permute.xlu1 %v15914_v0  ;;  %10188 = vset.pattern.permute.xlu0 %v15914_v0 }
 0x212   :  { %669 = vrot.lane.b32.xlu1 %v11498_v57, %s15958_s17  ;;  %2928 = vrot.lane.b32.xlu0 %v11498_v57, %s15971_s14 }
 0x213   :  { %3880 = vmatprep.subr.mxu0 %v1743_v16 }
 0x214   :  { %3881 = vmatpush1.msra.mxu0 %v1742_v1  ;;  %v1583_v3 = vpop.permute.xlu1 %1582  ;;  %v11713_v47 = vpop.permute.xlu0 %2664 }
 0x215   :  { %v2693_v23 = vsel %vm161_vm15, %v2663_v29, %v11713_v47  ;;  %v1611_v32 = vsel %vm1602_vm3, %v11388_v58, %v1583_v3 }
 0x216   :  { %2796 = vrot.lane.b32.xlu1 %v11336_v14, %s15959_s29  ;;  %671 = vrot.lane.b32.xlu0 %v11513_v26, %s15958_s17 }
 0x217   :  { %3857 = vmatprep.subr.mxu1 %v2693_v23 }
 0x218   :  { %3858 = vmatpush2.msra.mxu1 %v2692_v48  ;;  %v1452_v39 = vpop.permute.xlu1 %1451  ;;  %v11728_v4 = vpop.permute.xlu0 %1584 }
 0x219   :  { %v1612_v6 = vsel %vm1602_vm3, %v1583_v3, %v11728_v4  ;;  %3859 = vmatprep.subr.mxu1 %v11724_v2  ;;  %v1480_v54 = vsel %vm1471_vm4, %v11408_v11, %v1452_v39  ;;  %v11829_v3 = vld [vmem:[%s15851_s1] sm:$0xff] }
 0x21a   :  { %538 = vrot.lane.b32.xlu1 %v11498_v57, %s15987_s9  ;;  %2798 = vrot.lane.b32.xlu0 %v11498_v57, %s15959_s29 }
 0x21b   :  { %3882 = vmatprep.subr.mxu0 %v1612_v6  ;;  %3860 = vmatpush2.msra.mxu1 %v11610_v30 }
 0x21c   :  { %3883 = vmatpush1.msra.mxu0 %v1611_v32  ;;  %v2496_v12 = vpop.permute.xlu1 %2495  ;;  %v11740_v28 = vpop.permute.xlu0 %1453 }
 0x21d   :  { %v1481_v34 = vsel %vm1471_vm4, %v1452_v39, %v11740_v28  ;;  %v2526_v41 = vsel %vm15992_vm6, %v11589_v27, %v2496_v12  ;;  %vm15994_vm6 = vcmask 752640  }
 0x21e   :  { %2666 = vrot.lane.b32.xlu1 %v11336_v14, %s15961_s24  ;;  %540 = vrot.lane.b32.xlu0 %v11513_v26, %s15987_s9 }
 0x21f   :  { %3884 = vmatprep.subr.mxu0 %v1481_v34 }
 0x220   :  { %3885 = vmatpush1.msra.mxu0 %v1480_v54  ;;  %v1321_v58 = vpop.permute.xlu1 %1320  ;;  %v11750_v30 = vpop.permute.xlu0 %2497 }
 0x221   :  { %v2527_v63 = vsel %vm15989_vm9, %v2496_v12, %v11750_v30  ;;  %v1349_v44 = vsel %vm15913_vm5, %v11428_v18, %v1321_v58  ;;  %vm15993_vm9 = vmmov %vm15991_vm10 }
 0x222   :  { %407 = vrot.lane.b32.xlu1 %v11498_v57, %s15971_s14  ;;  %2668 = vrot.lane.b32.xlu0 %v11498_v57, %s15961_s24 }
 0x223   :  { %3861 = vmatprep.subr.mxu1 %v2527_v63 }
 0x224   :  { %3862 = vmatpush2.msra.mxu1 %v2526_v41  ;;  %v2365_v24 = vpop.permute.xlu1 %2364  ;;  %v11760_v11 = vpop.permute.xlu0 %1322 }
 0x225   :  { %v1350_v10 = vsel %vm15913_vm5, %v1321_v58, %v11760_v11  ;;  %v2395_v53 = vsel %vm15993_vm9, %v11614_v33, %v2365_v24  ;;  %vm15996_vm9 = vcmask 760832  }
 0x226   :  { %276 = vrot.lane.b32.xlu1 %v11498_v57, %s15959_s29  ;;  %409 = vrot.lane.b32.xlu0 %v11513_v26, %s15971_s14 }
 0x227   :  { %3886 = vmatprep.subr.mxu0 %v1350_v10 }
 0x228   :  { %3887 = vmatpush1.msra.mxu0 %v1349_v44  ;;  %v1190_v31 = vpop.permute.xlu1 %1189  ;;  %v11770_v27 = vpop.permute.xlu0 %2366 }
 0x229   :  { %v2396_v52 = vsel %vm15991_vm10, %v2365_v24, %v11770_v27  ;;  %vm15995_vm10 = vmmov %vm15994_vm6 }
 0x22a   :  { %2499 = vrot.lane.b32.xlu1 %v11319_v20, %s15962_s23  ;;  %278 = vrot.lane.b32.xlu0 %v11513_v26, %s15959_s29  ;;  %v1218_v50 = vsel %vm15995_vm10, %v11453_v13, %v1190_v31  ;;  %vm15998_vm10 = vcmask 769024  }
 0x22b   :  { %3863 = vmatprep.subr.mxu1 %v2396_v52 }
 0x22c   :  { %3864 = vmatpush2.msra.mxu1 %v2395_v53  ;;  %v2234_v40 = vpop.permute.xlu1 %2233  ;;  %v11780_v18 = vpop.permute.xlu0 %1191 }
 0x22d   :  { %v1219_v35 = vsel %vm15994_vm6, %v1190_v31, %v11780_v18  ;;  %v2264_v25 = vsel %vm2257_vm8, %v11625_v38, %v2234_v40  ;;  %vm15997_vm6 = vmmov %vm15996_vm9 }
 0x22e   :  { %145 = vrot.lane.b32.xlu1 %v11498_v57, %s15961_s24  ;;  %2501 = vrot.lane.b32.xlu0 %v11336_v14, %s15962_s23 }
 0x22f   :  { %3888 = vmatprep.subr.mxu0 %v1219_v35 }
 0x230   :  { %3889 = vmatpush1.msra.mxu0 %v1218_v50  ;;  %v1059_v59 = vpop.permute.xlu1 %1058  ;;  %v11790_v33 = vpop.permute.xlu0 %2235 }
 0x231   :  { %v2265_v61 = vsel %vm2257_vm8, %v2234_v40, %v11790_v33  ;;  %v1087_v22 = vsel %vm15997_vm6, %v11465_v19, %v1059_v59  ;;  %vm16000_vm6 = vcmask 777216  }
 0x232   :  { %2368 = vrot.lane.b32.xlu1 %v11319_v20, %s15963_s28  ;;  %147 = vrot.lane.b32.xlu0 %v11513_v26, %s15961_s24 }
 0x233   :  { %3865 = vmatprep.subr.mxu1 %v2265_v61 }
 0x234   :  { %3866 = vmatpush2.msra.mxu1 %v2264_v25  ;;  %v2103_v62 = vpop.permute.xlu1 %2102  ;;  %v11800_v13 = vpop.permute.xlu0 %1060 }
 0x235   :  { %v1088_v17 = vsel %vm15996_vm9, %v1059_v59, %v11800_v13  ;;  %v2133_v19 = vsel %vm2126_vm7, %v11635_v43, %v2103_v62  ;;  %vm15999_vm9 = vmmov %vm15998_vm10  ;;  %v11841_v43 = vld [vmem:[%s15850_s0 + $0x68] sm:$0xff] }
 0x236   :  { %2237 = vrot.lane.b32.xlu1 %v11319_v20, %s15954_s15  ;;  %2370 = vrot.lane.b32.xlu0 %v11336_v14, %s15963_s28 }
 0x237   :  { %3890 = vmatprep.subr.mxu0 %v1088_v17 }
 0x238   :  { %3891 = vmatpush1.msra.mxu0 %v1087_v22  ;;  %v928_v5 = vpop.permute.xlu1 %927  ;;  %v11810_v38 = vpop.permute.xlu0 %2104 }
 0x239   :  { %v2134_v21 = vsel %vm2126_vm7, %v2103_v62, %v11810_v38 }
 0x23a   :  { %2106 = vrot.lane.b32.xlu1 %v11319_v20, %s15966_s22  ;;  %2239 = vrot.lane.b32.xlu0 %v11336_v14, %s15954_s15  ;;  %v956_v20 = vsel %vm15999_vm9, %v11475_v46, %v928_v5  ;;  %v11858_v46 = vld [vmem:[%s15850_s0 + $0x70] sm:$0xff]  ;;  %vm16002_vm9 = vcmask 785408  }
 0x23b   :  { %3867 = vmatprep.subr.mxu1 %v2134_v21 }
 0x23c   :  { %3868 = vmatpush2.msra.mxu1 %v2133_v19  ;;  %v1980_v29 = vpop.permute.xlu1 %1979  ;;  %v11822_v16 = vpop.permute.xlu0 %929 }
 0x23d   :  { %v957_v1 = vsel %vm15998_vm10, %v928_v5, %v11822_v16  ;;  %3870 = vmatmul.mubr.f32.vlgmr.msra.gmra.mxu1 %v11829_v3  ;;  %vm16001_vm10 = vmmov %vm16000_vm6 }
 0x23e   :  { %3060 = vrot.lane.b32.xlu1 %v11513_v26, %s15987_s9  ;;  %2108 = vrot.lane.b32.xlu0 %v11336_v14, %s15966_s22  ;;  %v2006_v14 = vsel %vm1995_vm0, %v11663_v56, %v1980_v29 }
 0x23f   :  { %3892 = vmatprep.subr.mxu0 %v957_v1  ;;  %9822 = vmatprep.mubr.msk.f32.mxu1 %vm3588_vm11, %v11659_v55 }
 0x240   :  { %3893 = vmatpush1.msra.mxu0 %v956_v20  ;;  %v797_v23 = vpop.permute.xlu1 %796  ;;  %v11845_v48 = vpop.permute.xlu0 %1981 }
 0x241   :  { %v2007_v39 = vsel %vm1995_vm0, %v1980_v29, %v11845_v48  ;;  %v825_v56 = vsel %vm16001_vm10, %v11500_v36, %v797_v23  ;;  %vm16004_vm10 = vcmask 752640  }
 0x242   :  { %1983 = vrot.lane.b32.xlu1 %v11841_v43, %s15969_s27  ;;  %3062 = vrot.lane.b32.xlu0 %v11841_v43, %s15987_s9 }
 0x243   :  { %3947 = vmatprep.subr.mxu1 %v2007_v39 }
 0x244   :  { %3948 = vmatpush1.msra.mxu1 %v2006_v14  ;;  %v1849_v6 = vpop.permute.xlu1 %1848  ;;  %v11860_v32 = vpop.permute.xlu0 %798 }
 0x245   :  { %v826_v12 = vsel %vm16000_vm6, %v797_v23, %v11860_v32  ;;  %v1875_v63 = vsel %vm1864_vm1, %v11683_v45, %v1849_v6  ;;  %vm16003_vm6 = vmmov %vm16002_vm9 }
 0x246   :  { %2930 = vrot.lane.b32.xlu1 %v11513_v26, %s15971_s14  ;;  %1985 = vrot.lane.b32.xlu0 %v11858_v46, %s15969_s27 }
 0x247   :  { %3894 = vmatprep.subr.mxu0 %v826_v12  ;;  %v11971_v12 = vld [vmem:[%s15850_s0 + $0x48] sm:$0xff] }
 0x248   :  { %3895 = vmatpush1.msra.mxu0 %v825_v56  ;;  %v666_v34 = vpop.permute.xlu1 %665  ;;  %v11870_v54 = vpop.permute.xlu0 %1850 }
 0x249   :  { %v1876_v58 = vsel %vm1864_vm1, %v1849_v6, %v11870_v54  ;;  %v694_v10 = vsel %vm16003_vm6, %v11525_v49, %v666_v34  ;;  %vm16006_vm6 = vcmask 760832  }
 0x24a   :  { %1852 = vrot.lane.b32.xlu1 %v11841_v43, %s15973_s20  ;;  %2932 = vrot.lane.b32.xlu0 %v11841_v43, %s15971_s14 }
 0x24b   :  { %3949 = vmatprep.subr.mxu1 %v1876_v58 }
 0x24c   :  { %3950 = vmatpush1.msra.mxu1 %v1875_v63  ;;  %v1718_v41 = vpop.permute.xlu1 %1717  ;;  %v11880_v36 = vpop.permute.xlu0 %667 }
 0x24d   :  { %v695_v24 = vsel %vm16002_vm9, %v666_v34, %v11880_v36  ;;  %v1744_v52 = vsel %vm1733_vm2, %v11703_v37, %v1718_v41  ;;  %vm16005_vm9 = vmmov %vm16004_vm10 }
 0x24e   :  { %2800 = vrot.lane.b32.xlu1 %v11513_v26, %s15959_s29  ;;  %1854 = vrot.lane.b32.xlu0 %v11858_v46, %s15973_s20 }
 0x24f   :  { %3896 = vmatprep.subr.mxu0 %v695_v24 }
 0x250   :  { %3897 = vmatpush1.msra.mxu0 %v694_v10  ;;  %v535_v44 = vpop.permute.xlu1 %534  ;;  %v11890_v45 = vpop.permute.xlu0 %1719 }
 0x251   :  { %v1745_v31 = vsel %vm1733_vm2, %v1718_v41, %v11890_v45  ;;  %v563_v35 = vsel %vm554_vm12, %v11545_v9, %v535_v44 }
 0x252   :  { %1721 = vrot.lane.b32.xlu1 %v11841_v43, %s15976_s21  ;;  %2802 = vrot.lane.b32.xlu0 %v11841_v43, %s15959_s29 }
 0x253   :  { %3951 = vmatprep.subr.mxu1 %v1745_v31 }
 0x254   :  { %3952 = vmatpush1.msra.mxu1 %v1744_v52  ;;  %v1587_v53 = vpop.permute.xlu1 %1586  ;;  %v11900_v49 = vpop.permute.xlu0 %536 }
 0x255   :  { %v564_v40 = vsel %vm554_vm12, %v535_v44, %v11900_v49  ;;  %v1613_v61 = vsel %vm1602_vm3, %v11728_v4, %v1587_v53 }
 0x256   :  { %2670 = vrot.lane.b32.xlu1 %v11513_v26, %s15961_s24  ;;  %1723 = vrot.lane.b32.xlu0 %v11858_v46, %s15976_s21 }
 0x257   :  { %3898 = vmatprep.subr.mxu0 %v564_v40 }
 0x258   :  { %3899 = vmatpush1.msra.mxu0 %v563_v35  ;;  %v404_v50 = vpop.permute.xlu1 %403  ;;  %v11910_v37 = vpop.permute.xlu0 %1588 }
 0x259   :  { %v1614_v59 = vsel %vm1602_vm3, %v1587_v53, %v11910_v37  ;;  %v432_v17 = vsel %vm423_vm13, %v11568_v7, %v404_v50 }
 0x25a   :  { %1590 = vrot.lane.b32.xlu1 %v11841_v43, %s15977_s19  ;;  %2672 = vrot.lane.b32.xlu0 %v11841_v43, %s15961_s24 }
 0x25b   :  { %3953 = vmatprep.subr.mxu1 %v1614_v59 }
 0x25c   :  { %3954 = vmatpush1.msra.mxu1 %v1613_v61  ;;  %v1456_v25 = vpop.permute.xlu1 %1455  ;;  %v11920_v9 = vpop.permute.xlu0 %405 }
 0x25d   :  { %v433_v62 = vsel %vm423_vm13, %v404_v50, %v11920_v9  ;;  %v1482_v21 = vsel %vm1471_vm4, %v11740_v28, %v1456_v25 }
 0x25e   :  { %1459 = vrot.lane.b32.xlu1 %v11841_v43, %s15978_s13  ;;  %1592 = vrot.lane.b32.xlu0 %v11858_v46, %s15977_s19 }
 0x25f   :  { %3900 = vmatprep.subr.mxu0 %v433_v62 }
 0x260   :  { %3901 = vmatpush1.msra.mxu0 %v432_v17  ;;  %v273_v22 = vpop.permute.xlu1 %272  ;;  %v11930_v4 = vpop.permute.xlu0 %1457 }
 0x261   :  { %v1483_v5 = vsel %vm1471_vm4, %v1456_v25, %v11930_v4  ;;  %v301_v1 = vsel %vm292_vm14, %v11579_v15, %v273_v22 }
 0x262   :  { %2503 = vrot.lane.b32.xlu1 %v11498_v57, %s15962_s23  ;;  %1461 = vrot.lane.b32.xlu0 %v11858_v46, %s15978_s13 }
 0x263   :  { %3955 = vmatprep.subr.mxu1 %v1483_v5 }
 0x264   :  { %3956 = vmatpush1.msra.mxu1 %v1482_v21  ;;  %v1325_v19 = vpop.permute.xlu1 %1324  ;;  %v11940_v7 = vpop.permute.xlu0 %274 }
 0x265   :  { %v302_v29 = vsel %vm292_vm14, %v273_v22, %v11940_v7  ;;  %v1351_v39 = vsel %vm15913_vm5, %v11760_v11, %v1325_v19 }
 0x266   :  { %1328 = vrot.lane.b32.xlu1 %v11841_v43, %s15960_s30  ;;  %2505 = vrot.lane.b32.xlu0 %v11513_v26, %s15962_s23 }
 0x267   :  { %3902 = vmatprep.subr.mxu0 %v302_v29 }
 0x268   :  { %3903 = vmatpush1.msra.mxu0 %v301_v1  ;;  %v142_v20 = vpop.permute.xlu1 %141  ;;  %v11950_v28 = vpop.permute.xlu0 %1326 }
 0x269   :  { %v1352_v23 = vsel %vm15913_vm5, %v1325_v19, %v11950_v28  ;;  %v170_v11 = vsel %vm161_vm15, %v11599_v51, %v142_v20 }
 0x26a   :  { %2372 = vrot.lane.b32.xlu1 %v11498_v57, %s15963_s28  ;;  %1330 = vrot.lane.b32.xlu0 %v11858_v46, %s15960_s30 }
 0x26b   :  { %3957 = vmatprep.subr.mxu1 %v1352_v23 }
 0x26c   :  { %3958 = vmatpush1.msra.mxu1 %v1351_v39  ;;  %v1194_v14 = vpop.permute.xlu1 %1193  ;;  %v11960_v15 = vpop.permute.xlu0 %143  ;;  %v2583_v39 = vld [vmem:[%s15850_s0 + $0x50] sm:$0xff] }
 0x26d   :  { %v171_v6 = vsel %vm161_vm15, %v142_v20, %v11960_v15  ;;  %v1220_v63 = vsel %vm16005_vm9, %v11780_v18, %v1194_v14  ;;  %vm16008_vm9 = vcmask 769024  }
 0x26e   :  { %1197 = vrot.lane.b32.xlu1 %v11841_v43, %s15953_s26  ;;  %2374 = vrot.lane.b32.xlu0 %v11513_v26, %s15963_s28 }
 0x26f   :  { %3904 = vmatprep.subr.mxu0 %v171_v6 }
 0x270   :  { %3905 = vmatpush1.msra.mxu0 %v170_v11  ;;  %v1063_v56 = vpop.permute.xlu1 %1062  ;;  %v11975_v34 = vpop.permute.xlu0 %1195 }
 0x271   :  { %v1221_v58 = vsel %vm16004_vm10, %v1194_v14, %v11975_v34  ;;  %3906 = vmatprep.subr.mxu0 %v11971_v12  ;;  %vm16007_vm10 = vmmov %vm16006_vm6 }
 0x272   :  { %2241 = vrot.lane.b32.xlu1 %v11498_v57, %s15954_s15  ;;  %1199 = vrot.lane.b32.xlu0 %v11858_v46, %s15953_s26  ;;  %v1089_v10 = vsel %vm16007_vm10, %v11800_v13, %v1063_v56  ;;  %vm16010_vm10 = vcmask 777216  }
 0x273   :  { %3959 = vmatprep.subr.mxu1 %v1221_v58  ;;  %3907 = vmatpush1.msra.mxu0 %v11724_v2 }
 0x274   :  { %3960 = vmatpush1.msra.mxu1 %v1220_v63  ;;  %v932_v51 = vpop.permute.xlu1 %931  ;;  %v11987_v41 = vpop.permute.xlu0 %1064 }
 0x275   :  { %v1090_v24 = vsel %vm16006_vm6, %v1063_v56, %v11987_v41  ;;  %vm16009_vm6 = vmmov %vm16008_vm9 }
 0x276   :  { %1066 = vrot.lane.b32.xlu1 %v11841_v43, %s15955_s16  ;;  %2243 = vrot.lane.b32.xlu0 %v11513_v26, %s15954_s15  ;;  %v958_v31 = vsel %vm16009_vm6, %v11822_v16, %v932_v51  ;;  %vm16012_vm6 = vcmask 785408  }
 0x277   :  { %3961 = vmatprep.subr.mxu1 %v1090_v24 }
 0x278   :  { %3962 = vmatpush1.msra.mxu1 %v1089_v10  ;;  %v3057_v18 = vpop.permute.xlu1 %3056  ;;  %v11997_v2 = vpop.permute.xlu0 %933 }
 0x279   :  { %v959_v44 = vsel %vm16008_vm9, %v932_v51, %v11997_v2  ;;  %vm16011_vm9 = vmmov %vm16010_vm10 }
 0x27a   :  { %2110 = vrot.lane.b32.xlu1 %v11498_v57, %s15966_s22  ;;  %1068 = vrot.lane.b32.xlu0 %v11858_v46, %s15955_s16  ;;  %v3084_v57 = vsel %vm554_vm12, %v11645_v8, %v3057_v18 }
 0x27b   :  { %3963 = vmatprep.subr.mxu1 %v959_v44 }
 0x27c   :  { %3964 = vmatpush1.msra.mxu1 %v958_v31  ;;  %v801_v52 = vpop.permute.xlu1 %800  ;;  %v12007_v13 = vpop.permute.xlu0 %3058 }
 0x27d   :  { %v3085_v53 = vsel %vm554_vm12, %v3057_v18, %v12007_v13 }
 0x27e   :  { %935 = vrot.lane.b32.xlu1 %v11841_v43, %s15956_s18  ;;  %2112 = vrot.lane.b32.xlu0 %v11513_v26, %s15966_s22  ;;  %v827_v26 = vsel %vm16011_vm9, %v11860_v32, %v801_v52  ;;  %vm16014_vm9 = vcmask 228352  }
 0x27f   :  { %3922 = vmatprep.subr.mxu0 %v3085_v53 }
 0x280   :  { %3923 = vmatpush2.msra.mxu0 %v3084_v57  ;;  %v2927_v40 = vpop.permute.xlu1 %2926  ;;  %v12017_v16 = vpop.permute.xlu0 %802 }
 0x281   :  { %v828_v35 = vsel %vm16010_vm10, %v801_v52, %v12017_v16  ;;  %v2954_v61 = vsel %vm423_vm13, %v11673_v60, %v2927_v40  ;;  %vm16013_vm10 = vmmov %vm16012_vm6  ;;  %v12127_v52 = vld [vmem:[%s15850_s0 + $0x58] sm:$0xff] }
 0x282   :  { %804 = vrot.lane.b32.xlu1 %v11841_v43, %s15957_s25  ;;  %937 = vrot.lane.b32.xlu0 %v11858_v46, %s15956_s18 }
 0x283   :  { %3965 = vmatprep.subr.mxu1 %v828_v35 }
 0x284   :  { %3966 = vmatpush1.msra.mxu1 %v827_v26  ;;  %v670_v50 = vpop.permute.xlu1 %669  ;;  %v12027_v8 = vpop.permute.xlu0 %2928 }
 0x285   :  { %v2955_v59 = vsel %vm423_vm13, %v2927_v40, %v12027_v8  ;;  %v696_v17 = vsel %vm16013_vm10, %v11880_v36, %v670_v50  ;;  %vm16016_vm10 = vcmask 236544  }
 0x286   :  { %673 = vrot.lane.b32.xlu1 %v11841_v43, %s15958_s17  ;;  %806 = vrot.lane.b32.xlu0 %v11858_v46, %s15957_s25 }
 0x287   :  { %3924 = vmatprep.subr.mxu0 %v2955_v59 }
 0x288   :  { %3925 = vmatpush2.msra.mxu0 %v2954_v61  ;;  %v2797_v25 = vpop.permute.xlu1 %2796  ;;  %v12037_v32 = vpop.permute.xlu0 %671 }
 0x289   :  { %v697_v62 = vsel %vm16012_vm6, %v670_v50, %v12037_v32  ;;  %v2824_v21 = vsel %vm292_vm14, %v11693_v42, %v2797_v25  ;;  %vm16015_vm6 = vmmov %vm16014_vm9 }
 0x28a   :  { %542 = vrot.lane.b32.xlu1 %v11841_v43, %s15987_s9  ;;  %675 = vrot.lane.b32.xlu0 %v11858_v46, %s15958_s17 }
 0x28b   :  { %3967 = vmatprep.subr.mxu1 %v697_v62 }
 0x28c   :  { %3968 = vmatpush1.msra.mxu1 %v696_v17  ;;  %v539_v22 = vpop.permute.xlu1 %538  ;;  %v12047_v60 = vpop.permute.xlu0 %2798 }
 0x28d   :  { %v2825_v5 = vsel %vm292_vm14, %v2797_v25, %v12047_v60  ;;  %v565_v1 = vsel %vm554_vm12, %v11900_v49, %v539_v22 }
 0x28e   :  { %411 = vrot.lane.b32.xlu1 %v11841_v43, %s15971_s14  ;;  %544 = vrot.lane.b32.xlu0 %v11858_v46, %s15987_s9 }
 0x28f   :  { %3926 = vmatprep.subr.mxu0 %v2825_v5 }
 0x290   :  { %3927 = vmatpush2.msra.mxu0 %v2824_v21  ;;  %v2667_v19 = vpop.permute.xlu1 %2666  ;;  %v12057_v36 = vpop.permute.xlu0 %540 }
 0x291   :  { %v566_v29 = vsel %vm554_vm12, %v539_v22, %v12057_v36  ;;  %v2694_v49 = vsel %vm161_vm15, %v11713_v47, %v2667_v19  ;;  %v12093_v47 = vld [vmem:[%s15850_s0 + $0x78] sm:$0xff] }
 0x292   :  { %280 = vrot.lane.b32.xlu1 %v11841_v43, %s15959_s29  ;;  %413 = vrot.lane.b32.xlu0 %v11858_v46, %s15971_s14 }
 0x293   :  { %3969 = vmatprep.subr.mxu1 %v566_v29 }
 0x294   :  { %3970 = vmatpush1.msra.mxu1 %v565_v1  ;;  %v408_v20 = vpop.permute.xlu1 %407  ;;  %v12067_v42 = vpop.permute.xlu0 %2668 }
 0x295   :  { %v2695_v23 = vsel %vm161_vm15, %v2667_v19, %v12067_v42  ;;  %v434_v56 = vsel %vm423_vm13, %v11920_v9, %v408_v20 }
 0x296   :  { %149 = vrot.lane.b32.xlu1 %v11841_v43, %s15961_s24  ;;  %282 = vrot.lane.b32.xlu0 %v11858_v46, %s15959_s29 }
 0x297   :  { %3928 = vmatprep.subr.mxu0 %v2695_v23  ;;  %v12191_v23 = vld [vmem:[%s15850_s0 + $0x80] sm:$0xff] }
 0x298   :  { %3929 = vmatpush2.msra.mxu0 %v2694_v49  ;;  %v277_v14 = vpop.permute.xlu1 %276  ;;  %v12080_v6 = vpop.permute.xlu0 %409 }
 0x299   :  { %v435_v11 = vsel %vm423_vm13, %v408_v20, %v12080_v6  ;;  %3930 = vmatprep.subr.mxu0 %v2583_v39  ;;  %v303_v9 = vsel %vm292_vm14, %v11940_v7, %v277_v14 }
 0x29a   :  { %3064 = vrot.lane.b32.xlu1 %v11858_v46, %s15987_s9  ;;  %151 = vrot.lane.b32.xlu0 %v11858_v46, %s15961_s24 }
 0x29b   :  { %3971 = vmatprep.subr.mxu1 %v435_v11  ;;  %3931 = vmatpush2.msra.mxu0 %v11971_v12 }
 0x29c   :  { %3972 = vmatpush1.msra.mxu1 %v434_v56  ;;  %v2500_v58 = vpop.permute.xlu1 %2499  ;;  %v12096_v63 = vpop.permute.xlu0 %278 }
 0x29d   :  { %v304_v51 = vsel %vm292_vm14, %v277_v14, %v12096_v63  ;;  %v2528_v18 = vsel %vm16015_vm6, %v11750_v30, %v2500_v58 }
 0x29e   :  { %2934 = vrot.lane.b32.xlu1 %v11858_v46, %s15971_s14  ;;  %3066 = vrot.lane.b32.xlu0 %v12093_v47, %s15987_s9 }
 0x29f   :  { %3973 = vmatprep.subr.mxu1 %v304_v51 }
 0x2a0   :  { %3974 = vmatpush1.msra.mxu1 %v303_v9  ;;  %v146_v24 = vpop.permute.xlu1 %145  ;;  %v12106_v12 = vpop.permute.xlu0 %2501 }
 0x2a1   :  { %v2529_v10 = vsel %vm16014_vm9, %v2500_v58, %v12106_v12  ;;  %v172_v30 = vsel %vm161_vm15, %v11960_v15, %v146_v24  ;;  %vm16017_vm9 = vmmov %vm16016_vm10 }
 0x2a2   :  { %2804 = vrot.lane.b32.xlu1 %v11858_v46, %s15959_s29  ;;  %2936 = vrot.lane.b32.xlu0 %v12093_v47, %s15971_s14 }
 0x2a3   :  { %3932 = vmatprep.subr.mxu0 %v2529_v10 }
 0x2a4   :  { %3933 = vmatpush2.msra.mxu0 %v2528_v18  ;;  %v2369_v44 = vpop.permute.xlu1 %2368  ;;  %v12116_v7 = vpop.permute.xlu0 %147 }
 0x2a5   :  { %v173_v31 = vsel %vm161_vm15, %v146_v24, %v12116_v7  ;;  %v2397_v35 = vsel %vm16017_vm9, %v11770_v27, %v2369_v44 }
 0x2a6   :  { %2674 = vrot.lane.b32.xlu1 %v11858_v46, %s15961_s24  ;;  %2806 = vrot.lane.b32.xlu0 %v12093_v47, %s15959_s29 }
 0x2a7   :  { %3975 = vmatprep.subr.mxu1 %v173_v31 }
 0x2a8   :  { %3976 = vmatpush1.msra.mxu1 %v172_v30  ;;  %v2238_v53 = vpop.permute.xlu1 %2237  ;;  %v12131_v57 = vpop.permute.xlu0 %2370  ;;  %v12238_v30 = vld [vmem:[%s15850_s0 + $0x60] sm:$0xff] }
 0x2a9   :  { %v2398_v40 = vsel %vm16016_vm10, %v2369_v44, %v12131_v57  ;;  %3977 = vmatprep.subr.mxu1 %v12127_v52  ;;  %v2266_v59 = vsel %vm2257_vm8, %v11790_v33, %v2238_v53  ;;  %vm16018_vm10 = vmmov %vm16015_vm6 }
 0x2aa   :  { %2507 = vrot.lane.b32.xlu1 %v11841_v43, %s15962_s23  ;;  %2676 = vrot.lane.b32.xlu0 %v12093_v47, %s15961_s24 }
 0x2ab   :  { %3934 = vmatprep.subr.mxu0 %v2398_v40  ;;  %3978 = vmatpush1.msra.mxu1 %v2583_v39 }
 0x2ac   :  { %3935 = vmatpush2.msra.mxu0 %v2397_v35  ;;  %v2107_v15 = vpop.permute.xlu1 %2106  ;;  %v12142_v26 = vpop.permute.xlu0 %2239 }
 0x2ad   :  { %v2267_v50 = vsel %vm2257_vm8, %v2238_v53, %v12142_v26  ;;  %v2135_v62 = vsel %vm2126_vm7, %v11810_v38, %v2107_v15  ;;  %v3582_v38 = vld [vmem:[%s15852_s2] sm:$0xff] }
 0x2ae   :  { %2376 = vrot.lane.b32.xlu1 %v11841_v43, %s15963_s28  ;;  %2509 = vrot.lane.b32.xlu0 %v11858_v46, %s15962_s23 }
 0x2af   :  { %3936 = vmatprep.subr.mxu0 %v2267_v50 }
 0x2b0   :  { %3937 = vmatpush2.msra.mxu0 %v2266_v59  ;;  %v3061_v27 = vpop.permute.xlu1 %3060  ;;  %v12152_v61 = vpop.permute.xlu0 %2108 }
 0x2b1   :  { %v2136_v25 = vsel %vm2126_vm7, %v2107_v15, %v12152_v61  ;;  %v3086_v5 = vsel %vm554_vm12, %v12007_v13, %v3061_v27 }
 0x2b2   :  { %2245 = vrot.lane.b32.xlu1 %v11841_v43, %s15954_s15  ;;  %2378 = vrot.lane.b32.xlu0 %v11858_v46, %s15963_s28 }
 0x2b3   :  { %3938 = vmatprep.subr.mxu0 %v2136_v25 }
 0x2b4   :  { %3939 = vmatpush2.msra.mxu0 %v2135_v62  ;;  %v1984_v17 = vpop.permute.xlu1 %1983  ;;  %v12162_v33 = vpop.permute.xlu0 %3062 }
 0x2b5   :  { %3941 = vmatmul.mubr.f32.vlgmr.msra.gmra.mxu0 %v11829_v3  ;;  %v3087_v22 = vsel %vm554_vm12, %v3061_v27, %v12162_v33  ;;  %v2008_v13 = vsel %vm1995_vm0, %v11845_v48, %v1984_v17 }
 0x2b6   :  { %2114 = vrot.lane.b32.xlu1 %v11841_v43, %s15966_s22  ;;  %2247 = vrot.lane.b32.xlu0 %v11858_v46, %s15954_s15 }
 0x2b7   :  { %3993 = vmatprep.subr.mxu1 %v3087_v22  ;;  %9823 = vmatprep.mubr.msk.f32.mxu0 %vm3588_vm11, %v11659_v55 }
 0x2b8   :  { %3994 = vmatpush2.msra.mxu1 %v3086_v5  ;;  %v2931_v21 = vpop.permute.xlu1 %2930  ;;  %v12178_v19 = vpop.permute.xlu0 %1985 }
 0x2b9   :  { %v2009_v29 = vsel %vm1995_vm0, %v1984_v17, %v12178_v19  ;;  %v2956_v49 = vsel %vm423_vm13, %v12027_v8, %v2931_v21 }
 0x2ba   :  { %3585 = vperm.xlu1 %10187, %v3582_v38   ;;  %2116 = vrot.lane.b32.xlu0 %v11858_v46, %s15966_s22 }
 0x2bb   :  { %4018 = vmatprep.subr.mxu0 %v2009_v29 }
 0x2bc   :  { %4019 = vmatpush1.msra.mxu0 %v2008_v13  ;;  %v1853_v1 = vpop.permute.xlu1 %1852  ;;  %v12186_v20 = vpop.permute.xlu0 %2932 }
 0x2bd   :  { %v2957_v39 = vsel %vm423_vm13, %v2931_v21, %v12186_v20  ;;  %v1877_v56 = vsel %vm1864_vm1, %v11870_v54, %v1853_v1 }
 0x2be   :  { %1987 = vrot.lane.b32.xlu0 %v12093_v47, %s15969_s27  ;;  %3995 = vmatprep.subr.mxu1 %v2957_v39 }
 0x2bf   :  { %3996 = vmatpush2.msra.mxu1 %v2956_v49  ;;  %1989 = vrot.lane.b32.xlu1 %v12191_v23, %s15969_s27 }
 0x2c0   :  { %v2801_v48 = vpop.permute.xlu1 %2800  ;;  %v12201_v14 = vpop.permute.xlu0 %1854 }
 0x2c1   :  { %v1878_v11 = vsel %vm1864_vm1, %v1853_v1, %v12201_v14  ;;  %v2826_v9 = vsel %vm292_vm14, %v12047_v60, %v2801_v48 }
 0x2c2   :  { %1856 = vrot.lane.b32.xlu0 %v12093_v47, %s15973_s20  ;;  %4020 = vmatprep.subr.mxu0 %v1878_v11 }
 0x2c3   :  { %4021 = vmatpush1.msra.mxu0 %v1877_v56  ;;  %1858 = vrot.lane.b32.xlu1 %v12191_v23, %s15973_s20 }
 0x2c4   :  { %v1722_v8 = vpop.permute.xlu1 %1721  ;;  %v12211_v58 = vpop.permute.xlu0 %2802 }
 0x2c5   :  { %v2827_v51 = vsel %vm292_vm14, %v2801_v48, %v12211_v58  ;;  %v1746_v18 = vsel %vm1733_vm2, %v11890_v45, %v1722_v8 }
 0x2c6   :  { %1725 = vrot.lane.b32.xlu0 %v12093_v47, %s15976_s21  ;;  %3997 = vmatprep.subr.mxu1 %v2827_v51 }
 0x2c7   :  { %3998 = vmatpush2.msra.mxu1 %v2826_v9  ;;  %1727 = vrot.lane.b32.xlu1 %v12191_v23, %s15976_s21 }
 0x2c8   :  { %v2671_v54 = vpop.permute.xlu1 %2670  ;;  %v12221_v24 = vpop.permute.xlu0 %1723 }
 0x2c9   :  { %v1747_v10 = vsel %vm1733_vm2, %v1722_v8, %v12221_v24  ;;  %v2696_v45 = vsel %vm161_vm15, %v12067_v42, %v2671_v54 }
 0x2ca   :  { %1594 = vrot.lane.b32.xlu0 %v12093_v47, %s15977_s19  ;;  %4022 = vmatprep.subr.mxu0 %v1747_v10 }
 0x2cb   :  { %4023 = vmatpush1.msra.mxu0 %v1746_v18  ;;  %1596 = vrot.lane.b32.xlu1 %v12191_v23, %s15977_s19 }
 0x2cc   :  { %v1591_v60 = vpop.permute.xlu1 %1590  ;;  %v12231_v44 = vpop.permute.xlu0 %2672 }
 0x2cd   :  { %v2697_v31 = vsel %vm161_vm15, %v2671_v54, %v12231_v44  ;;  %v1615_v42 = vsel %vm1602_vm3, %v11910_v37, %v1591_v60 }
 0x2ce   :  { %1463 = vrot.lane.b32.xlu0 %v12093_v47, %s15978_s13  ;;  %3999 = vmatprep.subr.mxu1 %v2697_v31 }
 0x2cf   :  { %4000 = vmatpush2.msra.mxu1 %v2696_v45  ;;  %1465 = vrot.lane.b32.xlu1 %v12191_v23, %s15978_s13 }
 0x2d0   :  { %v1460_v53 = vpop.permute.xlu1 %1459  ;;  %v12246_v40 = vpop.permute.xlu0 %1592  ;;  %4001 = vmatprep.subr.mxu1 %v12238_v30 }
 0x2d1   :  { %v1616_v35 = vsel %vm1602_vm3, %v1591_v60, %v12246_v40  ;;  %4002 = vmatpush2.msra.mxu1 %v12127_v52  ;;  %v1484_v52 = vsel %vm1471_vm4, %v11930_v4, %v1460_v53 }
 0x2d2   :  { %1332 = vrot.lane.b32.xlu0 %v12093_v47, %s15960_s30  ;;  %4024 = vmatprep.subr.mxu0 %v1616_v35 }
 0x2d3   :  { %4025 = vmatpush1.msra.mxu0 %v1615_v42  ;;  %1334 = vrot.lane.b32.xlu1 %v12191_v23, %s15960_s30 }
 0x2d4   :  { %v2504_v15 = vpop.permute.xlu1 %2503  ;;  %v12258_v50 = vpop.permute.xlu0 %1461 }
 0x2d5   :  { %v1485_v59 = vsel %vm1471_vm4, %v1460_v53, %v12258_v50  ;;  %v2530_v62 = vsel %vm16018_vm10, %v12106_v12, %v2504_v15  ;;  %vm16020_vm10 = vcmask 752640  }
 0x2d6   :  { %4026 = vmatprep.subr.mxu0 %v1485_v59 }
 0x2d7   :  { %4027 = vmatpush1.msra.mxu0 %v1484_v52 }
 0x2d8   :  { %v1329_v27 = vpop.permute.xlu1 %1328  ;;  %v12264_v25 = vpop.permute.xlu0 %2505 }
 0x2d9   :  { %v2531_v37 = vsel %vm16015_vm6, %v2504_v15, %v12264_v25  ;;  %v1353_v4 = vsel %vm15913_vm5, %v11950_v28, %v1329_v27  ;;  %vm16019_vm6 = vmmov %vm16017_vm9 }
 0x2da   :  { %4003 = vmatprep.subr.mxu1 %v2531_v37 }
 0x2db   :  { %4004 = vmatpush2.msra.mxu1 %v2530_v62 }
 0x2dc   :  { %v2373_v17 = vpop.permute.xlu1 %2372  ;;  %v12270_v22 = vpop.permute.xlu0 %1330 }
 0x2dd   :  { %v1354_v5 = vsel %vm15913_vm5, %v1329_v27, %v12270_v22  ;;  %v2399_v12 = vsel %vm16019_vm6, %v12131_v57, %v2373_v17  ;;  %vm16021_vm5 = vmmov %vm16020_vm10  ;;  %vm16024_vm6 = vcmask 769024  }
 0x2de   :  { %4028 = vmatprep.subr.mxu0 %v1354_v5 }
 0x2df   :  { %4029 = vmatpush1.msra.mxu0 %v1353_v4 }
 0x2e0   :  { %v1198_v38 = vpop.permute.xlu1 %1197  ;;  %v12276_v21 = vpop.permute.xlu0 %2374 }
 0x2e1   :  { %v2400_v29 = vsel %vm16017_vm9, %v2373_v17, %v12276_v21  ;;  %v1222_v28 = vsel %vm16021_vm5, %v11975_v34, %v1198_v38  ;;  %vm16022_vm9 = vcmask 760832  }
 0x2e2   :  { %4005 = vmatprep.subr.mxu1 %v2400_v29  ;;  %vm16023_vm5 = vmmov %vm16022_vm9 }
 0x2e3   :  { %4006 = vmatpush2.msra.mxu1 %v2399_v12 }
 0x2e4   :  { %v2242_v13 = vpop.permute.xlu1 %2241  ;;  %v12282_v1 = vpop.permute.xlu0 %1199 }
 0x2e5   :  { %v1223_v39 = vsel %vm16020_vm10, %v1198_v38, %v12282_v1  ;;  %v2268_v57 = vsel %vm2257_vm8, %v12142_v26, %v2242_v13  ;;  %vm16025_vm10 = vmmov %vm16024_vm6 }
 0x2e6   :  { %4030 = vmatprep.subr.mxu0 %v1223_v39 }
 0x2e7   :  { %4031 = vmatpush1.msra.mxu0 %v1222_v28 }
 0x2e8   :  { %v1067_v49 = vpop.permute.xlu1 %1066  ;;  %v12288_v48 = vpop.permute.xlu0 %2243 }
 0x2e9   :  { %v2269_v11 = vsel %vm2257_vm8, %v2242_v13, %v12288_v48  ;;  %v1091_v34 = vsel %vm16023_vm5, %v11987_v41, %v1067_v49 }
 0x2ea   :  { %4007 = vmatprep.subr.mxu1 %v2269_v11 }
 0x2eb   :  { %4008 = vmatpush2.msra.mxu1 %v2268_v57 }
 0x2ec   :  { %v2111_v56 = vpop.permute.xlu1 %2110  ;;  %v12294_v8 = vpop.permute.xlu0 %1068 }
 0x2ed   :  { %v1092_v51 = vsel %vm16022_vm9, %v1067_v49, %v12294_v8  ;;  %v2137_v26 = vsel %vm2126_vm7, %v12152_v61, %v2111_v56  ;;  %vm16026_vm9 = vcmask 777216  }
 0x2ee   :  { %4032 = vmatprep.subr.mxu0 %v1092_v51  ;;  %vm16027_vm5 = vmmov %vm16026_vm9 }
 0x2ef   :  { %4033 = vmatpush1.msra.mxu0 %v1091_v34 }
 0x2f0   :  { %v936_v9 = vpop.permute.xlu1 %935  ;;  %v12300_v54 = vpop.permute.xlu0 %2112 }
 0x2f1   :  { %v2138_v10 = vsel %vm2126_vm7, %v2111_v56, %v12300_v54  ;;  %v960_v31 = vsel %vm16025_vm10, %v11997_v2, %v936_v9 }
 0x2f2   :  { %4009 = vmatprep.subr.mxu1 %v2138_v10 }
 0x2f3   :  { %4010 = vmatpush2.msra.mxu1 %v2137_v26  ;;  %v2586_v26 = vld [vmem:[%s15850_s0 + $0x68] sm:$0xff] }
 0x2f4   :  { %v805_v18 = vpop.permute.xlu1 %804  ;;  %v12306_v60 = vpop.permute.xlu0 %937  ;;  %4012 = vmatmul.mubr.f32.vlgmr.msra.gmra.mxu1 %v11829_v3 }
 0x2f5   :  { %v961_v41 = vsel %vm16024_vm6, %v936_v9, %v12306_v60  ;;  %9824 = vmatprep.mubr.msk.f32.mxu1 %vm3588_vm11, %v11659_v55  ;;  %v829_v35 = vsel %vm16027_vm5, %v12017_v16, %v805_v18  ;;  %vm16028_vm6 = vcmask 785408  }
 0x2f6   :  { %4034 = vmatprep.subr.mxu0 %v961_v41  ;;  %vm16029_vm10 = vmmov %vm16028_vm6 }
 0x2f7   :  { %4035 = vmatpush1.msra.mxu0 %v960_v31 }
 0x2f8   :  { %v674_v45 = vpop.permute.xlu1 %673  ;;  %v12315_v53 = vpop.permute.xlu0 %806 }
 0x2f9   :  { %v830_v61 = vsel %vm16026_vm9, %v805_v18, %v12315_v53  ;;  %v698_v2 = vsel %vm16029_vm10, %v12037_v32, %v674_v45  ;;  %vm16030_vm9 = vcmask 228352  }
 0x2fa   :  { %4036 = vmatprep.subr.mxu0 %v830_v61  ;;  %vm16031_vm5 = vmmov %vm16030_vm9 }
 0x2fb   :  { %4037 = vmatpush1.msra.mxu0 %v829_v35 }
 0x2fc   :  { %v543_v42 = vpop.permute.xlu1 %542  ;;  %v12321_v15 = vpop.permute.xlu0 %675 }
 0x2fd   :  { %v699_v55 = vsel %vm16028_vm6, %v674_v45, %v12321_v15  ;;  %v567_v16 = vsel %vm554_vm12, %v12057_v36, %v543_v42  ;;  %vm16032_vm6 = vcmask 236544  }
 0x2fe   :  { %4038 = vmatprep.subr.mxu0 %v699_v55  ;;  %vm16033_vm10 = vmmov %vm16032_vm6  ;;  %v12399_v55 = vpop.f32.mrf.mxu0 }
 0x2ff   :  { %4039 = vmatpush1.msra.mxu0 %v698_v2 }
 0x300   :  { %v412_v59 = vpop.permute.xlu1 %411  ;;  %v12327_v52 = vpop.permute.xlu0 %544 }
 0x301   :  { %v568_v27 = vsel %vm554_vm12, %v543_v42, %v12327_v52  ;;  %v436_v32 = vsel %vm423_vm13, %v12080_v6, %v412_v59 }
 0x302   :  { %4040 = vmatprep.subr.mxu0 %v568_v27 }
 0x303   :  { %4041 = vmatpush1.msra.mxu0 %v567_v16  ;;  %v3660_v16 = vpop.f32.mrf.mxu0 }
 0x304   :  { %v281_v37 = vpop.permute.xlu1 %280  ;;  %v12333_v62 = vpop.permute.xlu0 %413 }
 0x305   :  { %v437_v17 = vsel %vm423_vm13, %v412_v59, %v12333_v62  ;;  %v305_v36 = vsel %vm292_vm14, %v12096_v63, %v281_v37 }
 0x306   :  { %4042 = vmatprep.subr.mxu0 %v437_v17 }
 0x307   :  { %4043 = vmatpush1.msra.mxu0 %v436_v32  ;;  %v10408_v32 = vld [vmem:[%s15851_s1 + $0x8] sm:$0xff] }
 0x308   :  { %v150_v5 = vpop.permute.xlu1 %149  ;;  %v12339_v4 = vpop.permute.xlu0 %282 }
 0x309   :  { %v306_v38 = vsel %vm292_vm14, %v281_v37, %v12339_v4  ;;  %v174_v6 = vsel %vm161_vm15, %v12116_v7, %v150_v5  ;;  %v3729_v37 = vpop.f32.mrf.mxu1 }
 0x30a   :  { %4044 = vmatprep.subr.mxu0 %v306_v38 }
 0x30b   :  { %4045 = vmatpush1.msra.mxu0 %v305_v36 }
 0x30c   :  { %v3065_v29 = vpop.permute.xlu1 %3064  ;;  %v12345_v12 = vpop.permute.xlu0 %151 }
 0x30d   :  { %v175_v13 = vsel %vm161_vm15, %v150_v5, %v12345_v12  ;;  %v3088_v49 = vsel %vm554_vm12, %v12162_v33, %v3065_v29  ;;  %v3731_v5 = vpop.f32.mrf.mxu1 }
 0x30e   :  { %4046 = vmatprep.subr.mxu0 %v175_v13 }
 0x30f   :  { %4047 = vmatpush1.msra.mxu0 %v174_v6 }
 0x310   :  { %v2935_v39 = vpop.permute.xlu1 %2934  ;;  %v12351_v28 = vpop.permute.xlu0 %3066  ;;  %4048 = vmatprep.subr.mxu0 %v11841_v43 }
 0x311   :  { %4049 = vmatpush1.msra.mxu0 %v12238_v30  ;;  %v3089_v63 = vsel %vm554_vm12, %v3065_v29, %v12351_v28  ;;  %v2958_v43 = vsel %vm423_vm13, %v12186_v20, %v2935_v39 }
 0x312   :  { %4064 = vmatprep.subr.mxu0 %v3089_v63 }
 0x313   :  { %4065 = vmatpush2.msra.mxu0 %v3088_v49 }
 0x314   :  { %v2805_v11 = vpop.permute.xlu1 %2804  ;;  %v12359_v57 = vpop.permute.xlu0 %2936 }
 0x315   :  { %v2959_v7 = vsel %vm423_vm13, %v2935_v39, %v12359_v57  ;;  %v2828_v33 = vsel %vm292_vm14, %v12211_v58, %v2805_v11 }
 0x316   :  { %4066 = vmatprep.subr.mxu0 %v2959_v7 }
 0x317   :  { %4067 = vmatpush2.msra.mxu0 %v2958_v43 }
 0x318   :  { %v2675_v30 = vpop.permute.xlu1 %2674  ;;  %v12365_v56 = vpop.permute.xlu0 %2806 }
 0x319   :  { %v2829_v51 = vsel %vm292_vm14, %v2805_v11, %v12365_v56  ;;  %v2698_v20 = vsel %vm161_vm15, %v12231_v44, %v2675_v30 }
 0x31a   :  { %4068 = vmatprep.subr.mxu0 %v2829_v51 }
 0x31b   :  { %4069 = vmatpush2.msra.mxu0 %v2828_v33 }
 0x31c   :  { %v2508_v34 = vpop.permute.xlu1 %2507  ;;  %v12371_v9 = vpop.permute.xlu0 %2676 }
 0x31d   :  { %v2699_v10 = vsel %vm161_vm15, %v2675_v30, %v12371_v9  ;;  %v2532_v31 = vsel %vm16031_vm5, %v12264_v25, %v2508_v34 }
 0x31e   :  { %4070 = vmatprep.subr.mxu0 %v2699_v10 }
 0x31f   :  { %4071 = vmatpush2.msra.mxu0 %v2698_v20 }
 0x320   :  { %v2377_v18 = vpop.permute.xlu1 %2376  ;;  %v12380_v41 = vpop.permute.xlu0 %2509  ;;  %4072 = vmatprep.subr.mxu0 %v11858_v46 }
 0x321   :  { %4073 = vmatpush2.msra.mxu0 %v2586_v26  ;;  %v2533_v58 = vsel %vm16030_vm9, %v2508_v34, %v12380_v41  ;;  %v2401_v35 = vsel %vm16033_vm10, %v12276_v21, %v2377_v18  ;;  %vm16034_vm9 = vcmask 523264  }
 0x322   :  { %4074 = vmatprep.subr.mxu0 %v2533_v58  ;;  %vm16035_vm5 = vmmov %vm16034_vm9 }
 0x323   :  { %4075 = vmatpush2.msra.mxu0 %v2532_v31 }
 0x324   :  { %v12387_v44 = vpop.permute.xlu0 %2378  ;;  %v2246_v45 = vpop.permute.xlu1 %2245 }
 0x325   :  { %v2402_v61 = vsel %vm16032_vm6, %v2377_v18, %v12387_v44  ;;  %v2270_v25 = vsel %vm2257_vm8, %v12288_v48, %v2246_v45  ;;  %v3800_v48 = vpop.f32.mrf.mxu0  ;;  %vm16036_vm6 = vcmask 752640  }
 0x326   :  { %4076 = vmatprep.subr.mxu0 %v2402_v61  ;;  %vm16037_vm10 = vmmov %vm16036_vm6 }
 0x327   :  { %4077 = vmatpush2.msra.mxu0 %v2401_v35  ;;  %v3802_v29 = vpop.f32.mrf.mxu0 }
 0x328   :  { %v12393_v46 = vpop.permute.xlu0 %2247  ;;  %v2115_v2 = vpop.permute.xlu1 %2114 }
 0x329   :  { %v2271_v42 = vsel %vm2257_vm8, %v2246_v45, %v12393_v46  ;;  %v2139_v21 = vsel %vm2126_vm7, %v12300_v54, %v2115_v2 }
 0x32a   :  { %4078 = vmatprep.subr.mxu0 %v2271_v42 }
 0x32b   :  { %4079 = vmatpush2.msra.mxu0 %v2270_v25 }
 0x32c   :  { %v12401_v59 = vpop.permute.xlu0 %2116 }
 0x32d   :  { %v2140_v27 = vsel %vm2126_vm7, %v2115_v2, %v12401_v59 }
 0x32e   :  { %4080 = vmatprep.subr.mxu0 %v2140_v27  ;;  %v3871_v27 = vpop.f32.mrf.mxu1 }
 0x32f   :  { %4081 = vmatpush2.msra.mxu0 %v2139_v21 }
 0x330   :  { %v1988_v17 = vpop.permute.xlu0 %1987  ;;  %4083 = vmatmul.mubr.f32.vlgmr.msra.gmra.mxu0 %v11829_v3 }
 0x331   :  { %9825 = vmatprep.mubr.msk.f32.mxu0 %vm3588_vm11, %v10408_v32  ;;  %v2010_v43 = vsel %vm1995_vm0, %v12178_v19, %v1988_v17 }
 0x334   :  { %v1857_v38 = vpop.permute.xlu0 %1856 }
 0x335   :  { %v12412_v36 = vpop.permute.xlu1 %3585  ;;  %v1879_v19 = vsel %vm1864_vm1, %v12201_v14, %v1857_v38 }
 0x336   :  { %v12415_v54 = vadd.f32 %v3731_v5, %v12412_v36  ;;  %v12418_v13 = vadd.f32 %v3729_v37, %v12412_v36  ;;  %v12421_v3 = vadd.f32 %v3802_v29, %v12412_v36  ;;  %v12426_v63 = vadd.f32 %v3800_v48, %v12412_v36  ;;  %v3873_v37 = vpop.f32.mrf.mxu1 }
 0x337   :  { %v12455_v20 = vadd.f32 %v3660_v16, %v12412_v36  ;;  %v12523_v32 = vadd.f32 %v12399_v55, %v12412_v36  ;;  %v12538_v55 = vld [vmem:[%s15850_s0 + $0x88] sm:$0xff] }
 0x338   :  { %v4234_v6 = vmax.f32 %v12415_v54, 0.0  ;;  %v4233_v39 = vmax.f32 %v12418_v13, 0.0  ;;  %v1726_v11 = vpop.permute.xlu0 %1725  ;;  %v4236_v30 = vmax.f32 %v12421_v3, 0.0  ;;  %v4235_v51 = vmax.f32 %v12426_v63, 0.0 }
 0x339   :  { %v12428_v49 = vpop.permute.xlu1 %1989  ;;  %v1748_v14 = vsel %vm1733_vm2, %v12221_v24, %v1726_v11  ;;  %v4232_v58 = vmax.f32 %v12455_v20, 0.0  ;;  %v4231_v5 = vmax.f32 %v12523_v32, 0.0 }
 0x33a   :  { %4326 = vrot.lane.b32.xlu1 %v4234_v6, %s15961_s24  ;;  %4324 = vrot.lane.b32.xlu0 %v4233_v39, %s15961_s24  ;;  %v2011_v7 = vsel %vm1995_vm0, %v1988_v17, %v12428_v49  ;;  %v12507_v17 = vadd.f32 %v3873_v37, %v12412_v36 }
 0x33b   :  { %4089 = vmatprep.subr.mxu1 %v2011_v7 }
 0x33c   :  { %4090 = vmatpush1.msra.mxu1 %v2010_v43  ;;  %v1595_v10 = vpop.permute.xlu0 %1594 }
 0x33d   :  { %v12442_v33 = vpop.permute.xlu1 %1858  ;;  %v1617_v24 = vsel %vm1602_vm3, %v12246_v40, %v1595_v10 }
 0x33e   :  { %4330 = vrot.lane.b32.xlu1 %v4236_v30, %s15961_s24  ;;  %4328 = vrot.lane.b32.xlu0 %v4235_v51, %s15961_s24  ;;  %v1880_v34 = vsel %vm1864_vm1, %v1857_v38, %v12442_v33  ;;  %v12543_v38 = vld [vmem:[%s15850_s0 + $0x90] sm:$0xff] }
 0x33f   :  { %4091 = vmatprep.subr.mxu1 %v1880_v34 }
 0x340   :  { %4092 = vmatpush1.msra.mxu1 %v1879_v19  ;;  %v1464_v45 = vpop.permute.xlu0 %1463 }
 0x341   :  { %v12457_v26 = vpop.permute.xlu1 %1727  ;;  %v1486_v25 = vsel %vm1471_vm4, %v12258_v50, %v1464_v45  ;;  %v12500_v50 = vadd.f32 %v3871_v27, %v12412_v36 }
 0x342   :  { %1203 = vrot.lane.b32.xlu1 %v12191_v23, %s15953_s26  ;;  %1201 = vrot.lane.b32.xlu0 %v12093_v47, %s15953_s26  ;;  %v1749_v18 = vsel %vm1733_vm2, %v1726_v11, %v12457_v26 }
 0x343   :  { %4093 = vmatprep.subr.mxu1 %v1749_v18  ;;  %v4237_v48 = vmax.f32 %v12500_v50, 0.0 }
 0x344   :  { %4094 = vmatpush1.msra.mxu1 %v1748_v14  ;;  %v1333_v2 = vpop.permute.xlu0 %1332 }
 0x345   :  { %v12468_v31 = vpop.permute.xlu1 %1596  ;;  %v1355_v16 = vsel %vm16035_vm5, %v12270_v22, %v1333_v2  ;;  %v4238_v22 = vmax.f32 %v12507_v17, 0.0 }
 0x346   :  { %1070 = vrot.lane.b32.xlu1 %v12093_v47, %s15955_s16  ;;  %4322 = vrot.lane.b32.xlu0 %v4232_v58, %s15961_s24  ;;  %v1618_v61 = vsel %vm1602_vm3, %v1595_v10, %v12468_v31 }
 0x347   :  { %4095 = vmatprep.subr.mxu1 %v1618_v61 }
 0x348   :  { %4096 = vmatpush1.msra.mxu1 %v1617_v24 }
 0x349   :  { %v12479_v35 = vpop.permute.xlu1 %1465 }
 0x34a   :  { %939 = vrot.lane.b32.xlu1 %v12093_v47, %s15956_s18  ;;  %1072 = vrot.lane.b32.xlu0 %v12191_v23, %s15955_s16  ;;  %v1487_v42 = vsel %vm1471_vm4, %v1464_v45, %v12479_v35 }
 0x34b   :  { %4097 = vmatprep.subr.mxu1 %v1487_v42 }
 0x34c   :  { %4098 = vmatpush1.msra.mxu1 %v1486_v25 }
 0x34d   :  { %v12489_v40 = vpop.permute.xlu1 %1334 }
 0x34e   :  { %808 = vrot.lane.b32.xlu1 %v12093_v47, %s15957_s25  ;;  %941 = vrot.lane.b32.xlu0 %v12191_v23, %s15956_s18  ;;  %v1356_v21 = vsel %vm16034_vm9, %v1333_v2, %v12489_v40  ;;  %vm16038_vm9 = vcmask 760832  }
 0x34f   :  { %4099 = vmatprep.subr.mxu1 %v1356_v21  ;;  %vm16039_vm5 = vmmov %vm16038_vm9 }
 0x350   :  { %4100 = vmatpush1.msra.mxu1 %v1355_v16 }
 0x352   :  { %677 = vrot.lane.b32.xlu1 %v12093_v47, %s15958_s17  ;;  %810 = vrot.lane.b32.xlu0 %v12191_v23, %s15957_s25 }
 0x356   :  { %4332 = vrot.lane.b32.xlu1 %v4237_v48, %s15961_s24  ;;  %679 = vrot.lane.b32.xlu0 %v12191_v23, %s15958_s17 }
 0x35a   :  { %546 = vrot.lane.b32.xlu1 %v12093_v47, %s15987_s9  ;;  %4334 = vrot.lane.b32.xlu0 %v4238_v22, %s15961_s24 }
 0x35e   :  { %415 = vrot.lane.b32.xlu1 %v12093_v47, %s15971_s14  ;;  %548 = vrot.lane.b32.xlu0 %v12191_v23, %s15987_s9 }
 0x362   :  { %417 = vrot.lane.b32.xlu0 %v12191_v23, %s15971_s14  ;;  %4320 = vrot.lane.b32.xlu1 %v4231_v5, %s15961_s24 }
 0x366   :  { %1991 = vrot.lane.b32.xlu0 %v12538_v55, %s15969_s27  ;;  %1993 = vrot.lane.b32.xlu1 %v12543_v38, %s15969_s27 }
 0x36a   :  { %284 = vrot.lane.b32.xlu0 %v12093_v47, %s15959_s29  ;;  %286 = vrot.lane.b32.xlu1 %v12191_v23, %s15959_s29 }
 0x36e   :  { %1860 = vrot.lane.b32.xlu0 %v12538_v55, %s15973_s20  ;;  %1862 = vrot.lane.b32.xlu1 %v12543_v38, %s15973_s20 }
 0x372   :  { %153 = vrot.lane.b32.xlu0 %v12093_v47, %s15961_s24  ;;  %155 = vrot.lane.b32.xlu1 %v12191_v23, %s15961_s24 }
 0x375   :  { %v3942_v24 = vpop.f32.mrf.mxu0 }
 0x376   :  { %1729 = vrot.lane.b32.xlu0 %v12538_v55, %s15976_s21  ;;  %1731 = vrot.lane.b32.xlu1 %v12543_v38, %s15976_s21  ;;  %v12665_v2 = vadd.f32 %v3942_v24, %v12412_v36  ;;  %s10459_s21 = smov 58  }
 0x378   :  { %v15916_v16 = vmax.f32 %v12665_v2, 0.0 }
 0x37a   :  { %1598 = vrot.lane.b32.xlu0 %v12538_v55, %s15977_s19  ;;  %1600 = vrot.lane.b32.xlu1 %v12543_v38, %s15977_s19 }
 0x37e   :  { %3068 = vrot.lane.b32.xlu0 %v12191_v23, %s15987_s9  ;;  %3070 = vrot.lane.b32.xlu1 %v12538_v55, %s15987_s9 }
 0x382   :  { %1467 = vrot.lane.b32.xlu0 %v12538_v55, %s15978_s13  ;;  %1469 = vrot.lane.b32.xlu1 %v12543_v38, %s15978_s13 }
 0x386   :  { %2938 = vrot.lane.b32.xlu0 %v12191_v23, %s15971_s14  ;;  %2940 = vrot.lane.b32.xlu1 %v12538_v55, %s15971_s14 }
 0x38a   :  { %1336 = vrot.lane.b32.xlu0 %v12538_v55, %s15960_s30  ;;  %1338 = vrot.lane.b32.xlu1 %v12543_v38, %s15960_s30 }
 0x38e   :  { %2808 = vrot.lane.b32.xlu0 %v12191_v23, %s15959_s29  ;;  %2810 = vrot.lane.b32.xlu1 %v12538_v55, %s15959_s29 }
 0x392   :  { %1205 = vrot.lane.b32.xlu0 %v12538_v55, %s15953_s26  ;;  %1207 = vrot.lane.b32.xlu1 %v12543_v38, %s15953_s26  ;;  %s16164_s26 = sld [smem:[#allocation15_spill]] }
 0x396   :  { %2678 = vrot.lane.b32.xlu0 %v12191_v23, %s15961_s24  ;;  %2680 = vrot.lane.b32.xlu1 %v12538_v55, %s15961_s24 }
 0x39a   :  { %1074 = vrot.lane.b32.xlu0 %v12538_v55, %s15955_s16  ;;  %1076 = vrot.lane.b32.xlu1 %v12543_v38, %s15955_s16  ;;  %s16165_s16 = sld [smem:[#allocation17_spill]] }
 0x39e   :  { %943 = vrot.lane.b32.xlu0 %v12538_v55, %s15956_s18  ;;  %945 = vrot.lane.b32.xlu1 %v12543_v38, %s15956_s18 }
 0x3a2   :  { %2511 = vrot.lane.b32.xlu0 %v12093_v47, %s15962_s23  ;;  %2513 = vrot.lane.b32.xlu1 %v12191_v23, %s15962_s23 }
 0x3a6   :  { %812 = vrot.lane.b32.xlu0 %v12538_v55, %s15957_s25  ;;  %814 = vrot.lane.b32.xlu1 %v12543_v38, %s15957_s25 }
 0x3aa   :  { %2380 = vrot.lane.b32.xlu0 %v12093_v47, %s15963_s28  ;;  %2382 = vrot.lane.b32.xlu1 %v12191_v23, %s15963_s28 }
 0x3ac   :  { %v12617_v29 = vpop.permute.xlu1 %4326  ;;  %v12619_v11 = vpop.permute.xlu0 %4324 }
 0x3ae   :  { %681 = vrot.lane.b32.xlu0 %v12538_v55, %s15958_s17  ;;  %683 = vrot.lane.b32.xlu1 %v12543_v38, %s15958_s17 }
 0x3b0   :  { %v12625_v7 = vpop.permute.xlu1 %4330  ;;  %v12627_v43 = vpop.permute.xlu0 %4328 }
 0x3b2   :  { %2249 = vrot.lane.b32.xlu0 %v12093_v47, %s15954_s15  ;;  %2251 = vrot.lane.b32.xlu1 %v12191_v23, %s15954_s15  ;;  %v12646_v47 = vld [vmem:[%s15850_s0 + $0x78] sm:$0xff] }
 0x3b4   :  { %v12633_v34 = vpop.permute.xlu1 %1203  ;;  %v1202_v19 = vpop.permute.xlu0 %1201 }
 0x3b5   :  { %v1225_v10 = vsel %vm16036_vm6, %v1202_v19, %v12633_v34  ;;  %v1224_v18 = vsel %vm16037_vm10, %v12282_v1, %v1202_v19  ;;  %vm16040_vm6 = vcmask 769024  }
 0x3b6   :  { %550 = vrot.lane.b32.xlu0 %v12538_v55, %s15987_s9  ;;  %552 = vrot.lane.b32.xlu1 %v12543_v38, %s15987_s9  ;;  %vm16041_vm10 = vmmov %vm16040_vm6 }
 0x3b7   :  { %4101 = vmatprep.subr.mxu1 %v1225_v10 }
 0x3b8   :  { %4102 = vmatpush1.msra.mxu1 %v1224_v18  ;;  %v1071_v14 = vpop.permute.xlu1 %1070  ;;  %v12648_v45 = vpop.permute.xlu0 %4322 }
 0x3b9   :  { %v1093_v25 = vsel %vm16039_vm5, %v12294_v8, %v1071_v14 }
 0x3ba   :  { %2118 = vrot.lane.b32.xlu0 %v12646_v47, %s15966_s22  ;;  %2120 = vrot.lane.b32.xlu1 %v12191_v23, %s15966_s22 }
 0x3bc   :  { %v940_v61 = vpop.permute.xlu1 %939  ;;  %v12654_v42 = vpop.permute.xlu0 %1072 }
 0x3bd   :  { %v1094_v1 = vsel %vm16038_vm9, %v1071_v14, %v12654_v42  ;;  %v962_v8 = vsel %vm16041_vm10, %v12306_v60, %v940_v61  ;;  %vm16042_vm9 = vcmask 777216  }
 0x3be   :  { %419 = vrot.lane.b32.xlu0 %v12538_v55, %s15971_s14  ;;  %421 = vrot.lane.b32.xlu1 %v12543_v38, %s15971_s14  ;;  %vm16043_vm5 = vmmov %vm16042_vm9 }
 0x3bf   :  { %4103 = vmatprep.subr.mxu1 %v1094_v1 }
 0x3c0   :  { %4104 = vmatpush1.msra.mxu1 %v1093_v25  ;;  %v809_v23 = vpop.permute.xlu1 %808  ;;  %v12667_v27 = vpop.permute.xlu0 %941 }
 0x3c1   :  { %v963_v21 = vsel %vm16040_vm6, %v940_v61, %v12667_v27  ;;  %v831_v60 = vsel %vm16043_vm5, %v12315_v53, %v809_v23  ;;  %vm16044_vm6 = vcmask 785408   ;;  %v3018_v53 = vld [vmem:[%s15850_s0 + $0x98] sm:$0xff]  ;;  %v3944_v25 = vpop.f32.mrf.mxu0  ;;  %vm16050_vm5 = vcmask 760832  }
 0x3c2   :  { %288 = vrot.lane.b32.xlu0 %v12538_v55, %s15959_s29  ;;  %290 = vrot.lane.b32.xlu1 %v12543_v38, %s15959_s29  ;;  %vm16045_vm10 = vmmov %vm16044_vm6 }
 0x3c3   :  { %4105 = vmatprep.subr.mxu1 %v963_v21  ;;  %v12710_v21 = vadd.f32 %v3944_v25, %v12412_v36 }
 0x3c4   :  { %4106 = vmatpush1.msra.mxu1 %v962_v8  ;;  %v678_v37 = vpop.permute.xlu1 %677  ;;  %v12678_v19 = vpop.permute.xlu0 %810 }
 0x3c5   :  { %v832_v10 = vsel %vm16042_vm9, %v809_v23, %v12678_v19  ;;  %v700_v24 = vsel %vm16045_vm10, %v12321_v15, %v678_v37  ;;  %vm16052_vm10 = vcmask 769024  }
 0x3c6   :  { %4336 = vrot.lane.b32.xlu0 %v15916_v16, %s15961_s24  ;;  %157 = vrot.lane.b32.xlu1 %v12538_v55, %s15961_s24 }
 0x3c7   :  { %4107 = vmatprep.subr.mxu1 %v832_v10 }
 0x3c8   :  { %4108 = vmatpush1.msra.mxu1 %v831_v60  ;;  %v12689_v18 = vpop.permute.xlu1 %4332  ;;  %v12691_v14 = vpop.permute.xlu0 %679  ;;  %v15917_v60 = vmax.f32 %v12710_v21, 0.0 }
 0x3c9   :  { %v701_v61 = vsel %vm16044_vm6, %v678_v37, %v12691_v14  ;;  %vm16051_vm6 = vmmov %vm16050_vm5 }
 0x3ca   :  { %159 = vrot.lane.b32.xlu0 %v12543_v38, %s15961_s24  ;;  %3072 = vrot.lane.b32.xlu1 %v12543_v38, %s15987_s9 }
 0x3cb   :  { %4109 = vmatprep.subr.mxu1 %v701_v61 }
 0x3cc   :  { %4110 = vmatpush1.msra.mxu1 %v700_v24  ;;  %v547_v1 = vpop.permute.xlu1 %546  ;;  %v12704_v23 = vpop.permute.xlu0 %4334 }
 0x3cd   :  { %v569_v37 = vsel %vm554_vm12, %v12327_v52, %v547_v1 }
 0x3ce   :  { %3074 = vrot.lane.b32.xlu0 %v3018_v53, %s15987_s9  ;;  %2942 = vrot.lane.b32.xlu1 %v12543_v38, %s15971_s14 }
 0x3d0   :  { %v416_v8 = vpop.permute.xlu1 %415  ;;  %v12712_v10 = vpop.permute.xlu0 %548 }
 0x3d1   :  { %v570_v15 = vsel %vm554_vm12, %v547_v1, %v12712_v10  ;;  %v438_v52 = vsel %vm423_vm13, %v12333_v62, %v416_v8 }
 0x3d2   :  { %2944 = vrot.lane.b32.xlu0 %v3018_v53, %s15971_s14  ;;  %2812 = vrot.lane.b32.xlu1 %v12543_v38, %s15959_s29 }
 0x3d3   :  { %4111 = vmatprep.subr.mxu1 %v570_v15  ;;  %v4013_v15 = vpop.f32.mrf.mxu1 }
 0x3d4   :  { %4112 = vmatpush1.msra.mxu1 %v569_v37  ;;  %v12722_v61 = vpop.permute.xlu1 %4320  ;;  %v12724_v24 = vpop.permute.xlu0 %417 }
 0x3d5   :  { %v439_v25 = vsel %vm423_vm13, %v416_v8, %v12724_v24 }
 0x3d6   :  { %2814 = vrot.lane.b32.xlu0 %v3018_v53, %s15959_s29  ;;  %4338 = vrot.lane.b32.xlu1 %v15917_v60, %s15961_s24  ;;  %v4015_v60 = vpop.f32.mrf.mxu1 }
 0x3d7   :  { %4113 = vmatprep.subr.mxu1 %v439_v25 }
 0x3d8   :  { %4114 = vmatpush1.msra.mxu1 %v438_v52  ;;  %v1994_v1 = vpop.permute.xlu1 %1993  ;;  %v1992_v37 = vpop.permute.xlu0 %1991 }
 0x3d9   :  { %v2013_v0 = vsel %vm1995_vm0, %v1992_v37, %v1994_v1  ;;  %v2012_v16 = vsel %vm1995_vm0, %v12428_v49, %v1992_v37  ;;  %v12754_v49 = vadd.f32 %v4015_v60, %v12412_v36  ;;  %vm16046_vm0 = vcmask 523264  }
 0x3da   :  { %2682 = vrot.lane.b32.xlu0 %v12543_v38, %s15961_s24  ;;  %2684 = vrot.lane.b32.xlu1 %v3018_v53, %s15961_s24 }
 0x3db   :  { %4160 = vmatprep.subr.mxu0 %v2013_v0  ;;  %v12751_v0 = vadd.f32 %v4013_v15, %v12412_v36  ;;  %v15918_v60 = vmax.f32 %v12754_v49, 0.0 }
 0x3dc   :  { %4161 = vmatpush1.msra.mxu0 %v2012_v16  ;;  %v12740_v25 = vpop.permute.xlu1 %286  ;;  %v285_v62 = vpop.permute.xlu0 %284 }
 0x3dd   :  { %v308_v53 = vsel %vm292_vm14, %v285_v62, %v12740_v25  ;;  %v307_v8 = vsel %vm292_vm14, %v12339_v4, %v285_v62  ;;  %v4241_v15 = vmax.f32 %v12751_v0, 0.0 }
 0x3de   :  { %2515 = vrot.lane.b32.xlu0 %v12538_v55, %s15962_s23  ;;  %2517 = vrot.lane.b32.xlu1 %v12543_v38, %s15962_s23  ;;  %s10457_s23 = smov 122  }
 0x3df   :  { %4115 = vmatprep.subr.mxu1 %v308_v53 }
 0x3e0   :  { %4116 = vmatpush1.msra.mxu1 %v307_v8  ;;  %v1863_v16 = vpop.permute.xlu1 %1862  ;;  %v1861_v52 = vpop.permute.xlu0 %1860 }
 0x3e1   :  { %v1882_v1 = vsel %vm1864_vm1, %v1861_v52, %v1863_v16  ;;  %v1881_v4 = vsel %vm1864_vm1, %v12442_v33, %v1861_v52  ;;  %v63_v16 = vld [vmem:[%s15850_s0 + $0x70] sm:$0xff]  ;;  %v4358_v52 = vsel %vm161_vm15, %v12619_v11, %v12617_v29 }
 0x3e2   :  { %2384 = vrot.lane.b32.xlu0 %v12538_v55, %s15963_s28  ;;  %2386 = vrot.lane.b32.xlu1 %v12543_v38, %s15963_s28  ;;  %s10458_s28 = smov 56  }
 0x3e3   :  { %4162 = vmatprep.subr.mxu0 %v1882_v1  ;;  %v4359_v1 = vsel %vm161_vm15, %v12617_v29, %v12627_v43 }
 0x3e4   :  { %4163 = vmatpush1.msra.mxu0 %v1881_v4  ;;  %v12765_v37 = vpop.permute.xlu1 %155  ;;  %v154_v62 = vpop.permute.xlu0 %153  ;;  %v12800_v29 = vmax.f32 %v4234_v6, %v4359_v1 }
 0x3e5   :  { %v177_v33 = vsel %vm161_vm15, %v154_v62, %v12765_v37  ;;  %v176_v53 = vsel %vm161_vm15, %v12345_v12, %v154_v62 }
 0x3e6   :  { %4340 = vrot.lane.b32.xlu0 %v4241_v15, %s15961_s24  ;;  %4342 = vrot.lane.b32.xlu1 %v15918_v60, %s15961_s24  ;;  %v4360_v60 = vsel %vm161_vm15, %v12627_v43, %v12625_v7 }
 0x3e7   :  { %4117 = vmatprep.subr.mxu1 %v177_v33  ;;  %v12796_v33 = vmax.f32 %v4233_v39, %v4358_v52  ;;  %v12814_v6 = vmax.f32 %v4235_v51, %v4360_v60  ;;  %v4361_v60 = vsel %vm161_vm15, %v12625_v7, %v12689_v18 }
 0x3e8   :  { %4118 = vmatpush1.msra.mxu1 %v176_v53  ;;  %v1732_v8 = vpop.permute.xlu1 %1731  ;;  %v1730_v4 = vpop.permute.xlu0 %1729 }
 0x3e9   :  { %4119 = vmatprep.subr.mxu1 %v12646_v47  ;;  %v1751_v12 = vsel %vm1733_vm2, %v1730_v4, %v1732_v8  ;;  %v1750_v62 = vsel %vm1733_vm2, %v12457_v26, %v1730_v4  ;;  %v4357_v26 = vsel %vm161_vm15, %v12648_v45, %v12619_v11  ;;  %vm16047_vm2 = vmmov %vm16046_vm0 }
 0x3ea   :  { %2253 = vrot.lane.b32.xlu0 %v12538_v55, %s15954_s15  ;;  %2255 = vrot.lane.b32.xlu1 %v12543_v38, %s15954_s15  ;;  %v12831_v51 = vmax.f32 %v4232_v58, %v4357_v26  ;;  %v12848_v58 = vmax.f32 %v4236_v30, %v4361_v60 }
 0x3eb   :  { %4164 = vmatprep.subr.mxu0 %v1751_v12  ;;  %4120 = vmatpush1.msra.mxu1 %v63_v16  ;;  %v4362_v16 = vsel %vm161_vm15, %v12689_v18, %v12704_v23  ;;  %v4356_v12 = vsel %vm161_vm15, %v12722_v61, %v12648_v45 }
 0x3ec   :  { %4165 = vmatpush1.msra.mxu0 %v1750_v62  ;;  %v1601_v53 = vpop.permute.xlu1 %1600  ;;  %v1599_v8 = vpop.permute.xlu0 %1598  ;;  %v12852_v7 = vmax.f32 %v4237_v48, %v4362_v16  ;;  %v12872_v50 = vmax.f32 %v4231_v5, %v4356_v12 }
 0x3ed   :  { %v1620_v13 = vsel %vm1602_vm3, %v1599_v8, %v1601_v53  ;;  %v1619_v54 = vsel %vm1602_vm3, %v12468_v31, %v1599_v8 }
 0x3ee   :  { %4448 = vrot.lane.b32.xlu0 %v12796_v33, %s15958_s17  ;;  %4450 = vrot.lane.b32.xlu1 %v12800_v29, %s15958_s17 }
 0x3ef   :  { %4166 = vmatprep.subr.mxu0 %v1620_v13 }
 0x3f0   :  { %4167 = vmatpush1.msra.mxu0 %v1619_v54  ;;  %v12816_v39 = vpop.permute.xlu1 %3070  ;;  %v3069_v43 = vpop.permute.xlu0 %3068 }
 0x3f1   :  { %v3091_v31 = vsel %vm554_vm12, %v3069_v43, %v12816_v39  ;;  %v3090_v63 = vsel %vm554_vm12, %v12351_v28, %v3069_v43  ;;  %v4084_v52 = vpop.f32.mrf.mxu0 }
 0x3f2   :  { %4452 = vrot.lane.b32.xlu0 %v12814_v6, %s15958_s17  ;;  %2122 = vrot.lane.b32.xlu1 %v12538_v55, %s15966_s22  ;;  %v12855_v18 = vadd.f32 %v4084_v52, %v12412_v36 }
 0x3f3   :  { %4135 = vmatprep.subr.mxu1 %v3091_v31 }
 0x3f4   :  { %4136 = vmatpush2.msra.mxu1 %v3090_v63  ;;  %v1470_v11 = vpop.permute.xlu1 %1469  ;;  %v1468_v1 = vpop.permute.xlu0 %1467  ;;  %v4243_v48 = vmax.f32 %v12855_v18, 0.0 }
 0x3f5   :  { %v1489_v28 = vsel %vm1471_vm4, %v1468_v1, %v1470_v11  ;;  %v1488_v20 = vsel %vm1471_vm4, %v12479_v35, %v1468_v1  ;;  %vm16048_vm4 = vcmask 752640   ;;  %v12901_v11 = vld [vmem:[%s15850_s0 + $0x80] sm:$0xff] }
 0x3f6   :  { %2124 = vrot.lane.b32.xlu0 %v12543_v38, %s15966_s22  ;;  %4446 = vrot.lane.b32.xlu1 %v12831_v51, %s15958_s17  ;;  %vm16049_vm9 = vmmov %vm16048_vm4 }
 0x3f7   :  { %4168 = vmatprep.subr.mxu0 %v1489_v28 }
 0x3f8   :  { %4169 = vmatpush1.msra.mxu0 %v1488_v20  ;;  %v12857_v4 = vpop.permute.xlu1 %2940  ;;  %v2939_v35 = vpop.permute.xlu0 %2938 }
 0x3f9   :  { %v2961_v3 = vsel %vm423_vm13, %v2939_v35, %v12857_v4  ;;  %v2960_v30 = vsel %vm423_vm13, %v12359_v57, %v2939_v35 }
 0x3fa   :  { %4454 = vrot.lane.b32.xlu0 %v12848_v58, %s15958_s17  ;;  %4456 = vrot.lane.b32.xlu1 %v12852_v7, %s15958_s17 }
 0x3fb   :  { %4137 = vmatprep.subr.mxu1 %v2961_v3 }
 0x3fc   :  { %4138 = vmatpush2.msra.mxu1 %v2960_v30  ;;  %v1339_v45 = vpop.permute.xlu1 %1338  ;;  %v1337_v61 = vpop.permute.xlu0 %1336 }
 0x3fd   :  { %v1358_v62 = vsel %vm16046_vm0, %v1337_v61, %v1339_v45  ;;  %v1357_v57 = vsel %vm16047_vm2, %v12489_v40, %v1337_v61  ;;  %vm16053_vm0 = vmmov %vm16052_vm10  ;;  %vm16054_vm2 = vcmask 228352  }
 0x3fe   :  { %4344 = vrot.lane.b32.xlu1 %v4243_v48, %s15961_s24  ;;  %4444 = vrot.lane.b32.xlu0 %v12872_v50, %s15958_s17 }
 0x3ff   :  { %4170 = vmatprep.subr.mxu0 %v1358_v62 }
 0x400   :  { %4171 = vmatpush1.msra.mxu0 %v1357_v57  ;;  %v12883_v32 = vpop.permute.xlu1 %2810  ;;  %v2809_v5 = vpop.permute.xlu0 %2808 }
 0x401   :  { %v2831_v53 = vsel %vm292_vm14, %v2809_v5, %v12883_v32  ;;  %v2830_v8 = vsel %vm292_vm14, %v12365_v56, %v2809_v5 }
 0x402   :  { %4139 = vmatprep.subr.mxu1 %v2831_v53 }
 0x403   :  { %4140 = vmatpush2.msra.mxu1 %v2830_v8 }
 0x404   :  { %v1208_v13 = vpop.permute.xlu1 %1207  ;;  %v1206_v54 = vpop.permute.xlu0 %1205 }
 0x405   :  { %v1227_v26 = vsel %vm16048_vm4, %v1206_v54, %v1208_v13  ;;  %v1226_v40 = vsel %vm16049_vm9, %v12633_v34, %v1206_v54  ;;  %vm16055_vm4 = vmmov %vm16054_vm2  ;;  %vm16056_vm9 = vcmask 777216  }
 0x406   :  { %4172 = vmatprep.subr.mxu0 %v1227_v26 }
 0x407   :  { %4173 = vmatpush1.msra.mxu0 %v1226_v40 }
 0x408   :  { %v12892_v43 = vpop.permute.xlu1 %2680  ;;  %v2679_v31 = vpop.permute.xlu0 %2678 }
 0x409   :  { %v2701_v63 = vsel %vm161_vm15, %v2679_v31, %v12892_v43  ;;  %v2700_v56 = vsel %vm161_vm15, %v12371_v9, %v2679_v31 }
 0x40a   :  { %4141 = vmatprep.subr.mxu1 %v2701_v63 }
 0x40b   :  { %4142 = vmatpush2.msra.mxu1 %v2700_v56 }
 0x40c   :  { %v1077_v60 = vpop.permute.xlu1 %1076  ;;  %v1075_v34 = vpop.permute.xlu0 %1074  ;;  %4143 = vmatprep.subr.mxu1 %v12901_v11 }
 0x40d   :  { %v1096_v16 = vsel %vm16050_vm5, %v1075_v34, %v1077_v60  ;;  %v1095_v52 = vsel %vm16051_vm6, %v12654_v42, %v1075_v34  ;;  %4144 = vmatpush2.msra.mxu1 %v12646_v47  ;;  %vm16057_vm5 = vmmov %vm16056_vm9  ;;  %vm16058_vm6 = vcmask 236544  }
 0x40e   :  { %4174 = vmatprep.subr.mxu0 %v1096_v16 }
 0x40f   :  { %4175 = vmatpush1.msra.mxu0 %v1095_v52 }
 0x410   :  { %v946_v9 = vpop.permute.xlu1 %945  ;;  %v944_v1 = vpop.permute.xlu0 %943 }
 0x411   :  { %v965_v28 = vsel %vm16052_vm10, %v944_v1, %v946_v9  ;;  %v964_v20 = vsel %vm16053_vm0, %v12667_v27, %v944_v1  ;;  %vm16059_vm10 = vmmov %vm16058_vm6  ;;  %vm16060_vm0 = vcmask 785408   ;;  %v12947_v9 = vld [vmem:[%s15851_s1] sm:$0xff]  ;;  %s10456_s1 = smov 120  }
 0x412   :  { %4176 = vmatprep.subr.mxu0 %v965_v28 }
 0x413   :  { %4177 = vmatpush1.msra.mxu0 %v964_v20 }
 0x414   :  { %v12911_v12 = vpop.permute.xlu1 %2513  ;;  %v2512_v35 = vpop.permute.xlu0 %2511 }
 0x415   :  { %v2535_v3 = vsel %vm16054_vm2, %v2512_v35, %v12911_v12  ;;  %v2534_v47 = vsel %vm16055_vm4, %v12380_v41, %v2512_v35  ;;  %vm16061_vm2 = vmmov %vm16060_vm0 }
 0x416   :  { %4145 = vmatprep.subr.mxu1 %v2535_v3 }
 0x417   :  { %4146 = vmatpush2.msra.mxu1 %v2534_v47 }
 0x418   :  { %v815_v42 = vpop.permute.xlu1 %814  ;;  %v813_v30 = vpop.permute.xlu0 %812 }
 0x419   :  { %v834_v45 = vsel %vm16056_vm9, %v813_v30, %v815_v42  ;;  %v833_v27 = vsel %vm16057_vm5, %v12678_v19, %v813_v30  ;;  %vm16064_vm9 = vmmov %vm16058_vm6 }
 0x41a   :  { %4178 = vmatprep.subr.mxu0 %v834_v45  ;;  %vm16065_vm5 = vmmov %vm16058_vm6 }
 0x41b   :  { %4179 = vmatpush1.msra.mxu0 %v833_v27 }
 0x41c   :  { %v12920_v61 = vpop.permute.xlu1 %2382  ;;  %v2381_v62 = vpop.permute.xlu0 %2380 }
 0x41d   :  { %v2404_v57 = vsel %vm16058_vm6, %v2381_v62, %v12920_v61  ;;  %v2403_v41 = vsel %vm16059_vm10, %v12387_v44, %v2381_v62  ;;  %vm16067_vm6 = vmmov %vm16060_vm0 }
 0x41e   :  { %4147 = vmatprep.subr.mxu1 %v2404_v57  ;;  %vm16068_vm10 = vmmov %vm16060_vm0 }
 0x41f   :  { %4148 = vmatpush2.msra.mxu1 %v2403_v41 }
 0x420   :  { %v684_v5 = vpop.permute.xlu1 %683  ;;  %v682_v53 = vpop.permute.xlu0 %681 }
 0x421   :  { %v703_v8 = vsel %vm16060_vm0, %v682_v53, %v684_v5  ;;  %v702_v19 = vsel %vm16061_vm2, %v12691_v14, %v682_v53  ;;  %vm16071_vm2 = vmmov %vm16060_vm0 }
 0x422   :  { %4180 = vmatprep.subr.mxu0 %v703_v8 }
 0x423   :  { %4181 = vmatpush1.msra.mxu0 %v702_v19  ;;  %v16062_v19 = vmax.f32 %v12665_v2, 0.0 }
 0x424   :  { %v12929_v13 = vpop.permute.xlu1 %2251  ;;  %v2250_v54 = vpop.permute.xlu0 %2249 }
 0x425   :  { %v2273_v26 = vsel %vm2257_vm8, %v2250_v54, %v12929_v13  ;;  %v2272_v44 = vsel %vm2257_vm8, %v12393_v46, %v2250_v54 }
 0x426   :  { %4149 = vmatprep.subr.mxu1 %v2273_v26 }
 0x427   :  { %4150 = vmatpush2.msra.mxu1 %v2272_v44 }
 0x428   :  { %v553_v40 = vpop.permute.xlu1 %552  ;;  %v551_v31 = vpop.permute.xlu0 %550 }
 0x429   :  { %v572_v63 = vsel %vm554_vm12, %v551_v31, %v553_v40  ;;  %v571_v14 = vsel %vm554_vm12, %v12712_v10, %v551_v31 }
 0x42a   :  { %4182 = vmatprep.subr.mxu0 %v572_v63 }
 0x42b   :  { %4183 = vmatpush1.msra.mxu0 %v571_v14 }
 0x42c   :  { %v12938_v56 = vpop.permute.xlu1 %2120  ;;  %v2119_v60 = vpop.permute.xlu0 %2118 }
 0x42d   :  { %v2142_v34 = vsel %vm2126_vm7, %v2119_v60, %v12938_v56  ;;  %v2141_v46 = vsel %vm2126_vm7, %v12401_v59, %v2119_v60 }
 0x42e   :  { %4151 = vmatprep.subr.mxu1 %v2142_v34 }
 0x42f   :  { %4152 = vmatpush2.msra.mxu1 %v2141_v46 }
 0x430   :  { %v422_v16 = vpop.permute.xlu1 %421  ;;  %v420_v52 = vpop.permute.xlu0 %419  ;;  %4154 = vmatmul.mubr.f32.vlgmr.msra.gmra.mxu1 %v12947_v9 }
 0x431   :  { %v441_v10 = vsel %vm423_vm13, %v420_v52, %v422_v16  ;;  %v440_v1 = vsel %vm423_vm13, %v12724_v24, %v420_v52 }
 0x432   :  { %4184 = vmatprep.subr.mxu0 %v441_v10 }
 0x433   :  { %4185 = vmatpush1.msra.mxu0 %v440_v1 }
 0x434   :  { %v291_v28 = vpop.permute.xlu1 %290  ;;  %v289_v59 = vpop.permute.xlu0 %288 }
 0x435   :  { %v310_v20 = vsel %vm292_vm14, %v289_v59, %v291_v28  ;;  %v309_v35 = vsel %vm292_vm14, %v12740_v25, %v289_v59 }
 0x436   :  { %4186 = vmatprep.subr.mxu0 %v310_v20 }
 0x437   :  { %4187 = vmatpush1.msra.mxu0 %v309_v35 }
 0x438   :  { %v158_v3 = vpop.permute.xlu1 %157  ;;  %v4337_v47 = vpop.permute.xlu0 %4336 }
 0x439   :  { %v4363_v42 = vsel %vm161_vm15, %v12704_v23, %v4337_v47  ;;  %v178_v25 = vsel %vm161_vm15, %v12765_v37, %v158_v3 }
 0x43a   :  { %v12960_v30 = vmax.f32 %v4238_v22, %v4363_v42 }
 0x43c   :  { %v3073_v24 = vpop.permute.xlu1 %3072  ;;  %v160_v45 = vpop.permute.xlu0 %159  ;;  %4458 = vrot.lane.b32.xlu0 %v12960_v30, %s15958_s17 }
 0x43d   :  { %v179_v27 = vsel %vm161_vm15, %v158_v3, %v160_v45  ;;  %v3092_v22 = vsel %vm554_vm12, %v12816_v39, %v3073_v24 }
 0x43e   :  { %4188 = vmatprep.subr.mxu0 %v179_v27 }
 0x43f   :  { %4189 = vmatpush1.msra.mxu0 %v178_v25 }
 0x440   :  { %v2943_v62 = vpop.permute.xlu1 %2942  ;;  %v3075_v57 = vpop.permute.xlu0 %3074  ;;  %4190 = vmatprep.subr.mxu0 %v12538_v55 }
 0x441   :  { %4191 = vmatpush1.msra.mxu0 %v12901_v11  ;;  %v3093_v17 = vsel %vm554_vm12, %v3073_v24, %v3075_v57  ;;  %v2962_v37 = vsel %vm423_vm13, %v12857_v4, %v2943_v62 }
 0x442   :  { %4206 = vmatprep.subr.mxu0 %v3093_v17 }
 0x443   :  { %4207 = vmatpush2.msra.mxu0 %v3092_v22 }
 0x444   :  { %v2813_v23 = vpop.permute.xlu1 %2812  ;;  %v2945_v41 = vpop.permute.xlu0 %2944 }
 0x445   :  { %v2963_v5 = vsel %vm423_vm13, %v2943_v62, %v2945_v41  ;;  %v2832_v26 = vsel %vm292_vm14, %v12883_v32, %v2813_v23  ;;  %vm16063_vm13 = vmmov %vm16055_vm4 }
 0x446   :  { %4208 = vmatprep.subr.mxu0 %v2963_v5 }
 0x447   :  { %4209 = vmatpush2.msra.mxu0 %v2962_v37 }
 0x448   :  { %v4339_v53 = vpop.permute.xlu1 %4338  ;;  %v2815_v8 = vpop.permute.xlu0 %2814 }
 0x449   :  { %v4364_v11 = vsel %vm161_vm15, %v4337_v47, %v4339_v53  ;;  %v2833_v39 = vsel %vm292_vm14, %v2813_v23, %v2815_v8 }
 0x44a   :  { %v12978_v54 = vmax.f32 %v16062_v19, %v4364_v11  ;;  %4210 = vmatprep.subr.mxu0 %v2833_v39 }
 0x44b   :  { %4211 = vmatpush2.msra.mxu0 %v2832_v26 }
 0x44c   :  { %4460 = vrot.lane.b32.xlu1 %v12978_v54, %s15958_s17  ;;  %v2685_v4 = vpop.permute.xlu1 %2684  ;;  %v2683_v44 = vpop.permute.xlu0 %2682 }
 0x44d   :  { %v2703_v40 = vsel %vm161_vm15, %v2683_v44, %v2685_v4  ;;  %v2702_v31 = vsel %vm161_vm15, %v12892_v43, %v2683_v44  ;;  %v16074_v44 = vmax.f32 %v12754_v49, 0.0 }
 0x44e   :  { %4212 = vmatprep.subr.mxu0 %v2703_v40 }
 0x44f   :  { %4213 = vmatpush2.msra.mxu0 %v2702_v31 }
 0x450   :  { %v2518_v2 = vpop.permute.xlu1 %2517  ;;  %v2516_v63 = vpop.permute.xlu0 %2515  ;;  %4214 = vmatprep.subr.mxu0 %v12543_v38 }
 0x451   :  { %4215 = vmatpush2.msra.mxu0 %v12538_v55  ;;  %v2537_v32 = vsel %vm16063_vm13, %v2516_v63, %v2518_v2  ;;  %v2536_v14 = vsel %vm16055_vm4, %v12911_v12, %v2516_v63  ;;  %v16066_v12 = vmax.f32 %v12710_v21, 0.0  ;;  %vm16072_vm13 = vcmask 523264  }
 0x452   :  { %4216 = vmatprep.subr.mxu0 %v2537_v32  ;;  %vm16073_vm4 = vmmov %vm16072_vm13 }
 0x453   :  { %4217 = vmatpush2.msra.mxu0 %v2536_v14 }
 0x454   :  { %v2387_v60 = vpop.permute.xlu1 %2386  ;;  %v2385_v34 = vpop.permute.xlu0 %2384 }
 0x455   :  { %v2406_v46 = vsel %vm16064_vm9, %v2385_v34, %v2387_v60  ;;  %v2405_v43 = vsel %vm16065_vm5, %v12920_v61, %v2385_v34  ;;  %vm4943_vm9 = vcmask 982016   ;;  %vm4840_vm5 = vcmask 998400  }
 0x456   :  { %4218 = vmatprep.subr.mxu0 %v2406_v46 }
 0x457   :  { %4219 = vmatpush2.msra.mxu0 %v2405_v43 }
 0x458   :  { %v12996_v16 = vpop.permute.xlu1 %4342  ;;  %v4341_v38 = vpop.permute.xlu0 %4340 }
 0x459   :  { %v4365_v55 = vsel %vm161_vm15, %v4339_v53, %v4341_v38  ;;  %v4366_v52 = vsel %vm161_vm15, %v4341_v38, %v12996_v16 }
 0x45a   :  { %v13003_v10 = vmax.f32 %v16066_v12, %v4365_v55  ;;  %v13007_v1 = vmax.f32 %v4241_v15, %v4366_v52 }
 0x45c   :  { %v2256_v28 = vpop.permute.xlu1 %2255  ;;  %v2254_v61 = vpop.permute.xlu0 %2253  ;;  %4462 = vrot.lane.b32.xlu0 %v13003_v10, %s15958_s17  ;;  %4464 = vrot.lane.b32.xlu1 %v13007_v1, %s15958_s17 }
 0x45d   :  { %v2275_v59 = vsel %vm2257_vm8, %v2254_v61, %v2256_v28  ;;  %v2274_v20 = vsel %vm2257_vm8, %v12929_v13, %v2254_v61  ;;  %vm16069_vm8 = vmmov %vm16060_vm0 }
 0x45e   :  { %4220 = vmatprep.subr.mxu0 %v2275_v59 }
 0x45f   :  { %4221 = vmatpush2.msra.mxu0 %v2274_v20 }
 0x460   :  { %v4451_v21 = vpop.permute.xlu1 %4450  ;;  %v4449_v35 = vpop.permute.xlu0 %4448 }
 0x461   :  { %v4482_v0 = vsel %vm16067_vm6, %v4449_v35, %v4451_v21  ;;  %vm16075_vm6 = vmmov %vm16073_vm4 }
 0x462   :  { %v13018_v15 = vmax.f32 %v12796_v33, %v4482_v0 }
 0x464   :  { %v2123_v3 = vpop.permute.xlu1 %2122  ;;  %v4453_v47 = vpop.permute.xlu0 %4452  ;;  %5966 = vrot.lane.b32.xlu0 %v13018_v15, %s15960_s30 }
 0x465   :  { %v4483_v42 = vsel %vm16068_vm10, %v4451_v21, %v4453_v47  ;;  %v2143_v62 = vsel %vm2126_vm7, %v12938_v56, %v2123_v3  ;;  %vm16076_vm10 = vmmov %vm16073_vm4 }
 0x466   :  { %v13024_v24 = vmax.f32 %v12800_v29, %v4483_v42 }
 0x468   :  { %v4447_v13 = vpop.permute.xlu1 %4446  ;;  %v2125_v45 = vpop.permute.xlu0 %2124  ;;  %5968 = vrot.lane.b32.xlu1 %v13024_v24, %s15960_s30 }
 0x469   :  { %v4481_v27 = vsel %vm16069_vm8, %v4447_v13, %v4449_v35  ;;  %v2144_v25 = vsel %vm2126_vm7, %v2123_v3, %v2125_v45  ;;  %vm16070_vm7 = vmmov %vm16060_vm0  ;;  %vm5455_vm8 = vcmask 457728  }
 0x46a   :  { %v13030_v33 = vmax.f32 %v12831_v51, %v4481_v27  ;;  %4222 = vmatprep.subr.mxu0 %v2144_v25 }
 0x46b   :  { %4223 = vmatpush2.msra.mxu0 %v2143_v62 }
 0x46c   :  { %5964 = vrot.lane.b32.xlu0 %v13030_v33, %s15960_s30  ;;  %5864 = vrot.lane.b32.xlu1 %v13018_v15, %s10456_s1  ;;  %v4455_v29 = vpop.permute.xlu0 %4454  ;;  %v13057_v56 = vpop.permute.xlu1 %4456 }
 0x46d   :  { %4225 = vmatmul.mubr.f32.vlgmr.msra.gmra.mxu0 %v12947_v9  ;;  %v4484_v51 = vsel %vm16070_vm7, %v4453_v47, %v4455_v29  ;;  %v4485_v57 = vsel %vm16060_vm0, %v4455_v29, %v13057_v56  ;;  %vm5352_vm7 = vcmask 474112  }
 0x46e   :  { %v13064_v9 = vmax.f32 %v12814_v6, %v4484_v51  ;;  %v13073_v17 = vmax.f32 %v12848_v58, %v4485_v57 }
 0x470   :  { %5866 = vrot.lane.b32.xlu0 %v13024_v24, %s10456_s1  ;;  %5862 = vrot.lane.b32.xlu1 %v13030_v33, %s10456_s1  ;;  %v4445_v22 = vpop.permute.xlu0 %4444  ;;  %v13151_v58 = vpop.permute.xlu1 %4344 }
 0x471   :  { %v4480_v6 = vsel %vm16071_vm2, %v4445_v22, %v4447_v13  ;;  %v4367_v39 = vsel %vm161_vm15, %v12996_v16, %v13151_v58  ;;  %vm16077_vm2 = vmmov %vm16073_vm4 }
 0x472   :  { %v13085_v23 = vmax.f32 %v12872_v50, %v4480_v6  ;;  %v13191_v40 = vmax.f32 %v16074_v44, %v4367_v39 }
 0x474   :  { %5762 = vrot.lane.b32.xlu0 %v13018_v15, %s10457_s23  ;;  %5764 = vrot.lane.b32.xlu1 %v13024_v24, %s10457_s23 }
 0x478   :  { %5760 = vrot.lane.b32.xlu0 %v13030_v33, %s10457_s23  ;;  %5660 = vrot.lane.b32.xlu1 %v13018_v15, %s15987_s9 }
 0x47c   :  { %5662 = vrot.lane.b32.xlu0 %v13024_v24, %s15987_s9  ;;  %5658 = vrot.lane.b32.xlu1 %v13030_v33, %s15987_s9 }
 0x480   :  { %5558 = vrot.lane.b32.xlu0 %v13018_v15, %s15959_s29  ;;  %5560 = vrot.lane.b32.xlu1 %v13024_v24, %s15959_s29 }
 0x484   :  { %5556 = vrot.lane.b32.xlu0 %v13030_v33, %s15959_s29  ;;  %5970 = vrot.lane.b32.xlu1 %v13064_v9, %s15960_s30 }
 0x488   :  { %5972 = vrot.lane.b32.xlu0 %v13073_v17, %s15960_s30  ;;  %5868 = vrot.lane.b32.xlu1 %v13064_v9, %s10456_s1 }
 0x48c   :  { %5870 = vrot.lane.b32.xlu0 %v13073_v17, %s10456_s1  ;;  %5427 = vrot.lane.b32.xlu1 %v13030_v33, %s10458_s28 }
 0x490   :  { %5429 = vrot.lane.b32.xlu0 %v13018_v15, %s10458_s28  ;;  %5425 = vrot.lane.b32.xlu1 %v13085_v23, %s10458_s28 }
 0x494   :  { %5766 = vrot.lane.b32.xlu0 %v13064_v9, %s10457_s23  ;;  %5768 = vrot.lane.b32.xlu1 %v13073_v17, %s10457_s23 }
 0x498   :  { %5324 = vrot.lane.b32.xlu0 %v13030_v33, %s10459_s21  ;;  %5326 = vrot.lane.b32.xlu1 %v13018_v15, %s10459_s21 }
 0x49c   :  { %5322 = vrot.lane.b32.xlu0 %v13085_v23, %s10459_s21  ;;  %5664 = vrot.lane.b32.xlu1 %v13064_v9, %s15987_s9 }
 0x4a0   :  { %5666 = vrot.lane.b32.xlu0 %v13073_v17, %s15987_s9  ;;  %5222 = vrot.lane.b32.xlu1 %v13030_v33, %s15973_s20 }
 0x4a4   :  { %5224 = vrot.lane.b32.xlu0 %v13018_v15, %s15973_s20  ;;  %5220 = vrot.lane.b32.xlu1 %v13085_v23, %s15973_s20 }
 0x4a8   :  { %5562 = vrot.lane.b32.xlu0 %v13064_v9, %s15959_s29  ;;  %5564 = vrot.lane.b32.xlu1 %v13073_v17, %s15959_s29 }
 0x4ac   :  { %5120 = vrot.lane.b32.xlu0 %v13030_v33, %s15977_s19  ;;  %5122 = vrot.lane.b32.xlu1 %v13018_v15, %s15977_s19 }
 0x4ae   :  { %v13157_v50 = vpop.permute.xlu0 %4458 }
 0x4b0   :  { %5118 = vrot.lane.b32.xlu0 %v13085_v23, %s15977_s19  ;;  %5018 = vrot.lane.b32.xlu1 %v13030_v33, %s15960_s30 }
 0x4b4   :  { %5020 = vrot.lane.b32.xlu0 %v13018_v15, %s15960_s30  ;;  %5016 = vrot.lane.b32.xlu1 %v13085_v23, %s15960_s30 }
 0x4b8   :  { %5431 = vrot.lane.b32.xlu0 %v13024_v24, %s10458_s28  ;;  %5433 = vrot.lane.b32.xlu1 %v13064_v9, %s10458_s28 }
 0x4bc   :  { %4915 = vrot.lane.b32.xlu0 %v13030_v33, %s10456_s1  ;;  %4917 = vrot.lane.b32.xlu1 %v13018_v15, %s10456_s1 }
 0x4be   :  { %v13159_v41 = vpop.permute.xlu1 %4460 }
 0x4c0   :  { %4913 = vrot.lane.b32.xlu0 %v13085_v23, %s10456_s1  ;;  %5328 = vrot.lane.b32.xlu1 %v13024_v24, %s10459_s21 }
 0x4c4   :  { %5330 = vrot.lane.b32.xlu0 %v13064_v9, %s10459_s21  ;;  %4812 = vrot.lane.b32.xlu1 %v13030_v33, %s10457_s23 }
 0x4c8   :  { %4814 = vrot.lane.b32.xlu0 %v13018_v15, %s10457_s23  ;;  %4810 = vrot.lane.b32.xlu1 %v13085_v23, %s10457_s23 }
 0x4cc   :  { %5226 = vrot.lane.b32.xlu0 %v13024_v24, %s15973_s20  ;;  %5228 = vrot.lane.b32.xlu1 %v13064_v9, %s15973_s20 }
 0x4ce   :  { %v13165_v5 = vpop.permute.xlu0 %4462  ;;  %v13167_v37 = vpop.permute.xlu1 %4464 }
 0x4d0   :  { %4710 = vrot.lane.b32.xlu0 %v13030_v33, %s15987_s9  ;;  %4712 = vrot.lane.b32.xlu1 %v13018_v15, %s15987_s9 }
 0x4d4   :  { %4708 = vrot.lane.b32.xlu0 %v13085_v23, %s15987_s9  ;;  %5124 = vrot.lane.b32.xlu1 %v13024_v24, %s15977_s19 }
 0x4d6   :  { %v5967_v53 = vpop.permute.xlu0 %5966 }
 0x4d8   :  { %5126 = vrot.lane.b32.xlu0 %v13064_v9, %s15977_s19  ;;  %4608 = vrot.lane.b32.xlu1 %v13030_v33, %s15959_s29 }
 0x4da   :  { %v13173_v8 = vpop.permute.xlu1 %5968 }
 0x4db   :  { %v5995_v11 = vsel %vm16072_vm13, %v5967_v53, %v13173_v8  ;;  %vm16078_vm13 = vmmov %vm16077_vm2 }
 0x4dc   :  { %4610 = vrot.lane.b32.xlu0 %v13018_v15, %s15959_s29  ;;  %4606 = vrot.lane.b32.xlu1 %v13085_v23, %s15959_s29 }
 0x4dd   :  { %7252 = vmatprep.subr.mxu1 %v5995_v11  ;;  %v4486_v11 = vsel %vm16060_vm0, %v13057_v56, %v13157_v50 }
 0x4de   :  { %v5965_v19 = vpop.permute.xlu0 %5964  ;;  %v5865_v4 = vpop.permute.xlu1 %5864 }
 0x4df   :  { %v5994_v26 = vsel %vm16073_vm4, %v5965_v19, %v5967_v53  ;;  %vm16079_vm4 = vmmov %vm16060_vm0 }
 0x4e0   :  { %5022 = vrot.lane.b32.xlu0 %v13024_v24, %s15960_s30  ;;  %7253 = vmatpush1.msra.mxu1 %v5994_v26  ;;  %v13282_v26 = vmax.f32 %v12852_v7, %v4486_v11 }
 0x4e1   :  { %5024 = vrot.lane.b32.xlu1 %v13064_v9, %s15960_s30 }
 0x4e2   :  { %v5867_v31 = vpop.permute.xlu0 %5866  ;;  %v5863_v2 = vpop.permute.xlu1 %5862 }
 0x4e3   :  { %v5893_v63 = vsel %vm4943_vm9, %v5865_v4, %v5867_v31  ;;  %v5892_v32 = vsel %vm4943_vm9, %v5863_v2, %v5865_v4 }
 0x4e4   :  { %4466 = vrot.lane.b32.xlu0 %v13191_v40, %s15958_s17  ;;  %7254 = vmatprep.subr.mxu1 %v5893_v63 }
 0x4e5   :  { %4919 = vrot.lane.b32.xlu1 %v13024_v24, %s10456_s1  ;;  %7255 = vmatpush1.msra.mxu1 %v5892_v32 }
 0x4e6   :  { %v5763_v14 = vpop.permute.xlu0 %5762  ;;  %v5765_v60 = vpop.permute.xlu1 %5764 }
 0x4e7   :  { %v5791_v49 = vsel %vm4840_vm5, %v5763_v14, %v5765_v60 }
 0x4e8   :  { %4921 = vrot.lane.b32.xlu0 %v13064_v9, %s10456_s1  ;;  %7256 = vmatprep.subr.mxu1 %v5791_v49 }
 0x4e9   :  { %6810 = vrot.lane.b32.xlu1 %v13024_v24, %s10456_s1 }
 0x4ea   :  { %v5761_v34 = vpop.permute.xlu0 %5760  ;;  %v5661_v43 = vpop.permute.xlu1 %5660 }
 0x4eb   :  { %v5790_v46 = vsel %vm4840_vm5, %v5761_v34, %v5763_v14 }
 0x4ec   :  { %6812 = vrot.lane.b32.xlu0 %v13064_v9, %s10456_s1  ;;  %7257 = vmatpush1.msra.mxu1 %v5790_v46 }
 0x4ed   :  { %4816 = vrot.lane.b32.xlu1 %v13024_v24, %s10457_s23 }
 0x4ee   :  { %v13209_v16 = vpop.permute.xlu0 %5662  ;;  %v5659_v38 = vpop.permute.xlu1 %5658 }
 0x4ef   :  { %v5689_v55 = vsel %vm554_vm12, %v5661_v43, %v13209_v16  ;;  %v5688_v52 = vsel %vm554_vm12, %v5659_v38, %v5661_v43 }
 0x4f0   :  { %4818 = vrot.lane.b32.xlu0 %v13064_v9, %s10457_s23  ;;  %7258 = vmatprep.subr.mxu1 %v5689_v55 }
 0x4f1   :  { %6808 = vrot.lane.b32.xlu1 %v13018_v15, %s10456_s1  ;;  %7259 = vmatpush1.msra.mxu1 %v5688_v52 }
 0x4f2   :  { %v5559_v12 = vpop.permute.xlu0 %5558  ;;  %v13218_v28 = vpop.permute.xlu1 %5560 }
 0x4f3   :  { %v5587_v61 = vsel %vm292_vm14, %v5559_v12, %v13218_v28 }
 0x4f4   :  { %6708 = vrot.lane.b32.xlu0 %v13024_v24, %s10457_s23  ;;  %7260 = vmatprep.subr.mxu1 %v5587_v61 }
 0x4f5   :  { %6710 = vrot.lane.b32.xlu1 %v13064_v9, %s10457_s23 }
 0x4f6   :  { %v5557_v59 = vpop.permute.xlu0 %5556  ;;  %v5971_v21 = vpop.permute.xlu1 %5970 }
 0x4f7   :  { %v5586_v20 = vsel %vm292_vm14, %v5557_v59, %v5559_v12  ;;  %v5996_v47 = vsel %vm16076_vm10, %v13173_v8, %v5971_v21  ;;  %vm16081_vm10 = vmmov %vm16060_vm0 }
 0x4f8   :  { %4714 = vrot.lane.b32.xlu0 %v13024_v24, %s15987_s9  ;;  %7261 = vmatpush1.msra.mxu1 %v5586_v20  ;;  %vm16082_vm0 = vmmov %vm16077_vm2 }
 0x4f9   :  { %4716 = vrot.lane.b32.xlu1 %v13064_v9, %s15987_s9  ;;  %7262 = vmatprep.subr.mxu1 %v13018_v15 }
 0x4fa   :  { %v13232_v35 = vpop.permute.xlu0 %5972  ;;  %7263 = vmatpush1.msra.mxu1 %v13030_v33  ;;  %v5869_v0 = vpop.permute.xlu1 %5868 }
 0x4fb   :  { %v5997_v3 = vsel %vm16075_vm6, %v5971_v21, %v13232_v35  ;;  %v5894_v27 = vsel %vm4943_vm9, %v5867_v31, %v5869_v0  ;;  %vm16080_vm6 = vmmov %vm16077_vm2 }
 0x4fc   :  { %6706 = vrot.lane.b32.xlu0 %v13018_v15, %s10457_s23  ;;  %7329 = vmatprep.subr.mxu0 %v5997_v3 }
 0x4fd   :  { %6606 = vrot.lane.b32.xlu1 %v13024_v24, %s15987_s9  ;;  %7330 = vmatpush1.msra.mxu0 %v5996_v47 }
 0x4fe   :  { %v13243_v42 = vpop.permute.xlu0 %5870  ;;  %v5428_v13 = vpop.permute.xlu1 %5427 }
 0x4ff   :  { %v5895_v45 = vsel %vm4943_vm9, %v5869_v0, %v13243_v42 }
 0x500   :  { %6608 = vrot.lane.b32.xlu0 %v13064_v9, %s15987_s9  ;;  %7331 = vmatprep.subr.mxu0 %v5895_v45  ;;  %v13349_v45 = vld [vmem:[%s15853_s3 + $0x8] sm:$0xff] }
 0x501   :  { %4612 = vrot.lane.b32.xlu1 %v13024_v24, %s15959_s29  ;;  %7332 = vmatpush1.msra.mxu0 %v5894_v27 }
 0x502   :  { %v13252_v25 = vpop.permute.xlu0 %5429  ;;  %v5426_v62 = vpop.permute.xlu1 %5425  ;;  %9826 = vmatprep.mubr.msk.f32.mxu1 %vm3588_vm11, %v13349_v45  ;;  %9828 = vmatprep.mubr.msk.f32.mxu0 %vm3588_vm11, %v13349_v45 }
 0x503   :  { %v5457_v29 = vsel %vm5455_vm8, %v5428_v13, %v13252_v25  ;;  %v5456_v51 = vsel %vm5455_vm8, %v5426_v62, %v5428_v13 }
 0x504   :  { %4614 = vrot.lane.b32.xlu0 %v13064_v9, %s15959_s29  ;;  %7264 = vmatprep.subr.mxu1 %v5457_v29 }
 0x505   :  { %6604 = vrot.lane.b32.xlu1 %v13018_v15, %s15987_s9  ;;  %7265 = vmatpush1.msra.mxu1 %v5456_v51 }
 0x506   :  { %v5767_v57 = vpop.permute.xlu0 %5766  ;;  %v13261_v22 = vpop.permute.xlu1 %5768 }
 0x507   :  { %v5792_v6 = vsel %vm4840_vm5, %v5765_v60, %v5767_v57  ;;  %v5793_v53 = vsel %vm4840_vm5, %v5767_v57, %v13261_v22  ;;  %v4487_v57 = vsel %vm16079_vm4, %v13157_v50, %v13159_v41 }
 0x508   :  { %6504 = vrot.lane.b32.xlu0 %v13024_v24, %s15959_s29  ;;  %7333 = vmatprep.subr.mxu0 %v5793_v53 }
 0x509   :  { %6506 = vrot.lane.b32.xlu1 %v13064_v9, %s15959_s29  ;;  %7334 = vmatpush1.msra.mxu0 %v5792_v6 }
 0x50a   :  { %v5325_v8 = vpop.permute.xlu0 %5324  ;;  %v13273_v19 = vpop.permute.xlu1 %5326 }
 0x50b   :  { %v5354_v39 = vsel %vm5352_vm7, %v5325_v8, %v13273_v19 }
 0x50c   :  { %6502 = vrot.lane.b32.xlu0 %v13018_v15, %s15959_s29  ;;  %7266 = vmatprep.subr.mxu1 %v5354_v39 }
 0x50d   :  { %6814 = vrot.lane.b32.xlu1 %v13073_v17, %s10456_s1 }
 0x50e   :  { %v5323_v4 = vpop.permute.xlu0 %5322  ;;  %v5665_v31 = vpop.permute.xlu1 %5664 }
 0x50f   :  { %v5353_v44 = vsel %vm5352_vm7, %v5323_v4, %v5325_v8  ;;  %v5690_v7 = vsel %vm554_vm12, %v13209_v16, %v5665_v31  ;;  %v13378_v8 = vmax.f32 %v12960_v30, %v4487_v57 }
 0x510   :  { %6816 = vrot.lane.b32.xlu0 %v13282_v26, %s10456_s1  ;;  %7267 = vmatpush1.msra.mxu1 %v5353_v44 }
 0x511   :  { %6374 = vrot.lane.b32.xlu1 %v13018_v15, %s10458_s28 }
 0x512   :  { %v13289_v56 = vpop.permute.xlu0 %5666  ;;  %v5223_v2 = vpop.permute.xlu1 %5222 }
 0x513   :  { %v5691_v63 = vsel %vm554_vm12, %v5665_v31, %v13289_v56 }
 0x514   :  { %6376 = vrot.lane.b32.xlu0 %v13024_v24, %s10458_s28  ;;  %7335 = vmatprep.subr.mxu0 %v5691_v63 }
 0x515   :  { %6372 = vrot.lane.b32.xlu1 %v13030_v33, %s10458_s28  ;;  %7336 = vmatpush1.msra.mxu0 %v5690_v7 }
 0x516   :  { %v13299_v32 = vpop.permute.xlu0 %5224  ;;  %v5221_v14 = vpop.permute.xlu1 %5220 }
 0x517   :  { %v5251_v60 = vsel %vm1864_vm1, %v5223_v2, %v13299_v32  ;;  %v5250_v49 = vsel %vm1864_vm1, %v5221_v14, %v5223_v2 }
 0x518   :  { %6712 = vrot.lane.b32.xlu0 %v13073_v17, %s10457_s23  ;;  %7268 = vmatprep.subr.mxu1 %v5251_v60 }
 0x519   :  { %6714 = vrot.lane.b32.xlu1 %v13282_v26, %s10457_s23  ;;  %7269 = vmatpush1.msra.mxu1 %v5250_v49 }
 0x51a   :  { %v5563_v34 = vpop.permute.xlu0 %5562  ;;  %v13308_v46 = vpop.permute.xlu1 %5564 }
 0x51b   :  { %v5588_v43 = vsel %vm292_vm14, %v13218_v28, %v5563_v34  ;;  %v5589_v16 = vsel %vm292_vm14, %v5563_v34, %v13308_v46 }
 0x51c   :  { %6272 = vrot.lane.b32.xlu0 %v13018_v15, %s10459_s21  ;;  %7337 = vmatprep.subr.mxu0 %v5589_v16 }
 0x51d   :  { %6274 = vrot.lane.b32.xlu1 %v13024_v24, %s10459_s21  ;;  %7338 = vmatpush1.msra.mxu0 %v5588_v43 }
 0x51e   :  { %v5121_v38 = vpop.permute.xlu0 %5120  ;;  %7339 = vmatprep.subr.mxu0 %v13064_v9  ;;  %v13319_v55 = vpop.permute.xlu1 %5122 }
 0x51f   :  { %7340 = vmatpush1.msra.mxu0 %v13024_v24  ;;  %v5149_v52 = vsel %vm1602_vm3, %v5121_v38, %v13319_v55 }
 0x520   :  { %6270 = vrot.lane.b32.xlu0 %v13030_v33, %s10459_s21  ;;  %7270 = vmatprep.subr.mxu1 %v5149_v52 }
 0x521   :  { %6610 = vrot.lane.b32.xlu1 %v13073_v17, %s15987_s9 }
 0x522   :  { %v5119_v12 = vpop.permute.xlu0 %5118  ;;  %v5019_v61 = vpop.permute.xlu1 %5018 }
 0x523   :  { %v5148_v28 = vsel %vm1602_vm3, %v5119_v12, %v5121_v38 }
 0x524   :  { %6612 = vrot.lane.b32.xlu0 %v13282_v26, %s15987_s9  ;;  %7271 = vmatpush1.msra.mxu1 %v5148_v28 }
 0x525   :  { %6170 = vrot.lane.b32.xlu1 %v13018_v15, %s15973_s20 }
 0x526   :  { %v13333_v59 = vpop.permute.xlu0 %5020  ;;  %v5017_v20 = vpop.permute.xlu1 %5016 }
 0x527   :  { %v5047_v21 = vsel %vm16077_vm2, %v5019_v61, %v13333_v59  ;;  %v5046_v0 = vsel %vm16078_vm13, %v5017_v20, %v5019_v61  ;;  %vm16083_vm2 = vmmov %vm16079_vm4 }
 0x528   :  { %6172 = vrot.lane.b32.xlu0 %v13024_v24, %s15973_s20  ;;  %7272 = vmatprep.subr.mxu1 %v5047_v21  ;;  %vm16084_vm13 = vmmov %vm16082_vm0 }
 0x529   :  { %6168 = vrot.lane.b32.xlu1 %v13030_v33, %s15973_s20  ;;  %7273 = vmatpush1.msra.mxu1 %v5046_v0  ;;  %vm16085_vm4 = vmmov %vm16082_vm0 }
 0x52a   :  { %v5432_v3 = vpop.permute.xlu0 %5431  ;;  %v13342_v47 = vpop.permute.xlu1 %5433 }
 0x52b   :  { %v5458_v13 = vsel %vm5455_vm8, %v13252_v25, %v5432_v3  ;;  %v5459_v27 = vsel %vm5455_vm8, %v5432_v3, %v13342_v47 }
 0x52c   :  { %6508 = vrot.lane.b32.xlu0 %v13073_v17, %s15959_s29  ;;  %7341 = vmatprep.subr.mxu0 %v5459_v27  ;;  %v4488_v27 = vsel %vm16081_vm10, %v13159_v41, %v13165_v5  ;;  %v4489_v41 = vsel %vm16083_vm2, %v13165_v5, %v13167_v37  ;;  %vm16087_vm10 = vmmov %vm16082_vm0 }
 0x52d   :  { %6510 = vrot.lane.b32.xlu1 %v13282_v26, %s15959_s29  ;;  %7342 = vmatpush1.msra.mxu0 %v5458_v13 }
 0x52e   :  { %v4916_v25 = vpop.permute.xlu0 %4915  ;;  %v13361_v62 = vpop.permute.xlu1 %4917 }
 0x52f   :  { %v4945_v29 = vsel %vm4943_vm9, %v4916_v25, %v13361_v62 }
 0x530   :  { %6068 = vrot.lane.b32.xlu0 %v13018_v15, %s15977_s19  ;;  %7274 = vmatprep.subr.mxu1 %v4945_v29  ;;  %v13469_v29 = vmax.f32 %v13003_v10, %v4489_v41 }
 0x531   :  { %6070 = vrot.lane.b32.xlu1 %v13024_v24, %s15977_s19 }
 0x532   :  { %v4914_v51 = vpop.permute.xlu0 %4913  ;;  %v5329_v53 = vpop.permute.xlu1 %5328 }
 0x533   :  { %v4944_v6 = vsel %vm4943_vm9, %v4914_v51, %v4916_v25  ;;  %v5355_v50 = vsel %vm5352_vm7, %v13273_v19, %v5329_v53 }
 0x534   :  { %6066 = vrot.lane.b32.xlu0 %v13030_v33, %s15977_s19  ;;  %7275 = vmatpush1.msra.mxu1 %v4944_v6 }
 0x535   :  { %5974 = vrot.lane.b32.xlu1 %v13282_v26, %s15960_s30 }
 0x536   :  { %v13380_v11 = vpop.permute.xlu0 %5330  ;;  %v4813_v39 = vpop.permute.xlu1 %4812 }
 0x537   :  { %v5356_v4 = vsel %vm5352_vm7, %v5329_v53, %v13380_v11 }
 0x538   :  { %5976 = vrot.lane.b32.xlu0 %v13378_v8, %s15960_s30  ;;  %7343 = vmatprep.subr.mxu0 %v5356_v4 }
 0x539   :  { %6378 = vrot.lane.b32.xlu1 %v13064_v9, %s10458_s28  ;;  %7344 = vmatpush1.msra.mxu0 %v5355_v50 }
 0x53a   :  { %v13390_v44 = vpop.permute.xlu0 %4814  ;;  %v4811_v30 = vpop.permute.xlu1 %4810 }
 0x53b   :  { %v4842_v31 = vsel %vm4840_vm5, %v4813_v39, %v13390_v44  ;;  %v4841_v2 = vsel %vm4840_vm5, %v4811_v30, %v4813_v39 }
 0x53c   :  { %6380 = vrot.lane.b32.xlu0 %v13073_v17, %s10458_s28  ;;  %7276 = vmatprep.subr.mxu1 %v4842_v31 }
 0x53d   :  { %5872 = vrot.lane.b32.xlu1 %v13282_v26, %s10456_s1  ;;  %7277 = vmatpush1.msra.mxu1 %v4841_v2 }
 0x53e   :  { %v5227_v19 = vpop.permute.xlu0 %5226  ;;  %v13399_v63 = vpop.permute.xlu1 %5228 }
 0x53f   :  { %v5252_v7 = vsel %vm1864_vm1, %v13299_v32, %v5227_v19  ;;  %v5253_v14 = vsel %vm1864_vm1, %v5227_v19, %v13399_v63 }
 0x540   :  { %5874 = vrot.lane.b32.xlu0 %v13378_v8, %s10456_s1  ;;  %7345 = vmatprep.subr.mxu0 %v5253_v14 }
 0x541   :  { %6276 = vrot.lane.b32.xlu1 %v13064_v9, %s10459_s21  ;;  %7346 = vmatpush1.msra.mxu0 %v5252_v7 }
 0x542   :  { %v4711_v60 = vpop.permute.xlu0 %4710  ;;  %v13409_v49 = vpop.permute.xlu1 %4712 }
 0x543   :  { %v4739_v32 = vsel %vm554_vm12, %v4711_v60, %v13409_v49 }
 0x544   :  { %6278 = vrot.lane.b32.xlu0 %v13073_v17, %s10459_s21  ;;  %7278 = vmatprep.subr.mxu1 %v4739_v32 }
 0x545   :  { %5770 = vrot.lane.b32.xlu1 %v13282_v26, %s10457_s23 }
 0x546   :  { %v4709_v34 = vpop.permute.xlu0 %4708  ;;  %v5125_v16 = vpop.permute.xlu1 %5124 }
 0x547   :  { %v4738_v43 = vsel %vm554_vm12, %v4709_v34, %v4711_v60  ;;  %v5150_v28 = vsel %vm1602_vm3, %v13319_v55, %v5125_v16 }
 0x548   :  { %5772 = vrot.lane.b32.xlu0 %v13378_v8, %s10457_s23  ;;  %7279 = vmatpush1.msra.mxu1 %v4738_v43 }
 0x549   :  { %6174 = vrot.lane.b32.xlu1 %v13064_v9, %s15973_s20 }
 0x54a   :  { %v13422_v38 = vpop.permute.xlu0 %5126  ;;  %v4609_v52 = vpop.permute.xlu1 %4608 }
 0x54b   :  { %v5151_v12 = vsel %vm1602_vm3, %v5125_v16, %v13422_v38 }
 0x54c   :  { %6176 = vrot.lane.b32.xlu0 %v13073_v17, %s15973_s20  ;;  %7347 = vmatprep.subr.mxu0 %v5151_v12 }
 0x54d   :  { %5668 = vrot.lane.b32.xlu1 %v13282_v26, %s15987_s9  ;;  %7348 = vmatpush1.msra.mxu0 %v5150_v28 }
 0x54e   :  { %v13432_v61 = vpop.permute.xlu0 %4610  ;;  %v4607_v20 = vpop.permute.xlu1 %4606 }
 0x54f   :  { %v4637_v21 = vsel %vm292_vm14, %v4609_v52, %v13432_v61  ;;  %v4636_v0 = vsel %vm292_vm14, %v4607_v20, %v4609_v52 }
 0x550   :  { %5670 = vrot.lane.b32.xlu0 %v13378_v8, %s15987_s9  ;;  %7280 = vmatprep.subr.mxu1 %v4637_v21 }
 0x551   :  { %6072 = vrot.lane.b32.xlu1 %v13064_v9, %s15977_s19  ;;  %7281 = vmatpush1.msra.mxu1 %v4636_v0 }
 0x552   :  { %v5023_v55 = vpop.permute.xlu0 %5022  ;;  %7282 = vmatprep.subr.mxu1 %v13030_v33 }
 0x553   :  { %v13442_v3 = vpop.permute.xlu1 %5024  ;;  %7283 = vmatpush1.msra.mxu1 %v13085_v23  ;;  %v5048_v13 = vsel %vm16080_vm6, %v13333_v59, %v5023_v55  ;;  %v13459_v23 = vmax.f32 %v12978_v54, %v4488_v27  ;;  %vm16086_vm6 = vmmov %vm16083_vm2 }
 0x554   :  { %6074 = vrot.lane.b32.xlu0 %v13073_v17, %s15977_s19  ;;  %v5049_v25 = vsel %vm16082_vm0, %v5023_v55, %v13442_v3  ;;  %vm16088_vm2 = vmmov %vm16082_vm0 }
 0x555   :  { %5566 = vrot.lane.b32.xlu1 %v13282_v26, %s15959_s29  ;;  %7349 = vmatprep.subr.mxu0 %v5049_v25 }
 0x556   :  { %7350 = vmatpush1.msra.mxu0 %v5048_v13  ;;  %v13456_v33 = vpop.permute.xlu0 %4466 }
 0x557   :  { %v4920_v59 = vpop.permute.xlu1 %4919 }
 0x558   :  { %5568 = vrot.lane.b32.xlu0 %v13378_v8, %s15959_s29  ;;  %v4946_v5 = vsel %vm4943_vm9, %v13361_v62, %v4920_v59 }
 0x559   :  { %5978 = vrot.lane.b32.xlu1 %v13459_v23, %s15960_s30 }
 0x55a   :  { %v13471_v51 = vpop.permute.xlu0 %4921 }
 0x55b   :  { %v6811_v57 = vpop.permute.xlu1 %6810  ;;  %v4947_v54 = vsel %vm4943_vm9, %v4920_v59, %v13471_v51 }
 0x55c   :  { %5980 = vrot.lane.b32.xlu0 %v13469_v29, %s15960_s30  ;;  %7351 = vmatprep.subr.mxu0 %v4947_v54 }
 0x55d   :  { %5876 = vrot.lane.b32.xlu1 %v13459_v23, %s10456_s1  ;;  %7352 = vmatpush1.msra.mxu0 %v4946_v5 }
 0x55e   :  { %v13481_v6 = vpop.permute.xlu0 %6812 }
 0x55f   :  { %v4817_v10 = vpop.permute.xlu1 %4816  ;;  %v6839_v53 = vsel %vm4943_vm9, %v6811_v57, %v13481_v6 }
 0x560   :  { %5878 = vrot.lane.b32.xlu0 %v13469_v29, %s10456_s1  ;;  %7298 = vmatprep.subr.mxu1 %v6839_v53  ;;  %v4843_v30 = vsel %vm4840_vm5, %v13390_v44, %v4817_v10 }
 0x561   :  { %5435 = vrot.lane.b32.xlu1 %v13073_v17, %s10458_s28 }
 0x562   :  { %v13489_v39 = vpop.permute.xlu0 %4818 }
 0x563   :  { %v6809_v62 = vpop.permute.xlu1 %6808  ;;  %v4844_v4 = vsel %vm4840_vm5, %v4817_v10, %v13489_v39 }
 0x564   :  { %v6838_v50 = vsel %vm4943_vm9, %v6809_v62, %v6811_v57  ;;  %5437 = vrot.lane.b32.xlu0 %v13282_v26, %s10458_s28  ;;  %7353 = vmatprep.subr.mxu0 %v4844_v4 }
 0x565   :  { %5774 = vrot.lane.b32.xlu1 %v13459_v23, %s10457_s23  ;;  %7299 = vmatpush2.msra.mxu1 %v6838_v50 }
 0x566   :  { %7354 = vmatpush1.msra.mxu0 %v4843_v30  ;;  %v6709_v31 = vpop.permute.xlu0 %6708 }
 0x567   :  { %v13500_v2 = vpop.permute.xlu1 %6710 }
 0x568   :  { %5776 = vrot.lane.b32.xlu0 %v13469_v29, %s10457_s23  ;;  %v6737_v19 = vsel %vm4840_vm5, %v6709_v31, %v13500_v2 }
 0x569   :  { %5332 = vrot.lane.b32.xlu1 %v13073_v17, %s10459_s21  ;;  %7300 = vmatprep.subr.mxu1 %v6737_v19 }
 0x56a   :  { %v4715_v7 = vpop.permute.xlu0 %4714 }
 0x56b   :  { %v13508_v14 = vpop.permute.xlu1 %4716  ;;  %v4740_v44 = vsel %vm554_vm12, %v13409_v49, %v4715_v7 }
 0x56c   :  { %5334 = vrot.lane.b32.xlu0 %v13282_v26, %s10459_s21  ;;  %v4741_v60 = vsel %vm554_vm12, %v4715_v7, %v13508_v14 }
 0x56d   :  { %5672 = vrot.lane.b32.xlu1 %v13459_v23, %s15987_s9  ;;  %7355 = vmatprep.subr.mxu0 %v4741_v60 }
 0x56e   :  { %7356 = vmatpush1.msra.mxu0 %v4740_v44  ;;  %v6707_v32 = vpop.permute.xlu0 %6706 }
 0x56f   :  { %v6736_v34 = vsel %vm4840_vm5, %v6707_v32, %v6709_v31  ;;  %v6607_v43 = vpop.permute.xlu1 %6606 }
 0x570   :  { %5674 = vrot.lane.b32.xlu0 %v13469_v29, %s15987_s9  ;;  %7301 = vmatpush2.msra.mxu1 %v6736_v34 }
 0x571   :  { %5230 = vrot.lane.b32.xlu1 %v13073_v17, %s15973_s20 }
 0x572   :  { %v13523_v49 = vpop.permute.xlu0 %6608 }
 0x573   :  { %v4613_v16 = vpop.permute.xlu1 %4612  ;;  %v6635_v52 = vsel %vm554_vm12, %v6607_v43, %v13523_v49 }
 0x574   :  { %5232 = vrot.lane.b32.xlu0 %v13282_v26, %s15973_s20  ;;  %7302 = vmatprep.subr.mxu1 %v6635_v52  ;;  %v4638_v0 = vsel %vm292_vm14, %v13432_v61, %v4613_v16 }
 0x575   :  { %5570 = vrot.lane.b32.xlu1 %v13459_v23, %s15959_s29 }
 0x576   :  { %v13531_v12 = vpop.permute.xlu0 %4614 }
 0x577   :  { %v6605_v28 = vpop.permute.xlu1 %6604  ;;  %v4639_v20 = vsel %vm292_vm14, %v4613_v16, %v13531_v12 }
 0x578   :  { %v6634_v21 = vsel %vm554_vm12, %v6605_v28, %v6607_v43  ;;  %5572 = vrot.lane.b32.xlu0 %v13469_v29, %s15959_s29  ;;  %7357 = vmatprep.subr.mxu0 %v4639_v20 }
 0x579   :  { %5128 = vrot.lane.b32.xlu1 %v13073_v17, %s15977_s19  ;;  %7303 = vmatpush2.msra.mxu1 %v6634_v21 }
 0x57a   :  { %7358 = vmatpush1.msra.mxu0 %v4638_v0  ;;  %v6505_v55 = vpop.permute.xlu0 %6504 }
 0x57b   :  { %7359 = vmatprep.subr.mxu0 %v13024_v24  ;;  %v13543_v13 = vpop.permute.xlu1 %6506 }
 0x57c   :  { %7360 = vmatpush1.msra.mxu0 %v13018_v15  ;;  %5130 = vrot.lane.b32.xlu0 %v13282_v26, %s15977_s19  ;;  %v6533_v27 = vsel %vm292_vm14, %v6505_v55, %v13543_v13 }
 0x57d   :  { %5026 = vrot.lane.b32.xlu1 %v13073_v17, %s15960_s30  ;;  %7304 = vmatprep.subr.mxu1 %v6533_v27 }
 0x57e   :  { %v6503_v25 = vpop.permute.xlu0 %6502 }
 0x57f   :  { %v6532_v61 = vsel %vm292_vm14, %v6503_v25, %v6505_v55  ;;  %v6815_v41 = vpop.permute.xlu1 %6814 }
 0x580   :  { %5028 = vrot.lane.b32.xlu0 %v13282_v26, %s15960_s30  ;;  %7305 = vmatpush2.msra.mxu1 %v6532_v61  ;;  %v6840_v5 = vsel %vm4943_vm9, %v13481_v6, %v6815_v41 }
 0x581   :  { %5439 = vrot.lane.b32.xlu1 %v13378_v8, %s10458_s28  ;;  %7306 = vmatprep.subr.mxu1 %v13024_v24 }
 0x582   :  { %v13558_v59 = vpop.permute.xlu0 %6816  ;;  %7307 = vmatpush2.msra.mxu1 %v13018_v15 }
 0x583   :  { %v6375_v57 = vpop.permute.xlu1 %6374  ;;  %v6841_v54 = vsel %vm4943_vm9, %v6815_v41, %v13558_v59  ;;  %v13643_v41 = vld [vmem:[%s15853_s3] sm:$0xff] }
 0x584   :  { %5441 = vrot.lane.b32.xlu0 %v13459_v23, %s10458_s28  ;;  %7375 = vmatprep.subr.mxu0 %v6841_v54 }
 0x585   :  { %4923 = vrot.lane.b32.xlu1 %v13073_v17, %s10456_s1  ;;  %7376 = vmatpush2.msra.mxu0 %v6840_v5 }
 0x586   :  { %v13569_v24 = vpop.permute.xlu0 %6376 }
 0x587   :  { %v6373_v10 = vpop.permute.xlu1 %6372  ;;  %v6403_v15 = vsel %vm5455_vm8, %v6375_v57, %v13569_v24 }
 0x588   :  { %v6402_v53 = vsel %vm5455_vm8, %v6373_v10, %v6375_v57  ;;  %4925 = vrot.lane.b32.xlu0 %v13282_v26, %s10456_s1  ;;  %7308 = vmatprep.subr.mxu1 %v6403_v15 }
 0x589   :  { %5336 = vrot.lane.b32.xlu1 %v13378_v8, %s10459_s21  ;;  %7309 = vmatpush2.msra.mxu1 %v6402_v53 }
 0x58a   :  { %v6713_v6 = vpop.permute.xlu0 %6712 }
 0x58b   :  { %v13578_v62 = vpop.permute.xlu1 %6714  ;;  %v6738_v4 = vsel %vm4840_vm5, %v13500_v2, %v6713_v6 }
 0x58c   :  { %5338 = vrot.lane.b32.xlu0 %v13459_v23, %s10459_s21  ;;  %v6739_v50 = vsel %vm4840_vm5, %v6713_v6, %v13578_v62 }
 0x58d   :  { %4820 = vrot.lane.b32.xlu1 %v13073_v17, %s10457_s23  ;;  %7377 = vmatprep.subr.mxu0 %v6739_v50 }
 0x58e   :  { %7378 = vmatpush2.msra.mxu0 %v6738_v4  ;;  %v6273_v30 = vpop.permute.xlu0 %6272  ;;  %v13666_v4 = vld [vmem:[%s15853_s3 + $0x18] sm:$0xff] }
 0x58f   :  { %v13588_v31 = vpop.permute.xlu1 %6274 }
 0x590   :  { %4822 = vrot.lane.b32.xlu0 %v13282_v26, %s10457_s23  ;;  %v6301_v2 = vsel %vm5352_vm7, %v6273_v30, %v13588_v31 }
 0x591   :  { %5234 = vrot.lane.b32.xlu1 %v13378_v8, %s15973_s20  ;;  %7310 = vmatprep.subr.mxu1 %v6301_v2 }
 0x592   :  { %v6271_v19 = vpop.permute.xlu0 %6270 }
 0x593   :  { %v6300_v7 = vsel %vm5352_vm7, %v6271_v19, %v6273_v30  ;;  %v6611_v44 = vpop.permute.xlu1 %6610 }
 0x594   :  { %5236 = vrot.lane.b32.xlu0 %v13459_v23, %s15973_s20  ;;  %7311 = vmatpush2.msra.mxu1 %v6300_v7  ;;  %v6636_v43 = vsel %vm554_vm12, %v13523_v49, %v6611_v44 }
 0x595   :  { %4718 = vrot.lane.b32.xlu1 %v13073_v17, %s15987_s9 }
 0x596   :  { %v13601_v60 = vpop.permute.xlu0 %6612 }
 0x597   :  { %v6171_v32 = vpop.permute.xlu1 %6170  ;;  %v6637_v34 = vsel %vm554_vm12, %v6611_v44, %v13601_v60 }
 0x598   :  { %4720 = vrot.lane.b32.xlu0 %v13282_v26, %s15987_s9  ;;  %7379 = vmatprep.subr.mxu0 %v6637_v34 }
 0x599   :  { %5132 = vrot.lane.b32.xlu1 %v13378_v8, %s15977_s19  ;;  %7380 = vmatpush2.msra.mxu0 %v6636_v43 }
 0x59a   :  { %v13611_v16 = vpop.permute.xlu0 %6172 }
 0x59b   :  { %v6169_v52 = vpop.permute.xlu1 %6168  ;;  %v6199_v28 = vsel %vm1864_vm1, %v6171_v32, %v13611_v16 }
 0x59c   :  { %v6198_v20 = vsel %vm1864_vm1, %v6169_v52, %v6171_v32  ;;  %5134 = vrot.lane.b32.xlu0 %v13459_v23, %s15977_s19  ;;  %7312 = vmatprep.subr.mxu1 %v6199_v28 }
 0x59d   :  { %4616 = vrot.lane.b32.xlu1 %v13073_v17, %s15959_s29  ;;  %7313 = vmatpush2.msra.mxu1 %v6198_v20 }
 0x59e   :  { %v6509_v49 = vpop.permute.xlu0 %6508 }
 0x59f   :  { %v13620_v21 = vpop.permute.xlu1 %6510  ;;  %v6534_v0 = vsel %vm292_vm14, %v13543_v13, %v6509_v49 }
 0x5a0   :  { %4618 = vrot.lane.b32.xlu0 %v13282_v26, %s15959_s29  ;;  %v6535_v55 = vsel %vm292_vm14, %v6509_v49, %v13620_v21 }
 0x5a1   :  { %5030 = vrot.lane.b32.xlu1 %v13378_v8, %s15960_s30  ;;  %7381 = vmatprep.subr.mxu0 %v6535_v55 }
 0x5a2   :  { %7382 = vmatpush2.msra.mxu0 %v6534_v0  ;;  %v6069_v27 = vpop.permute.xlu0 %6068 }
 0x5a3   :  { %7383 = vmatprep.subr.mxu0 %v13073_v17  ;;  %v13631_v25 = vpop.permute.xlu1 %6070 }
 0x5a4   :  { %7384 = vmatpush2.msra.mxu0 %v13064_v9  ;;  %5032 = vrot.lane.b32.xlu0 %v13459_v23, %s15960_s30  ;;  %v6097_v13 = vsel %vm1602_vm3, %v6069_v27, %v13631_v25 }
 0x5a5   :  { %4927 = vrot.lane.b32.xlu1 %v13378_v8, %s10456_s1  ;;  %7314 = vmatprep.subr.mxu1 %v6097_v13  ;;  %v4490_v13 = vsel %vm16086_vm6, %v13167_v37, %v13456_v33  ;;  %vm16091_vm6 = vmmov %vm16082_vm0 }
 0x5a6   :  { %v6067_v61 = vpop.permute.xlu0 %6066 }
 0x5a7   :  { %v6096_v57 = vsel %vm1602_vm3, %v6067_v61, %v6069_v27  ;;  %v5975_v54 = vpop.permute.xlu1 %5974 }
 0x5a8   :  { %4929 = vrot.lane.b32.xlu0 %v13459_v23, %s10456_s1  ;;  %7315 = vmatpush2.msra.mxu1 %v6096_v57  ;;  %v5998_v53 = vsel %vm16085_vm4, %v13232_v35, %v5975_v54  ;;  %v13675_v35 = vld [vmem:[%s15853_s3 + $0x10] sm:$0xff]  ;;  %vm16090_vm4 = vmmov %vm16082_vm0 }
 0x5a9   :  { %6818 = vrot.lane.b32.xlu1 %v13378_v8, %s10456_s1  ;;  %7317 = vmatmul.mubr.f32.vlgmr.msra.gmra.mxu1 %v13643_v41 }
 0x5aa   :  { %v13651_v5 = vpop.permute.xlu0 %5976  ;;  %9827 = vmatprep.mubr.msk.f32.mxu1 %vm3588_vm11, %v13666_v4 }
 0x5ab   :  { %v6379_v10 = vpop.permute.xlu1 %6378  ;;  %v5999_v15 = vsel %vm16084_vm13, %v5975_v54, %v13651_v5  ;;  %v13740_v54 = vmax.f32 %v13007_v1, %v4490_v13  ;;  %vm16089_vm13 = vmmov %vm16082_vm0 }
 0x5ac   :  { %6820 = vrot.lane.b32.xlu0 %v13459_v23, %s10456_s1  ;;  %7406 = vmatprep.subr.mxu1 %v5999_v15  ;;  %v6404_v2 = vsel %vm5455_vm8, %v13569_v24, %v6379_v10 }
 0x5ad   :  { %4824 = vrot.lane.b32.xlu1 %v13378_v8, %s10457_s23  ;;  %7407 = vmatpush1.msra.mxu1 %v5998_v53 }
 0x5ae   :  { %v13661_v6 = vpop.permute.xlu0 %6380  ;;  %7323 = vmatmul.mubr.f32.gmra.mxu1 %v13675_v35 }
 0x5af   :  { %v5873_v50 = vpop.permute.xlu1 %5872  ;;  %v6405_v30 = vsel %vm5455_vm8, %v6379_v10, %v13661_v6  ;;  %9830 = vmatprep.mubr.msk.f32.mxu1 %vm3588_vm11, %v13349_v45 }
 0x5b0   :  { %4826 = vrot.lane.b32.xlu0 %v13459_v23, %s10457_s23  ;;  %7385 = vmatprep.subr.mxu0 %v6405_v30  ;;  %v5896_v24 = vsel %vm4943_vm9, %v13243_v42, %v5873_v50 }
 0x5b1   :  { %6716 = vrot.lane.b32.xlu1 %v13378_v8, %s10457_s23  ;;  %7386 = vmatpush2.msra.mxu0 %v6404_v2 }
 0x5b2   :  { %v13683_v19 = vpop.permute.xlu0 %5874 }
 0x5b3   :  { %v6277_v7 = vpop.permute.xlu1 %6276  ;;  %v5897_v44 = vsel %vm4943_vm9, %v5873_v50, %v13683_v19 }
 0x5b4   :  { %6718 = vrot.lane.b32.xlu0 %v13459_v23, %s10457_s23  ;;  %7408 = vmatprep.subr.mxu1 %v5897_v44  ;;  %v6302_v52 = vsel %vm5352_vm7, %v13588_v31, %v6277_v7 }
 0x5b5   :  { %4722 = vrot.lane.b32.xlu1 %v13378_v8, %s15987_s9  ;;  %7409 = vmatpush1.msra.mxu1 %v5896_v24 }
 0x5b6   :  { %v13696_v32 = vpop.permute.xlu0 %6278 }
 0x5b7   :  { %v5771_v34 = vpop.permute.xlu1 %5770  ;;  %v6303_v43 = vsel %vm5352_vm7, %v6277_v7, %v13696_v32 }
 0x5b8   :  { %4724 = vrot.lane.b32.xlu0 %v13459_v23, %s15987_s9  ;;  %7387 = vmatprep.subr.mxu0 %v6303_v43  ;;  %v5794_v49 = vsel %vm4840_vm5, %v13261_v22, %v5771_v34 }
 0x5b9   :  { %6614 = vrot.lane.b32.xlu1 %v13378_v8, %s15987_s9  ;;  %7388 = vmatpush2.msra.mxu0 %v6302_v52 }
 0x5ba   :  { %v13706_v42 = vpop.permute.xlu0 %5772 }
 0x5bb   :  { %v6175_v28 = vpop.permute.xlu1 %6174  ;;  %v5795_v20 = vsel %vm4840_vm5, %v5771_v34, %v13706_v42 }
 0x5bc   :  { %6616 = vrot.lane.b32.xlu0 %v13459_v23, %s15987_s9  ;;  %7410 = vmatprep.subr.mxu1 %v5795_v20  ;;  %v6200_v27 = vsel %vm1864_vm1, %v13611_v16, %v6175_v28 }
 0x5bd   :  { %4620 = vrot.lane.b32.xlu1 %v13378_v8, %s15959_s29  ;;  %7411 = vmatpush1.msra.mxu1 %v5794_v49 }
 0x5be   :  { %v13716_v31 = vpop.permute.xlu0 %6176 }
 0x5bf   :  { %v5669_v0 = vpop.permute.xlu1 %5668  ;;  %v6201_v55 = vsel %vm1864_vm1, %v6175_v28, %v13716_v31 }
 0x5c0   :  { %4622 = vrot.lane.b32.xlu0 %v13459_v23, %s15959_s29  ;;  %7389 = vmatprep.subr.mxu0 %v6201_v55  ;;  %v5692_v16 = vsel %vm554_vm12, %v13289_v56, %v5669_v0 }
 0x5c1   :  { %6512 = vrot.lane.b32.xlu1 %v13378_v8, %s15959_s29  ;;  %7390 = vmatpush2.msra.mxu0 %v6200_v27 }
 0x5c2   :  { %v13726_v22 = vpop.permute.xlu0 %5670 }
 0x5c3   :  { %v6073_v61 = vpop.permute.xlu1 %6072  ;;  %v5693_v57 = vsel %vm554_vm12, %v5669_v0, %v13726_v22 }
 0x5c4   :  { %6514 = vrot.lane.b32.xlu0 %v13459_v23, %s15959_s29  ;;  %7412 = vmatprep.subr.mxu1 %v5693_v57  ;;  %v6098_v56 = vsel %vm1602_vm3, %v13631_v25, %v6073_v61 }
 0x5c5   :  { %6822 = vrot.lane.b32.xlu1 %v13469_v29, %s10456_s1  ;;  %7413 = vmatpush1.msra.mxu1 %v5692_v16 }
 0x5c6   :  { %v13742_v10 = vpop.permute.xlu0 %6074 }
 0x5c7   :  { %v5567_v37 = vpop.permute.xlu1 %5566  ;;  %v6099_v15 = vsel %vm1602_vm3, %v6073_v61, %v13742_v10 }
 0x5c8   :  { %6824 = vrot.lane.b32.xlu0 %v13740_v54, %s10456_s1  ;;  %7391 = vmatprep.subr.mxu0 %v6099_v15  ;;  %v5590_v25 = vsel %vm292_vm14, %v13308_v46, %v5567_v37 }
 0x5c9   :  { %6382 = vrot.lane.b32.xlu1 %v13282_v26, %s10458_s28  ;;  %7392 = vmatpush2.msra.mxu0 %v6098_v56 }
 0x5ca   :  { %v13752_v53 = vpop.permute.xlu0 %5568  ;;  %7394 = vmatmul.mubr.f32.vlgmr.msra.gmra.mxu0 %v13643_v41 }
 0x5cb   :  { %v5979_v1 = vpop.permute.xlu1 %5978  ;;  %v5591_v50 = vsel %vm292_vm14, %v5567_v37, %v13752_v53  ;;  %9829 = vmatprep.mubr.msk.f32.mxu0 %vm3588_vm11, %v13666_v4 }
 0x5cc   :  { %6384 = vrot.lane.b32.xlu0 %v13378_v8, %s10458_s28  ;;  %7414 = vmatprep.subr.mxu1 %v5591_v50  ;;  %v6000_v46 = vsel %vm16082_vm0, %v13651_v5, %v5979_v1 }
 0x5cd   :  { %6720 = vrot.lane.b32.xlu1 %v13469_v29, %s10457_s23  ;;  %7415 = vmatpush1.msra.mxu1 %v5590_v25  ;;  %v4086_v25 = vpop.f32.mrf.mxu0 }
 0x5ce   :  { %v13765_v30 = vpop.permute.xlu0 %5980  ;;  %7416 = vmatprep.subr.mxu1 %v13282_v26  ;;  %7400 = vmatmul.mubr.f32.gmra.mxu0 %v13675_v35 }
 0x5cf   :  { %v5877_v2 = vpop.permute.xlu1 %5876  ;;  %7417 = vmatpush1.msra.mxu1 %v13073_v17  ;;  %v6001_v7 = vsel %vm16087_vm10, %v5979_v1, %v13765_v30  ;;  %9832 = vmatprep.mubr.msk.f32.mxu0 %vm3588_vm11, %v13349_v45 }
 0x5d0   :  { %6722 = vrot.lane.b32.xlu0 %v13740_v54, %s10457_s23  ;;  %7483 = vmatprep.subr.mxu0 %v6001_v7  ;;  %v5898_v45 = vsel %vm4943_vm9, %v13683_v19, %v5877_v2 }
 0x5d1   :  { %6280 = vrot.lane.b32.xlu1 %v13282_v26, %s10459_s21  ;;  %7484 = vmatpush1.msra.mxu0 %v6000_v46  ;;  %v13854_v46 = vadd.f32 %v4086_v25, %v12412_v36 }
 0x5d2   :  { %v13780_v44 = vpop.permute.xlu0 %5878 }
 0x5d3   :  { %v5436_v24 = vpop.permute.xlu1 %5435  ;;  %v5899_v34 = vsel %vm4943_vm9, %v5877_v2, %v13780_v44  ;;  %v4155_v2 = vpop.f32.mrf.mxu1 }
 0x5d4   :  { %6282 = vrot.lane.b32.xlu0 %v13378_v8, %s10459_s21  ;;  %7485 = vmatprep.subr.mxu0 %v5899_v34  ;;  %v5460_v28 = vsel %vm5455_vm8, %v13342_v47, %v5436_v24 }
 0x5d5   :  { %6618 = vrot.lane.b32.xlu1 %v13469_v29, %s15987_s9  ;;  %7486 = vmatpush1.msra.mxu0 %v5898_v45  ;;  %v4157_v45 = vpop.f32.mrf.mxu1 }
 0x5d6   :  { %v13790_v5 = vpop.permute.xlu0 %5437 }
 0x5d7   :  { %v5775_v43 = vpop.permute.xlu1 %5774  ;;  %v5461_v52 = vsel %vm5455_vm8, %v5436_v24, %v13790_v5 }
 0x5d8   :  { %6620 = vrot.lane.b32.xlu0 %v13740_v54, %s15987_s9  ;;  %7418 = vmatprep.subr.mxu1 %v5461_v52  ;;  %v5796_v0 = vsel %vm4840_vm5, %v13706_v42, %v5775_v43  ;;  %v13866_v52 = vadd.f32 %v4155_v2, %v12412_v36 }
 0x5d9   :  { %6178 = vrot.lane.b32.xlu1 %v13282_v26, %s15973_s20  ;;  %7419 = vmatpush1.msra.mxu1 %v5460_v28 }
 0x5da   :  { %v13800_v19 = vpop.permute.xlu0 %5776 }
 0x5db   :  { %v5333_v20 = vpop.permute.xlu1 %5332  ;;  %v5797_v49 = vsel %vm4840_vm5, %v5775_v43, %v13800_v19  ;;  %v4226_v43 = vpop.f32.mrf.mxu0 }
 0x5dc   :  { %6180 = vrot.lane.b32.xlu0 %v13378_v8, %s15973_s20  ;;  %7487 = vmatprep.subr.mxu0 %v5797_v49  ;;  %v5357_v13 = vsel %vm5352_vm7, %v13380_v11, %v5333_v20  ;;  %v13872_v49 = vadd.f32 %v4157_v45, %v12412_v36 }
 0x5dd   :  { %6516 = vrot.lane.b32.xlu1 %v13469_v29, %s15959_s29  ;;  %7488 = vmatpush1.msra.mxu0 %v5796_v0 }
 0x5de   :  { %v13810_v47 = vpop.permute.xlu0 %5334 }
 0x5df   :  { %v5673_v55 = vpop.permute.xlu1 %5672  ;;  %v5358_v27 = vsel %vm5352_vm7, %v5333_v20, %v13810_v47  ;;  %v4244_v20 = vmax.f32 %v13854_v46, 0.0 }
 0x5e0   :  { %6518 = vrot.lane.b32.xlu0 %v13740_v54, %s15959_s29  ;;  %7420 = vmatprep.subr.mxu1 %v5358_v27  ;;  %v5694_v16 = vsel %vm554_vm12, %v13726_v22, %v5673_v55  ;;  %v4228_v27 = vpop.f32.mrf.mxu0 }
 0x5e1   :  { %6076 = vrot.lane.b32.xlu1 %v13282_v26, %s15977_s19  ;;  %7421 = vmatpush1.msra.mxu1 %v5357_v13  ;;  %v4245_v13 = vmax.f32 %v13866_v52, 0.0 }
 0x5e2   :  { %v13820_v42 = vpop.permute.xlu0 %5674 }
 0x5e3   :  { %v5231_v61 = vpop.permute.xlu1 %5230  ;;  %v5695_v57 = vsel %vm554_vm12, %v5673_v55, %v13820_v42 }
 0x5e4   :  { %6078 = vrot.lane.b32.xlu0 %v13378_v8, %s15977_s19  ;;  %7489 = vmatprep.subr.mxu0 %v5695_v57  ;;  %v5254_v56 = vsel %vm1864_vm1, %v13399_v63, %v5231_v61 }
 0x5e5   :  { %6386 = vrot.lane.b32.xlu1 %v13459_v23, %s10458_s28  ;;  %7490 = vmatpush1.msra.mxu0 %v5694_v16  ;;  %v4246_v16 = vmax.f32 %v13872_v49, 0.0  ;;  %v7235_v49 = vld [vmem:[%s15854_s4 + $0x8] sm:$0xff] }
 0x5e6   :  { %v13830_v11 = vpop.permute.xlu0 %5232 }
 0x5e7   :  { %v5571_v37 = vpop.permute.xlu1 %5570  ;;  %v5255_v15 = vsel %vm1864_vm1, %v5231_v61, %v13830_v11  ;;  %v13885_v61 = vadd.f32 %v4226_v43, %v12412_v36 }
 0x5e8   :  { %6388 = vrot.lane.b32.xlu0 %v13469_v29, %s10458_s28  ;;  %7422 = vmatprep.subr.mxu1 %v5255_v15  ;;  %v5592_v7 = vsel %vm292_vm14, %v13752_v53, %v5571_v37 }
 0x5e9   :  { %6284 = vrot.lane.b32.xlu1 %v13459_v23, %s10459_s21  ;;  %7423 = vmatpush1.msra.mxu1 %v5254_v56 }
 0x5ea   :  { %v13840_v22 = vpop.permute.xlu0 %5572 }
 0x5eb   :  { %v5129_v1 = vpop.permute.xlu1 %5128  ;;  %v5593_v50 = vsel %vm292_vm14, %v5571_v37, %v13840_v22  ;;  %v13891_v37 = vadd.f32 %v4228_v27, %v12412_v36  ;;  %v4247_v36 = vmax.f32 %v13885_v61, 0.0 }
 0x5ec   :  { %6286 = vrot.lane.b32.xlu0 %v13469_v29, %s10459_s21  ;;  %7491 = vmatprep.subr.mxu0 %v5593_v50  ;;  %v5152_v53 = vsel %vm1602_vm3, %v13422_v38, %v5129_v1 }
 0x5ed   :  { %6182 = vrot.lane.b32.xlu1 %v13459_v23, %s15973_s20  ;;  %7492 = vmatpush1.msra.mxu0 %v5592_v7  ;;  %v4248_v50 = vmax.f32 %v13891_v37, 0.0 }
 0x5ee   :  { %v13850_v63 = vpop.permute.xlu0 %5130  ;;  %7493 = vmatprep.subr.mxu0 %v13459_v23 }
 0x5ef   :  { %v5027_v24 = vpop.permute.xlu1 %5026  ;;  %7494 = vmatpush1.msra.mxu0 %v13378_v8  ;;  %v5153_v34 = vsel %vm1602_vm3, %v5129_v1, %v13850_v63 }
 0x5f0   :  { %6184 = vrot.lane.b32.xlu0 %v13469_v29, %s15973_s20  ;;  %7424 = vmatprep.subr.mxu1 %v5153_v34  ;;  %v5050_v38 = vsel %vm16089_vm13, %v13442_v3, %v5027_v24 }
 0x5f1   :  { %6080 = vrot.lane.b32.xlu1 %v13459_v23, %s15977_s19  ;;  %7425 = vmatpush1.msra.mxu1 %v5152_v53 }
 0x5f2   :  { %v13868_v28 = vpop.permute.xlu0 %5028 }
 0x5f3   :  { %v5440_v0 = vpop.permute.xlu1 %5439  ;;  %v5051_v55 = vsel %vm16088_vm2, %v5027_v24, %v13868_v28 }
 0x5f4   :  { %6082 = vrot.lane.b32.xlu0 %v13469_v29, %s15977_s19  ;;  %7426 = vmatprep.subr.mxu1 %v5051_v55  ;;  %v5462_v56 = vsel %vm5455_vm8, %v13790_v5, %v5440_v0 }
 0x5f5   :  { %4346 = vrot.lane.b32.xlu1 %v4244_v20, %s15961_s24  ;;  %7427 = vmatpush1.msra.mxu1 %v5050_v38 }
 0x5f6   :  { %v13887_v57 = vpop.permute.xlu0 %5441 }
 0x5f7   :  { %v4924_v15 = vpop.permute.xlu1 %4923  ;;  %v5463_v3 = vsel %vm5455_vm8, %v5440_v0, %v13887_v57 }
 0x5f8   :  { %4348 = vrot.lane.b32.xlu0 %v4245_v13, %s15961_s24  ;;  %7495 = vmatprep.subr.mxu0 %v5463_v3  ;;  %v4948_v5 = vsel %vm4943_vm9, %v13471_v51, %v4924_v15 }
 0x5f9   :  { %4350 = vrot.lane.b32.xlu1 %v4246_v16, %s15961_s24  ;;  %7496 = vmatpush1.msra.mxu0 %v5462_v56 }
 0x5fa   :  { %v4926_v1 = vpop.permute.xlu0 %4925 }
 0x5fb   :  { %v5337_v25 = vpop.permute.xlu1 %5336  ;;  %v4949_v2 = vsel %vm4943_vm9, %v4924_v15, %v4926_v1 }
 0x5fc   :  { %4352 = vrot.lane.b32.xlu0 %v4247_v36, %s15961_s24  ;;  %7428 = vmatprep.subr.mxu1 %v4949_v2  ;;  %v5359_v45 = vsel %vm5352_vm7, %v13810_v47, %v5337_v25 }
 0x5fd   :  { %4354 = vrot.lane.b32.xlu1 %v4248_v50, %s15961_s24  ;;  %7429 = vmatpush1.msra.mxu1 %v4948_v5 }
 0x5fe   :  { %v13914_v7 = vpop.permute.xlu0 %5338 }
 0x5ff   :  { %v4821_v24 = vpop.permute.xlu1 %4820  ;;  %v5360_v34 = vsel %vm5352_vm7, %v5337_v25, %v13914_v7 }
 0x600   :  { %7497 = vmatprep.subr.mxu0 %v5360_v34  ;;  %v4845_v0 = vsel %vm4840_vm5, %v13489_v39, %v4821_v24 }
 0x601   :  { %7498 = vmatpush1.msra.mxu0 %v5359_v45 }
 0x602   :  { %v4823_v43 = vpop.permute.xlu0 %4822 }
 0x603   :  { %v5235_v53 = vpop.permute.xlu1 %5234  ;;  %v4846_v51 = vsel %vm4840_vm5, %v4821_v24, %v4823_v43 }
 0x604   :  { %7430 = vmatprep.subr.mxu1 %v4846_v51  ;;  %v5256_v47 = vsel %vm1864_vm1, %v13830_v11, %v5235_v53 }
 0x605   :  { %7431 = vmatpush1.msra.mxu1 %v4845_v0 }
 0x606   :  { %v13923_v55 = vpop.permute.xlu0 %5236 }
 0x607   :  { %v4719_v27 = vpop.permute.xlu1 %4718  ;;  %v5257_v38 = vsel %vm1864_vm1, %v5235_v53, %v13923_v55 }
 0x608   :  { %7499 = vmatprep.subr.mxu0 %v5257_v38  ;;  %v4742_v39 = vsel %vm554_vm12, %v13508_v14, %v4719_v27 }
 0x609   :  { %7500 = vmatpush1.msra.mxu0 %v5256_v47 }
 0x60a   :  { %v4721_v15 = vpop.permute.xlu0 %4720 }
 0x60b   :  { %v5133_v3 = vpop.permute.xlu1 %5132  ;;  %v4743_v56 = vsel %vm554_vm12, %v4719_v27, %v4721_v15 }
 0x60c   :  { %7432 = vmatprep.subr.mxu1 %v4743_v56  ;;  %v5154_v11 = vsel %vm1602_vm3, %v13850_v63, %v5133_v3 }
 0x60d   :  { %7433 = vmatpush1.msra.mxu1 %v4742_v39 }
 0x60e   :  { %v13932_v25 = vpop.permute.xlu0 %5134 }
 0x60f   :  { %v4617_v2 = vpop.permute.xlu1 %4616  ;;  %v5155_v5 = vsel %vm1602_vm3, %v5133_v3, %v13932_v25 }
 0x610   :  { %7501 = vmatprep.subr.mxu0 %v5155_v5  ;;  %v4640_v14 = vsel %vm292_vm14, %v13531_v12, %v4617_v2 }
 0x611   :  { %7502 = vmatpush1.msra.mxu0 %v5154_v11 }
 0x612   :  { %v4619_v24 = vpop.permute.xlu0 %4618 }
 0x613   :  { %v5031_v34 = vpop.permute.xlu1 %5030  ;;  %v4641_v45 = vsel %vm292_vm14, %v4617_v2, %v4619_v24 }
 0x614   :  { %7434 = vmatprep.subr.mxu1 %v4641_v45  ;;  %v5052_v0 = vsel %vm16091_vm6, %v13868_v28, %v5031_v34  ;;  %vm16100_vm6 = vmmov %vm16090_vm4 }
 0x615   :  { %7435 = vmatpush1.msra.mxu1 %v4640_v14 }
 0x616   :  { %v13941_v53 = vpop.permute.xlu0 %5032  ;;  %7436 = vmatprep.subr.mxu1 %v13073_v17 }
 0x617   :  { %v4928_v51 = vpop.permute.xlu1 %4927  ;;  %7437 = vmatpush1.msra.mxu1 %v13064_v9  ;;  %v5053_v63 = vsel %vm16090_vm4, %v5031_v34, %v13941_v53 }
 0x618   :  { %7503 = vmatprep.subr.mxu0 %v5053_v63  ;;  %v4950_v17 = vsel %vm4943_vm9, %v4926_v1, %v4928_v51 }
 0x619   :  { %7504 = vmatpush1.msra.mxu0 %v5052_v0 }
 0x61a   :  { %v13949_v27 = vpop.permute.xlu0 %4929 }
 0x61b   :  { %v6819_v38 = vpop.permute.xlu1 %6818  ;;  %v4951_v12 = vsel %vm4943_vm9, %v4928_v51, %v13949_v27 }
 0x61c   :  { %7505 = vmatprep.subr.mxu0 %v4951_v12  ;;  %v6842_v56 = vsel %vm4943_vm9, %v13558_v59, %v6819_v38 }
 0x61d   :  { %7506 = vmatpush1.msra.mxu0 %v4950_v17 }
 0x61e   :  { %v6821_v47 = vpop.permute.xlu0 %6820 }
 0x61f   :  { %v4825_v9 = vpop.permute.xlu1 %4824  ;;  %v6843_v3 = vsel %vm4943_vm9, %v6819_v38, %v6821_v47 }
 0x620   :  { %7452 = vmatprep.subr.mxu1 %v6843_v3  ;;  %v4847_v5 = vsel %vm4840_vm5, %v4823_v43, %v4825_v9 }
 0x621   :  { %7453 = vmatpush2.msra.mxu1 %v6842_v56 }
 0x622   :  { %v13957_v28 = vpop.permute.xlu0 %4826 }
 0x623   :  { %v6717_v39 = vpop.permute.xlu1 %6716  ;;  %v4848_v2 = vsel %vm4840_vm5, %v4825_v9, %v13957_v28 }
 0x624   :  { %7507 = vmatprep.subr.mxu0 %v4848_v2  ;;  %v6740_v45 = vsel %vm4840_vm5, %v13578_v62, %v6717_v39 }
 0x625   :  { %7508 = vmatpush1.msra.mxu0 %v4847_v5 }
 0x626   :  { %v6719_v1 = vpop.permute.xlu0 %6718 }
 0x627   :  { %v4723_v11 = vpop.permute.xlu1 %4722  ;;  %v6741_v34 = vsel %vm4840_vm5, %v6717_v39, %v6719_v1 }
 0x628   :  { %7454 = vmatprep.subr.mxu1 %v6741_v34  ;;  %v4744_v63 = vsel %vm554_vm12, %v4721_v15, %v4723_v11 }
 0x629   :  { %7455 = vmatpush2.msra.mxu1 %v6740_v45 }
 0x62a   :  { %v13965_v59 = vpop.permute.xlu0 %4724 }
 0x62b   :  { %v6615_v14 = vpop.permute.xlu1 %6614  ;;  %v4745_v51 = vsel %vm554_vm12, %v4723_v11, %v13965_v59 }
 0x62c   :  { %7509 = vmatprep.subr.mxu0 %v4745_v51  ;;  %v6638_v12 = vsel %vm554_vm12, %v13601_v60, %v6615_v14 }
 0x62d   :  { %7510 = vmatpush1.msra.mxu0 %v4744_v63 }
 0x62e   :  { %v6617_v43 = vpop.permute.xlu0 %6616 }
 0x62f   :  { %v4621_v0 = vpop.permute.xlu1 %4620  ;;  %v6639_v38 = vsel %vm554_vm12, %v6615_v14, %v6617_v43 }
 0x630   :  { %7456 = vmatprep.subr.mxu1 %v6639_v38  ;;  %v4642_v3 = vsel %vm292_vm14, %v4619_v24, %v4621_v0 }
 0x631   :  { %7457 = vmatpush2.msra.mxu1 %v6638_v12 }
 0x632   :  { %v13973_v62 = vpop.permute.xlu0 %4622 }
 0x633   :  { %v6513_v17 = vpop.permute.xlu1 %6512  ;;  %v4643_v9 = vsel %vm292_vm14, %v4621_v0, %v13973_v62 }
 0x634   :  { %7511 = vmatprep.subr.mxu0 %v4643_v9  ;;  %v6536_v60 = vsel %vm292_vm14, %v13620_v21, %v6513_v17 }
 0x635   :  { %7512 = vmatpush1.msra.mxu0 %v4642_v3 }
 0x636   :  { %v6515_v15 = vpop.permute.xlu0 %6514  ;;  %7513 = vmatprep.subr.mxu0 %v13378_v8 }
 0x637   :  { %v6823_v56 = vpop.permute.xlu1 %6822  ;;  %7514 = vmatpush1.msra.mxu0 %v13282_v26  ;;  %v6537_v39 = vsel %vm292_vm14, %v6513_v17, %v6515_v15 }
 0x638   :  { %7458 = vmatprep.subr.mxu1 %v6537_v39  ;;  %v6844_v11 = vsel %vm4943_vm9, %v6821_v47, %v6823_v56 }
 0x639   :  { %7459 = vmatpush2.msra.mxu1 %v6536_v60 }
 0x63a   :  { %v13983_v2 = vpop.permute.xlu0 %6824  ;;  %7460 = vmatprep.subr.mxu1 %v13378_v8 }
 0x63b   :  { %v6383_v5 = vpop.permute.xlu1 %6382  ;;  %7461 = vmatpush2.msra.mxu1 %v13282_v26  ;;  %v6845_v24 = vsel %vm4943_vm9, %v6823_v56, %v13983_v2 }
 0x63c   :  { %7529 = vmatprep.subr.mxu0 %v6845_v24  ;;  %v6406_v21 = vsel %vm5455_vm8, %v13661_v6, %v6383_v5 }
 0x63d   :  { %7530 = vmatpush2.msra.mxu0 %v6844_v11 }
 0x63e   :  { %v6385_v34 = vpop.permute.xlu0 %6384 }
 0x63f   :  { %v6721_v45 = vpop.permute.xlu1 %6720  ;;  %v6407_v14 = vsel %vm5455_vm8, %v6383_v5, %v6385_v34 }
 0x640   :  { %7462 = vmatprep.subr.mxu1 %v6407_v14  ;;  %v6742_v63 = vsel %vm4840_vm5, %v6719_v1, %v6721_v45 }
 0x641   :  { %7463 = vmatpush2.msra.mxu1 %v6406_v21 }
 0x642   :  { %v13993_v8 = vpop.permute.xlu0 %6722 }
 0x643   :  { %v6281_v51 = vpop.permute.xlu1 %6280  ;;  %v6743_v26 = vsel %vm4840_vm5, %v6721_v45, %v13993_v8 }
 0x644   :  { %7531 = vmatprep.subr.mxu0 %v6743_v26  ;;  %v6304_v12 = vsel %vm5352_vm7, %v13696_v32, %v6281_v51 }
 0x645   :  { %7532 = vmatpush2.msra.mxu0 %v6742_v63 }
 0x646   :  { %v6283_v47 = vpop.permute.xlu0 %6282 }
 0x647   :  { %v6619_v0 = vpop.permute.xlu1 %6618  ;;  %v6305_v38 = vsel %vm5352_vm7, %v6281_v51, %v6283_v47 }
 0x648   :  { %7464 = vmatprep.subr.mxu1 %v6305_v38  ;;  %v6640_v3 = vsel %vm554_vm12, %v6617_v43, %v6619_v0  ;;  %v14035_v38 = vld [vmem:[%s15853_s3 + $0x8] sm:$0xff] }
 0x649   :  { %7465 = vmatpush2.msra.mxu1 %v6304_v12  ;;  %16092 = vst [vmem:[#allocation11_spill] sm:$0xff] %v14035_v38 }
 0x64a   :  { %v14001_v6 = vpop.permute.xlu0 %6620 }
 0x64b   :  { %v6179_v17 = vpop.permute.xlu1 %6178  ;;  %v6641_v9 = vsel %vm554_vm12, %v6619_v0, %v14001_v6 }
 0x64c   :  { %7533 = vmatprep.subr.mxu0 %v6641_v9  ;;  %v6202_v60 = vsel %vm1864_vm1, %v13716_v31, %v6179_v17 }
 0x64d   :  { %7534 = vmatpush2.msra.mxu0 %v6640_v3 }
 0x64e   :  { %v6181_v1 = vpop.permute.xlu0 %6180 }
 0x64f   :  { %v6517_v56 = vpop.permute.xlu1 %6516  ;;  %v6203_v39 = vsel %vm1864_vm1, %v6179_v17, %v6181_v1 }
 0x650   :  { %7466 = vmatprep.subr.mxu1 %v6203_v39  ;;  %v6538_v11 = vsel %vm292_vm14, %v6515_v15, %v6517_v56 }
 0x651   :  { %7467 = vmatpush2.msra.mxu1 %v6202_v60 }
 0x652   :  { %v14009_v32 = vpop.permute.xlu0 %6518 }
 0x653   :  { %v6077_v5 = vpop.permute.xlu1 %6076  ;;  %v6539_v24 = vsel %vm292_vm14, %v6517_v56, %v14009_v32 }
 0x654   :  { %7535 = vmatprep.subr.mxu0 %v6539_v24  ;;  %v6100_v31 = vsel %vm1602_vm3, %v13742_v10, %v6077_v5 }
 0x655   :  { %7536 = vmatpush2.msra.mxu0 %v6538_v11 }
 0x656   :  { %v6079_v43 = vpop.permute.xlu0 %6078  ;;  %7537 = vmatprep.subr.mxu0 %v13469_v29 }
 0x657   :  { %v6387_v45 = vpop.permute.xlu1 %6386  ;;  %7538 = vmatpush2.msra.mxu0 %v13459_v23  ;;  %v6101_v14 = vsel %vm1602_vm3, %v6077_v5, %v6079_v43 }
 0x658   :  { %7468 = vmatprep.subr.mxu1 %v6101_v14  ;;  %v6408_v26 = vsel %vm5455_vm8, %v6385_v34, %v6387_v45 }
 0x659   :  { %7469 = vmatpush2.msra.mxu1 %v6100_v31 }
 0x65a   :  { %v14019_v21 = vpop.permute.xlu0 %6388  ;;  %7471 = vmatmul.mubr.f32.vlgmr.msra.gmra.mxu1 %v13643_v41 }
 0x65b   :  { %v6285_v51 = vpop.permute.xlu1 %6284  ;;  %v6409_v15 = vsel %vm5455_vm8, %v6387_v45, %v14019_v21  ;;  %9831 = vmatprep.mubr.msk.f32.mxu1 %vm3588_vm11, %v13666_v4 }
 0x65c   :  { %7539 = vmatprep.subr.mxu0 %v6409_v15  ;;  %v6306_v34 = vsel %vm5352_vm7, %v6283_v47, %v6285_v51 }
 0x65d   :  { %7540 = vmatpush2.msra.mxu0 %v6408_v26 }
 0x65e   :  { %v14027_v63 = vpop.permute.xlu0 %6286  ;;  %7477 = vmatmul.mubr.f32.gmra.mxu1 %v13675_v35 }
 0x65f   :  { %v6183_v10 = vpop.permute.xlu1 %6182  ;;  %v6307_v0 = vsel %vm5352_vm7, %v6285_v51, %v14027_v63  ;;  %9834 = vmatprep.mubr.msk.f32.mxu1 %vm3588_vm11, %v14035_v38 }
 0x660   :  { %7541 = vmatprep.subr.mxu0 %v6307_v0  ;;  %v6204_v3 = vsel %vm1864_vm1, %v6181_v1, %v6183_v10 }
 0x661   :  { %7542 = vmatpush2.msra.mxu0 %v6306_v34 }
 0x662   :  { %v14040_v12 = vpop.permute.xlu0 %6184 }
 0x663   :  { %v6081_v17 = vpop.permute.xlu1 %6080  ;;  %v6205_v9 = vsel %vm1864_vm1, %v6183_v10, %v14040_v12 }
 0x664   :  { %7543 = vmatprep.subr.mxu0 %v6205_v9  ;;  %v6102_v5 = vsel %vm1602_vm3, %v6079_v43, %v6081_v17 }
 0x665   :  { %7544 = vmatpush2.msra.mxu0 %v6204_v3 }
 0x666   :  { %v14045_v56 = vpop.permute.xlu0 %6082 }
 0x667   :  { %v4347_v39 = vpop.permute.xlu1 %4346  ;;  %v6103_v60 = vsel %vm1602_vm3, %v6081_v17, %v14045_v56 }
 0x668   :  { %v4368_v47 = vsel %vm161_vm15, %v13151_v58, %v4347_v39  ;;  %7545 = vmatprep.subr.mxu0 %v6103_v60 }
 0x669   :  { %v4402_v24 = vmax.f32 %v4243_v48, %v4368_v47  ;;  %7546 = vmatpush2.msra.mxu0 %v6102_v5 }
 0x66a   :  { %v4349_v11 = vpop.permute.xlu0 %4348  ;;  %7548 = vmatmul.mubr.f32.vlgmr.msra.gmra.mxu0 %v13643_v41 }
 0x66b   :  { %v4369_v1 = vsel %vm161_vm15, %v4347_v39, %v4349_v11  ;;  %4468 = vrot.lane.b32.xlu0 %v4402_v24, %s15958_s17  ;;  %v4351_v45 = vpop.permute.xlu1 %4350  ;;  %9833 = vmatprep.mubr.msk.f32.mxu0 %vm3588_vm11, %v13666_v4 }
 0x66c   :  { %v4403_v58 = vmax.f32 %v4244_v20, %v4369_v1  ;;  %v4370_v43 = vsel %vm161_vm15, %v4349_v11, %v4351_v45  ;;  %v7234_v20 = vld [vmem:[%s15854_s4] sm:$0xff] }
 0x66d   :  { %v14064_v18 = vmax.f32 %v4245_v13, %v4370_v43 }
 0x66e   :  { %v4353_v48 = vpop.permute.xlu0 %4352  ;;  %7554 = vmatmul.mubr.f32.gmra.mxu0 %v13675_v35  ;;  %4470 = vrot.lane.b32.xlu1 %v4403_v58, %s15958_s17 }
 0x66f   :  { %v4371_v41 = vsel %vm161_vm15, %v4351_v45, %v4353_v48  ;;  %4472 = vrot.lane.b32.xlu0 %v14064_v18, %s15958_s17  ;;  %v4355_v4 = vpop.permute.xlu1 %4354  ;;  %9836 = vmatprep.mubr.msk.f32.mxu0 %vm3588_vm11, %v14035_v38 }
 0x670   :  { %v14075_v46 = vmax.f32 %v4246_v16, %v4371_v41  ;;  %v4372_v52 = vsel %vm161_vm15, %v4353_v48, %v4355_v4  ;;  %v4425_v13 = vmax.f32 %v4248_v50, %v4355_v4  ;;  %vm16093_vm15 = vcmask 785408  }
 0x671   :  { %v14080_v35 = vmax.f32 %v4247_v36, %v4372_v52  ;;  %vm16094_vm10 = vmmov %vm16093_vm15 }
 0x672   :  { %4474 = vrot.lane.b32.xlu1 %v14075_v46, %s15958_s17  ;;  %vm16095_vm0 = vmmov %vm16094_vm10 }
 0x673   :  { %4476 = vrot.lane.b32.xlu0 %v14080_v35, %s15958_s17  ;;  %vm16098_vm2 = vmmov %vm16095_vm0 }
 0x674   :  { %vm16099_vm13 = vmmov %vm16095_vm0 }
 0x676   :  { %7238 = vperm.xlu1 %10187, %v7234_v20  }
 0x677   :  { %7243 = vperm.xlu0 %10188, %v7235_v49  }
 0x67a   :  { %5982 = vrot.lane.b32.xlu1 %v13740_v54, %s15960_s30 }
 0x67b   :  { %5880 = vrot.lane.b32.xlu0 %v13740_v54, %s10456_s1 }
 0x67f   :  { %5778 = vrot.lane.b32.xlu0 %v13740_v54, %s10457_s23 }
 0x683   :  { %5676 = vrot.lane.b32.xlu0 %v13740_v54, %s15987_s9 }
 0x687   :  { %5574 = vrot.lane.b32.xlu0 %v13740_v54, %s15959_s29 }
 0x68a   :  { %v14199_v0 = vpop.f32.mrf.mxu0 }
 0x68b   :  { %5443 = vrot.lane.b32.xlu0 %v13469_v29, %s10458_s28 }
 0x68c   :  { %v14207_v17 = vpop.f32.mrf.mxu0 }
 0x68e   :  { %v14213_v9 = vpop.f32.mrf.mxu0 }
 0x68f   :  { %5340 = vrot.lane.b32.xlu0 %v13469_v29, %s10459_s21 }
 0x690   :  { %v14221_v39 = vpop.f32.mrf.mxu0 }
 0x693   :  { %5238 = vrot.lane.b32.xlu0 %v13469_v29, %s15973_s20 }
 0x697   :  { %5136 = vrot.lane.b32.xlu0 %v13469_v29, %s15977_s19 }
 0x69b   :  { %5034 = vrot.lane.b32.xlu0 %v13469_v29, %s15960_s30 }
 0x69f   :  { %4478 = vrot.lane.b32.xlu0 %v4425_v13, %s15958_s17  ;;  %s16162_s17 = sld [smem:[#allocation16_spill]] }
 0x6a3   :  { %4933 = vrot.lane.b32.xlu0 %v13740_v54, %s10456_s1 }
 0x6a7   :  { %4830 = vrot.lane.b32.xlu0 %v13740_v54, %s10457_s23 }
 0x6dd   :  { %v4469_v61 = vpop.permute.xlu0 %4468 }
 0x6de   :  { %v4491_v16 = vsel %vm16093_vm15, %v13456_v33, %v4469_v61  ;;  %vm16101_vm15 = vmmov %vm16090_vm4 }
 0x6df   :  { %v14122_v36 = vmax.f32 %v13191_v40, %v4491_v16 }
 0x6e0   :  { %v4471_v14 = vpop.permute.xlu1 %4470 }
 0x6e1   :  { %5984 = vrot.lane.b32.xlu1 %v14122_v36, %s15960_s30  ;;  %v14126_v37 = vpop.permute.xlu0 %4472  ;;  %v4492_v40 = vsel %vm16095_vm0, %v4469_v61, %v4471_v14  ;;  %vm16103_vm0 = vmmov %vm16090_vm4 }
 0x6e2   :  { %v4493_v50 = vsel %vm16094_vm10, %v4471_v14, %v14126_v37  ;;  %v14157_v33 = vmax.f32 %v4402_v24, %v4492_v40  ;;  %vm16102_vm10 = vmmov %vm16090_vm4 }
 0x6e3   :  { %v14130_v31 = vmax.f32 %v4403_v58, %v4493_v50 }
 0x6e4   :  { %v4475_v60 = vpop.permute.xlu1 %4474 }
 0x6e5   :  { %5882 = vrot.lane.b32.xlu1 %v14122_v36, %s10456_s1  ;;  %5988 = vrot.lane.b32.xlu0 %v14130_v31, %s15960_s30  ;;  %v14171_v51 = vpop.permute.xlu0 %4476  ;;  %v4494_v40 = vsel %vm16099_vm13, %v14126_v37, %v4475_v60 }
 0x6e6   :  { %v4495_v49 = vsel %vm16098_vm2, %v4475_v60, %v14171_v51  ;;  %vm16104_vm2 = vmmov %vm16103_vm0 }
 0x6e7   :  { %v14258_v13 = vmax.f32 %v14075_v46, %v4495_v49 }
 0x6e9   :  { %5780 = vrot.lane.b32.xlu1 %v14122_v36, %s10457_s23  ;;  %4728 = vrot.lane.b32.xlu0 %v13740_v54, %s15987_s9 }
 0x6ed   :  { %5678 = vrot.lane.b32.xlu1 %v14122_v36, %s15987_s9  ;;  %5886 = vrot.lane.b32.xlu0 %v14130_v31, %s10456_s1 }
 0x6f1   :  { %5576 = vrot.lane.b32.xlu1 %v14122_v36, %s15959_s29  ;;  %4626 = vrot.lane.b32.xlu0 %v13740_v54, %s15959_s29  ;;  %v14229_v24 = vpop.permute.xlu1 %7238 }
 0x6f2   :  { %v14177_v15 = vpop.permute.xlu0 %7243 }
 0x6f3   :  { %16096 = vst [vmem:[#allocation12_spill] sm:$0xff] %v14177_v15 }
 0x6f5   :  { %5445 = vrot.lane.b32.xlu1 %v13740_v54, %s10458_s28  ;;  %5784 = vrot.lane.b32.xlu0 %v14130_v31, %s10457_s23  ;;  %v5983_v50 = vpop.permute.xlu1 %5982 }
 0x6f6   :  { %v14183_v26 = vpop.permute.xlu0 %5880  ;;  %v6002_v37 = vsel %vm16100_vm6, %v13765_v30, %v5983_v50  ;;  %vm16106_vm6 = vmmov %vm16103_vm0 }
 0x6f7   :  { %v5900_v30 = vsel %vm4943_vm9, %v13780_v44, %v14183_v26 }
 0x6f9   :  { %5342 = vrot.lane.b32.xlu1 %v13740_v54, %s10459_s21  ;;  %5682 = vrot.lane.b32.xlu0 %v14130_v31, %s15987_s9 }
 0x6fa   :  { %v14193_v10 = vpop.permute.xlu0 %5778 }
 0x6fb   :  { %v5798_v44 = vsel %vm4840_vm5, %v13800_v19, %v14193_v10 }
 0x6fd   :  { %5240 = vrot.lane.b32.xlu1 %v13740_v54, %s15973_s20  ;;  %6828 = vrot.lane.b32.xlu0 %v14157_v33, %s10456_s1 }
 0x6fe   :  { %v14201_v34 = vpop.permute.xlu0 %5676 }
 0x6ff   :  { %v5696_v19 = vsel %vm554_vm12, %v13820_v42, %v14201_v34 }
 0x701   :  { %5138 = vrot.lane.b32.xlu1 %v13740_v54, %s15977_s19  ;;  %5580 = vrot.lane.b32.xlu0 %v14130_v31, %s15959_s29 }
 0x702   :  { %v14215_v3 = vpop.permute.xlu0 %5574 }
 0x703   :  { %v5594_v42 = vsel %vm292_vm14, %v13840_v22, %v14215_v3 }
 0x705   :  { %5036 = vrot.lane.b32.xlu1 %v13740_v54, %s15960_s30  ;;  %6726 = vrot.lane.b32.xlu0 %v14157_v33, %s10457_s23 }
 0x706   :  { %v14223_v47 = vpop.permute.xlu0 %5443 }
 0x707   :  { %v5464_v22 = vsel %vm5455_vm8, %v13887_v57, %v14223_v47 }
 0x709   :  { %4931 = vrot.lane.b32.xlu1 %v13469_v29, %s10456_s1  ;;  %6624 = vrot.lane.b32.xlu0 %v14157_v33, %s15987_s9 }
 0x70a   :  { %v14236_v58 = vpop.permute.xlu0 %5340 }
 0x70b   :  { %v5361_v57 = vsel %vm5352_vm7, %v13914_v7, %v14236_v58 }
 0x70d   :  { %4828 = vrot.lane.b32.xlu1 %v13469_v29, %s10457_s23  ;;  %5449 = vrot.lane.b32.xlu0 %v14157_v33, %s10458_s28 }
 0x70e   :  { %v14245_v20 = vpop.permute.xlu0 %5238 }
 0x711   :  { %6522 = vrot.lane.b32.xlu0 %v14157_v33, %s15959_s29  ;;  %5986 = vrot.lane.b32.xlu1 %v14157_v33, %s15960_s30 }
 0x712   :  { %v14260_v61 = vpop.permute.xlu0 %5136 }
 0x715   :  { %5346 = vrot.lane.b32.xlu0 %v14157_v33, %s10459_s21  ;;  %4726 = vrot.lane.b32.xlu1 %v13469_v29, %s15987_s9 }
 0x716   :  { %v14266_v16 = vpop.permute.xlu0 %5034 }
 0x719   :  { %5244 = vrot.lane.b32.xlu0 %v14157_v33, %s15973_s20  ;;  %5884 = vrot.lane.b32.xlu1 %v14157_v33, %s10456_s1 }
 0x71a   :  { %v14276_v46 = vpop.permute.xlu0 %4478 }
 0x71d   :  { %6392 = vrot.lane.b32.xlu0 %v14122_v36, %s10458_s28  ;;  %4624 = vrot.lane.b32.xlu1 %v13469_v29, %s15959_s29 }
 0x71e   :  { %v14282_v14 = vpop.permute.xlu0 %4933 }
 0x721   :  { %5142 = vrot.lane.b32.xlu0 %v14157_v33, %s15977_s19  ;;  %5782 = vrot.lane.b32.xlu1 %v14157_v33, %s10457_s23 }
 0x725   :  { %6290 = vrot.lane.b32.xlu0 %v14122_v36, %s10459_s21  ;;  %5680 = vrot.lane.b32.xlu1 %v14157_v33, %s15987_s9 }
 0x729   :  { %5040 = vrot.lane.b32.xlu0 %v14157_v33, %s15960_s30  ;;  %6826 = vrot.lane.b32.xlu1 %v14122_v36, %s10456_s1 }
 0x72a   :  { %v7549_v5 = vpop.f32.mrf.mxu0 }
 0x72b   :  { %v7550_v1 = vadd.f32 %v7549_v5, %v14229_v24  ;;  %v14295_v5 = vmax.f32 %v14064_v18, %v4494_v40 }
 0x72c   :  { %v7551_v11 = vpop.f32.mrf.mxu0 }
 0x72d   :  { %6188 = vrot.lane.b32.xlu0 %v14122_v36, %s15973_s20  ;;  %5578 = vrot.lane.b32.xlu1 %v14157_v33, %s15959_s29  ;;  %v7797_v41 = vmax.f32 %v7550_v1, 0.0  ;;  %v14297_v11 = vpop.permute.xlu0 %4830 }
 0x72e   :  { %v7555_v45 = vpop.f32.mrf.mxu0 }
 0x72f   :  { %v7556_v43 = vadd.f32 %v7555_v45, %v14177_v15 }
 0x730   :  { %v7557_v48 = vpop.f32.mrf.mxu0 }
 0x731   :  { %v7811_v4 = vmax.f32 %v7556_v43, 0.0  ;;  %4937 = vrot.lane.b32.xlu0 %v14157_v33, %s10456_s1  ;;  %6724 = vrot.lane.b32.xlu1 %v14122_v36, %s10457_s23  ;;  %v7318_v43 = vpop.f32.mrf.mxu1 }
 0x732   :  { %v14415_v38 = vadd.f32 %v7318_v43, %v14229_v24 }
 0x733   :  { %v14243_v52 = vpack.i.bf16 %v7811_v4, %v7797_v41  ;;  %v14327_v49 = vpop.f32.mrf.mxu1 }
 0x735   :  { %16097 = vst [vmem:[#allocation13_spill] sm:$0xff] %v14243_v52  ;;  %6086 = vrot.lane.b32.xlu0 %v14122_v36, %s15977_s19  ;;  %6622 = vrot.lane.b32.xlu1 %v14122_v36, %s15987_s9 }
 0x739   :  { %4834 = vrot.lane.b32.xlu0 %v14157_v33, %s10457_s23  ;;  %5447 = vrot.lane.b32.xlu1 %v14122_v36, %s10458_s28 }
 0x73d   :  { %6520 = vrot.lane.b32.xlu1 %v14122_v36, %s15959_s29  ;;  %5992 = vrot.lane.b32.xlu0 %v14258_v13, %s15960_s30 }
 0x741   :  { %5344 = vrot.lane.b32.xlu1 %v14122_v36, %s10459_s21  ;;  %4732 = vrot.lane.b32.xlu0 %v14157_v33, %s15987_s9 }
 0x745   :  { %5242 = vrot.lane.b32.xlu1 %v14122_v36, %s15973_s20  ;;  %5890 = vrot.lane.b32.xlu0 %v14258_v13, %s10456_s1 }
 0x749   :  { %6390 = vrot.lane.b32.xlu1 %v13740_v54, %s10458_s28  ;;  %4630 = vrot.lane.b32.xlu0 %v14157_v33, %s15959_s29 }
 0x74d   :  { %5140 = vrot.lane.b32.xlu1 %v14122_v36, %s15977_s19  ;;  %5788 = vrot.lane.b32.xlu0 %v14258_v13, %s10457_s23 }
 0x751   :  { %6288 = vrot.lane.b32.xlu1 %v13740_v54, %s10459_s21  ;;  %5686 = vrot.lane.b32.xlu0 %v14258_v13, %s15987_s9 }
 0x753   :  { %v14299_v1 = vpop.permute.xlu1 %5984 }
 0x754   :  { %v6003_v45 = vsel %vm16090_vm4, %v5983_v50, %v14299_v1  ;;  %vm16105_vm4 = vmmov %vm16103_vm0 }
 0x755   :  { %5038 = vrot.lane.b32.xlu1 %v14122_v36, %s15960_s30  ;;  %6832 = vrot.lane.b32.xlu0 %v14295_v5, %s10456_s1 }
 0x756   :  { %7560 = vmatprep.subr.mxu1 %v6003_v45  ;;  %v7324_v45 = vpop.f32.mrf.mxu1 }
 0x757   :  { %7561 = vmatpush1.msra.mxu1 %v6002_v37  ;;  %v14309_v18 = vpop.permute.xlu0 %5988  ;;  %v14311_v60 = vpop.permute.xlu1 %5882 }
 0x758   :  { %v5901_v48 = vsel %vm4943_vm9, %v14183_v26, %v14311_v60 }
 0x759   :  { %6186 = vrot.lane.b32.xlu1 %v13740_v54, %s15973_s20  ;;  %5584 = vrot.lane.b32.xlu0 %v14258_v13, %s15959_s29 }
 0x75a   :  { %7562 = vmatprep.subr.mxu1 %v5901_v48 }
 0x75b   :  { %7563 = vmatpush1.msra.mxu1 %v5900_v30  ;;  %v14323_v41 = vpop.permute.xlu0 %4728  ;;  %v14325_v4 = vpop.permute.xlu1 %5780 }
 0x75c   :  { %v5799_v50 = vsel %vm4840_vm5, %v14193_v10, %v14325_v4  ;;  %v7326_v30 = vpop.f32.mrf.mxu1 }
 0x75d   :  { %4935 = vrot.lane.b32.xlu1 %v14122_v36, %s10456_s1  ;;  %6730 = vrot.lane.b32.xlu0 %v14295_v5, %s10457_s23 }
 0x75e   :  { %7564 = vmatprep.subr.mxu1 %v5799_v50 }
 0x75f   :  { %7565 = vmatpush1.msra.mxu1 %v5798_v44  ;;  %v14339_v26 = vpop.permute.xlu0 %5886  ;;  %v14341_v40 = vpop.permute.xlu1 %5678 }
 0x760   :  { %v5697_v37 = vsel %vm554_vm12, %v14201_v34, %v14341_v40 }
 0x761   :  { %6084 = vrot.lane.b32.xlu1 %v13740_v54, %s15977_s19  ;;  %6628 = vrot.lane.b32.xlu0 %v14295_v5, %s15987_s9 }
 0x762   :  { %7566 = vmatprep.subr.mxu1 %v5697_v37  ;;  %v14372_v37 = vadd.f32 %v7326_v30, %v14177_v15 }
 0x763   :  { %7567 = vmatpush1.msra.mxu1 %v5696_v19  ;;  %v14353_v10 = vpop.permute.xlu0 %4626  ;;  %v14355_v48 = vpop.permute.xlu1 %5576  ;;  %v14376_v19 = vadd.f32 %v14207_v17, %v14229_v24 }
 0x764   :  { %v5595_v50 = vsel %vm292_vm14, %v14215_v3, %v14355_v48 }
 0x765   :  { %4832 = vrot.lane.b32.xlu1 %v14122_v36, %s10457_s23  ;;  %5453 = vrot.lane.b32.xlu0 %v14295_v5, %s10458_s28  ;;  %v15920_v30 = vmax.f32 %v14376_v19, 0.0 }
 0x766   :  { %7568 = vmatprep.subr.mxu1 %v5595_v50 }
 0x767   :  { %7569 = vmatpush1.msra.mxu1 %v5594_v42  ;;  %v14367_v34 = vpop.permute.xlu0 %5784  ;;  %v14369_v44 = vpop.permute.xlu1 %5445  ;;  %v15921_v42 = vmax.f32 %v14372_v37, 0.0 }
 0x768   :  { %7570 = vmatprep.subr.mxu1 %v13740_v54  ;;  %v5465_v50 = vsel %vm5455_vm8, %v14223_v47, %v14369_v44 }
 0x769   :  { %7571 = vmatpush1.msra.mxu1 %v13469_v29  ;;  %6526 = vrot.lane.b32.xlu0 %v14295_v5, %s15959_s29 }
 0x76a   :  { %5990 = vrot.lane.b32.xlu1 %v14295_v5, %s15960_s30  ;;  %7572 = vmatprep.subr.mxu1 %v5465_v50 }
 0x76b   :  { %7573 = vmatpush1.msra.mxu1 %v5464_v22  ;;  %v14390_v17 = vpop.permute.xlu0 %5682  ;;  %v14392_v3 = vpop.permute.xlu1 %5342  ;;  %v10194_v22 = vpack.i.bf16 %v15921_v42, %v15920_v30 }
 0x76c   :  { %v5362_v52 = vsel %vm5352_vm7, %v14236_v58, %v14392_v3  ;;  %v5258_v58 = vsel %vm1864_vm1, %v13923_v55, %v14245_v20  ;;  %v5156_v55 = vsel %vm1602_vm3, %v13932_v25, %v14260_v61  ;;  %v5054_v25 = vsel %vm16102_vm10, %v13941_v53, %v14266_v16  ;;  %vm16109_vm10 = vmmov %vm16103_vm0 }
 0x76d   :  { %5350 = vrot.lane.b32.xlu0 %v14295_v5, %s10459_s21  ;;  %7574 = vmatprep.subr.mxu1 %v5362_v52  ;;  %v14418_v52 = vadd.f32 %v7324_v45, %v14177_v15  ;;  %v15923_v45 = vmax.f32 %v14415_v38, 0.0 }
 0x76e   :  { %4730 = vrot.lane.b32.xlu1 %v14122_v36, %s15987_s9  ;;  %7575 = vmatpush1.msra.mxu1 %v5361_v57 }
 0x76f   :  { %v14406_v47 = vpop.permute.xlu0 %6828  ;;  %v14408_v50 = vpop.permute.xlu1 %5240  ;;  %v15922_v30 = vmax.f32 %v14418_v52, 0.0 }
 0x770   :  { %v5259_v7 = vsel %vm1864_vm1, %v14245_v20, %v14408_v50 }
 0x771   :  { %10195 = vrot.lane.b32.xlu0 %v10194_v22, %s15959_s29  ;;  %7576 = vmatprep.subr.mxu1 %v5259_v7 }
 0x772   :  { %5888 = vrot.lane.b32.xlu1 %v14295_v5, %s10456_s1  ;;  %7577 = vmatpush1.msra.mxu1 %v5258_v58  ;;  %v10204_v58 = vpack.i.bf16 %v15922_v30, %v15923_v45 }
 0x773   :  { %v14429_v43 = vpop.permute.xlu0 %5580  ;;  %v14431_v57 = vpop.permute.xlu1 %5138 }
 0x774   :  { %v5157_v22 = vsel %vm1602_vm3, %v14260_v61, %v14431_v57 }
 0x775   :  { %5246 = vrot.lane.b32.xlu0 %v14130_v31, %s15973_s20  ;;  %7578 = vmatprep.subr.mxu1 %v5157_v22 }
 0x776   :  { %4628 = vrot.lane.b32.xlu1 %v14122_v36, %s15959_s29  ;;  %7579 = vmatpush1.msra.mxu1 %v5156_v55 }
 0x777   :  { %v14445_v20 = vpop.permute.xlu0 %6726  ;;  %v14447_v7 = vpop.permute.xlu1 %5036 }
 0x778   :  { %v5055_v22 = vsel %vm16101_vm15, %v14266_v16, %v14447_v7  ;;  %vm16108_vm15 = vmmov %vm16103_vm0 }
 0x779   :  { %10205 = vrot.lane.b32.xlu0 %v10204_v58, %s15959_s29  ;;  %7580 = vmatprep.subr.mxu1 %v5055_v22 }
 0x77a   :  { %5786 = vrot.lane.b32.xlu1 %v14295_v5, %s10457_s23  ;;  %7581 = vmatpush1.msra.mxu1 %v5054_v25 }
 0x77b   :  { %v14462_v61 = vpop.permute.xlu0 %6624  ;;  %v4932_v55 = vpop.permute.xlu1 %4931 }
 0x77c   :  { %v4953_v42 = vsel %vm4943_vm9, %v4932_v55, %v14282_v14  ;;  %v4952_v30 = vsel %vm4943_vm9, %v13949_v27, %v4932_v55 }
 0x77d   :  { %6396 = vrot.lane.b32.xlu0 %v14130_v31, %s10458_s28  ;;  %7582 = vmatprep.subr.mxu1 %v4953_v42 }
 0x77e   :  { %5684 = vrot.lane.b32.xlu1 %v14295_v5, %s15987_s9  ;;  %7583 = vmatpush1.msra.mxu1 %v4952_v30 }
 0x77f   :  { %v14472_v53 = vpop.permute.xlu0 %5449  ;;  %v4829_v16 = vpop.permute.xlu1 %4828 }
 0x780   :  { %v4850_v58 = vsel %vm4840_vm5, %v4829_v16, %v14297_v11  ;;  %v4849_v22 = vsel %vm4840_vm5, %v13957_v28, %v4829_v16 }
 0x781   :  { %5146 = vrot.lane.b32.xlu0 %v14295_v5, %s15977_s19  ;;  %7584 = vmatprep.subr.mxu1 %v4850_v58 }
 0x782   :  { %6830 = vrot.lane.b32.xlu1 %v14130_v31, %s10456_s1  ;;  %7585 = vmatpush1.msra.mxu1 %v4849_v22 }
 0x783   :  { %v14482_v27 = vpop.permute.xlu0 %6522  ;;  %v5987_v30 = vpop.permute.xlu1 %5986 }
 0x784   :  { %v6005_v42 = vsel %vm16103_vm0, %v5987_v30, %v14309_v18  ;;  %v6004_v25 = vsel %vm16104_vm2, %v14299_v1, %v5987_v30  ;;  %vm16117_vm2 = vmmov %vm16103_vm0 }
 0x785   :  { %6294 = vrot.lane.b32.xlu0 %v14130_v31, %s10459_s21  ;;  %7637 = vmatprep.subr.mxu0 %v6005_v42 }
 0x786   :  { %5582 = vrot.lane.b32.xlu1 %v14295_v5, %s15959_s29  ;;  %7638 = vmatpush1.msra.mxu0 %v6004_v25 }
 0x787   :  { %v14492_v28 = vpop.permute.xlu0 %5346  ;;  %v4727_v55 = vpop.permute.xlu1 %4726 }
 0x788   :  { %v4747_v16 = vsel %vm554_vm12, %v4727_v55, %v14323_v41  ;;  %v4746_v58 = vsel %vm554_vm12, %v13965_v59, %v4727_v55 }
 0x789   :  { %5044 = vrot.lane.b32.xlu0 %v14295_v5, %s15960_s30  ;;  %7586 = vmatprep.subr.mxu1 %v4747_v16 }
 0x78a   :  { %6728 = vrot.lane.b32.xlu1 %v14130_v31, %s10457_s23  ;;  %7587 = vmatpush1.msra.mxu1 %v4746_v58 }
 0x78b   :  { %v14502_v1 = vpop.permute.xlu0 %5244  ;;  %v5885_v22 = vpop.permute.xlu1 %5884 }
 0x78c   :  { %v5903_v30 = vsel %vm4943_vm9, %v5885_v22, %v14339_v26  ;;  %v5902_v42 = vsel %vm4943_vm9, %v14311_v60, %v5885_v22 }
 0x78d   :  { %6192 = vrot.lane.b32.xlu0 %v14130_v31, %s15973_s20  ;;  %7639 = vmatprep.subr.mxu0 %v5903_v30  ;;  %v14532_v30 = vadd.f32 %v14327_v49, %v14229_v24 }
 0x78e   :  { %6626 = vrot.lane.b32.xlu1 %v14130_v31, %s15987_s9  ;;  %7640 = vmatpush1.msra.mxu0 %v5902_v42  ;;  %v14536_v42 = vadd.f32 %v14199_v0, %v14229_v24 }
 0x78f   :  { %v14512_v59 = vpop.permute.xlu0 %6392  ;;  %v4625_v25 = vpop.permute.xlu1 %4624 }
 0x790   :  { %v4645_v55 = vsel %vm292_vm14, %v4625_v25, %v14353_v10  ;;  %v4644_v16 = vsel %vm292_vm14, %v13973_v62, %v4625_v25 }
 0x791   :  { %4941 = vrot.lane.b32.xlu0 %v14295_v5, %s10456_s1  ;;  %7588 = vmatprep.subr.mxu1 %v4645_v55  ;;  %v15924_v55 = vmax.f32 %v14532_v30, 0.0 }
 0x792   :  { %5451 = vrot.lane.b32.xlu1 %v14130_v31, %s10458_s28  ;;  %7589 = vmatpush1.msra.mxu1 %v4644_v16  ;;  %v15929_v16 = vmax.f32 %v14536_v42, 0.0 }
 0x793   :  { %v14522_v60 = vpop.permute.xlu0 %5142  ;;  %7590 = vmatprep.subr.mxu1 %v13469_v29  ;;  %v5783_v58 = vpop.permute.xlu1 %5782  ;;  %v14548_v29 = vadd.f32 %v14221_v39, %v14177_v15 }
 0x794   :  { %7591 = vmatpush1.msra.mxu1 %v13459_v23  ;;  %v5801_v22 = vsel %vm4840_vm5, %v5783_v58, %v14367_v34  ;;  %v5800_v62 = vsel %vm4840_vm5, %v14325_v4, %v5783_v58  ;;  %v14544_v23 = vadd.f32 %v14213_v9, %v14177_v15 }
 0x795   :  { %6090 = vrot.lane.b32.xlu0 %v14130_v31, %s15977_s19  ;;  %7641 = vmatprep.subr.mxu0 %v5801_v22  ;;  %v15925_v22 = vmax.f32 %v14548_v29, 0.0 }
 0x796   :  { %6524 = vrot.lane.b32.xlu1 %v14130_v31, %s15959_s29  ;;  %7642 = vmatpush1.msra.mxu0 %v5800_v62  ;;  %v15926_v9 = vmax.f32 %v14544_v23, 0.0 }
 0x797   :  { %v14550_v4 = vpop.permute.xlu0 %6290  ;;  %v5681_v0 = vpop.permute.xlu1 %5680 }
 0x798   :  { %v5699_v49 = vsel %vm554_vm12, %v5681_v0, %v14390_v17  ;;  %v5698_v25 = vsel %vm554_vm12, %v14341_v40, %v5681_v0  ;;  %v10189_v40 = vpack.i.bf16 %v15929_v16, %v15924_v55  ;;  %v4496_v55 = vsel %vm16099_vm13, %v14171_v51, %v14276_v46  ;;  %vm16131_vm13 = vmmov %vm16103_vm0 }
 0x799   :  { %4838 = vrot.lane.b32.xlu0 %v14295_v5, %s10457_s23  ;;  %7643 = vmatprep.subr.mxu0 %v5699_v49  ;;  %v14576_v49 = vpop.f32.mrf.mxu1  ;;  %v4530_v51 = vmax.f32 %v14080_v35, %v4496_v55 }
 0x79a   :  { %5348 = vrot.lane.b32.xlu1 %v14130_v31, %s10459_s21  ;;  %7644 = vmatpush1.msra.mxu0 %v5698_v25 }
 0x79b   :  { %v14563_v39 = vpop.permute.xlu0 %5040  ;;  %v6827_v58 = vpop.permute.xlu1 %6826 }
 0x79c   :  { %v6847_v62 = vsel %vm4943_vm9, %v6827_v58, %v14406_v47  ;;  %v6846_v0 = vsel %vm4943_vm9, %v13983_v2, %v6827_v58  ;;  %v10199_v2 = vpack.i.bf16 %v15925_v22, %v15926_v9 }
 0x79d   :  { %4736 = vrot.lane.b32.xlu0 %v14295_v5, %s15987_s9  ;;  %7606 = vmatprep.subr.mxu1 %v6847_v62 }
 0x79e   :  { %10190 = vrot.lane.b32.xlu1 %v10189_v40, %s15959_s29  ;;  %7607 = vmatpush2.msra.mxu1 %v6846_v0  ;;  %v14594_v40 = vpop.f32.mrf.mxu1 }
 0x79f   :  { %v14579_v25 = vpop.permute.xlu0 %6188  ;;  %v5579_v45 = vpop.permute.xlu1 %5578 }
 0x7a0   :  { %v5597_v58 = vsel %vm292_vm14, %v5579_v45, %v14429_v43  ;;  %v5596_v62 = vsel %vm292_vm14, %v14355_v48, %v5579_v45  ;;  %v7478_v22 = vpop.f32.mrf.mxu1 }
 0x7a1   :  { %4634 = vrot.lane.b32.xlu0 %v14295_v5, %s15959_s29  ;;  %7645 = vmatprep.subr.mxu0 %v5597_v58 }
 0x7a2   :  { %10200 = vrot.lane.b32.xlu1 %v10199_v2, %s15959_s29  ;;  %7646 = vmatpush1.msra.mxu0 %v5596_v62  ;;  %v7480_v2 = vpop.f32.mrf.mxu1 }
 0x7a3   :  { %v14598_v46 = vpop.permute.xlu0 %4937  ;;  %7647 = vmatprep.subr.mxu0 %v14157_v33  ;;  %v6725_v0 = vpop.permute.xlu1 %6724 }
 0x7a4   :  { %7648 = vmatpush1.msra.mxu0 %v14122_v36  ;;  %v6745_v48 = vsel %vm4840_vm5, %v6725_v0, %v14445_v20  ;;  %v6744_v45 = vsel %vm4840_vm5, %v13993_v8, %v6725_v0  ;;  %v14619_v8 = vadd.f32 %v7478_v22, %v14177_v15  ;;  %v14622_v0 = vadd.f32 %v7480_v2, %v14177_v15 }
 0x7a5   :  { %6836 = vrot.lane.b32.xlu0 %v4530_v51, %s10456_s1  ;;  %7608 = vmatprep.subr.mxu1 %v6745_v48 }
 0x7a6   :  { %5248 = vrot.lane.b32.xlu1 %v14295_v5, %s15973_s20  ;;  %7609 = vmatpush2.msra.mxu1 %v6744_v45  ;;  %v15928_v22 = vmax.f32 %v14619_v8, 0.0 }
 0x7a7   :  { %v14609_v35 = vpop.permute.xlu0 %6086  ;;  %v6623_v55 = vpop.permute.xlu1 %6622 }
 0x7a8   :  { %v6643_v58 = vsel %vm554_vm12, %v6623_v55, %v14462_v61  ;;  %v6642_v62 = vsel %vm554_vm12, %v14001_v6, %v6623_v55  ;;  %v15927_v55 = vmax.f32 %v14622_v0, 0.0 }
 0x7a9   :  { %6734 = vrot.lane.b32.xlu0 %v4530_v51, %s10457_s23  ;;  %7610 = vmatprep.subr.mxu1 %v6643_v58 }
 0x7aa   :  { %6394 = vrot.lane.b32.xlu1 %v14157_v33, %s10458_s28  ;;  %7611 = vmatpush2.msra.mxu1 %v6642_v62 }
 0x7ab   :  { %v14624_v48 = vpop.permute.xlu0 %4834  ;;  %v5448_v45 = vpop.permute.xlu1 %5447 }
 0x7ac   :  { %v5467_v9 = vsel %vm5455_vm8, %v5448_v45, %v14472_v53  ;;  %v5466_v6 = vsel %vm5455_vm8, %v14369_v44, %v5448_v45 }
 0x7ad   :  { %6632 = vrot.lane.b32.xlu0 %v4530_v51, %s15987_s9  ;;  %7649 = vmatprep.subr.mxu0 %v5467_v9  ;;  %v10214_v9 = vpack.i.bf16 %v15927_v55, %v15928_v22 }
 0x7ae   :  { %5144 = vrot.lane.b32.xlu1 %v14130_v31, %s15977_s19  ;;  %7650 = vmatpush1.msra.mxu0 %v5466_v6 }
 0x7af   :  { %v14635_v2 = vpop.permute.xlu0 %5992  ;;  %v6521_v58 = vpop.permute.xlu1 %6520 }
 0x7b0   :  { %v6541_v62 = vsel %vm292_vm14, %v6521_v58, %v14482_v27  ;;  %v6540_v44 = vsel %vm292_vm14, %v14009_v32, %v6521_v58 }
 0x7b1   :  { %6530 = vrot.lane.b32.xlu0 %v4530_v51, %s15959_s29  ;;  %7612 = vmatprep.subr.mxu1 %v6541_v62 }
 0x7b2   :  { %6292 = vrot.lane.b32.xlu1 %v14157_v33, %s10459_s21  ;;  %7613 = vmatpush2.msra.mxu1 %v6540_v44 }
 0x7b3   :  { %v14648_v45 = vpop.permute.xlu0 %4732  ;;  %7614 = vmatprep.subr.mxu1 %v14122_v36  ;;  %v5345_v6 = vpop.permute.xlu1 %5344 }
 0x7b4   :  { %7615 = vmatpush2.msra.mxu1 %v13740_v54  ;;  %v5364_v32 = vsel %vm5352_vm7, %v5345_v6, %v14492_v28  ;;  %v5363_v51 = vsel %vm5352_vm7, %v14392_v3, %v5345_v6 }
 0x7b5   :  { %10215 = vrot.lane.b32.xlu0 %v10214_v9, %s15959_s29  ;;  %7651 = vmatprep.subr.mxu0 %v5364_v32 }
 0x7b6   :  { %5042 = vrot.lane.b32.xlu1 %v14130_v31, %s15960_s30  ;;  %7652 = vmatpush1.msra.mxu0 %v5363_v51 }
 0x7b7   :  { %v14659_v58 = vpop.permute.xlu0 %5890  ;;  %v5243_v62 = vpop.permute.xlu1 %5242 }
 0x7b8   :  { %v5261_v44 = vsel %vm1864_vm1, %v5243_v62, %v14502_v1  ;;  %v5260_v55 = vsel %vm1864_vm1, %v14408_v50, %v5243_v62 }
 0x7b9   :  { %6400 = vrot.lane.b32.xlu0 %v14258_v13, %s10458_s28  ;;  %7653 = vmatprep.subr.mxu0 %v5261_v44 }
 0x7ba   :  { %6190 = vrot.lane.b32.xlu1 %v14157_v33, %s15973_s20  ;;  %7654 = vmatpush1.msra.mxu0 %v5260_v55 }
 0x7bb   :  { %v14669_v3 = vpop.permute.xlu0 %4630  ;;  %v6391_v9 = vpop.permute.xlu1 %6390 }
 0x7bc   :  { %v6411_v6 = vsel %vm5455_vm8, %v6391_v9, %v14512_v59  ;;  %v6410_v32 = vsel %vm5455_vm8, %v14019_v21, %v6391_v9 }
 0x7bd   :  { %6298 = vrot.lane.b32.xlu0 %v14258_v13, %s10459_s21  ;;  %7616 = vmatprep.subr.mxu1 %v6411_v6 }
 0x7be   :  { %4939 = vrot.lane.b32.xlu1 %v14130_v31, %s10456_s1  ;;  %7617 = vmatpush2.msra.mxu1 %v6410_v32 }
 0x7bf   :  { %v14679_v50 = vpop.permute.xlu0 %5788  ;;  %v5141_v55 = vpop.permute.xlu1 %5140 }
 0x7c0   :  { %v5159_v51 = vsel %vm1602_vm3, %v5141_v55, %v14522_v60  ;;  %v5158_v62 = vsel %vm1602_vm3, %v14431_v57, %v5141_v55 }
 0x7c1   :  { %6196 = vrot.lane.b32.xlu0 %v14258_v13, %s15973_s20  ;;  %7655 = vmatprep.subr.mxu0 %v5159_v51 }
 0x7c2   :  { %6088 = vrot.lane.b32.xlu1 %v14157_v33, %s15977_s19  ;;  %7656 = vmatpush1.msra.mxu0 %v5158_v62 }
 0x7c3   :  { %v14689_v21 = vpop.permute.xlu0 %5686  ;;  %v6289_v44 = vpop.permute.xlu1 %6288 }
 0x7c4   :  { %v6309_v9 = vsel %vm5352_vm7, %v6289_v44, %v14550_v4  ;;  %v6308_v6 = vsel %vm5352_vm7, %v14027_v63, %v6289_v44 }
 0x7c5   :  { %6092 = vrot.lane.b32.xlu0 %v14295_v5, %s15977_s19  ;;  %7618 = vmatprep.subr.mxu1 %v6309_v9 }
 0x7c6   :  { %4836 = vrot.lane.b32.xlu1 %v14130_v31, %s10457_s23  ;;  %7619 = vmatpush2.msra.mxu1 %v6308_v6 }
 0x7c7   :  { %v14699_v57 = vpop.permute.xlu0 %6832  ;;  %v5039_v32 = vpop.permute.xlu1 %5038 }
 0x7c8   :  { %v5057_v55 = vsel %vm16105_vm4, %v5039_v32, %v14563_v39  ;;  %v5056_v51 = vsel %vm16106_vm6, %v14447_v7, %v5039_v32  ;;  %vm16132_vm4 = vmmov %vm16103_vm0 }
 0x7c9   :  { %7657 = vmatprep.subr.mxu0 %v5057_v55  ;;  %vm16134_vm6 = vmmov %vm16103_vm0 }
 0x7ca   :  { %4734 = vrot.lane.b32.xlu1 %v14130_v31, %s15987_s9  ;;  %7658 = vmatpush1.msra.mxu0 %v5056_v51 }
 0x7cb   :  { %v14707_v63 = vpop.permute.xlu0 %5584  ;;  %v6187_v62 = vpop.permute.xlu1 %6186 }
 0x7cc   :  { %v6206_v44 = vsel %vm1864_vm1, %v14040_v12, %v6187_v62  ;;  %v6207_v9 = vsel %vm1864_vm1, %v6187_v62, %v14579_v25 }
 0x7cd   :  { %7620 = vmatprep.subr.mxu1 %v6207_v9  ;;  %v14736_v9 = vld [vmem:[%s15853_s3] sm:$0xff] }
 0x7ce   :  { %4632 = vrot.lane.b32.xlu1 %v14130_v31, %s15959_s29  ;;  %7621 = vmatpush2.msra.mxu1 %v6206_v44 }
 0x7cf   :  { %v14715_v7 = vpop.permute.xlu0 %6730  ;;  %v4936_v6 = vpop.permute.xlu1 %4935 }
 0x7d0   :  { %v4954_v32 = vsel %vm4943_vm9, %v14282_v14, %v4936_v6  ;;  %v4955_v55 = vsel %vm4943_vm9, %v4936_v6, %v14598_v46 }
 0x7d1   :  { %7659 = vmatprep.subr.mxu0 %v4955_v55 }
 0x7d2   :  { %6834 = vrot.lane.b32.xlu1 %v14258_v13, %s10456_s1  ;;  %7660 = vmatpush1.msra.mxu0 %v4954_v32 }
 0x7d3   :  { %v14723_v12 = vpop.permute.xlu0 %6628  ;;  %v6085_v51 = vpop.permute.xlu1 %6084 }
 0x7d4   :  { %v6104_v62 = vsel %vm1602_vm3, %v14045_v56, %v6085_v51  ;;  %v6105_v44 = vsel %vm1602_vm3, %v6085_v51, %v14609_v35  ;;  %v14741_v56 = vadd.f32 %v14594_v40, %v14229_v24  ;;  %v14750_v51 = vld [vmem:[%s15853_s3 + $0x18] sm:$0xff]  ;;  %v14765_v40 = vld [vmem:[%s15853_s3 + $0x10] sm:$0xff]  ;;  %s16166_s3 = sld [smem:[#allocation19_spill]] }
 0x7d5   :  { %7622 = vmatprep.subr.mxu1 %v6105_v44 }
 0x7d6   :  { %6732 = vrot.lane.b32.xlu1 %v14258_v13, %s10457_s23  ;;  %7623 = vmatpush2.msra.mxu1 %v6104_v62  ;;  %v14756_v62 = vadd.f32 %v14576_v49, %v14229_v24  ;;  %v15932_v44 = vmax.f32 %v14741_v56, 0.0 }
 0x7d7   :  { %v14731_v14 = vpop.permute.xlu0 %5453  ;;  %7625 = vmatmul.mubr.f32.vlgmr.msra.gmra.mxu1 %v14736_v9  ;;  %v4833_v6 = vpop.permute.xlu1 %4832 }
 0x7d8   :  { %v4851_v32 = vsel %vm4840_vm5, %v14297_v11, %v4833_v6  ;;  %v4852_v55 = vsel %vm4840_vm5, %v4833_v6, %v14624_v48  ;;  %9835 = vmatprep.mubr.msk.f32.mxu1 %vm3588_vm11, %v14750_v51  ;;  %v15933_v22 = vmax.f32 %v14756_v62, 0.0 }
 0x7d9   :  { %7661 = vmatprep.subr.mxu0 %v4852_v55  ;;  %v16107_v55 = vld [vmem:[#allocation11_spill] sm:$0xff] }
 0x7da   :  { %6630 = vrot.lane.b32.xlu1 %v14258_v13, %s15987_s9  ;;  %7662 = vmatpush1.msra.mxu0 %v4851_v32 }
 0x7db   :  { %v14760_v11 = vpop.permute.xlu0 %6526  ;;  %7631 = vmatmul.mubr.f32.gmra.mxu1 %v14765_v40 }
 0x7dc   :  { %v5991_v6 = vpop.permute.xlu1 %5990  ;;  %9838 = vmatprep.mubr.msk.f32.mxu1 %vm3588_vm11, %v16107_v55  ;;  %v10209_v55 = vpack.i.bf16 %v15932_v44, %v15933_v22 }
 0x7dd   :  { %v6006_v49 = vsel %vm16108_vm15, %v14309_v18, %v5991_v6  ;;  %v6007_v32 = vsel %vm16109_vm10, %v5991_v6, %v14635_v2  ;;  %vm16135_vm15 = vmmov %vm16103_vm0  ;;  %vm8796_vm10 = vcmask 1043456  }
 0x7de   :  { %6528 = vrot.lane.b32.xlu1 %v14258_v13, %s15959_s29  ;;  %7714 = vmatprep.subr.mxu1 %v6007_v32 }
 0x7df   :  { %7715 = vmatpush1.msra.mxu1 %v6006_v49  ;;  %v14778_v16 = vpop.permute.xlu0 %5350 }
 0x7e0   :  { %v4731_v15 = vpop.permute.xlu1 %4730 }
 0x7e1   :  { %v4748_v18 = vsel %vm554_vm12, %v14323_v41, %v4731_v15  ;;  %v4749_v2 = vsel %vm554_vm12, %v4731_v15, %v14648_v45 }
 0x7e2   :  { %10210 = vrot.lane.b32.xlu1 %v10209_v55, %s15959_s29  ;;  %7663 = vmatprep.subr.mxu0 %v4749_v2 }
 0x7e3   :  { %7664 = vmatpush1.msra.mxu0 %v4748_v18  ;;  %v14789_v6 = vpop.permute.xlu0 %10195 }
 0x7e4   :  { %v5889_v49 = vpop.permute.xlu1 %5888 }
 0x7e5   :  { %v5904_v32 = vsel %vm4943_vm9, %v14339_v26, %v5889_v49  ;;  %v5905_v44 = vsel %vm4943_vm9, %v5889_v49, %v14659_v58 }
 0x7e6   :  { %6398 = vrot.lane.b32.xlu1 %v14295_v5, %s10458_s28  ;;  %7716 = vmatprep.subr.mxu1 %v5905_v44  ;;  %s16161_s28 = sld [smem:[#allocation14_spill]] }
 0x7e7   :  { %7717 = vmatpush1.msra.mxu1 %v5904_v32  ;;  %v14797_v41 = vpop.permute.xlu0 %5246 }
 0x7e8   :  { %v4629_v15 = vpop.permute.xlu1 %4628 }
 0x7e9   :  { %v4646_v55 = vsel %vm292_vm14, %v14353_v10, %v4629_v15  ;;  %v4647_v18 = vsel %vm292_vm14, %v4629_v15, %v14669_v3 }
 0x7ea   :  { %6296 = vrot.lane.b32.xlu1 %v14295_v5, %s10459_s21  ;;  %7665 = vmatprep.subr.mxu0 %v4647_v18 }
 0x7eb   :  { %7666 = vmatpush1.msra.mxu0 %v4646_v55  ;;  %v14805_v26 = vpop.permute.xlu0 %10205 }
 0x7ec   :  { %7667 = vmatprep.subr.mxu0 %v14122_v36  ;;  %v5787_v58 = vpop.permute.xlu1 %5786 }
 0x7ed   :  { %v5802_v44 = vsel %vm4840_vm5, %v14367_v34, %v5787_v58  ;;  %7668 = vmatpush1.msra.mxu0 %v13740_v54  ;;  %v5803_v10 = vsel %vm4840_vm5, %v5787_v58, %v14679_v50  ;;  %v16110_v34 = vld [vmem:[#allocation13_spill] sm:$0xff] }
 0x7ee   :  { %6194 = vrot.lane.b32.xlu1 %v14295_v5, %s15973_s20  ;;  %7718 = vmatprep.subr.mxu1 %v5803_v10 }
 0x7ef   :  { %7719 = vmatpush1.msra.mxu1 %v5802_v44  ;;  %v14815_v2 = vpop.permute.xlu0 %6396 }
 0x7f0   :  { %v5685_v49 = vpop.permute.xlu1 %5684 }
 0x7f1   :  { %v5700_v36 = vsel %vm554_vm12, %v14390_v17, %v5685_v49  ;;  %v5701_v32 = vsel %vm554_vm12, %v5685_v49, %v14689_v21 }
 0x7f2   :  { %10220 = vrot.lane.b32.xlu1 %v16110_v34, %s15959_s29  ;;  %7720 = vmatprep.subr.mxu1 %v5701_v32 }
 0x7f3   :  { %7721 = vmatpush1.msra.mxu1 %v5700_v36  ;;  %v14823_v54 = vpop.permute.xlu0 %5146 }
 0x7f4   :  { %v6831_v50 = vpop.permute.xlu1 %6830 }
 0x7f5   :  { %v6848_v15 = vsel %vm4943_vm9, %v14406_v47, %v6831_v50  ;;  %v6849_v55 = vsel %vm4943_vm9, %v6831_v50, %v14699_v57 }
 0x7f6   :  { %6094 = vrot.lane.b32.xlu1 %v14258_v13, %s15977_s19  ;;  %7683 = vmatprep.subr.mxu0 %v6849_v55  ;;  %s10465_s19 = smov [#allocation8]  }
 0x7f7   :  { %7684 = vmatpush2.msra.mxu0 %v6848_v15  ;;  %v14831_v17 = vpop.permute.xlu0 %6294 }
 0x7f8   :  { %v5583_v21 = vpop.permute.xlu1 %5582 }
 0x7f9   :  { %v5598_v18 = vsel %vm292_vm14, %v14429_v43, %v5583_v21  ;;  %v5599_v58 = vsel %vm292_vm14, %v5583_v21, %v14707_v63 }
 0x7fa   :  { %7722 = vmatprep.subr.mxu1 %v5599_v58 }
 0x7fb   :  { %7723 = vmatpush1.msra.mxu1 %v5598_v18  ;;  %v14837_v47 = vpop.permute.xlu0 %5044 }
 0x7fc   :  { %7724 = vmatprep.subr.mxu1 %v14295_v5  ;;  %v6729_v44 = vpop.permute.xlu1 %6728 }
 0x7fd   :  { %v6746_v10 = vsel %vm4840_vm5, %v14445_v20, %v6729_v44  ;;  %7725 = vmatpush1.msra.mxu1 %v14130_v31  ;;  %v6747_v49 = vsel %vm4840_vm5, %v6729_v44, %v14715_v7 }
 0x7fe   :  { %7685 = vmatprep.subr.mxu0 %v6747_v49 }
 0x7ff   :  { %7686 = vmatpush2.msra.mxu0 %v6746_v10  ;;  %v14845_v43 = vpop.permute.xlu0 %6192  ;;  %v15934_v10 = vunpack.i.l.bf16 %v14789_v6 }
 0x800   :  { %v6627_v63 = vpop.permute.xlu1 %6626 }
 0x801   :  { %v6644_v36 = vsel %vm554_vm12, %v14462_v61, %v6627_v63  ;;  %v6645_v32 = vsel %vm554_vm12, %v6627_v63, %v14723_v12  ;;  %v10208_v63 = vunpack.i.h.bf16 %v14805_v26 }
 0x802   :  { %7687 = vmatprep.subr.mxu0 %v6645_v32 }
 0x803   :  { %7688 = vmatpush2.msra.mxu0 %v6644_v36  ;;  %v14851_v34 = vpop.permute.xlu0 %4941  ;;  %v10207_v36 = vunpack.i.l.bf16 %v14805_v26  ;;  %v16112_v26 = vmax.f32 %v14532_v30, 0.0  ;;  %v16114_v30 = vmax.f32 %v14418_v52, 0.0  ;;  %v5262_v52 = vsel %vm1864_vm1, %v14502_v1, %v14797_v41 }
 0x804   :  { %v5452_v20 = vpop.permute.xlu1 %5451 }
 0x805   :  { %v5468_v50 = vsel %vm5455_vm8, %v14472_v53, %v5452_v20  ;;  %v5469_v15 = vsel %vm5455_vm8, %v5452_v20, %v14731_v14 }
 0x806   :  { %7726 = vmatprep.subr.mxu1 %v5469_v15 }
 0x807   :  { %7727 = vmatpush1.msra.mxu1 %v5468_v50  ;;  %v14857_v55 = vpop.permute.xlu0 %6090 }
 0x808   :  { %v6525_v21 = vpop.permute.xlu1 %6524 }
 0x809   :  { %v6542_v61 = vsel %vm292_vm14, %v14482_v27, %v6525_v21  ;;  %v6543_v18 = vsel %vm292_vm14, %v6525_v21, %v14760_v11 }
 0x80a   :  { %7689 = vmatprep.subr.mxu0 %v6543_v18 }
 0x80b   :  { %7690 = vmatpush2.msra.mxu0 %v6542_v61  ;;  %v14863_v58 = vpop.permute.xlu0 %4838  ;;  %v16111_v61 = vmax.f32 %v14536_v42, 0.0 }
 0x80c   :  { %7691 = vmatprep.subr.mxu0 %v14130_v31  ;;  %v5349_v53 = vpop.permute.xlu1 %5348 }
 0x80d   :  { %v5365_v14 = vsel %vm5352_vm7, %v14492_v28, %v5349_v53  ;;  %7692 = vmatpush2.msra.mxu0 %v14157_v33  ;;  %v5366_v44 = vsel %vm5352_vm7, %v5349_v53, %v14778_v16  ;;  %v10198_v28 = vunpack.i.h.bf16 %v14789_v6 }
 0x80e   :  { %7728 = vmatprep.subr.mxu1 %v5366_v44 }
 0x80f   :  { %7729 = vmatpush1.msra.mxu1 %v5365_v14  ;;  %v14871_v27 = vpop.permute.xlu0 %4736  ;;  %v7998_v44 = vsel %vm292_vm14, %v10208_v63, %v10198_v28  ;;  %v16115_v63 = vmax.f32 %v14372_v37, 0.0 }
 0x810   :  { %v10191_v49 = vpop.permute.xlu1 %10190 }
 0x811   :  { %v10193_v32 = vunpack.i.h.bf16 %v10191_v49  ;;  %v10192_v20 = vunpack.i.l.bf16 %v10191_v49 }
 0x813   :  { %v7987_v50 = vsel %vm292_vm14, %v10193_v32, %v15934_v10  ;;  %v7985_v16 = vsel %vm292_vm14, %v10207_v36, %v10192_v20  ;;  %v7986_v15 = vsel %vm292_vm14, %v10192_v20, %v10193_v32  ;;  %v14882_v21 = vpop.permute.xlu0 %4634  ;;  %v16113_v10 = vmax.f32 %v14415_v38, 0.0 }
 0x814   :  { %v14886_v18 = vmax.f32 %v16111_v61, %v7987_v50  ;;  %v14890_v53 = vmax.f32 %v16112_v26, %v7986_v15  ;;  %v10201_v14 = vpop.permute.xlu1 %10200  ;;  %v14905_v15 = vmax.f32 %v16114_v30, %v7998_v44  ;;  %v16116_v38 = vmax.f32 %v14544_v23, 0.0 }
 0x815   :  { %v10203_v49 = vunpack.i.h.bf16 %v10201_v14  ;;  %v10202_v22 = vunpack.i.l.bf16 %v10201_v14  ;;  %v14895_v36 = vmax.f32 %v16113_v10, %v7985_v16 }
 0x816   :  { %v10224_v32 = vpack.i.bf16 %v14886_v18, %v14890_v53 }
 0x817   :  { %v7999_v42 = vsel %vm292_vm14, %v10198_v28, %v10202_v22  ;;  %v8000_v20 = vsel %vm292_vm14, %v10202_v22, %v10203_v49  ;;  %v14901_v50 = vpop.permute.xlu0 %6836  ;;  %v10234_v28 = vpack.i.bf16 %v14905_v15, %v14895_v36 }
 0x818   :  { %v14909_v61 = vmax.f32 %v16115_v63, %v7999_v42  ;;  %v14913_v10 = vmax.f32 %v16116_v38, %v8000_v20  ;;  %v5249_v16 = vpop.permute.xlu1 %5248  ;;  %10225 = vrot.lane.b32.xlu0 %v10224_v32, %s15960_s30 }
 0x819   :  { %v5263_v22 = vsel %vm1864_vm1, %v14797_v41, %v5249_v16 }
 0x81a   :  { %7730 = vmatprep.subr.mxu1 %v5263_v22  ;;  %v10229_v37 = vpack.i.bf16 %v14913_v10, %v14909_v61 }
 0x81b   :  { %7731 = vmatpush1.msra.mxu1 %v5262_v52  ;;  %v14925_v23 = vpop.permute.xlu0 %6734 }
 0x81c   :  { %v6395_v26 = vpop.permute.xlu1 %6394  ;;  %10230 = vrot.lane.b32.xlu1 %v10229_v37, %s15960_s30  ;;  %10235 = vrot.lane.b32.xlu0 %v10234_v28, %s15960_s30  ;;  %v16118_v28 = vmax.f32 %v14548_v29, 0.0 }
 0x81d   :  { %v6412_v14 = vsel %vm5455_vm8, %v14512_v59, %v6395_v26  ;;  %v6413_v1 = vsel %vm5455_vm8, %v6395_v26, %v14815_v2 }
 0x81e   :  { %7693 = vmatprep.subr.mxu0 %v6413_v1 }
 0x81f   :  { %7694 = vmatpush2.msra.mxu0 %v6412_v14  ;;  %v14933_v41 = vpop.permute.xlu0 %6632  ;;  %v16119_v14 = vmax.f32 %v14619_v8, 0.0 }
 0x820   :  { %v5145_v44 = vpop.permute.xlu1 %5144 }
 0x821   :  { %v5160_v32 = vsel %vm1602_vm3, %v14522_v60, %v5145_v44  ;;  %v5161_v42 = vsel %vm1602_vm3, %v5145_v44, %v14823_v54 }
 0x822   :  { %7732 = vmatprep.subr.mxu1 %v5161_v42  ;;  %v14979_v42 = vld [vmem:[%s15855_s5 + $0x78] sm:$0xff]  }
 0x823   :  { %7733 = vmatpush1.msra.mxu1 %v5160_v32  ;;  %v14939_v20 = vpop.permute.xlu0 %6530 }
 0x824   :  { %v6293_v30 = vpop.permute.xlu1 %6292 }
 0x825   :  { %v6310_v59 = vsel %vm5352_vm7, %v14550_v4, %v6293_v30  ;;  %v6311_v63 = vsel %vm5352_vm7, %v6293_v30, %v14831_v17 }
 0x826   :  { %7695 = vmatprep.subr.mxu0 %v6311_v63 }
 0x827   :  { %7696 = vmatpush2.msra.mxu0 %v6310_v59  ;;  %v14945_v38 = vpop.permute.xlu0 %10215 }
 0x828   :  { %v10218_v60 = vunpack.i.h.bf16 %v14945_v38  ;;  %v10217_v16 = vunpack.i.l.bf16 %v14945_v38  ;;  %v5043_v54 = vpop.permute.xlu1 %5042 }
 0x829   :  { %v5058_v22 = vsel %vm16103_vm0, %v14563_v39, %v5043_v54  ;;  %v5059_v52 = vsel %vm16117_vm2, %v5043_v54, %v14837_v47  ;;  %v15007_v54 = vld [vmem:[%s15855_s5 + $0x30] sm:$0xff]   ;;  %vm8792_vm2 = vcmask 203776  }
 0x82a   :  { %v8001_v4 = vsel %vm292_vm14, %v10203_v49, %v10217_v16  ;;  %v8002_v37 = vsel %vm292_vm14, %v10217_v16, %v10218_v60  ;;  %7734 = vmatprep.subr.mxu1 %v5059_v52 }
 0x82b   :  { %v14959_v26 = vmax.f32 %v16118_v28, %v8001_v4  ;;  %v14963_v1 = vmax.f32 %v16119_v14, %v8002_v37  ;;  %7735 = vmatpush1.msra.mxu1 %v5058_v22  ;;  %v15024_v4 = vld [vmem:[%s15855_s5 + $0x28] sm:$0xff]   ;;  %v15030_v37 = vld [vmem:[%s15855_s5 + $0x60] sm:$0xff]  }
 0x82c   :  { %v6191_v39 = vpop.permute.xlu1 %6190  ;;  %v15040_v14 = vld [vmem:[%s15855_s5 + $0x20] sm:$0xff]  }
 0x82d   :  { %v6208_v47 = vsel %vm1864_vm1, %v14579_v25, %v6191_v39  ;;  %v6209_v49 = vsel %vm1864_vm1, %v6191_v39, %v14845_v43  ;;  %v10244_v44 = vpack.i.bf16 %v14963_v1, %v14959_v26  ;;  %v15046_v39 = vld [vmem:[%s15855_s5 + $0x58] sm:$0xff]  }
 0x82e   :  { %7697 = vmatprep.subr.mxu0 %v6209_v49  ;;  %v15058_v49 = vld [vmem:[%s15855_s5 + $0x18] sm:$0xff]  }
 0x82f   :  { %7698 = vmatpush2.msra.mxu0 %v6208_v47  ;;  %10245 = vrot.lane.b32.xlu0 %v10244_v44, %s15960_s30  ;;  %v15074_v44 = vld [vmem:[%s15855_s5 + $0x10] sm:$0xff]  }
 0x830   :  { %v4940_v29 = vpop.permute.xlu1 %4939 }
 0x831   :  { %v4956_v8 = vsel %vm4943_vm9, %v14598_v46, %v4940_v29  ;;  %v4957_v32 = vsel %vm4943_vm9, %v4940_v29, %v14851_v34  ;;  %v14988_v46 = vld [vmem:[%s15855_s5 + $0x38] sm:$0xff]   ;;  %v14993_v34 = vld [vmem:[%s15855_s5 + $0x70] sm:$0xff]   ;;  %v15080_v29 = vld [vmem:[%s15855_s5 + $0x48] sm:$0xff]  }
 0x832   :  { %7736 = vmatprep.subr.mxu1 %v4957_v32  ;;  %v15090_v32 = vld [vmem:[%s15855_s5 + $0x8] sm:$0xff]  }
 0x833   :  { %7737 = vmatpush1.msra.mxu1 %v4956_v8 }
 0x834   :  { %v6089_v25 = vpop.permute.xlu1 %6088 }
 0x835   :  { %v6106_v30 = vsel %vm1602_vm3, %v14609_v35, %v6089_v25  ;;  %v6107_v59 = vsel %vm1602_vm3, %v6089_v25, %v14857_v55  ;;  %v15096_v25 = vld [vmem:[%s15855_s5 + $0x40] sm:$0xff]  }
 0x836   :  { %7699 = vmatprep.subr.mxu0 %v6107_v59  ;;  %v15106_v59 = vld [vmem:[%s15855_s5] sm:$0xff]  }
 0x837   :  { %7700 = vmatpush2.msra.mxu0 %v6106_v30 }
 0x838   :  { %7702 = vmatmul.mubr.f32.vlgmr.msra.gmra.mxu0 %v14736_v9  ;;  %v4837_v63 = vpop.permute.xlu1 %4836  ;;  %9937 = vmatprep.subr.bf16.mxu0 %v14979_v42 }
 0x839   :  { %v4853_v35 = vsel %vm4840_vm5, %v14624_v48, %v4837_v63  ;;  %v4854_v16 = vsel %vm4840_vm5, %v4837_v63, %v14863_v58  ;;  %9837 = vmatprep.mubr.msk.f32.mxu0 %vm3588_vm11, %v14750_v51  ;;  %9938 = vmatpush3.bf16.msra.mxu0 %v14988_v46  ;;  %v15013_v48 = vld [vmem:[%s15855_s5 + $0x68] sm:$0xff]   ;;  %v6401_v63 = vpop.permute.xlu0 %6400 }
 0x83a   :  { %7738 = vmatprep.subr.mxu1 %v4854_v16  ;;  %9939 = vmatprep.subr.bf16.mxu0 %v14993_v34 }
 0x83b   :  { %7739 = vmatpush1.msra.mxu1 %v4853_v35 }
 0x83c   :  { %7708 = vmatmul.mubr.f32.gmra.mxu0 %v14765_v40  ;;  %v4735_v58 = vpop.permute.xlu1 %4734 }
 0x83d   :  { %v4750_v22 = vsel %vm554_vm12, %v14648_v45, %v4735_v58  ;;  %v4751_v52 = vsel %vm554_vm12, %v4735_v58, %v14871_v27  ;;  %9940 = vmatpush3.bf16.msra.mxu0 %v15007_v54  ;;  %v16120_v58 = vunpack.i.l.bf16 %v14789_v6 }
 0x83e   :  { %7740 = vmatprep.subr.mxu1 %v4751_v52  ;;  %9941 = vmatprep.subr.bf16.mxu0 %v15013_v48 }
 0x83f   :  { %7741 = vmatpush1.msra.mxu1 %v4750_v22 }
 0x840   :  { %v4633_v45 = vpop.permute.xlu1 %4632 }
 0x841   :  { %v4648_v27 = vsel %vm292_vm14, %v14669_v3, %v4633_v45  ;;  %v4649_v28 = vsel %vm292_vm14, %v4633_v45, %v14882_v21  ;;  %9942 = vmatpush3.bf16.msra.mxu0 %v15024_v4  ;;  %v16121_v45 = vmax.f32 %v14376_v19, 0.0 }
 0x842   :  { %7742 = vmatprep.subr.mxu1 %v4649_v28  ;;  %9943 = vmatprep.subr.bf16.mxu0 %v15030_v37 }
 0x843   :  { %7743 = vmatpush1.msra.mxu1 %v4648_v27 }
 0x844   :  { %7744 = vmatprep.subr.mxu1 %v14130_v31  ;;  %v6835_v3 = vpop.permute.xlu1 %6834  ;;  %v15064_v31 = vld [vmem:[%s15855_s5 + $0x50] sm:$0xff]  }
 0x845   :  { %v6850_v21 = vsel %vm4943_vm9, %v14699_v57, %v6835_v3  ;;  %7745 = vmatpush1.msra.mxu1 %v14157_v33  ;;  %v6851_v47 = vsel %vm4943_vm9, %v6835_v3, %v14901_v50  ;;  %9944 = vmatpush3.bf16.msra.mxu0 %v15040_v14 }
 0x846   :  { %7760 = vmatprep.subr.mxu1 %v6851_v47  ;;  %9945 = vmatprep.subr.bf16.mxu0 %v15046_v39  ;;  %v6299_v47 = vpop.permute.xlu0 %6298 }
 0x847   :  { %7761 = vmatpush2.msra.mxu1 %v6850_v21 }
 0x848   :  { %v6733_v33 = vpop.permute.xlu1 %6732 }
 0x849   :  { %v6748_v57 = vsel %vm4840_vm5, %v14715_v7, %v6733_v33  ;;  %v6749_v50 = vsel %vm4840_vm5, %v6733_v33, %v14925_v23  ;;  %9946 = vmatpush3.bf16.msra.mxu0 %v15058_v49  ;;  %vm10461_vm5 = vmmov 0  }
 0x84a   :  { %7762 = vmatprep.subr.mxu1 %v6749_v50  ;;  %9947 = vmatprep.subr.bf16.mxu0 %v15064_v31 }
 0x84b   :  { %7763 = vmatpush2.msra.mxu1 %v6748_v57  ;;  %v6197_v57 = vpop.permute.xlu0 %6196 }
 0x84c   :  { %v6631_v7 = vpop.permute.xlu1 %6630 }
 0x84d   :  { %v6646_v23 = vsel %vm554_vm12, %v14723_v12, %v6631_v7  ;;  %v6647_v8 = vsel %vm554_vm12, %v6631_v7, %v14933_v41  ;;  %9948 = vmatpush3.bf16.msra.mxu0 %v15074_v44  ;;  %vm16128_vm12 = vmmov %vm16103_vm0 }
 0x84e   :  { %7764 = vmatprep.subr.mxu1 %v6647_v8  ;;  %9949 = vmatprep.subr.bf16.mxu0 %v15080_v29 }
 0x84f   :  { %7765 = vmatpush2.msra.mxu1 %v6646_v23 }
 0x850   :  { %v6529_v12 = vpop.permute.xlu1 %6528 }
 0x851   :  { %v6544_v41 = vsel %vm292_vm14, %v14760_v11, %v6529_v12  ;;  %v6545_v30 = vsel %vm292_vm14, %v6529_v12, %v14939_v20  ;;  %9950 = vmatpush3.bf16.msra.mxu0 %v15090_v32  ;;  %v15935_v20 = vmov 0.0  }
 0x852   :  { %7766 = vmatprep.subr.mxu1 %v6545_v30  ;;  %9951 = vmatprep.subr.bf16.mxu0 %v15096_v25 }
 0x853   :  { %7767 = vmatpush2.msra.mxu1 %v6544_v41  ;;  %v6093_v41 = vpop.permute.xlu0 %6092 }
 0x854   :  { %7768 = vmatprep.subr.mxu1 %v14258_v13  ;;  %v10211_v35 = vpop.permute.xlu1 %10210  ;;  %v16122_v13 = vmax.f32 %v14756_v62, 0.0  ;;  %v6108_v38 = vsel %vm1602_vm3, %v14857_v55, %v6093_v41  ;;  %v15172_v55 = vld [vmem:[%s15855_s5 + $0xb0] sm:$0xff]  }
 0x855   :  { %v10213_v16 = vunpack.i.h.bf16 %v10211_v35  ;;  %v10212_v11 = vunpack.i.l.bf16 %v10211_v35  ;;  %7769 = vmatpush2.msra.mxu1 %v14295_v5  ;;  %9952 = vmatpush3.bf16.msra.mxu0 %v15106_v59 }
 0x856   :  { %10081 = vmatprep.subr.bf16.mxu0 %v15935_v20 }
 0x857   :  { %v7988_v22 = vsel %vm292_vm14, %v16120_v58, %v10212_v11  ;;  %v7989_v52 = vsel %vm292_vm14, %v10212_v11, %v10213_v16  ;;  %v16124_v11 = vmax.f32 %v14741_v56, 0.0  ;;  %v15161_v56 = vld [vmem:[%s15855_s5 + $0xf0] sm:$0xff]  }
 0x858   :  { %v15119_v27 = vmax.f32 %v16121_v45, %v7988_v22  ;;  %v15123_v28 = vmax.f32 %v16122_v13, %v7989_v52  ;;  %v6399_v5 = vpop.permute.xlu1 %6398  ;;  %v15149_v52 = vld [vmem:[%s15855_s5 + $0xf8] sm:$0xff]  }
 0x859   :  { %v6414_v3 = vsel %vm5455_vm8, %v14815_v2, %v6399_v5  ;;  %v6415_v21 = vsel %vm5455_vm8, %v6399_v5, %v6401_v63  ;;  %v16123_v63 = vmax.f32 %v14622_v0, 0.0  ;;  %v15156_v0 = vld [vmem:[%s15855_s5 + $0xb8] sm:$0xff]   ;;  %v15215_v5 = vld [vmem:[%s15855_s5 + $0xd0] sm:$0xff]   ;;  %vm16129_vm8 = vmmov %vm16103_vm0 }
 0x85a   :  { %7770 = vmatprep.subr.mxu1 %v6415_v21  ;;  %v10239_v6 = vpack.i.bf16 %v15123_v28, %v15119_v27  ;;  %v15203_v45 = vld [vmem:[%s15855_s5 + $0xd8] sm:$0xff]   ;;  %v15227_v21 = vld [vmem:[%s15855_s5 + $0xc8] sm:$0xff]  }
 0x85b   :  { %7771 = vmatpush2.msra.mxu1 %v6414_v3  ;;  %v15209_v13 = vld [vmem:[%s15855_s5 + $0x98] sm:$0xff]   ;;  %v15221_v3 = vld [vmem:[%s15855_s5 + $0x90] sm:$0xff]  }
 0x85c   :  { %v6297_v33 = vpop.permute.xlu1 %6296  ;;  %10240 = vrot.lane.b32.xlu1 %v10239_v6, %s15960_s30  ;;  %v15239_v6 = vld [vmem:[%s15855_s5 + $0xc0] sm:$0xff]  }
 0x85d   :  { %v6312_v19 = vsel %vm5352_vm7, %v14831_v17, %v6297_v33  ;;  %v6313_v62 = vsel %vm5352_vm7, %v6297_v33, %v6299_v47  ;;  %v15233_v47 = vld [vmem:[%s15855_s5 + $0x88] sm:$0xff]   ;;  %v15245_v33 = vld [vmem:[%s15855_s5 + $0x80] sm:$0xff]   ;;  %vm16130_vm7 = vmmov %vm16103_vm0 }
 0x85e   :  { %7772 = vmatprep.subr.mxu1 %v6313_v62 }
 0x85f   :  { %7773 = vmatpush2.msra.mxu1 %v6312_v19 }
 0x860   :  { %v6195_v2 = vpop.permute.xlu1 %6194 }
 0x861   :  { %v6210_v50 = vsel %vm1864_vm1, %v14845_v43, %v6195_v2  ;;  %v6211_v7 = vsel %vm1864_vm1, %v6195_v2, %v6197_v57  ;;  %vm16125_vm1 = vmmov %vm16103_vm0 }
 0x862   :  { %7774 = vmatprep.subr.mxu1 %v6211_v7 }
 0x863   :  { %7775 = vmatpush2.msra.mxu1 %v6210_v50 }
 0x864   :  { %v10221_v23 = vpop.permute.xlu1 %10220 }
 0x865   :  { %v10223_v8 = vunpack.i.h.bf16 %v10221_v23  ;;  %v10222_v12 = vunpack.i.l.bf16 %v10221_v23 }
 0x867   :  { %v8003_v17 = vsel %vm292_vm14, %v10218_v60, %v10223_v8  ;;  %v7990_v30 = vsel %vm292_vm14, %v10213_v16, %v10222_v12  ;;  %v15191_v16 = vld [vmem:[%s15855_s5 + $0xe0] sm:$0xff]  }
 0x868   :  { %v8055_v35 = vmax.f32 %v16123_v63, %v8003_v17  ;;  %v8042_v43 = vmax.f32 %v16124_v11, %v7990_v30  ;;  %v6095_v58 = vpop.permute.xlu1 %6094 }
 0x869   :  { %v6109_v22 = vsel %vm1602_vm3, %v6093_v41, %v6095_v58  ;;  %vm16126_vm3 = vmmov %vm16103_vm0 }
 0x86a   :  { %7776 = vmatprep.subr.mxu1 %v6109_v22  ;;  %v10249_v60 = vpack.i.bf16 %v8055_v35, %v8042_v43 }
 0x86b   :  { %7777 = vmatpush2.msra.mxu1 %v6108_v38 }
 0x86c   :  { %7779 = vmatmul.mubr.f32.vlgmr.msra.gmra.mxu1 %v14736_v9  ;;  %10250 = vrot.lane.b32.xlu1 %v10249_v60, %s15960_s30  ;;  %v15178_v9 = vld [vmem:[%s15855_s5 + $0xe8] sm:$0xff]   ;;  %v15260_v60 = vld [vmem:[%s15855_s5 + $0x138] sm:$0xff]  }
 0x86d   :  { %9839 = vmatprep.mubr.msk.f32.mxu1 %vm3588_vm11, %v14750_v51  ;;  %9959 = vmatprep.subr.bf16.mxu1 %v15149_v52  ;;  %v15185_v51 = vld [vmem:[%s15855_s5 + $0xa8] sm:$0xff]   ;;  %vm16127_vm11 = vmmov %vm16103_vm0  ;;  %vm8797_vm0 = vcmask 1044480  }
 0x86e   :  { %9960 = vmatpush3.bf16.msra.mxu1 %v15156_v0 }
 0x86f   :  { %9961 = vmatprep.subr.bf16.mxu1 %v15161_v56 }
 0x870   :  { %7785 = vmatmul.mubr.f32.gmra.mxu1 %v14765_v40  ;;  %v15197_v40 = vld [vmem:[%s15855_s5 + $0xa0] sm:$0xff]  }
 0x872   :  { %9962 = vmatpush3.bf16.msra.mxu1 %v15172_v55 }
 0x873   :  { %9963 = vmatprep.subr.bf16.mxu1 %v15178_v9 }
 0x876   :  { %9964 = vmatpush3.bf16.msra.mxu1 %v15185_v51 }
 0x877   :  { %9965 = vmatprep.subr.bf16.mxu1 %v15191_v16 }
 0x87a   :  { %9966 = vmatpush3.bf16.msra.mxu1 %v15197_v40 }
 0x87b   :  { %9967 = vmatprep.subr.bf16.mxu1 %v15203_v45 }
 0x87e   :  { %9968 = vmatpush3.bf16.msra.mxu1 %v15209_v13 }
 0x87f   :  { %9969 = vmatprep.subr.bf16.mxu1 %v15215_v5 }
 0x882   :  { %9970 = vmatpush3.bf16.msra.mxu1 %v15221_v3 }
 0x883   :  { %9971 = vmatprep.subr.bf16.mxu1 %v15227_v21 }
 0x886   :  { %9972 = vmatpush3.bf16.msra.mxu1 %v15233_v47 }
 0x887   :  { %9973 = vmatprep.subr.bf16.mxu1 %v15239_v6 }
 0x88a   :  { %v10226_v19 = vpop.permute.xlu0 %10225  ;;  %9974 = vmatpush3.bf16.msra.mxu1 %v15245_v33 }
 0x88b   :  { %v10228_v62 = vunpack.i.h.bf16 %v10226_v19  ;;  %v10227_v57 = vunpack.i.l.bf16 %v10226_v19  ;;  %v15296_v19 = vld [vmem:[%s15855_s5 + $0x110] sm:$0xff]  }
 0x88d   :  { %v8178_v2 = vsel %vm16125_vm1, %v10227_v57, %v10228_v62 }
 0x88e   :  { %v10231_v50 = vpop.permute.xlu1 %10230  ;;  %v10236_v7 = vpop.permute.xlu0 %10235  ;;  %v8230_v43 = vmax.f32 %v14890_v53, %v8178_v2  ;;  %v15275_v53 = vld [vmem:[%s15855_s5 + $0x128] sm:$0xff]   ;;  %v15310_v2 = vld [vmem:[%s15855_s5 + $0x100] sm:$0xff]  }
 0x88f   :  { %v10233_v23 = vunpack.i.h.bf16 %v10231_v50  ;;  %v10232_v8 = vunpack.i.l.bf16 %v10231_v50  ;;  %v10238_v12 = vunpack.i.h.bf16 %v10236_v7  ;;  %v10237_v41 = vunpack.i.l.bf16 %v10236_v7 }
 0x891   :  { %v8191_v17 = vsel %vm16126_vm3, %v10232_v8, %v10233_v23  ;;  %v8190_v30 = vsel %vm16127_vm11, %v10238_v12, %v10232_v8  ;;  %v8177_v63 = vsel %vm16128_vm12, %v10237_v41, %v10227_v57  ;;  %v15303_v57 = vld [vmem:[%s15855_s5 + $0x108] sm:$0xff]   ;;  %vm16148_vm3 = vmmov %vm16125_vm1 }
 0x892   :  { %v8242_v35 = vmax.f32 %v14905_v15, %v8190_v30  ;;  %v8229_v11 = vmax.f32 %v14895_v36, %v8177_v63  ;;  %v8243_v58 = vmax.f32 %v14909_v61, %v8191_v17  ;;  %v15266_v15 = vld [vmem:[%s15855_s5 + $0x130] sm:$0xff]   ;;  %v15282_v36 = vld [vmem:[%s15855_s5 + $0x120] sm:$0xff]   ;;  %v15289_v61 = vld [vmem:[%s15855_s5 + $0x118] sm:$0xff]   ;;  %s9809_s5 = sshll.u32 %s10465_s19, 4  ;;  %s9810_s5 = int_to_ptr.vmem [resolvable:$true] %s9809_s5 }
 0x893   :  { %vm16149_vm11 = vmmov %vm16125_vm1  ;;  %s10414_s20 = scalar_lea.vmem %s9810_s5, 32  ;;  %p10419_p1 = scmp.lt.s32.totalorder %s9810_s5, %s9810_s5 }
 0x894   :  { %v8387_v22 = vpack.c.bf16 %v8242_v35, %v8229_v11  ;;  %v8388_v38 = vpack.c.bf16 %v8243_v58, %v8230_v43  ;;  %vm16150_vm12 = vmmov %vm16125_vm1  ;;  %p10415_p0 = scmp.ne.s32.totalorder %s9810_s5, %s10414_s20  ;;  %p10420_p2 = scmp.lt.s32.totalorder %s10414_s20, %s10414_s20 }
 0x896   :  { %8664 = vmatprep.mubr.bf16.mxu0 %v8388_v38  ;;  %p10421_p3 = por %p10420_p2, %p10419_p1 }
 0x897   :  { %8665 = vmatmul.mubr.bf16.vlgmr.msra.gmra.mxu0 %v8387_v22 }
 0x898   :  { %10082 = vmatpush3.bf16.msra.mxu0 %v15260_v60  ;;  %10097 = vmatprep.mubr.msk.bf16.mxu0 %vm10461_vm5, %v15935_v20  ;;  %p10422_p4 = pnand %p10421_p3, %p10415_p0 }
 0x899   :  { %10083 = vmatprep.subr.bf16.mxu0 %v15935_v20 }
 0x89c   :  { %10084 = vmatpush3.bf16.msra.mxu0 %v15266_v15 }
 0x89d   :  { %10085 = vmatprep.subr.bf16.mxu0 %v15935_v20 }
 0x8a0   :  { %10086 = vmatpush3.bf16.msra.mxu0 %v15275_v53 }
 0x8a1   :  { %10087 = vmatprep.subr.bf16.mxu0 %v15935_v20  ;;  %v10246_v50 = vpop.permute.xlu0 %10245 }
 0x8a2   :  { %v10248_v7 = vunpack.i.h.bf16 %v10246_v50  ;;  %v10247_v8 = vunpack.i.l.bf16 %v10246_v50 }
 0x8a4   :  { %10088 = vmatpush3.bf16.msra.mxu0 %v15282_v36  ;;  %v8192_v41 = vsel %vm16129_vm8, %v10233_v23, %v10247_v8  ;;  %v8193_v17 = vsel %vm16130_vm7, %v10247_v8, %v10248_v7  ;;  %v16133_v23 = vmov 0   ;;  %vm16151_vm8 = vmmov %vm16125_vm1 }
 0x8a5   :  { %10089 = vmatprep.subr.bf16.mxu0 %v15935_v20  ;;  %v8244_v43 = vmax.f32 %v14913_v10, %v8192_v41  ;;  %v8245_v22 = vmax.f32 %v14959_v26, %v8193_v17  ;;  %v7626_v26 = vpop.f32.mrf.mxu1  ;;  %vm16152_vm7 = vmmov %vm16125_vm1 }
 0x8a7   :  { %v7628_v41 = vpop.f32.mrf.mxu1 }
 0x8a8   :  { %10090 = vmatpush3.bf16.msra.mxu0 %v15289_v61 }
 0x8a9   :  { %10091 = vmatprep.subr.bf16.mxu0 %v15935_v20 }
 0x8ac   :  { %10092 = vmatpush3.bf16.msra.mxu0 %v15296_v19 }
 0x8ad   :  { %10093 = vmatprep.subr.bf16.mxu0 %v15935_v20 }
 0x8b0   :  { %10094 = vmatpush3.bf16.msra.mxu0 %v15303_v57 }
 0x8b1   :  { %10095 = vmatprep.subr.bf16.mxu0 %v15935_v20 }
 0x8b4   :  { %10096 = vmatpush3.bf16.msra.mxu0 %v15310_v2 }
 0x8b5   :  { %10012 = vmatprep.subr.bf16.mxu0 %v15149_v52 }
 0x8ce   :  { %v10241_v12 = vpop.permute.xlu1 %10240 }
 0x8cf   :  { %v10243_v30 = vunpack.i.h.bf16 %v10241_v12  ;;  %v10242_v63 = vunpack.i.l.bf16 %v10241_v12 }
 0x8d1   :  { %v8179_v35 = vsel %vm16131_vm13, %v10228_v62, %v10242_v63  ;;  %v8180_v11 = vsel %vm16132_vm4, %v10242_v63, %v10243_v30  ;;  %vm16153_vm13 = vmmov %vm16125_vm1 }
 0x8d2   :  { %v8231_v58 = vmax.f32 %v14886_v18, %v8179_v35  ;;  %v8232_v52 = vmax.f32 %v15119_v27, %v8180_v11  ;;  %vm16154_vm4 = vmmov %vm16125_vm1 }
 0x8d4   :  { %v8389_v38 = vpack.c.bf16 %v8244_v43, %v8231_v58  ;;  %v8390_v50 = vpack.c.bf16 %v8245_v22, %v8232_v52 }
 0x8d6   :  { %8705 = vmatprep.mubr.bf16.mxu1 %v8390_v50 }
 0x8d7   :  { %8706 = vmatmul.mubr.bf16.vlgmr.msra.gmra.mxu1 %v8389_v38 }
 0x8d8   :  { %8844 = vmatprep.mubr.bf16.mxu1 %v16133_v23 }
 0x8de   :  { %v10251_v8 = vpop.permute.xlu1 %10250 }
 0x8df   :  { %v10253_v12 = vunpack.i.h.bf16 %v10251_v8  ;;  %v10252_v20 = vunpack.i.l.bf16 %v10251_v8  ;;  %v10462_v8 = vmov 65535  }
 0x8e1   :  { %v8181_v62 = vsel %vm16134_vm6, %v10243_v30, %v10252_v20  ;;  %v8194_v63 = vsel %vm16135_vm15, %v10248_v7, %v10253_v12  ;;  %v7632_v20 = vpop.f32.mrf.mxu1  ;;  %v8798_v12 = vsel %vm8796_vm10, 4294967295, %v10462_v8  ;;  %vm16155_vm6 = vmmov %vm16125_vm1  ;;  %vm8927_vm15 = vcmask 130048  }
 0x8e2   :  { %v8233_v10 = vmax.f32 %v15123_v28, %v8181_v62  ;;  %v8246_v18 = vmax.f32 %v14963_v1, %v8194_v63  ;;  %v15337_v28 = vadd.f32 %v7628_v41, %v14229_v24  ;;  %v10354_v62 = vld [vmem:[%s15856_s6 + $0x20] ss:$16 sps:$4 sm:$0x1f]   ;;  %v15402_v63 = vsel %vm8797_vm0, %v8798_v12, 0 }
 0x8e3   :  { %v7634_v1 = vpop.f32.mrf.mxu1 }
 0x8e4   :  { %v8391_v27 = vpack.c.bf16 %v8246_v18, %v8233_v10  ;;  %v15406_v10 = vand.u32 %v10354_v62, %v15402_v63  ;;  %v15412_v18 = vld [vmem:[%s15856_s6 + $0x4] ss:$16 sps:$4 sm:$0xff]  }
 0x8e5   :  { %16137 = vst [vmem:[#allocation11_spill] sm:$0xff] %v15412_v18 }
 0x8e6   :  { %10098 = vmatmul.mubr.bf16.vlgmr.msra.gmra.mxu0 %v8391_v27  ;;  %v15417_v27 = vld [vmem:[%s15856_s6] ss:$16 sps:$4 sm:$0xff]  }
 0x8e7   :  { %10013 = vmatpush3.bf16.msra.mxu0 %v15156_v0  ;;  %16138 = vst [vmem:[#allocation13_spill] sm:$0xff] %v15417_v27 }
 0x8e8   :  { %10014 = vmatprep.subr.bf16.mxu0 %v15161_v56  ;;  %v16136_v56 = vld [vmem:[#allocation12_spill] sm:$0xff] }
 0x8eb   :  { %10015 = vmatpush3.bf16.msra.mxu0 %v15172_v55  ;;  %v15342_v55 = vadd.f32 %v7634_v1, %v16136_v56 }
 0x8ec   :  { %10016 = vmatprep.subr.bf16.mxu0 %v15178_v9 }
 0x8ed   :  { %v7814_v17 = vmax.f32 %v15342_v55, 0.0 }
 0x8ef   :  { %10017 = vmatpush3.bf16.msra.mxu0 %v15185_v51 }
 0x8f0   :  { %10018 = vmatprep.subr.bf16.mxu0 %v15191_v16  ;;  %v7800_v16 = vmax.f32 %v15337_v28, 0.0 }
 0x8f3   :  { %10019 = vmatpush3.bf16.msra.mxu0 %v15197_v40  ;;  %v15349_v40 = vadd.f32 %v7632_v20, %v16136_v56 }
 0x8f4   :  { %10020 = vmatprep.subr.bf16.mxu0 %v15203_v45 }
 0x8f7   :  { %10021 = vmatpush3.bf16.msra.mxu0 %v15209_v13  ;;  %v15357_v13 = vadd.f32 %v7626_v26, %v14229_v24  ;;  %v10362_v26 = vld [vmem:[%s15856_s6 + $0x2c] ss:$16 sps:$4 sm:$0x1f]  }
 0x8f8   :  { %v7703_v0 = vpop.f32.mrf.mxu0  ;;  %10022 = vmatprep.subr.bf16.mxu0 %v15215_v5  ;;  %v15428_v1 = vand.u32 %v10362_v26, %v15402_v63 }
 0x8f9   :  { %v15345_v9 = vadd.f32 %v7703_v0, %v14229_v24  ;;  %v7799_v52 = vmax.f32 %v15357_v13, 0.0 }
 0x8fa   :  { %v7705_v51 = vpop.f32.mrf.mxu0  ;;  %16139 = vst [vmem:[#allocation12_spill] sm:$0xff] %v15428_v1 }
 0x8fb   :  { %v7801_v45 = vmax.f32 %v15345_v9, 0.0  ;;  %v15353_v7 = vadd.f32 %v7705_v51, %v14229_v24  ;;  %10023 = vmatpush3.bf16.msra.mxu0 %v15221_v3  ;;  %v7813_v3 = vmax.f32 %v15349_v40, 0.0 }
 0x8fc   :  { %v7709_v5 = vpop.f32.mrf.mxu0  ;;  %10024 = vmatprep.subr.bf16.mxu0 %v15227_v21 }
 0x8fd   :  { %v10254_v30 = vpack.i.bf16 %v7801_v45, %v7800_v16  ;;  %v15942_v35 = vmax.f32 %v15353_v7, 0.0  ;;  %v15367_v11 = vadd.f32 %v7709_v5, %v16136_v56  ;;  %v10269_v50 = vpack.i.bf16 %v7813_v3, %v7799_v52 }
 0x8fe   :  { %v7711_v43 = vpop.f32.mrf.mxu0 }
 0x8ff   :  { %v10259_v21 = vpack.i.bf16 %v7814_v17, %v15942_v35  ;;  %v15375_v58 = vadd.f32 %v7711_v43, %v16136_v56  ;;  %10255 = vrot.lane.b32.xlu0 %v10254_v30, %s15959_s29  ;;  %10025 = vmatpush3.bf16.msra.mxu0 %v15233_v47  ;;  %v7815_v22 = vmax.f32 %v15367_v11, 0.0 }
 0x900   :  { %10026 = vmatprep.subr.bf16.mxu0 %v15239_v6  ;;  %v10356_v6 = vld [vmem:[%s15856_s6 + $0x24] ss:$16 sps:$4 sm:$0x1f]  }
 0x901   :  { %v15937_v38 = vmax.f32 %v15375_v58, 0.0  ;;  %10260 = vrot.lane.b32.xlu1 %v10259_v21, %s15959_s29 }
 0x903   :  { %v10264_v47 = vpack.i.bf16 %v15937_v38, %v7815_v22  ;;  %10027 = vmatpush3.bf16.msra.mxu0 %v15245_v33  ;;  %v8804_v33 = vand.u32 %v10356_v6, %v15402_v63 }
 0x905   :  { %10270 = vrot.lane.b32.xlu1 %v10269_v50, %s15959_s29  ;;  %10265 = vrot.lane.b32.xlu0 %v10264_v47, %s15959_s29 }
 0x906   :  { %8824 = vmatprep.subr.bf16.mxu1 %v8804_v33  ;;  %9125 = vmatprep.subr.bf16.mxu0 %v8804_v33 }
 0x907   :  { %8825 = vmatpush1.bf16.msra.mxu1 %v15406_v10 }
 0x908   :  { %8826 = vmatprep.subr.bf16.mxu1 %v15412_v18 }
 0x90b   :  { %8827 = vmatpush1.bf16.msra.mxu1 %v15417_v27 }
 0x90c   :  { %8867 = vmatprep.subr.bf16.mxu1 %v15428_v1 }
 0x92c   :  { %v7780_v41 = vpop.f32.mrf.mxu1 }
 0x92d   :  { %v15425_v20 = vadd.f32 %v7780_v41, %v14229_v24 }
 0x92e   :  { %v7782_v0 = vpop.f32.mrf.mxu1 }
 0x92f   :  { %v15431_v51 = vadd.f32 %v7782_v0, %v14229_v24  ;;  %v15941_v30 = vmax.f32 %v15425_v20, 0.0 }
 0x930   :  { %v7786_v5 = vpop.f32.mrf.mxu1 }
 0x931   :  { %v15940_v43 = vmax.f32 %v15431_v51, 0.0  ;;  %v15437_v21 = vadd.f32 %v7786_v5, %v16136_v56 }
 0x932   :  { %v7788_v50 = vpop.f32.mrf.mxu1 }
 0x933   :  { %v10274_v47 = vpack.i.bf16 %v15940_v43, %v15941_v30  ;;  %v15444_v6 = vadd.f32 %v7788_v50, %v16136_v56  ;;  %v15938_v24 = vmax.f32 %v15437_v21, 0.0 }
 0x935   :  { %v15939_v8 = vmax.f32 %v15444_v6, 0.0  ;;  %10275 = vrot.lane.b32.xlu0 %v10274_v47, %s15959_s29 }
 0x937   :  { %v10279_v12 = vpack.i.bf16 %v15939_v8, %v15938_v24 }
 0x939   :  { %10280 = vrot.lane.b32.xlu1 %v10279_v12, %s15959_s29  ;;  %s16163_s29 = sld [smem:[#allocation18_spill]] }
 0x957   :  { %v9953_v55 = vpop.f32.mrf.mxu0 }
 0x971   :  { %v10256_v62 = vpop.permute.xlu0 %10255 }
 0x972   :  { %v10258_v33 = vunpack.i.h.bf16 %v10256_v62  ;;  %v10257_v26 = vunpack.i.l.bf16 %v10256_v62 }
 0x973   :  { %v10261_v41 = vpop.permute.xlu1 %10260 }
 0x974   :  { %v7994_v56 = vsel %vm292_vm14, %v10257_v26, %v10258_v33  ;;  %v10262_v0 = vunpack.i.l.bf16 %v10261_v41  ;;  %v10263_v47 = vunpack.i.h.bf16 %v10261_v41 }
 0x975   :  { %v15458_v50 = vmax.f32 %v7800_v16, %v7994_v56 }
 0x976   :  { %v7995_v5 = vsel %vm292_vm14, %v10258_v33, %v10262_v0 }
 0x977   :  { %v15462_v38 = vmax.f32 %v7801_v45, %v7995_v5  ;;  %v10271_v24 = vpop.permute.xlu1 %10270  ;;  %v10266_v12 = vpop.permute.xlu0 %10265 }
 0x978   :  { %v10273_v8 = vunpack.i.h.bf16 %v10271_v24  ;;  %v10272_v43 = vunpack.i.l.bf16 %v10271_v24  ;;  %v10268_v62 = vunpack.i.h.bf16 %v10266_v12  ;;  %v10267_v30 = vunpack.i.l.bf16 %v10266_v12 }
 0x979   :  { %v10284_v35 = vpack.i.bf16 %v15462_v38, %v15458_v50 }
 0x97a   :  { %v7993_v33 = vsel %vm292_vm14, %v10272_v43, %v10257_v26  ;;  %v8006_v28 = vsel %vm292_vm14, %v10273_v8, %v10263_v47  ;;  %v8007_v16 = vsel %vm292_vm14, %v10263_v47, %v10267_v30  ;;  %v8008_v41 = vsel %vm292_vm14, %v10267_v30, %v10268_v62 }
 0x97b   :  { %v15472_v9 = vmax.f32 %v7799_v52, %v7993_v33  ;;  %v15476_v45 = vmax.f32 %v7813_v3, %v8006_v28  ;;  %v15480_v24 = vmax.f32 %v7814_v17, %v8007_v16  ;;  %v15484_v43 = vmax.f32 %v7815_v22, %v8008_v41  ;;  %10285 = vrot.lane.b32.xlu0 %v10284_v35, %s15960_s30  ;;  %v9954_v3 = vpop.f32.mrf.mxu0  ;;  %v10360_v41 = vld [vmem:[%s15856_s6 + $0x28] ss:$16 sps:$4 sm:$0x1f]  }
 0x97c   :  { %v9955_v5 = vadd.f32 %v9954_v3, %v9953_v55  ;;  %v16141_v3 = vmax.f32 %v15425_v20, 0.0  ;;  %v16143_v20 = vmax.f32 %v15444_v6, 0.0  ;;  %v15536_v6 = vld [vmem:[%s15856_s6 + $0x8] ss:$16 sps:$4 sm:$0xff]  }
 0x97d   :  { %v10289_v30 = vpack.i.bf16 %v15484_v43, %v15480_v24  ;;  %v10294_v13 = vpack.i.bf16 %v15476_v45, %v15472_v9  ;;  %v9956_v11 = vpop.f32.mrf.mxu0 }
 0x97f   :  { %10290 = vrot.lane.b32.xlu1 %v10289_v30, %s15960_s30  ;;  %10295 = vrot.lane.b32.xlu0 %v10294_v13, %s15960_s30  ;;  %v9957_v8 = vpop.f32.mrf.mxu0 }
 0x980   :  { %v9958_v47 = vadd.f32 %v9957_v8, %v9956_v11 }
 0x997   :  { %v9975_v40 = vpop.f32.mrf.mxu1 }
 0x999   :  { %v9976_v17 = vpop.f32.mrf.mxu1 }
 0x99a   :  { %v9977_v26 = vadd.f32 %v9976_v17, %v9975_v40  ;;  %v16140_v17 = vmax.f32 %v15353_v7, 0.0  ;;  %v15514_v7 = vld [vmem:[%s15856_s6 + $0xc] ss:$16 sps:$4 sm:$0xff]  }
 0x99b   :  { %v9978_v52 = vpop.f32.mrf.mxu1 }
 0x99c   :  { %v8708_v30 = vadd.f32 %v9977_v26, %v9955_v5 }
 0x99d   :  { %v9979_v22 = vpop.f32.mrf.mxu1 }
 0x99e   :  { %v9980_v35 = vadd.f32 %v9979_v22, %v9978_v52 }
 0x9a0   :  { %v8711_v13 = vadd.f32 %v9980_v35, %v9958_v47  ;;  %v16144_v47 = vmax.f32 %v15437_v21, 0.0 }
 0x9a6   :  { %v8748_v56 = vpop.f32.mrf.mxu0 }
 0x9a7   :  { %v10276_v12 = vpop.permute.xlu0 %10275  ;;  %v8749_v40 = vadd.f32 %v8748_v56, %v8708_v30 }
 0x9a8   :  { %v10278_v33 = vunpack.i.h.bf16 %v10276_v12  ;;  %v10277_v28 = vunpack.i.l.bf16 %v10276_v12  ;;  %v10099_v16 = vpop.f32.mrf.mxu0 }
 0x9a9   :  { %v16145_v16 = vmax.f32 %v15375_v58, 0.0 }
 0x9aa   :  { %v7996_v1 = vsel %vm292_vm14, %v10262_v0, %v10277_v28  ;;  %v7997_v27 = vsel %vm292_vm14, %v10277_v28, %v10278_v33  ;;  %v8751_v18 = vpop.f32.mrf.mxu0  ;;  %v15507_v0 = vand.u32 %v10360_v41, %v15402_v63 }
 0x9ab   :  { %v15500_v55 = vmax.f32 %v16140_v17, %v7996_v1  ;;  %v15504_v52 = vmax.f32 %v16141_v3, %v7997_v27  ;;  %v8752_v11 = vadd.f32 %v8751_v18, %v8711_v13  ;;  %v10281_v22 = vpop.permute.xlu1 %10280  ;;  %v16142_v27 = vmax.f32 %v15431_v51, 0.0 }
 0x9ac   :  { %v10283_v8 = vunpack.i.h.bf16 %v10281_v22  ;;  %v10282_v12 = vunpack.i.l.bf16 %v10281_v22  ;;  %v10100_v26 = vpop.f32.mrf.mxu0 }
 0x9ad   :  { %v8755_v35 = vpack.c.bf16 %v8752_v11, %v8749_v40  ;;  %v10299_v56 = vpack.i.bf16 %v15504_v52, %v15500_v55  ;;  %v8078_v18 = vmax.f32 %v16142_v27, %v10278_v33  ;;  %v16157_v27 = vld [vmem:[#allocation13_spill] sm:$0xff] }
 0x9ae   :  { %v8092_v1 = vmax.f32 %v16143_v20, %v10283_v8  ;;  %v8010_v5 = vsel %vm292_vm14, %v10282_v12, %v10283_v8  ;;  %v8009_v63 = vsel %vm292_vm14, %v10268_v62, %v10282_v12  ;;  %vm16147_vm14 = vmmov %vm16125_vm1 }
 0x9af   :  { %v15524_v28 = vmax.f32 %v16144_v47, %v8010_v5  ;;  %v15528_v41 = vmax.f32 %v16145_v16, %v8009_v63  ;;  %10300 = vrot.lane.b32.xlu1 %v10299_v56, %s15960_s30  ;;  %9888 = vmatmul.mubr.msk.bf16.vlgmr.msra.gmra.mxu1 %vm8792_vm2, %v8755_v35  ;;  %v15624_v63 = vld [vmem:[%s15857_s7 + $0x28] sm:$0xff] }
 0x9b0   :  { %v10309_v51 = vpack.i.bf16 %v8092_v1, %v8078_v18  ;;  %8868 = vmatpush1.bf16.msra.mxu1 %v15507_v0  ;;  %8887 = vmatprep.mubr.bf16.mxu1 %v16133_v23  ;;  %v15614_v1 = vld [vmem:[%s15857_s7 + $0x20] sm:$0xff] }
 0x9b1   :  { %v10304_v21 = vpack.i.bf16 %v15524_v28, %v15528_v41  ;;  %8869 = vmatprep.subr.bf16.mxu1 %v15514_v7 }
 0x9b3   :  { %10310 = vrot.lane.b32.xlu1 %v10309_v51, %s15960_s30  ;;  %10305 = vrot.lane.b32.xlu0 %v10304_v21, %s15960_s30 }
 0x9b4   :  { %8870 = vmatpush1.bf16.msra.mxu1 %v15536_v6 }
 0x9b5   :  { %9990 = vmatprep.subr.bf16.mxu1 %v14979_v42  ;;  %v16146_v42 = vmov 0.0  }
 0x9b7   :  { %9889 = vmatmul.mubr.msk.bf16.vlgmr.msra.gmra.mxu1 %vm8792_vm2, %v8755_v35 }
 0x9b8   :  { %9991 = vmatpush3.bf16.msra.mxu1 %v14988_v46 }
 0x9b9   :  { %9992 = vmatprep.subr.bf16.mxu1 %v14993_v34 }
 0x9bc   :  { %9993 = vmatpush3.bf16.msra.mxu1 %v15007_v54 }
 0x9bd   :  { %9994 = vmatprep.subr.bf16.mxu1 %v15013_v48 }
 0x9c0   :  { %9995 = vmatpush3.bf16.msra.mxu1 %v15024_v4 }
 0x9c1   :  { %9996 = vmatprep.subr.bf16.mxu1 %v15030_v37 }
 0x9c4   :  { %9997 = vmatpush3.bf16.msra.mxu1 %v15040_v14 }
 0x9c5   :  { %9998 = vmatprep.subr.bf16.mxu1 %v15046_v39 }
 0x9c8   :  { %9999 = vmatpush3.bf16.msra.mxu1 %v15058_v49 }
 0x9c9   :  { %10000 = vmatprep.subr.bf16.mxu1 %v15064_v31 }
 0x9cc   :  { %10001 = vmatpush3.bf16.msra.mxu1 %v15074_v44 }
 0x9cd   :  { %10002 = vmatprep.subr.bf16.mxu1 %v15080_v29 }
 0x9d0   :  { %10003 = vmatpush3.bf16.msra.mxu1 %v15090_v32 }
 0x9d1   :  { %10004 = vmatprep.subr.bf16.mxu1 %v15096_v25 }
 0x9d4   :  { %10005 = vmatpush3.bf16.msra.mxu1 %v15106_v59 }
 0x9d5   :  { %10101 = vmatprep.subr.bf16.mxu1 %v16146_v42 }
 0x9ed   :  { %v10286_v46 = vpop.permute.xlu0 %10285 }
 0x9ee   :  { %v10288_v34 = vunpack.i.h.bf16 %v10286_v46  ;;  %v10287_v54 = vunpack.i.l.bf16 %v10286_v46 }
 0x9f0   :  { %v8186_v48 = vsel %vm16147_vm14, %v10287_v54, %v10288_v34 }
 0x9f1   :  { %v10291_v4 = vpop.permute.xlu1 %10290  ;;  %v10296_v37 = vpop.permute.xlu0 %10295  ;;  %v8238_v58 = vmax.f32 %v15458_v50, %v8186_v48  ;;  %v15633_v48 = vld [vmem:[%s15857_s7 + $0x10] sm:$0xff] }
 0x9f2   :  { %v10293_v14 = vunpack.i.h.bf16 %v10291_v4  ;;  %v10292_v39 = vunpack.i.l.bf16 %v10291_v4  ;;  %v10298_v49 = vunpack.i.h.bf16 %v10296_v37  ;;  %v10297_v31 = vunpack.i.l.bf16 %v10296_v37  ;;  %v15638_v4 = vld [vmem:[%s15857_s7 + $0x18] sm:$0xff] }
 0x9f4   :  { %v8199_v44 = vsel %vm16125_vm1, %v10292_v39, %v10293_v14  ;;  %v8198_v29 = vsel %vm16148_vm3, %v10298_v49, %v10292_v39  ;;  %v8185_v32 = vsel %vm16149_vm11, %v10297_v31, %v10287_v54 }
 0x9f5   :  { %v8250_v25 = vmax.f32 %v15476_v45, %v8198_v29  ;;  %v8237_v59 = vmax.f32 %v15472_v9, %v8185_v32  ;;  %v8251_v62 = vmax.f32 %v15480_v24, %v8199_v44  ;;  %v15648_v44 = vld [vmem:[%s15857_s7 + $0x38] sm:$0xff] }
 0x9f7   :  { %v8982_v33 = vpack.c.bf16 %v8251_v62, %v8238_v58  ;;  %v8981_v30 = vpack.c.bf16 %v8250_v25, %v8237_v59 }
 0x9f9   :  { %9018 = vmatprep.mubr.bf16.mxu1 %v8982_v33 }
 0x9fa   :  { %9019 = vmatmul.mubr.bf16.vlgmr.msra.gmra.mxu1 %v8981_v30 }
 0x9fb   :  { %10102 = vmatpush3.bf16.msra.mxu1 %v15260_v60  ;;  %10117 = vmatprep.mubr.msk.bf16.mxu1 %vm10461_vm5, %v16146_v42 }
 0x9fc   :  { %10103 = vmatprep.subr.bf16.mxu1 %v16146_v42 }
 0x9ff   :  { %10104 = vmatpush3.bf16.msra.mxu1 %v15266_v15 }
 0xa00   :  { %10105 = vmatprep.subr.bf16.mxu1 %v16146_v42 }
 0xa03   :  { %10106 = vmatpush3.bf16.msra.mxu1 %v15275_v53 }
 0xa04   :  { %10107 = vmatprep.subr.bf16.mxu1 %v16146_v42 }
 0xa07   :  { %10108 = vmatpush3.bf16.msra.mxu1 %v15282_v36 }
 0xa08   :  { %10109 = vmatprep.subr.bf16.mxu1 %v16146_v42 }
 0xa0b   :  { %10110 = vmatpush3.bf16.msra.mxu1 %v15289_v61 }
 0xa0c   :  { %10111 = vmatprep.subr.bf16.mxu1 %v16146_v42 }
 0xa0f   :  { %10112 = vmatpush3.bf16.msra.mxu1 %v15296_v19 }
 0xa10   :  { %10113 = vmatprep.subr.bf16.mxu1 %v16146_v42 }
 0xa13   :  { %10114 = vmatpush3.bf16.msra.mxu1 %v15303_v57 }
 0xa14   :  { %10115 = vmatprep.subr.bf16.mxu1 %v16146_v42 }
 0xa17   :  { %10116 = vmatpush3.bf16.msra.mxu1 %v15310_v2 }
 0xa18   :  { %9545 = vmatprep.subr.bf16.mxu1 %v16133_v23 }
 0xa21   :  { %v10301_v60 = vpop.permute.xlu1 %10300 }
 0xa22   :  { %v10303_v15 = vunpack.i.h.bf16 %v10301_v60  ;;  %v10302_v53 = vunpack.i.l.bf16 %v10301_v60 }
 0xa24   :  { %v8187_v36 = vsel %vm16150_vm12, %v10288_v34, %v10302_v53  ;;  %v8188_v61 = vsel %vm16151_vm8, %v10302_v53, %v10303_v15 }
 0xa25   :  { %v10311_v50 = vpop.permute.xlu1 %10310  ;;  %v10306_v9 = vpop.permute.xlu0 %10305  ;;  %v8239_v57 = vmax.f32 %v15462_v38, %v8187_v36  ;;  %v8240_v40 = vmax.f32 %v15500_v55, %v8188_v61  ;;  %v16156_v55 = vld [vmem:[#allocation11_spill] sm:$0xff] }
 0xa26   :  { %v10313_v19 = vunpack.i.h.bf16 %v10311_v50  ;;  %v10312_v45 = vunpack.i.l.bf16 %v10311_v50  ;;  %v10308_v24 = vunpack.i.h.bf16 %v10306_v9  ;;  %v10307_v13 = vunpack.i.l.bf16 %v10306_v9 }
 0xa28   :  { %v8189_v2 = vsel %vm16152_vm7, %v10303_v15, %v10312_v45  ;;  %v8202_v17 = vsel %vm16153_vm13, %v10308_v24, %v10313_v19  ;;  %v8200_v3 = vsel %vm16154_vm4, %v10293_v14, %v10307_v13  ;;  %v8201_v11 = vsel %vm16155_vm6, %v10307_v13, %v10308_v24  ;;  %v15643_v14 = vld [vmem:[%s15857_s7 + $0x30] sm:$0xff] }
 0xa29   :  { %v8241_v22 = vmax.f32 %v15504_v52, %v8189_v2  ;;  %v8254_v8 = vmax.f32 %v15524_v28, %v8202_v17  ;;  %v8252_v12 = vmax.f32 %v15484_v43, %v8200_v3  ;;  %v8253_v26 = vmax.f32 %v15528_v41, %v8201_v11  ;;  %v16158_v52 = vld [vmem:[#allocation12_spill] sm:$0xff]  ;;  %v15609_v43 = vld [vmem:[%s15857_s7] sm:$0xff] }
 0xa2a   :  { %v10463_v13 = vmov 1966171168   ;;  %v8946_v17 = vlaneseq }
 0xa2b   :  { %v8984_v35 = vpack.c.bf16 %v8253_v26, %v8240_v40  ;;  %v8985_v38 = vpack.c.bf16 %v8254_v8, %v8241_v22  ;;  %v8983_v56 = vpack.c.bf16 %v8252_v12, %v8239_v57  ;;  %v8944_v57 = vunpack.c.l.s4 %v10463_v13  ;;  %v10374_v13 = vld [vmem:[%s16161_s28 + $0x28] sm:$0xff]  }
 0xa2c   :  { %vm15663_vm0 = vcmp.lt.s32.totalorder %v8946_v17, 400 }
 0xa2d   :  { %9059 = vmatprep.mubr.bf16.mxu0 %v8984_v35  ;;  %10118 = vmatmul.mubr.bf16.vlgmr.msra.gmra.mxu1 %v8985_v38  ;;  %v8945_v8 = vunpack.c.0.s8 %v8944_v57  ;;  %v15656_v38 = vshrl.u32 %v8946_v17, 7  ;;  %v10375_v57 = vld [vmem:[%s16161_s28 + $0xa0] sm:$0xff]   ;;  %v10379_v17 = vld [vmem:[%s16161_s28 + $0x58] sm:$0xff]  }
 0xa2e   :  { %9060 = vmatmul.mubr.bf16.vlgmr.msra.gmra.mxu0 %v8983_v56 }
 0xa2f   :  { %9126 = vmatpush1.bf16.msra.mxu0 %v15406_v10  ;;  %9145 = vmatprep.mubr.bf16.mxu0 %v16133_v23  ;;  %v15619_v10 = vld [vmem:[%s15857_s7 + $0x8] sm:$0xff] }
 0xa30   :  { %9127 = vmatprep.subr.bf16.mxu0 %v16156_v55 }
 0xa33   :  { %9128 = vmatpush1.bf16.msra.mxu0 %v16157_v27 }
 0xa34   :  { %9168 = vmatprep.subr.bf16.mxu0 %v16158_v52 }
 0xa6f   :  { %v8846_v18 = vpop.f32.mrf.mxu1 }
 0xa70   :  { %v8898_v47 = vmul.f32 %v8846_v18, %v15609_v43 }
 0xa71   :  { %v8848_v20 = vpop.f32.mrf.mxu1 }
 0xa72   :  { %v8899_v41 = vmul.f32 %v8848_v20, %v15619_v10  ;;  %v15659_v20 = vsub.s32 %v8945_v8, %v15656_v38  ;;  %v10381_v8 = vld [vmem:[%s16161_s28 + $0x90] sm:$0xff]  }
 0xa73   :  { %v8850_v5 = vpop.f32.mrf.mxu1 }
 0xa74   :  { %v8902_v28 = vmul.f32 %v8850_v5, %v15614_v1 }
 0xa75   :  { %v8852_v16 = vpop.f32.mrf.mxu1 }
 0xa76   :  { %v8906_v51 = vadd.f32 %v8902_v28, %v8898_v47  ;;  %v8903_v21 = vmul.f32 %v8852_v16, %v15624_v63 }
 0xa77   :  { %v8889_v46 = vpop.f32.mrf.mxu1 }
 0xa78   :  { %v8907_v34 = vrot.slane %v8906_v51, 4  ;;  %v8913_v54 = vadd.f32 %v8903_v21, %v8899_v41  ;;  %v8900_v32 = vmul.f32 %v8889_v46, %v15633_v48 }
 0xa79   :  { %v8891_v37 = vpop.f32.mrf.mxu1 }
 0xa7a   :  { %v8914_v39 = vrot.slane %v8913_v54, 4  ;;  %v8908_v49 = vadd.f32 %v8907_v34, %v8906_v51  ;;  %v8901_v25 = vmul.f32 %v8891_v37, %v15638_v4 }
 0xa7b   :  { %v8893_v31 = vpop.f32.mrf.mxu1 }
 0xa7c   :  { %v8915_v29 = vadd.f32 %v8914_v39, %v8913_v54  ;;  %v8904_v59 = vmul.f32 %v8893_v31, %v15643_v14  ;;  %v8909_v60 = vrot.slane %v8908_v49, 2  ;;  %v8928_v15 = vsel %vm8927_vm15, %v8901_v25, 0.0 }
 0xa7d   :  { %v8895_v58 = vpop.f32.mrf.mxu1 }
 0xa7e   :  { %v8916_v62 = vrot.slane %v8915_v29, 2  ;;  %v8920_v33 = vadd.f32 %v8904_v59, %v8900_v32  ;;  %v8905_v30 = vmul.f32 %v8895_v58, %v15648_v44  ;;  %v8910_v19 = vadd.f32 %v8909_v60, %v8908_v49 }
 0xa80   :  { %v8921_v53 = vrot.slane %v8920_v33, 4  ;;  %v8929_v36 = vsel %vm8927_vm15, %v8905_v30, 0.0  ;;  %v8917_v61 = vadd.f32 %v8916_v62, %v8915_v29  ;;  %v8911_v11 = vrot.slane %v8910_v19, 1 }
 0xa81   :  { %v8930_v50 = vadd.f32 %v8929_v36, %v8928_v15 }
 0xa82   :  { %v8922_v9 = vadd.f32 %v8921_v53, %v8920_v33  ;;  %v8918_v40 = vrot.slane %v8917_v61, 1  ;;  %v8912_v56 = vadd.f32 %v8911_v11, %v8910_v19  ;;  %v10371_v19 = vld [vmem:[%s16161_s28 + $0x30] sm:$0xff]   ;;  %v10380_v11 = vld [vmem:[%s16161_s28 + $0x18] sm:$0xff]  }
 0xa83   :  { %v8931_v45 = vrot.slane %v8930_v50, 4 }
 0xa84   :  { %v8923_v24 = vrot.slane %v8922_v9, 2  ;;  %v8919_v12 = vadd.f32 %v8918_v40, %v8917_v61  ;;  %v10376_v40 = vld [vmem:[%s16161_s28 + $0x60] sm:$0xff]  }
 0xa85   :  { %v8932_v2 = vadd.f32 %v8931_v45, %v8930_v50  ;;  %v10366_v50 = vld [vmem:[%s16161_s28 + $0xb8] sm:$0xff]   ;;  %v10372_v45 = vld [vmem:[%s16161_s28 + $0xa8] sm:$0xff]  }
 0xa86   :  { %v8924_v3 = vadd.f32 %v8923_v24, %v8922_v9  ;;  %v8941_v27 = vcombine.low %v8912_v56, %v8919_v12  ;;  %v10367_v9 = vld [vmem:[%s16161_s28 + $0x78] sm:$0xff]   ;;  %9546 = vmatpush1.bf16.msra.mxu1 %v10366_v50  ;;  %v10373_v24 = vld [vmem:[%s16161_s28 + $0x68] sm:$0xff]   ;;  %v10383_v12 = vld [vmem:[%s16161_s28 + $0x10] sm:$0xff]  }
 0xa87   :  { %v8933_v22 = vrot.slane %v8932_v2, 2  ;;  %9547 = vmatprep.subr.bf16.mxu1 %v16133_v23  ;;  %v10386_v56 = vld [vmem:[%s16161_s28 + $0x8] sm:$0xff]  }
 0xa88   :  { %v8925_v26 = vrot.slane %v8924_v3, 1  ;;  %v8949_v47 = vrot.slane %v8941_v27, %v15659_v20  ;;  %v10387_v27 = vld [vmem:[%s16161_s28 + $0x80] sm:$0xff]  }
 0xa89   :  { %v8934_v35 = vadd.f32 %v8933_v22, %v8932_v2  ;;  %v10377_v2 = vld [vmem:[%s16161_s28 + $0x20] sm:$0xff]   ;;  %v10382_v22 = vld [vmem:[%s16161_s28 + $0x50] sm:$0xff]  }
 0xa8a   :  { %v8926_v52 = vadd.f32 %v8925_v26, %v8924_v3  ;;  %v10378_v3 = vld [vmem:[%s16161_s28 + $0x98] sm:$0xff]   ;;  %v10385_v26 = vld [vmem:[%s16161_s28 + $0x48] sm:$0xff]  }
 0xa8b   :  { %v8935_v55 = vrot.slane %v8934_v35, 1 }
 0xa8d   :  { %v8936_v18 = vadd.f32 %v8935_v55, %v8934_v35  ;;  %v10384_v35 = vld [vmem:[%s16161_s28 + $0x88] sm:$0xff]   ;;  %v10388_v55 = vld [vmem:[%s16161_s28 + $0x40] sm:$0xff]  }
 0xa8f   :  { %v8942_v5 = vcombine.low %v8926_v52, %v8936_v18  ;;  %v10389_v52 = vld [vmem:[%s16161_s28] sm:$0xff]  }
 0xa90   :  { %v10391_v18 = vld [vmem:[%s16161_s28 + $0xc0] sm:$0xff]  }
 0xa91   :  { %v8956_v28 = vrot.slane %v8942_v5, %v15659_v20 }
 0xa93   :  { %v8957_v16 = vcombine.low %v8949_v47, %v8956_v28 }
 0xa95   :  { %v8964_v51 = vrot.slane %v8957_v16, %v15659_v20 }
 0xa97   :  { %8970 = vst.msk [vmem:[#allocation7] ss:$2 sm:$0xf] %vm15663_vm0, %v8964_v51 }
 0xaba   :  { %v10006_v21 = vpop.f32.mrf.mxu1 }
 0xabc   :  { %v10007_v46 = vpop.f32.mrf.mxu1 }
 0xabd   :  { %v10008_v59 = vadd.f32 %v10007_v46, %v10006_v21 }
 0xabe   :  { %v10009_v34 = vpop.f32.mrf.mxu1 }
 0xac0   :  { %v10010_v54 = vpop.f32.mrf.mxu1 }
 0xac1   :  { %v10011_v33 = vadd.f32 %v10010_v54, %v10009_v34 }
 0xaed   :  { %v9102_v37 = vpop.f32.mrf.mxu1 }
 0xaee   :  { %v10028_v39 = vpop.f32.mrf.mxu0 }
 0xaef   :  { %v10119_v49 = vpop.f32.mrf.mxu1 }
 0xaf0   :  { %v10029_v31 = vpop.f32.mrf.mxu0 }
 0xaf1   :  { %v10030_v29 = vadd.f32 %v10029_v31, %v10028_v39  ;;  %v9105_v32 = vpop.f32.mrf.mxu1 }
 0xaf2   :  { %v10031_v25 = vpop.f32.mrf.mxu0 }
 0xaf3   :  { %v10120_v58 = vpop.f32.mrf.mxu1  ;;  %v9062_v30 = vadd.f32 %v10030_v29, %v10008_v59 }
 0xaf4   :  { %v10032_v62 = vpop.f32.mrf.mxu0 }
 0xaf5   :  { %v10033_v60 = vadd.f32 %v10032_v62, %v10031_v25  ;;  %v9103_v53 = vadd.f32 %v9102_v37, %v9062_v30 }
 0xaf7   :  { %v9065_v15 = vadd.f32 %v10033_v60, %v10011_v33 }
 0xaf9   :  { %v9106_v36 = vadd.f32 %v9105_v32, %v9065_v15 }
 0xafb   :  { %v9109_v61 = vpack.c.bf16 %v9106_v36, %v9103_v53 }
 0xafd   :  { %9890 = vmatmul.mubr.msk.bf16.vlgmr.msra.gmra.mxu0 %vm8792_vm2, %v9109_v61 }
 0xafe   :  { %9169 = vmatpush1.bf16.msra.mxu0 %v15507_v0  ;;  %9188 = vmatprep.mubr.bf16.mxu0 %v16133_v23  ;;  %v10368_v0 = vld [vmem:[%s16161_s28 + $0x38] sm:$0xff]  }
 0xaff   :  { %9170 = vmatprep.subr.bf16.mxu0 %v15514_v7  ;;  %v10369_v7 = vld [vmem:[%s16161_s28 + $0xb0] sm:$0xff]  }
 0xb00   :  { %9548 = vmatpush1.bf16.msra.mxu1 %v10369_v7 }
 0xb01   :  { %9549 = vmatprep.subr.bf16.mxu1 %v16133_v23 }
 0xb02   :  { %9171 = vmatpush1.bf16.msra.mxu0 %v15536_v6  ;;  %v10370_v6 = vld [vmem:[%s16161_s28 + $0x70] sm:$0xff]  }
 0xb03   :  { %10043 = vmatprep.subr.bf16.mxu0 %v10367_v9 }
 0xb04   :  { %9550 = vmatpush1.bf16.msra.mxu1 %v10372_v45 }
 0xb05   :  { %9891 = vmatmul.mubr.msk.bf16.vlgmr.msra.gmra.mxu0 %vm8792_vm2, %v9109_v61  ;;  %9551 = vmatprep.subr.bf16.mxu1 %v16133_v23 }
 0xb06   :  { %10044 = vmatpush3.bf16.msra.mxu0 %v10368_v0 }
 0xb07   :  { %10045 = vmatprep.subr.bf16.mxu0 %v10370_v6 }
 0xb08   :  { %9552 = vmatpush1.bf16.msra.mxu1 %v10375_v57 }
 0xb09   :  { %9553 = vmatprep.subr.bf16.mxu1 %v16133_v23 }
 0xb0a   :  { %10046 = vmatpush3.bf16.msra.mxu0 %v10371_v19 }
 0xb0b   :  { %10047 = vmatprep.subr.bf16.mxu0 %v10373_v24 }
 0xb0c   :  { %9554 = vmatpush1.bf16.msra.mxu1 %v10378_v3 }
 0xb0d   :  { %9555 = vmatprep.subr.bf16.mxu1 %v16133_v23 }
 0xb0e   :  { %10048 = vmatpush3.bf16.msra.mxu0 %v10374_v13 }
 0xb0f   :  { %10049 = vmatprep.subr.bf16.mxu0 %v10376_v40 }
 0xb10   :  { %9556 = vmatpush1.bf16.msra.mxu1 %v10381_v8  ;;  %v10464_v8 = vmov 1983009808  }
 0xb11   :  { %9557 = vmatprep.subr.bf16.mxu1 %v16133_v23 }
 0xb12   :  { %10050 = vmatpush3.bf16.msra.mxu0 %v10377_v2 }
 0xb13   :  { %10051 = vmatprep.subr.bf16.mxu0 %v10379_v17 }
 0xb14   :  { %9558 = vmatpush1.bf16.msra.mxu1 %v10384_v35 }
 0xb15   :  { %9559 = vmatprep.subr.bf16.mxu1 %v16133_v23 }
 0xb16   :  { %10052 = vmatpush3.bf16.msra.mxu0 %v10380_v11 }
 0xb17   :  { %10053 = vmatprep.subr.bf16.mxu0 %v10382_v22 }
 0xb18   :  { %9560 = vmatpush1.bf16.msra.mxu1 %v10387_v27 }
 0xb19   :  { %9575 = vmatprep.subr.bf16.mxu1 %v16133_v23 }
 0xb1a   :  { %10054 = vmatpush3.bf16.msra.mxu0 %v10383_v12  ;;  %v9272_v12 = vunpack.c.l.s4 %v10464_v8 }
 0xb1b   :  { %10055 = vmatprep.subr.bf16.mxu0 %v10385_v26 }
 0xb1c   :  { %9576 = vmatpush2.bf16.msra.mxu1 %v10391_v18  ;;  %v9273_v35 = vunpack.c.0.s8 %v9272_v12  ;;  %v10392_v18 = vld [vmem:[%s16162_s17 + $0x38] ss:$0 sps:$4 sm:$0xff]  }
 0xb1d   :  { %10141 = vmatprep.subr.bf16.mxu1 %v16146_v42 }
 0xb1e   :  { %10056 = vmatpush3.bf16.msra.mxu0 %v10386_v56  ;;  %v9276_v56 = vsub.s32 %v9273_v35, %v15656_v38  ;;  %v10393_v38 = vld [vmem:[%s16162_s17 + $0x30] sm:$0xff]  }
 0xb1f   :  { %10057 = vmatprep.subr.bf16.mxu0 %v10388_v55 }
 0xb22   :  { %10058 = vmatpush3.bf16.msra.mxu0 %v10389_v52 }
 0xb23   :  { %10121 = vmatprep.subr.bf16.mxu0 %v16146_v42 }
 0xbbd   :  { %v9147_v5 = vpop.f32.mrf.mxu0 }
 0xbbe   :  { %v9199_v16 = vmul.f32 %v9147_v5, %v15609_v43 }
 0xbbf   :  { %v9149_v47 = vpop.f32.mrf.mxu0 }
 0xbc0   :  { %v9200_v23 = vmul.f32 %v9149_v47, %v15619_v10 }
 0xbc1   :  { %v9151_v28 = vpop.f32.mrf.mxu0 }
 0xbc2   :  { %v9203_v51 = vmul.f32 %v9151_v28, %v15614_v1 }
 0xbc3   :  { %v9153_v21 = vpop.f32.mrf.mxu0 }
 0xbc4   :  { %v9207_v46 = vadd.f32 %v9203_v51, %v9199_v16  ;;  %v9204_v34 = vmul.f32 %v9153_v21, %v15624_v63 }
 0xbc5   :  { %v9190_v54 = vpop.f32.mrf.mxu0 }
 0xbc6   :  { %v9208_v37 = vrot.slane %v9207_v46, 4  ;;  %v9214_v39 = vadd.f32 %v9204_v34, %v9200_v23  ;;  %v9201_v59 = vmul.f32 %v9190_v54, %v15633_v48  ;;  %v10394_v23 = vld [vmem:[%s16162_s17 + $0x28] sm:$0xff]   ;;  %v10396_v34 = vld [vmem:[%s16162_s17 + $0x18] sm:$0xff]   ;;  %v10397_v54 = vld [vmem:[%s16162_s17 + $0x10] sm:$0xff]  }
 0xbc7   :  { %v9192_v49 = vpop.f32.mrf.mxu0 }
 0xbc8   :  { %v9215_v31 = vrot.slane %v9214_v39, 4  ;;  %v9209_v29 = vadd.f32 %v9208_v37, %v9207_v46  ;;  %v9202_v43 = vmul.f32 %v9192_v49, %v15638_v4  ;;  %v10395_v46 = vld [vmem:[%s16162_s17 + $0x20] sm:$0xff]   ;;  %v10398_v37 = vld [vmem:[%s16162_s17 + $0x8] sm:$0xff]  }
 0xbc9   :  { %v9194_v32 = vpop.f32.mrf.mxu0  ;;  %v10400_v49 = vld [vmem:[%s16163_s29 + $0x28] ss:$0 sps:$4 sm:$0x33]  }
 0xbca   :  { %v9216_v25 = vadd.f32 %v9215_v31, %v9214_v39  ;;  %v9205_v1 = vmul.f32 %v9194_v32, %v15643_v14  ;;  %v9210_v63 = vrot.slane %v9209_v29, 2  ;;  %v9228_v30 = vsel %vm8927_vm15, %v9202_v43, 0.0  ;;  %v10399_v39 = vld [vmem:[%s16162_s17] sm:$0xff]   ;;  %v10402_v32 = vld [vmem:[%s16163_s29 + $0x18] sm:$0xff]  }
 0xbcb   :  { %v9196_v58 = vpop.f32.mrf.mxu0 }
 0xbcc   :  { %v9217_v62 = vrot.slane %v9216_v25, 2  ;;  %v9221_v10 = vadd.f32 %v9205_v1, %v9201_v59  ;;  %v9206_v33 = vmul.f32 %v9196_v58, %v15648_v44  ;;  %v9211_v50 = vadd.f32 %v9210_v63, %v9209_v29  ;;  %v10401_v29 = vld [vmem:[%s16163_s29 + $0x20] sm:$0xff]  }
 0xbcd   :  { %v9892_v1 = vld [vmem:[%s16164_s26] ss:$0 sm:$0xff] }
 0xbce   :  { %v9222_v60 = vrot.slane %v9221_v10, 4  ;;  %v9229_v15 = vsel %vm8927_vm15, %v9206_v33, 0.0  ;;  %v9218_v53 = vadd.f32 %v9217_v62, %v9216_v25  ;;  %v9212_v7 = vrot.slane %v9211_v50, 1  ;;  %v10403_v25 = vld [vmem:[%s16163_s29 + $0x10] sm:$0xff]  }
 0xbcf   :  { %v9230_v36 = vadd.f32 %v9229_v15, %v9228_v30 }
 0xbd0   :  { %v9223_v61 = vadd.f32 %v9222_v60, %v9221_v10  ;;  %v9219_v4 = vrot.slane %v9218_v53, 1  ;;  %v9213_v24 = vadd.f32 %v9212_v7, %v9211_v50  ;;  %v10404_v50 = vld [vmem:[%s16163_s29 + $0x8] sm:$0xff]  }
 0xbd1   :  { %v9231_v48 = vrot.slane %v9230_v36, 4 }
 0xbd2   :  { %v9224_v9 = vrot.slane %v9223_v61, 2  ;;  %v9220_v19 = vadd.f32 %v9219_v4, %v9218_v53 }
 0xbd3   :  { %v9232_v0 = vadd.f32 %v9231_v48, %v9230_v36  ;;  %v10405_v48 = vld [vmem:[%s16163_s29] sm:$0xff]  }
 0xbd4   :  { %v9225_v14 = vadd.f32 %v9224_v9, %v9223_v61  ;;  %v9241_v57 = vcombine.low %v9213_v24, %v9220_v19  ;;  %v9919_v9 = vld [vmem:[%s16165_s16] ss:$0 sm:$0xff] }
 0xbd5   :  { %v9233_v6 = vrot.slane %v9232_v0, 2 }
 0xbd6   :  { %v9226_v45 = vrot.slane %v9225_v14, 1  ;;  %v9249_v3 = vrot.slane %v9241_v57, %v15659_v20 }
 0xbd7   :  { %v9234_v44 = vadd.f32 %v9233_v6, %v9232_v0 }
 0xbd8   :  { %v9227_v40 = vadd.f32 %v9226_v45, %v9225_v14 }
 0xbd9   :  { %v9235_v13 = vrot.slane %v9234_v44, 1 }
 0xbdb   :  { %v9236_v2 = vadd.f32 %v9235_v13, %v9234_v44 }
 0xbdd   :  { %v9242_v17 = vcombine.low %v9227_v40, %v9236_v2 }
 0xbdf   :  { %v9256_v11 = vrot.slane %v9242_v17, %v15659_v20 }
 0xbe1   :  { %v9257_v22 = vcombine.low %v9249_v3, %v9256_v11 }
 0xbe3   :  { %v9264_v26 = vrot.slane %v9257_v22, %v15659_v20  ;;  %v9658_v20 = vsel %vm8796_vm10, %v10392_v18, 0  ;;  %vm9801_vm10 = vcmask 74752  }
 0xbe5   :  { %9267 = vst.msk [vmem:[#allocation7 + $0x1] ss:$2 sm:$0xf] %vm15663_vm0, %v9264_v26 }
 0xbec   :  { %v9268_v55 = vld [vmem:[#allocation7] sm:$0xff] }
 0xbed   :  { %v9270_v27 = vcombine.high %v9268_v55, %v9268_v55  ;;  %v9277_v52 = vrot.slane %v9268_v55, %v9276_v56 }
 0xbef   :  { %v9285_v5 = vcombine.high %v9277_v52, %v9277_v52  ;;  %v9284_v47 = vrot.slane %v9270_v27, %v9276_v56  ;;  %v9291_v51 = vpack.c.bf16 %v9277_v52, %v9277_v52 }
 0xbf1   :  { %v9292_v28 = vpack.c.bf16 %v9285_v5, %v9285_v5  ;;  %v9286_v16 = vcombine.high %v9284_v47, %v9284_v47  ;;  %v9293_v21 = vpack.c.bf16 %v9284_v47, %v9284_v47 }
 0xbf3   :  { %9537 = vmatprep.mubr.bf16.mxu0 %v9292_v28  ;;  %v9294_v41 = vpack.c.bf16 %v9286_v16, %v9286_v16 }
 0xbf4   :  { %9538 = vmatmul.mubr.bf16.vlgmr.msra.gmra.mxu0 %v9291_v51 }
 0xbf5   :  { %9918 = vmatprep.mubr.msk.bf16.mxu1 %vm8927_vm15, %v9294_v41  ;;  %10122 = vmatpush3.bf16.msra.mxu0 %v9658_v20 }
 0xbf6   :  { %9578 = vmatmul.mubr.bf16.vlgmr.msra.gmra.mxu1 %v9293_v21  ;;  %10123 = vmatprep.subr.bf16.mxu0 %v16146_v42 }
 0xbf7   :  { %10137 = vmatprep.mubr.msk.bf16.mxu0 %vm10461_vm5, %v16146_v42  ;;  %10153 = vmatprep.mubr.msk.bf16.mxu1 %vm10461_vm5, %v16146_v42  ;;  %vm9757_vm5 = vcmask 1041408  }
 0xbf8   :  { %v9759_v31 = vsel %vm9757_vm5, %v10400_v49, 0 }
 0xbf9   :  { %10124 = vmatpush3.bf16.msra.mxu0 %v10393_v38  ;;  %10142 = vmatpush3.bf16.msra.mxu1 %v9759_v31 }
 0xbfa   :  { %10125 = vmatprep.subr.bf16.mxu0 %v16146_v42  ;;  %10143 = vmatprep.subr.bf16.mxu1 %v16146_v42 }
 0xbfd   :  { %10126 = vmatpush3.bf16.msra.mxu0 %v10394_v23  ;;  %10144 = vmatpush3.bf16.msra.mxu1 %v10401_v29 }
 0xbfe   :  { %10127 = vmatprep.subr.bf16.mxu0 %v16146_v42  ;;  %10145 = vmatprep.subr.bf16.mxu1 %v16146_v42 }
 0xc01   :  { %10128 = vmatpush3.bf16.msra.mxu0 %v10395_v46  ;;  %10146 = vmatpush3.bf16.msra.mxu1 %v10402_v32 }
 0xc02   :  { %10129 = vmatprep.subr.bf16.mxu0 %v16146_v42  ;;  %10147 = vmatprep.subr.bf16.mxu1 %v16146_v42 }
 0xc05   :  { %10130 = vmatpush3.bf16.msra.mxu0 %v10396_v34  ;;  %10148 = vmatpush3.bf16.msra.mxu1 %v10403_v25 }
 0xc06   :  { %10131 = vmatprep.subr.bf16.mxu0 %v16146_v42  ;;  %10149 = vmatprep.subr.bf16.mxu1 %v16146_v42 }
 0xc09   :  { %10132 = vmatpush3.bf16.msra.mxu0 %v10397_v54  ;;  %10150 = vmatpush3.bf16.msra.mxu1 %v10404_v50 }
 0xc0a   :  { %10133 = vmatprep.subr.bf16.mxu0 %v16146_v42  ;;  %10151 = vmatprep.subr.bf16.mxu1 %v16146_v42 }
 0xc0d   :  { %10134 = vmatpush3.bf16.msra.mxu0 %v10398_v37  ;;  %10152 = vmatpush3.bf16.msra.mxu1 %v10405_v48 }
 0xc0e   :  { %10135 = vmatprep.subr.bf16.mxu0 %v16146_v42  ;;  %v9929_v42 = vld [vmem:[%s16166_s3] ss:$0 sm:$0xff] }
 0xc11   :  { %10136 = vmatpush3.bf16.msra.mxu0 %v10399_v39 }
 0xcb4   :  { %v10059_v59 = vpop.f32.mrf.mxu0 }
 0xcb6   :  { %v10060_v43 = vpop.f32.mrf.mxu0  ;;  %v9579_v58 = vpop.f32.mrf.mxu1 }
 0xcb7   :  { %v10061_v62 = vadd.f32 %v10060_v43, %v10059_v59 }
 0xcb8   :  { %v10062_v10 = vpop.f32.mrf.mxu0  ;;  %v9581_v33 = vpop.f32.mrf.mxu1 }
 0xcb9   :  { %v9540_v63 = vadd.f32 %v10061_v62, %v9892_v1 }
 0xcba   :  { %v10063_v30 = vpop.f32.mrf.mxu0  ;;  %v9582_v60 = vpop.f32.mrf.mxu1 }
 0xcbb   :  { %v9580_v15 = vadd.f32 %v9579_v58, %v9540_v63 }
 0xcbc   :  { %v9583_v53 = vpop.f32.mrf.mxu1 }
 0xcbd   :  { %v9585_v36 = vmax.f32 %v9580_v15, 0.0 }
 0xcbf   :  { %v9586_v61 = vpack.c.bf16 %v9585_v36, %v9585_v36 }
 0xcc1   :  { %10138 = vmatmul.mubr.msk.bf16.vlgmr.msra.gmra.mxu0 %vm4943_vm9, %v9586_v61  ;;  %vm9753_vm9 = vcmask 687104  }
 0xd81   :  { %v9694_v4 = vpop.f32.mrf.mxu0 }
 0xd82   :  { %v9695_v0 = vadd.f32 %v9919_v9, %v9694_v4 }
 0xd83   :  { %v10139_v14 = vpop.f32.mrf.mxu0 }
 0xd84   :  { %v9700_v7 = vmax.f32 %v9695_v0, 0.0 }
 0xd85   :  { %v9697_v6 = vpop.f32.mrf.mxu0 }
 0xd86   :  { %v9701_v19 = vpack.c.bf16 %v9700_v7, %v9700_v7 }
 0xd87   :  { %v10140_v45 = vpop.f32.mrf.mxu0 }
 0xd88   :  { %10154 = vmatmul.mubr.msk.bf16.vlgmr.msra.gmra.mxu1 %vm9753_vm9, %v9701_v19 }
 0xe48   :  { %v9795_v44 = vpop.f32.mrf.mxu1 }
 0xe49   :  { %v9796_v24 = vadd.f32 %v9929_v42, %v9795_v44 }
 0xe4a   :  { %v10155_v13 = vpop.f32.mrf.mxu1 }
 0xe4b   :  { %9802 = vst.msk [vmem:[#allocation8] sm:$0x3] %vm9801_vm10, %v9796_v24 }
 0xe4c   :  { %v9798_v57 = vpop.f32.mrf.mxu1 }
 0xe4d   :  { %10425 = shalt.err (!%p10422_p4)
}
 0xe4e   :  { %s16167_s21 = sld [smem:[#allocation20_spill]]  ;;  %v10156_v40 = vpop.f32.mrf.mxu1 }
 0xe54   :  { %9812 = dma.vmem_to_hbm [thread:$0]  %s9810_s5, 32, %s16167_s21, [#allocation9]  }
 0xe55   :  { %10434 = dma.done.wait [#allocation9], 32  }
 0xe56   :  { %10435 = vsyncadd [#allocation9], 4294967264 }
 0xe57   :  { %9816 = vsyncpa [#allocation9], 1 }

</bundles_post_ra>
